<compile_context>
chip_gen: v5e
topology: v5e:2x2
jax: 0.10.0
libtpu: 0.0.40
codegen_flags: <defaults>
</compile_context>

<pallas_src>
import functools

import numpy as np
import jax
import jax.numpy as jnp
from jax import lax
from jax.experimental import pallas as pl
from jax.experimental.pallas import tpu as pltpu


# ---------------------------------------------------------------------------
# Wrapper-side operator matrices
# ---------------------------------------------------------------------------
def _convt_matrices(wk, k, s, h_in, h_out, w_in, w_out, pack):
    """ConvTranspose2d(1, 1, kernel_size=k, padding=0, stride=s) as matmuls:

        y = bias + sum_{kh=0..k-1}  P[kh] @ x @ V[kh]

    P[kh] (h_out, h_in):  0/1 row scatter, P[kh][r, i] = [r == s*i + (k-1) - kh]
                          (encodes the row zero-insertion / output_padding;
                          weight-independent -> baked numpy constant).
    V[kh] (w_in, w_out):  banded weights, V[kh][j, c] = w[k-1-kh, c - s*j]
                          when 0 <= c - s*j < k, else 0.

    V is replicated block-diagonally `pack` times so a lane-packed input
    (rows, pack*w_in) maps to (rows, pack*w_out) without mixing batch elements.
    """
    r = np.arange(h_out)[None, :, None]
    i = np.arange(h_in)[None, None, :]
    kh = np.arange(k)[:, None, None]
    P = (r == s * i + (k - 1) - kh).astype(np.float32)          # (k, h_out, h_in)

    j = np.arange(w_in)[:, None]
    c = np.arange(w_out)[None, :]
    idx = c - s * j                                              # (w_in, w_out)
    valid = (idx >= 0) & (idx < k)
    rows = wk[::-1, :]                                           # rows[kh] = w[k-1-kh]
    V = jnp.where(valid[None], rows[:, np.clip(idx, 0, k - 1)], 0.0)  # (k, w_in, w_out)

    eye = np.eye(pack, dtype=np.float32)                         # block-diag over the pair
    Vbd = jnp.einsum("pq,kjc->kpjqc", eye, V).reshape(k, pack * w_in, pack * w_out)
    return jnp.asarray(P), Vbd.astype(jnp.float32)


# ---------------------------------------------------------------------------
# Fused kernel: step1 + add, step2 + add, step3 (all on the MXU)
# ---------------------------------------------------------------------------
def _decoder_s_kernel(x_ref, f1_ref, f2_ref,
                      p1_ref, v1_ref, p2_ref, v2_ref, p3_ref, v3_ref,
                      b1_ref, b2_ref, b3_ref,
                      y3_ref):
    dot = functools.partial(jnp.dot, precision=lax.Precision.HIGHEST,
                            preferred_element_type=jnp.float32)

    x = x_ref[0]                                   # (H, pack*W), f32

    # --- step1: ConvTranspose2d(1,1,k=3,p=0,s=2,op=1) + dict_feats['step1'] ---
    y1 = f1_ref[0] + b1_ref[0]                     # residual + bias seeds the acc
    for kh in range(p1_ref.shape[0]):
        y1 = y1 + dot(p1_ref[kh], dot(x, v1_ref[kh]))

    # --- step2: ConvTranspose2d(1,1,k=3,p=0,s=2,op=1) + dict_feats['step2'] ---
    y2 = f2_ref[0] + b2_ref[0]
    for kh in range(p2_ref.shape[0]):
        y2 = y2 + dot(p2_ref[kh], dot(y1, v2_ref[kh]))

    # --- step3: ConvTranspose2d(1,1,k=9,p=0,s=1) ---
    # Two partial accumulators shorten the add dependency chain (review item).
    k3 = p3_ref.shape[0]
    acc0 = dot(p3_ref[0], dot(y2, v3_ref[0]))
    acc1 = dot(p3_ref[1], dot(y2, v3_ref[1]))
    for kh in range(2, k3, 2):
        acc0 = acc0 + dot(p3_ref[kh], dot(y2, v3_ref[kh]))
    for kh in range(3, k3, 2):
        acc1 = acc1 + dot(p3_ref[kh], dot(y2, v3_ref[kh]))

    y3_ref[0] = acc0 + acc1 + b3_ref[0]            # pre-softmax logits


# ---------------------------------------------------------------------------
# Wrapper
# ---------------------------------------------------------------------------
def _decoder_s_pallas(params, dict_feats, x):
    n, ch, h, w = x.shape
    assert ch == 1, "Decoder_s is single-channel"
    f1 = dict_feats["step1"]
    f2 = dict_feats["step2"]
    oh1, ow1 = f1.shape[2], f1.shape[3]            # = 2h+2
    oh2, ow2 = f2.shape[2], f2.shape[3]            # = 2*oh1+2
    oh3, ow3 = oh2 + 8, ow2 + 8                    # k=9, s=1 transposed conv

    pack = 2 if n % 2 == 0 else 1                  # lane-pack batch pairs
    g = n // pack

    def to_lanes(a):                               # (N,1,H,W) -> (G, H, pack*W)
        _, _, hh, ww = a.shape
        return (a.reshape(g, pack, hh, ww).transpose(0, 2, 1, 3)
                 .reshape(g, hh, pack * ww))

    xp, f1p, f2p = to_lanes(x), to_lanes(f1), to_lanes(f2)

    p1, v1 = _convt_matrices(params["w1"], 3, 2, h,   oh1, w,   ow1, pack)
    p2, v2 = _convt_matrices(params["w2"], 3, 2, oh1, oh2, ow1, ow2, pack)
    p3, v3 = _convt_matrices(params["w3"], 9, 1, oh2, oh3, ow2, ow3, pack)

    def tile(bh, bw):                              # one batch pair per grid step
        return pl.BlockSpec((1, bh, bw), lambda i: (i, 0, 0))

    def whole(a):                                  # grid-invariant -> stays resident
        return pl.BlockSpec(a.shape, lambda i: (0, 0, 0))

    smem = pl.BlockSpec(memory_space=pltpu.MemorySpace.SMEM)

    y3p = pl.pallas_call(
        _decoder_s_kernel,
        grid=(g,),
        in_specs=[tile(h, pack * w), tile(oh1, pack * ow1), tile(oh2, pack * ow2),
                  whole(p1), whole(v1), whole(p2), whole(v2), whole(p3), whole(v3),
                  smem, smem, smem],
        out_specs=tile(oh3, pack * ow3),
        out_shape=jax.ShapeDtypeStruct((g, oh3, pack * ow3), jnp.float32),
        compiler_params=pltpu.CompilerParams(
            dimension_semantics=("parallel",)),
    )(xp, f1p, f2p, p1, v1, p2, v2, p3, v3,
      params["b1"], params["b2"], params["b3"])

    logits = (y3p.reshape(g, oh3, pack, ow3).transpose(0, 2, 1, 3)
                 .reshape(n, 1, oh3, ow3))
    # nn.Softmax() (no dim) on a 4-D tensor == softmax over dim=1; C == 1 so
    # this folds to 1.0 — applied here so the kernel writes a single output.
    s = jax.nn.softmax(logits, axis=1)
    return s, logits


_decoder_s_jit = jax.jit(_decoder_s_pallas)


def decoder_s_forward(params, dict_feats, x):
    """Forward pass of Decoder_s (returns the softmax activation, like the module)."""
    return _decoder_s_jit(params, dict_feats, x)[0]


# ---------------------------------------------------------------------------
# Pure-JAX reference (correctness check only)
# ---------------------------------------------------------------------------
def _ref_convt(x, w, b, stride, pad, out_pad):
    wf = w[::-1, ::-1][None, None]                 # OIHW, spatially flipped
    lo = w.shape[0] - 1 - pad
    hi = lo + out_pad
    y = lax.conv_general_dilated(
        x, wf, window_strides=(1, 1), padding=((lo, hi), (lo, hi)),
        lhs_dilation=(stride, stride),
        dimension_numbers=("NCHW", "OIHW", "NCHW"),
        precision=lax.Precision.HIGHEST)
    return y + b[0]


def decoder_s_ref(params, feats, x):
    y = _ref_convt(x, params["w1"], params["b1"], 2, 0, 1) + feats["step1"]
    y = _ref_convt(y, params["w2"], params["b2"], 2, 0, 1) + feats["step2"]
    logits = _ref_convt(y, params["w3"], params["b3"], 1, 0, 0)
    return jax.nn.softmax(logits, axis=1), logits


# ---------------------------------------------------------------------------
if __name__ == "__main__":
    key = jax.random.PRNGKey(0)
    ks = jax.random.split(key, 9)

    N, H, W = 2, 8, 8                              # input spatial 8x8, C=1
    params = {
        "w1": jax.random.uniform(ks[0], (3, 3), jnp.float32, -1.0 / 3, 1.0 / 3),
        "b1": jax.random.uniform(ks[1], (1,), jnp.float32, -1.0 / 3, 1.0 / 3),
        "w2": jax.random.uniform(ks[2], (3, 3), jnp.float32, -1.0 / 3, 1.0 / 3),
        "b2": jax.random.uniform(ks[3], (1,), jnp.float32, -1.0 / 3, 1.0 / 3),
        "w3": jax.random.uniform(ks[4], (9, 9), jnp.float32, -1.0 / 9, 1.0 / 9),
        "b3": jax.random.uniform(ks[5], (1,), jnp.float32, -1.0 / 9, 1.0 / 9),
    }
    x = jax.random.normal(ks[6], (N, 1, H, W), jnp.float32)
    feats = {
        "step1": jax.random.normal(ks[7], (N, 1, 2 * H + 2, 2 * W + 2), jnp.float32),
        "step2": jax.random.normal(ks[8], (N, 1, 4 * H + 6, 4 * W + 6), jnp.float32),
    }

    s, logits = _decoder_s_jit(params, feats, x)
    jax.block_until_ready((s, logits))
    assert s.shape == (N, 1, 4 * H + 14, 4 * W + 14), s.shape
    assert logits.shape == s.shape, logits.shape

    s_ref, logits_ref = decoder_s_ref(params, feats, x)
    logit_err = float(jnp.max(jnp.abs(logits - logits_ref)))
    assert logit_err < 1e-4, logit_err             # checks all three conv stages
    assert jnp.allclose(s, s_ref, atol=1e-6), float(jnp.max(jnp.abs(s - s_ref)))

    out = decoder_s_forward(params, feats, x)      # module-level forward (softmax only)
    jax.block_until_ready(out)

    print("KERNEL_OK")
</pallas_src>

<mosaic_0001>
module attributes {stable_mosaic.version = 11 : i64} {
  func.func @_decoder_s_kernel(%arg0: i32, %arg1: memref<1x8x16xf32, #tpu.memory_space<vmem>>, %arg2: memref<1x18x36xf32, #tpu.memory_space<vmem>>, %arg3: memref<1x38x76xf32, #tpu.memory_space<vmem>>, %arg4: memref<3x18x8xf32, #tpu.memory_space<vmem>>, %arg5: memref<3x16x36xf32, #tpu.memory_space<vmem>>, %arg6: memref<3x38x18xf32, #tpu.memory_space<vmem>>, %arg7: memref<3x36x76xf32, #tpu.memory_space<vmem>>, %arg8: memref<9x46x38xf32, #tpu.memory_space<vmem>>, %arg9: memref<9x76x92xf32, #tpu.memory_space<vmem>>, %arg10: memref<1xf32, #tpu.memory_space<smem>>, %arg11: memref<1xf32, #tpu.memory_space<smem>>, %arg12: memref<1xf32, #tpu.memory_space<smem>>, %arg13: memref<1x46x92xf32, #tpu.memory_space<vmem>>) attributes {dimension_semantics = [#tpu.dimension_semantics<parallel>], iteration_bounds = array<i64: 1>, scalar_prefetch = 0 : i64, scratch_operands = 0 : i64, tpu.core_type = #tpu.core_type<tc>, window_params = [{transform_indices = @transform_0, window_bounds = array<i64: 1, 8, 16>}, {transform_indices = @transform_1, window_bounds = array<i64: 1, 18, 36>}, {transform_indices = @transform_2, window_bounds = array<i64: 1, 38, 76>}, {pipeline_mode = #tpu.pipeline_mode<synchronous>, transform_indices = @transform_3, window_bounds = array<i64: 3, 18, 8>}, {pipeline_mode = #tpu.pipeline_mode<synchronous>, transform_indices = @transform_4, window_bounds = array<i64: 3, 16, 36>}, {pipeline_mode = #tpu.pipeline_mode<synchronous>, transform_indices = @transform_5, window_bounds = array<i64: 3, 38, 18>}, {pipeline_mode = #tpu.pipeline_mode<synchronous>, transform_indices = @transform_6, window_bounds = array<i64: 3, 36, 76>}, {pipeline_mode = #tpu.pipeline_mode<synchronous>, transform_indices = @transform_7, window_bounds = array<i64: 9, 46, 38>}, {pipeline_mode = #tpu.pipeline_mode<synchronous>, transform_indices = @transform_8, window_bounds = array<i64: 9, 76, 92>}, {transform_indices = @transform_9, window_bounds = array<i64: 1>}, {transform_indices = @transform_10, window_bounds = array<i64: 1>}, {transform_indices = @transform_11, window_bounds = array<i64: 1>}, {transform_indices = @transform_12, window_bounds = array<i64: 1, 46, 92>}]} {
    %c0 = arith.constant 0 : index
    %c0_0 = arith.constant 0 : index
    %c0_1 = arith.constant 0 : index
    %0 = vector.load %arg1[%c0, %c0_0, %c0_1] : memref<1x8x16xf32, #tpu.memory_space<vmem>>, vector<1x8x16xf32>
    %1 = vector.shape_cast %0 : vector<1x8x16xf32> to vector<8x16xf32>
    %c0_2 = arith.constant 0 : index
    %c0_3 = arith.constant 0 : index
    %c0_4 = arith.constant 0 : index
    %2 = vector.load %arg2[%c0_2, %c0_3, %c0_4] : memref<1x18x36xf32, #tpu.memory_space<vmem>>, vector<1x18x36xf32>
    %3 = vector.shape_cast %2 : vector<1x18x36xf32> to vector<18x36xf32>
    %c0_5 = arith.constant 0 : index
    %4 = memref.load %arg10[%c0_5] : memref<1xf32, #tpu.memory_space<smem>>
    %5 = vector.broadcast %4 : f32 to vector<18x36xf32>
    %6 = arith.addf %3, %5 : vector<18x36xf32>
    %c0_6 = arith.constant 0 : index
    %c0_7 = arith.constant 0 : index
    %c0_8 = arith.constant 0 : index
    %7 = vector.load %arg4[%c0_6, %c0_7, %c0_8] : memref<3x18x8xf32, #tpu.memory_space<vmem>>, vector<1x18x8xf32>
    %8 = vector.shape_cast %7 : vector<1x18x8xf32> to vector<18x8xf32>
    %c0_9 = arith.constant 0 : index
    %c0_10 = arith.constant 0 : index
    %c0_11 = arith.constant 0 : index
    %9 = vector.load %arg5[%c0_9, %c0_10, %c0_11] : memref<3x16x36xf32, #tpu.memory_space<vmem>>, vector<1x16x36xf32>
    %10 = vector.shape_cast %9 : vector<1x16x36xf32> to vector<16x36xf32>
    %cst = arith.constant dense<0.000000e+00> : vector<8x36xf32>
    %11 = tpu.matmul %1, %10, %cst {dimension_numbers = #tpu.dot_dimension_numbers<[1], [0], [0], [1], [0, 0, 1, 1], [], []>, precision = #tpu.contract_precision<fp32>} : vector<8x16xf32>, vector<16x36xf32>, vector<8x36xf32> -> vector<8x36xf32>
    %cst_12 = arith.constant dense<0.000000e+00> : vector<18x36xf32>
    %12 = tpu.matmul %8, %11, %cst_12 {dimension_numbers = #tpu.dot_dimension_numbers<[1], [0], [0], [1], [0, 0, 1, 1], [], []>, precision = #tpu.contract_precision<fp32>} : vector<18x8xf32>, vector<8x36xf32>, vector<18x36xf32> -> vector<18x36xf32>
    %13 = arith.addf %6, %12 : vector<18x36xf32>
    %c1 = arith.constant 1 : index
    %c0_13 = arith.constant 0 : index
    %c0_14 = arith.constant 0 : index
    %14 = vector.load %arg4[%c1, %c0_13, %c0_14] : memref<3x18x8xf32, #tpu.memory_space<vmem>>, vector<1x18x8xf32>
    %15 = vector.shape_cast %14 : vector<1x18x8xf32> to vector<18x8xf32>
    %c1_15 = arith.constant 1 : index
    %c0_16 = arith.constant 0 : index
    %c0_17 = arith.constant 0 : index
    %16 = vector.load %arg5[%c1_15, %c0_16, %c0_17] : memref<3x16x36xf32, #tpu.memory_space<vmem>>, vector<1x16x36xf32>
    %17 = vector.shape_cast %16 : vector<1x16x36xf32> to vector<16x36xf32>
    %cst_18 = arith.constant dense<0.000000e+00> : vector<8x36xf32>
    %18 = tpu.matmul %1, %17, %cst_18 {dimension_numbers = #tpu.dot_dimension_numbers<[1], [0], [0], [1], [0, 0, 1, 1], [], []>, precision = #tpu.contract_precision<fp32>} : vector<8x16xf32>, vector<16x36xf32>, vector<8x36xf32> -> vector<8x36xf32>
    %cst_19 = arith.constant dense<0.000000e+00> : vector<18x36xf32>
    %19 = tpu.matmul %15, %18, %cst_19 {dimension_numbers = #tpu.dot_dimension_numbers<[1], [0], [0], [1], [0, 0, 1, 1], [], []>, precision = #tpu.contract_precision<fp32>} : vector<18x8xf32>, vector<8x36xf32>, vector<18x36xf32> -> vector<18x36xf32>
    %20 = arith.addf %13, %19 : vector<18x36xf32>
    %c2 = arith.constant 2 : index
    %c0_20 = arith.constant 0 : index
    %c0_21 = arith.constant 0 : index
    %21 = vector.load %arg4[%c2, %c0_20, %c0_21] : memref<3x18x8xf32, #tpu.memory_space<vmem>>, vector<1x18x8xf32>
    %22 = vector.shape_cast %21 : vector<1x18x8xf32> to vector<18x8xf32>
    %c2_22 = arith.constant 2 : index
    %c0_23 = arith.constant 0 : index
    %c0_24 = arith.constant 0 : index
    %23 = vector.load %arg5[%c2_22, %c0_23, %c0_24] : memref<3x16x36xf32, #tpu.memory_space<vmem>>, vector<1x16x36xf32>
    %24 = vector.shape_cast %23 : vector<1x16x36xf32> to vector<16x36xf32>
    %cst_25 = arith.constant dense<0.000000e+00> : vector<8x36xf32>
    %25 = tpu.matmul %1, %24, %cst_25 {dimension_numbers = #tpu.dot_dimension_numbers<[1], [0], [0], [1], [0, 0, 1, 1], [], []>, precision = #tpu.contract_precision<fp32>} : vector<8x16xf32>, vector<16x36xf32>, vector<8x36xf32> -> vector<8x36xf32>
    %cst_26 = arith.constant dense<0.000000e+00> : vector<18x36xf32>
    %26 = tpu.matmul %22, %25, %cst_26 {dimension_numbers = #tpu.dot_dimension_numbers<[1], [0], [0], [1], [0, 0, 1, 1], [], []>, precision = #tpu.contract_precision<fp32>} : vector<18x8xf32>, vector<8x36xf32>, vector<18x36xf32> -> vector<18x36xf32>
    %27 = arith.addf %20, %26 : vector<18x36xf32>
    %c0_27 = arith.constant 0 : index
    %c0_28 = arith.constant 0 : index
    %c0_29 = arith.constant 0 : index
    %28 = vector.load %arg3[%c0_27, %c0_28, %c0_29] : memref<1x38x76xf32, #tpu.memory_space<vmem>>, vector<1x38x76xf32>
    %29 = vector.shape_cast %28 : vector<1x38x76xf32> to vector<38x76xf32>
    %c0_30 = arith.constant 0 : index
    %30 = memref.load %arg11[%c0_30] : memref<1xf32, #tpu.memory_space<smem>>
    %31 = vector.broadcast %30 : f32 to vector<38x76xf32>
    %32 = arith.addf %29, %31 : vector<38x76xf32>
    %c0_31 = arith.constant 0 : index
    %c0_32 = arith.constant 0 : index
    %c0_33 = arith.constant 0 : index
    %33 = vector.load %arg6[%c0_31, %c0_32, %c0_33] : memref<3x38x18xf32, #tpu.memory_space<vmem>>, vector<1x38x18xf32>
    %34 = vector.shape_cast %33 : vector<1x38x18xf32> to vector<38x18xf32>
    %c0_34 = arith.constant 0 : index
    %c0_35 = arith.constant 0 : index
    %c0_36 = arith.constant 0 : index
    %35 = vector.load %arg7[%c0_34, %c0_35, %c0_36] : memref<3x36x76xf32, #tpu.memory_space<vmem>>, vector<1x36x76xf32>
    %36 = vector.shape_cast %35 : vector<1x36x76xf32> to vector<36x76xf32>
    %cst_37 = arith.constant dense<0.000000e+00> : vector<18x76xf32>
    %37 = tpu.matmul %27, %36, %cst_37 {dimension_numbers = #tpu.dot_dimension_numbers<[1], [0], [0], [1], [0, 0, 1, 1], [], []>, precision = #tpu.contract_precision<fp32>} : vector<18x36xf32>, vector<36x76xf32>, vector<18x76xf32> -> vector<18x76xf32>
    %cst_38 = arith.constant dense<0.000000e+00> : vector<38x76xf32>
    %38 = tpu.matmul %34, %37, %cst_38 {dimension_numbers = #tpu.dot_dimension_numbers<[1], [0], [0], [1], [0, 0, 1, 1], [], []>, precision = #tpu.contract_precision<fp32>} : vector<38x18xf32>, vector<18x76xf32>, vector<38x76xf32> -> vector<38x76xf32>
    %39 = arith.addf %32, %38 : vector<38x76xf32>
    %c1_39 = arith.constant 1 : index
    %c0_40 = arith.constant 0 : index
    %c0_41 = arith.constant 0 : index
    %40 = vector.load %arg6[%c1_39, %c0_40, %c0_41] : memref<3x38x18xf32, #tpu.memory_space<vmem>>, vector<1x38x18xf32>
    %41 = vector.shape_cast %40 : vector<1x38x18xf32> to vector<38x18xf32>
    %c1_42 = arith.constant 1 : index
    %c0_43 = arith.constant 0 : index
    %c0_44 = arith.constant 0 : index
    %42 = vector.load %arg7[%c1_42, %c0_43, %c0_44] : memref<3x36x76xf32, #tpu.memory_space<vmem>>, vector<1x36x76xf32>
    %43 = vector.shape_cast %42 : vector<1x36x76xf32> to vector<36x76xf32>
    %cst_45 = arith.constant dense<0.000000e+00> : vector<18x76xf32>
    %44 = tpu.matmul %27, %43, %cst_45 {dimension_numbers = #tpu.dot_dimension_numbers<[1], [0], [0], [1], [0, 0, 1, 1], [], []>, precision = #tpu.contract_precision<fp32>} : vector<18x36xf32>, vector<36x76xf32>, vector<18x76xf32> -> vector<18x76xf32>
    %cst_46 = arith.constant dense<0.000000e+00> : vector<38x76xf32>
    %45 = tpu.matmul %41, %44, %cst_46 {dimension_numbers = #tpu.dot_dimension_numbers<[1], [0], [0], [1], [0, 0, 1, 1], [], []>, precision = #tpu.contract_precision<fp32>} : vector<38x18xf32>, vector<18x76xf32>, vector<38x76xf32> -> vector<38x76xf32>
    %46 = arith.addf %39, %45 : vector<38x76xf32>
    %c2_47 = arith.constant 2 : index
    %c0_48 = arith.constant 0 : index
    %c0_49 = arith.constant 0 : index
    %47 = vector.load %arg6[%c2_47, %c0_48, %c0_49] : memref<3x38x18xf32, #tpu.memory_space<vmem>>, vector<1x38x18xf32>
    %48 = vector.shape_cast %47 : vector<1x38x18xf32> to vector<38x18xf32>
    %c2_50 = arith.constant 2 : index
    %c0_51 = arith.constant 0 : index
    %c0_52 = arith.constant 0 : index
    %49 = vector.load %arg7[%c2_50, %c0_51, %c0_52] : memref<3x36x76xf32, #tpu.memory_space<vmem>>, vector<1x36x76xf32>
    %50 = vector.shape_cast %49 : vector<1x36x76xf32> to vector<36x76xf32>
    %cst_53 = arith.constant dense<0.000000e+00> : vector<18x76xf32>
    %51 = tpu.matmul %27, %50, %cst_53 {dimension_numbers = #tpu.dot_dimension_numbers<[1], [0], [0], [1], [0, 0, 1, 1], [], []>, precision = #tpu.contract_precision<fp32>} : vector<18x36xf32>, vector<36x76xf32>, vector<18x76xf32> -> vector<18x76xf32>
    %cst_54 = arith.constant dense<0.000000e+00> : vector<38x76xf32>
    %52 = tpu.matmul %48, %51, %cst_54 {dimension_numbers = #tpu.dot_dimension_numbers<[1], [0], [0], [1], [0, 0, 1, 1], [], []>, precision = #tpu.contract_precision<fp32>} : vector<38x18xf32>, vector<18x76xf32>, vector<38x76xf32> -> vector<38x76xf32>
    %53 = arith.addf %46, %52 : vector<38x76xf32>
    %c0_55 = arith.constant 0 : index
    %c0_56 = arith.constant 0 : index
    %c0_57 = arith.constant 0 : index
    %54 = vector.load %arg8[%c0_55, %c0_56, %c0_57] : memref<9x46x38xf32, #tpu.memory_space<vmem>>, vector<1x46x38xf32>
    %55 = vector.shape_cast %54 : vector<1x46x38xf32> to vector<46x38xf32>
    %c0_58 = arith.constant 0 : index
    %c0_59 = arith.constant 0 : index
    %c0_60 = arith.constant 0 : index
    %56 = vector.load %arg9[%c0_58, %c0_59, %c0_60] : memref<9x76x92xf32, #tpu.memory_space<vmem>>, vector<1x76x92xf32>
    %57 = vector.shape_cast %56 : vector<1x76x92xf32> to vector<76x92xf32>
    %cst_61 = arith.constant dense<0.000000e+00> : vector<38x92xf32>
    %58 = tpu.matmul %53, %57, %cst_61 {dimension_numbers = #tpu.dot_dimension_numbers<[1], [0], [0], [1], [0, 0, 1, 1], [], []>, precision = #tpu.contract_precision<fp32>} : vector<38x76xf32>, vector<76x92xf32>, vector<38x92xf32> -> vector<38x92xf32>
    %cst_62 = arith.constant dense<0.000000e+00> : vector<46x92xf32>
    %59 = tpu.matmul %55, %58, %cst_62 {dimension_numbers = #tpu.dot_dimension_numbers<[1], [0], [0], [1], [0, 0, 1, 1], [], []>, precision = #tpu.contract_precision<fp32>} : vector<46x38xf32>, vector<38x92xf32>, vector<46x92xf32> -> vector<46x92xf32>
    %c1_63 = arith.constant 1 : index
    %c0_64 = arith.constant 0 : index
    %c0_65 = arith.constant 0 : index
    %60 = vector.load %arg8[%c1_63, %c0_64, %c0_65] : memref<9x46x38xf32, #tpu.memory_space<vmem>>, vector<1x46x38xf32>
    %61 = vector.shape_cast %60 : vector<1x46x38xf32> to vector<46x38xf32>
    %c1_66 = arith.constant 1 : index
    %c0_67 = arith.constant 0 : index
    %c0_68 = arith.constant 0 : index
    %62 = vector.load %arg9[%c1_66, %c0_67, %c0_68] : memref<9x76x92xf32, #tpu.memory_space<vmem>>, vector<1x76x92xf32>
    %63 = vector.shape_cast %62 : vector<1x76x92xf32> to vector<76x92xf32>
    %cst_69 = arith.constant dense<0.000000e+00> : vector<38x92xf32>
    %64 = tpu.matmul %53, %63, %cst_69 {dimension_numbers = #tpu.dot_dimension_numbers<[1], [0], [0], [1], [0, 0, 1, 1], [], []>, precision = #tpu.contract_precision<fp32>} : vector<38x76xf32>, vector<76x92xf32>, vector<38x92xf32> -> vector<38x92xf32>
    %cst_70 = arith.constant dense<0.000000e+00> : vector<46x92xf32>
    %65 = tpu.matmul %61, %64, %cst_70 {dimension_numbers = #tpu.dot_dimension_numbers<[1], [0], [0], [1], [0, 0, 1, 1], [], []>, precision = #tpu.contract_precision<fp32>} : vector<46x38xf32>, vector<38x92xf32>, vector<46x92xf32> -> vector<46x92xf32>
    %c2_71 = arith.constant 2 : index
    %c0_72 = arith.constant 0 : index
    %c0_73 = arith.constant 0 : index
    %66 = vector.load %arg8[%c2_71, %c0_72, %c0_73] : memref<9x46x38xf32, #tpu.memory_space<vmem>>, vector<1x46x38xf32>
    %67 = vector.shape_cast %66 : vector<1x46x38xf32> to vector<46x38xf32>
    %c2_74 = arith.constant 2 : index
    %c0_75 = arith.constant 0 : index
    %c0_76 = arith.constant 0 : index
    %68 = vector.load %arg9[%c2_74, %c0_75, %c0_76] : memref<9x76x92xf32, #tpu.memory_space<vmem>>, vector<1x76x92xf32>
    %69 = vector.shape_cast %68 : vector<1x76x92xf32> to vector<76x92xf32>
    %cst_77 = arith.constant dense<0.000000e+00> : vector<38x92xf32>
    %70 = tpu.matmul %53, %69, %cst_77 {dimension_numbers = #tpu.dot_dimension_numbers<[1], [0], [0], [1], [0, 0, 1, 1], [], []>, precision = #tpu.contract_precision<fp32>} : vector<38x76xf32>, vector<76x92xf32>, vector<38x92xf32> -> vector<38x92xf32>
    %cst_78 = arith.constant dense<0.000000e+00> : vector<46x92xf32>
    %71 = tpu.matmul %67, %70, %cst_78 {dimension_numbers = #tpu.dot_dimension_numbers<[1], [0], [0], [1], [0, 0, 1, 1], [], []>, precision = #tpu.contract_precision<fp32>} : vector<46x38xf32>, vector<38x92xf32>, vector<46x92xf32> -> vector<46x92xf32>
    %72 = arith.addf %59, %71 : vector<46x92xf32>
    %c4 = arith.constant 4 : index
    %c0_79 = arith.constant 0 : index
    %c0_80 = arith.constant 0 : index
    %73 = vector.load %arg8[%c4, %c0_79, %c0_80] : memref<9x46x38xf32, #tpu.memory_space<vmem>>, vector<1x46x38xf32>
    %74 = vector.shape_cast %73 : vector<1x46x38xf32> to vector<46x38xf32>
    %c4_81 = arith.constant 4 : index
    %c0_82 = arith.constant 0 : index
    %c0_83 = arith.constant 0 : index
    %75 = vector.load %arg9[%c4_81, %c0_82, %c0_83] : memref<9x76x92xf32, #tpu.memory_space<vmem>>, vector<1x76x92xf32>
    %76 = vector.shape_cast %75 : vector<1x76x92xf32> to vector<76x92xf32>
    %cst_84 = arith.constant dense<0.000000e+00> : vector<38x92xf32>
    %77 = tpu.matmul %53, %76, %cst_84 {dimension_numbers = #tpu.dot_dimension_numbers<[1], [0], [0], [1], [0, 0, 1, 1], [], []>, precision = #tpu.contract_precision<fp32>} : vector<38x76xf32>, vector<76x92xf32>, vector<38x92xf32> -> vector<38x92xf32>
    %cst_85 = arith.constant dense<0.000000e+00> : vector<46x92xf32>
    %78 = tpu.matmul %74, %77, %cst_85 {dimension_numbers = #tpu.dot_dimension_numbers<[1], [0], [0], [1], [0, 0, 1, 1], [], []>, precision = #tpu.contract_precision<fp32>} : vector<46x38xf32>, vector<38x92xf32>, vector<46x92xf32> -> vector<46x92xf32>
    %79 = arith.addf %72, %78 : vector<46x92xf32>
    %c6 = arith.constant 6 : index
    %c0_86 = arith.constant 0 : index
    %c0_87 = arith.constant 0 : index
    %80 = vector.load %arg8[%c6, %c0_86, %c0_87] : memref<9x46x38xf32, #tpu.memory_space<vmem>>, vector<1x46x38xf32>
    %81 = vector.shape_cast %80 : vector<1x46x38xf32> to vector<46x38xf32>
    %c6_88 = arith.constant 6 : index
    %c0_89 = arith.constant 0 : index
    %c0_90 = arith.constant 0 : index
    %82 = vector.load %arg9[%c6_88, %c0_89, %c0_90] : memref<9x76x92xf32, #tpu.memory_space<vmem>>, vector<1x76x92xf32>
    %83 = vector.shape_cast %82 : vector<1x76x92xf32> to vector<76x92xf32>
    %cst_91 = arith.constant dense<0.000000e+00> : vector<38x92xf32>
    %84 = tpu.matmul %53, %83, %cst_91 {dimension_numbers = #tpu.dot_dimension_numbers<[1], [0], [0], [1], [0, 0, 1, 1], [], []>, precision = #tpu.contract_precision<fp32>} : vector<38x76xf32>, vector<76x92xf32>, vector<38x92xf32> -> vector<38x92xf32>
    %cst_92 = arith.constant dense<0.000000e+00> : vector<46x92xf32>
    %85 = tpu.matmul %81, %84, %cst_92 {dimension_numbers = #tpu.dot_dimension_numbers<[1], [0], [0], [1], [0, 0, 1, 1], [], []>, precision = #tpu.contract_precision<fp32>} : vector<46x38xf32>, vector<38x92xf32>, vector<46x92xf32> -> vector<46x92xf32>
    %86 = arith.addf %79, %85 : vector<46x92xf32>
    %c8 = arith.constant 8 : index
    %c0_93 = arith.constant 0 : index
    %c0_94 = arith.constant 0 : index
    %87 = vector.load %arg8[%c8, %c0_93, %c0_94] : memref<9x46x38xf32, #tpu.memory_space<vmem>>, vector<1x46x38xf32>
    %88 = vector.shape_cast %87 : vector<1x46x38xf32> to vector<46x38xf32>
    %c8_95 = arith.constant 8 : index
    %c0_96 = arith.constant 0 : index
    %c0_97 = arith.constant 0 : index
    %89 = vector.load %arg9[%c8_95, %c0_96, %c0_97] : memref<9x76x92xf32, #tpu.memory_space<vmem>>, vector<1x76x92xf32>
    %90 = vector.shape_cast %89 : vector<1x76x92xf32> to vector<76x92xf32>
    %cst_98 = arith.constant dense<0.000000e+00> : vector<38x92xf32>
    %91 = tpu.matmul %53, %90, %cst_98 {dimension_numbers = #tpu.dot_dimension_numbers<[1], [0], [0], [1], [0, 0, 1, 1], [], []>, precision = #tpu.contract_precision<fp32>} : vector<38x76xf32>, vector<76x92xf32>, vector<38x92xf32> -> vector<38x92xf32>
    %cst_99 = arith.constant dense<0.000000e+00> : vector<46x92xf32>
    %92 = tpu.matmul %88, %91, %cst_99 {dimension_numbers = #tpu.dot_dimension_numbers<[1], [0], [0], [1], [0, 0, 1, 1], [], []>, precision = #tpu.contract_precision<fp32>} : vector<46x38xf32>, vector<38x92xf32>, vector<46x92xf32> -> vector<46x92xf32>
    %93 = arith.addf %86, %92 : vector<46x92xf32>
    %c3 = arith.constant 3 : index
    %c0_100 = arith.constant 0 : index
    %c0_101 = arith.constant 0 : index
    %94 = vector.load %arg8[%c3, %c0_100, %c0_101] : memref<9x46x38xf32, #tpu.memory_space<vmem>>, vector<1x46x38xf32>
    %95 = vector.shape_cast %94 : vector<1x46x38xf32> to vector<46x38xf32>
    %c3_102 = arith.constant 3 : index
    %c0_103 = arith.constant 0 : index
    %c0_104 = arith.constant 0 : index
    %96 = vector.load %arg9[%c3_102, %c0_103, %c0_104] : memref<9x76x92xf32, #tpu.memory_space<vmem>>, vector<1x76x92xf32>
    %97 = vector.shape_cast %96 : vector<1x76x92xf32> to vector<76x92xf32>
    %cst_105 = arith.constant dense<0.000000e+00> : vector<38x92xf32>
    %98 = tpu.matmul %53, %97, %cst_105 {dimension_numbers = #tpu.dot_dimension_numbers<[1], [0], [0], [1], [0, 0, 1, 1], [], []>, precision = #tpu.contract_precision<fp32>} : vector<38x76xf32>, vector<76x92xf32>, vector<38x92xf32> -> vector<38x92xf32>
    %cst_106 = arith.constant dense<0.000000e+00> : vector<46x92xf32>
    %99 = tpu.matmul %95, %98, %cst_106 {dimension_numbers = #tpu.dot_dimension_numbers<[1], [0], [0], [1], [0, 0, 1, 1], [], []>, precision = #tpu.contract_precision<fp32>} : vector<46x38xf32>, vector<38x92xf32>, vector<46x92xf32> -> vector<46x92xf32>
    %100 = arith.addf %65, %99 : vector<46x92xf32>
    %c5 = arith.constant 5 : index
    %c0_107 = arith.constant 0 : index
    %c0_108 = arith.constant 0 : index
    %101 = vector.load %arg8[%c5, %c0_107, %c0_108] : memref<9x46x38xf32, #tpu.memory_space<vmem>>, vector<1x46x38xf32>
    %102 = vector.shape_cast %101 : vector<1x46x38xf32> to vector<46x38xf32>
    %c5_109 = arith.constant 5 : index
    %c0_110 = arith.constant 0 : index
    %c0_111 = arith.constant 0 : index
    %103 = vector.load %arg9[%c5_109, %c0_110, %c0_111] : memref<9x76x92xf32, #tpu.memory_space<vmem>>, vector<1x76x92xf32>
    %104 = vector.shape_cast %103 : vector<1x76x92xf32> to vector<76x92xf32>
    %cst_112 = arith.constant dense<0.000000e+00> : vector<38x92xf32>
    %105 = tpu.matmul %53, %104, %cst_112 {dimension_numbers = #tpu.dot_dimension_numbers<[1], [0], [0], [1], [0, 0, 1, 1], [], []>, precision = #tpu.contract_precision<fp32>} : vector<38x76xf32>, vector<76x92xf32>, vector<38x92xf32> -> vector<38x92xf32>
    %cst_113 = arith.constant dense<0.000000e+00> : vector<46x92xf32>
    %106 = tpu.matmul %102, %105, %cst_113 {dimension_numbers = #tpu.dot_dimension_numbers<[1], [0], [0], [1], [0, 0, 1, 1], [], []>, precision = #tpu.contract_precision<fp32>} : vector<46x38xf32>, vector<38x92xf32>, vector<46x92xf32> -> vector<46x92xf32>
    %107 = arith.addf %100, %106 : vector<46x92xf32>
    %c7 = arith.constant 7 : index
    %c0_114 = arith.constant 0 : index
    %c0_115 = arith.constant 0 : index
    %108 = vector.load %arg8[%c7, %c0_114, %c0_115] : memref<9x46x38xf32, #tpu.memory_space<vmem>>, vector<1x46x38xf32>
    %109 = vector.shape_cast %108 : vector<1x46x38xf32> to vector<46x38xf32>
    %c7_116 = arith.constant 7 : index
    %c0_117 = arith.constant 0 : index
    %c0_118 = arith.constant 0 : index
    %110 = vector.load %arg9[%c7_116, %c0_117, %c0_118] : memref<9x76x92xf32, #tpu.memory_space<vmem>>, vector<1x76x92xf32>
    %111 = vector.shape_cast %110 : vector<1x76x92xf32> to vector<76x92xf32>
    %cst_119 = arith.constant dense<0.000000e+00> : vector<38x92xf32>
    %112 = tpu.matmul %53, %111, %cst_119 {dimension_numbers = #tpu.dot_dimension_numbers<[1], [0], [0], [1], [0, 0, 1, 1], [], []>, precision = #tpu.contract_precision<fp32>} : vector<38x76xf32>, vector<76x92xf32>, vector<38x92xf32> -> vector<38x92xf32>
    %cst_120 = arith.constant dense<0.000000e+00> : vector<46x92xf32>
    %113 = tpu.matmul %109, %112, %cst_120 {dimension_numbers = #tpu.dot_dimension_numbers<[1], [0], [0], [1], [0, 0, 1, 1], [], []>, precision = #tpu.contract_precision<fp32>} : vector<46x38xf32>, vector<38x92xf32>, vector<46x92xf32> -> vector<46x92xf32>
    %114 = arith.addf %107, %113 : vector<46x92xf32>
    %115 = arith.addf %93, %114 : vector<46x92xf32>
    %c0_121 = arith.constant 0 : index
    %116 = memref.load %arg12[%c0_121] : memref<1xf32, #tpu.memory_space<smem>>
    %117 = vector.broadcast %116 : f32 to vector<46x92xf32>
    %118 = arith.addf %115, %117 : vector<46x92xf32>
    %c0_122 = arith.constant 0 : index
    %c0_123 = arith.constant 0 : index
    %c0_124 = arith.constant 0 : index
    %119 = vector.load %arg13[%c0_122, %c0_123, %c0_124] : memref<1x46x92xf32, #tpu.memory_space<vmem>>, vector<1x46x92xf32>
    %120 = vector.shape_cast %119 : vector<1x46x92xf32> to vector<46x92xf32>
    %121 = vector.shape_cast %118 : vector<46x92xf32> to vector<1x46x92xf32>
    tpu.vector_store %arg13[%c0_122, %c0_123, %c0_124], %121 {strides = array<i32>} : memref<1x46x92xf32, #tpu.memory_space<vmem>>, vector<1x46x92xf32>,
    return
  }
  func.func @transform_0(%arg0: i32) -> (i32, i32, i32) {
    %c0_i32 = arith.constant 0 : i32
    %c0_i32_0 = arith.constant 0 : i32
    %c0_i32_1 = arith.constant 0 : i32
    return %arg0, %c0_i32, %c0_i32_0 : i32, i32, i32
  }
  func.func @transform_1(%arg0: i32) -> (i32, i32, i32) {
    %c0_i32 = arith.constant 0 : i32
    %c0_i32_0 = arith.constant 0 : i32
    %c0_i32_1 = arith.constant 0 : i32
    return %arg0, %c0_i32, %c0_i32_0 : i32, i32, i32
  }
  func.func @transform_2(%arg0: i32) -> (i32, i32, i32) {
    %c0_i32 = arith.constant 0 : i32
    %c0_i32_0 = arith.constant 0 : i32
    %c0_i32_1 = arith.constant 0 : i32
    return %arg0, %c0_i32, %c0_i32_0 : i32, i32, i32
  }
  func.func @transform_3(%arg0: i32) -> (i32, i32, i32) {
    %c0_i32 = arith.constant 0 : i32
    %c0_i32_0 = arith.constant 0 : i32
    %c0_i32_1 = arith.constant 0 : i32
    %c0_i32_2 = arith.constant 0 : i32
    return %c0_i32, %c0_i32_0, %c0_i32_1 : i32, i32, i32
  }
  func.func @transform_4(%arg0: i32) -> (i32, i32, i32) {
    %c0_i32 = arith.constant 0 : i32
    %c0_i32_0 = arith.constant 0 : i32
    %c0_i32_1 = arith.constant 0 : i32
    %c0_i32_2 = arith.constant 0 : i32
    return %c0_i32, %c0_i32_0, %c0_i32_1 : i32, i32, i32
  }
  func.func @transform_5(%arg0: i32) -> (i32, i32, i32) {
    %c0_i32 = arith.constant 0 : i32
    %c0_i32_0 = arith.constant 0 : i32
    %c0_i32_1 = arith.constant 0 : i32
    %c0_i32_2 = arith.constant 0 : i32
    return %c0_i32, %c0_i32_0, %c0_i32_1 : i32, i32, i32
  }
  func.func @transform_6(%arg0: i32) -> (i32, i32, i32) {
    %c0_i32 = arith.constant 0 : i32
    %c0_i32_0 = arith.constant 0 : i32
    %c0_i32_1 = arith.constant 0 : i32
    %c0_i32_2 = arith.constant 0 : i32
    return %c0_i32, %c0_i32_0, %c0_i32_1 : i32, i32, i32
  }
  func.func @transform_7(%arg0: i32) -> (i32, i32, i32) {
    %c0_i32 = arith.constant 0 : i32
    %c0_i32_0 = arith.constant 0 : i32
    %c0_i32_1 = arith.constant 0 : i32
    %c0_i32_2 = arith.constant 0 : i32
    return %c0_i32, %c0_i32_0, %c0_i32_1 : i32, i32, i32
  }
  func.func @transform_8(%arg0: i32) -> (i32, i32, i32) {
    %c0_i32 = arith.constant 0 : i32
    %c0_i32_0 = arith.constant 0 : i32
    %c0_i32_1 = arith.constant 0 : i32
    %c0_i32_2 = arith.constant 0 : i32
    return %c0_i32, %c0_i32_0, %c0_i32_1 : i32, i32, i32
  }
  func.func @transform_9(%arg0: i32) -> i32 {
    %c0_i32 = arith.constant 0 : i32
    %c0_i32_0 = arith.constant 0 : i32
    return %c0_i32 : i32
  }
  func.func @transform_10(%arg0: i32) -> i32 {
    %c0_i32 = arith.constant 0 : i32
    %c0_i32_0 = arith.constant 0 : i32
    return %c0_i32 : i32
  }
  func.func @transform_11(%arg0: i32) -> i32 {
    %c0_i32 = arith.constant 0 : i32
    %c0_i32_0 = arith.constant 0 : i32
    return %c0_i32 : i32
  }
  func.func @transform_12(%arg0: i32) -> (i32, i32, i32) {
    %c0_i32 = arith.constant 0 : i32
    %c0_i32_0 = arith.constant 0 : i32
    %c0_i32_1 = arith.constant 0 : i32
    return %arg0, %c0_i32, %c0_i32_0 : i32, i32, i32
  }
}

</mosaic_0001>

<bundles_post_ra>
// kernel: _decoder_s_pallas.1
= control target key start
LH: loop header
LB: loop body
LE: loop exit
PB: predicated region body
PF: predicated region fallthrough
CT: control target
= control target key end

     0   :  { %vm58_vm0 = vcmask 130048   ;;  %vm221_vm1 = vcmask 64512   ;;  %vm1246_vm2 = vcmask 1043456   ;;  %vm1236_vm3 = vcmask 293888   ;;  %s15618_s4 = inlined_call_operand.vmem [shape: f32[3,16,36], index: 4, kind: input, shape index: {}]   ;;  %s15619_s0 = inlined_call_operand.vmem [shape: f32[1,8,16], index: 0, kind: input, shape index: {}]   ;;  %s15620_s3 = inlined_call_operand.vmem [shape: f32[3,18,8], index: 3, kind: input, shape index: {}]   ;;  %s15621_s6 = inlined_call_operand.vmem [shape: f32[3,36,76], index: 6, kind: input, shape index: {}]   ;;  %s15622_s1 = inlined_call_operand.vmem [shape: f32[1,18,36], index: 1, kind: input, shape index: {}]   ;;  %s15623_s9 = inlined_call_operand.<no memory space> [shape: f32[1], index: 9, kind: input, shape index: {}]   ;;  %s15624_s5 = inlined_call_operand.vmem [shape: f32[3,38,18], index: 5, kind: input, shape index: {}]   ;;  %s15625_s8 = inlined_call_operand.vmem [shape: f32[9,76,92], index: 8, kind: input, shape index: {}]   ;;  %s15626_s2 = inlined_call_operand.vmem [shape: f32[1,38,76], index: 2, kind: input, shape index: {}]   ;;  %s15627_s10 = inlined_call_operand.<no memory space> [shape: f32[1], index: 10, kind: input, shape index: {}]   ;;  %s15628_s7 = inlined_call_operand.vmem [shape: f32[9,46,38], index: 7, kind: input, shape index: {}]   ;;  %s15629_s11 = inlined_call_operand.<no memory space> [shape: f32[1], index: 11, kind: input, shape index: {}]   ;;  %s15630_s12 = inlined_call_operand.vmem [shape: f32[1,46,92], index: 12, kind: output, shape index: {}]  }
   0x1   :  { %v57_v0 = vld [vmem:[%s15618_s4 + $0x8] sm:$0xff]  ;;  %v56_v1 = vld [vmem:[%s15618_s4] sm:$0xff]  ;;  %v10133_v24 = vld [vmem:[%s15618_s4 + $0x18] sm:$0xff]  ;;  %vm1510_vm4 = vcmask 146432   ;;  %vm1526_vm5 = vcmask 1041408   ;;  %vm3035_vm6 = vcmask 621568  }
   0x2   :  { %v44_v2 = vld [vmem:[%s15619_s0] sm:$0xff]  ;;  %v76_v3 = vand.u32 4294901760, %v57_v0  ;;  %v78_v4 = vand.u32 4294901760, %v56_v1  ;;  %v54_v25 = vld [vmem:[%s15620_s3 + $0x8] sm:$0xff]  ;;  %v10391_v26 = vand.u32 4294901760, %v10133_v24  ;;  %v10132_v27 = vld [vmem:[%s15618_s4 + $0x10] sm:$0xff] }
   0x3   :  { %v60_v5 = vsel %vm58_vm0, %v44_v2, 0  ;;  %v53_v19 = vld [vmem:[%s15620_s3] sm:$0xff]  ;;  %v10397_v30 = vand.u32 4294901760, %v10132_v27  ;;  %v226_v32 = vsel %vm221_vm1, %v54_v25, 0  ;;  %v55_v40 = vld [vmem:[%s15620_s3 + $0x10] sm:$0x3] }
   0x4   :  { %v10361_v6 = vand.u32 4294901760, %v60_v5  ;;  %77 = vmatpush.msra.mxu0 %v76_v3  ;;  %v104_v7 = vsub.f32 %v57_v0, %v76_v3  ;;  %v110_v8 = vsub.f32 %v56_v1, %v78_v4  ;;  %v223_v21 = vsel %vm221_vm1, %v53_v19, 0  ;;  %v10138_v19 = vld [vmem:[%s15618_s4 + $0x28] sm:$0xff] }
   0x5   :  { %v10383_v23 = vand.u32 4294901760, %v223_v21  ;;  %v10401_v33 = vsub.f32 %v10133_v24, %v10391_v26  ;;  %v10403_v37 = vand.u32 4294901760, %v226_v32  ;;  %v497_v38 = vsub.f32 %v10132_v27, %v10397_v30 }
   0x6   :  { %v10364_v9 = vsub.f32 %v60_v5, %v10361_v6  ;;  %79 = vmatpush.msra.mxu0 %v78_v4  ;;  %v105_v10 = vand.u32 4294901760, %v104_v7  ;;  %v111_v11 = vand.u32 4294901760, %v110_v8  ;;  %v229_v47 = vsel %vm221_vm1, %v55_v40, 0 }
   0x7   :  { %v249_v29 = vsub.f32 %v223_v21, %v10383_v23  ;;  %v492_v39 = vand.u32 4294901760, %v10401_v33  ;;  %v257_v44 = vsub.f32 %v226_v32, %v10403_v37  ;;  %v498_v45 = vand.u32 4294901760, %v497_v38 }
   0x8   :  { %v10367_v12 = vand.u32 4294901760, %v10364_v9  ;;  %136 = vmatpush.msrb.mxu0 %v104_v7  ;;  %v106_v13 = vsub.f32 %v104_v7, %v105_v10  ;;  %v112_v14 = vsub.f32 %v110_v8, %v111_v11  ;;  %v264_v53 = vand.u32 4294901760, %v229_v47 }
   0x9   :  { %v250_v36 = vand.u32 4294901760, %v249_v29  ;;  %v493_v48 = vsub.f32 %v10401_v33, %v492_v39  ;;  %v258_v52 = vand.u32 4294901760, %v257_v44  ;;  %v499_v54 = vsub.f32 %v497_v38, %v498_v45 }
   0xa   :  { %v83_v15 = vsub.f32 %v10364_v9, %v10367_v12  ;;  %139 = vmatpush.msrb.mxu0 %v110_v8  ;;  %v107_v16 = vand.u32 4294901760, %v106_v13  ;;  %v113_v17 = vand.u32 4294901760, %v112_v14  ;;  %v265_v59 = vsub.f32 %v229_v47, %v264_v53  ;;  %v10129_v13 = vld [vmem:[%s15620_s3 + $0x18] sm:$0xff] }
   0xb   :  { %v251_v43 = vsub.f32 %v249_v29, %v250_v36  ;;  %v494_v56 = vand.u32 4294901760, %v493_v48  ;;  %v259_v58 = vsub.f32 %v257_v44, %v258_v52  ;;  %v500_v60 = vand.u32 4294901760, %v499_v54 }
   0xc   :  { %v10371_v18 = vand.u32 4294901760, %v83_v15  ;;  %108 = vmatpush.msra.mxu1 %v107_v16  ;;  %v266_v0 = vand.u32 4294901760, %v265_v59  ;;  %v609_v16 = vsel %vm221_vm1, %v10129_v13, 0  ;;  %v10456_v21 = vand.u32 4294901760, %v10138_v19 }
   0xd   :  { %v252_v51 = vand.u32 4294901760, %v251_v43  ;;  %v260_v63 = vand.u32 4294901760, %v259_v58  ;;  %vm4257_vm7 = vcmask 310272   ;;  %vm4276_vm8 = vcmask 1045504  }
   0xe   :  { %85 = vmatmul.f32.vlgmr.msra.gmra.mxu0 %v10371_v18  ;;  %114 = vmatpush.msra.mxu1 %v113_v17  ;;  %v267_v2 = vsub.f32 %v265_v59, %v266_v0  ;;  %v10448_v17 = vand.u32 4294901760, %v609_v16  ;;  %vm10117_vm9 = vcmask 752640   ;;  %vm10123_vm10 = vcmask 750592  }
   0xf   :  { %188 = vmatpush.msra.mxu0 %v105_v10  ;;  %116 = vmatmul.f32.vlgmr.msra.gmra.mxu1 %v10361_v6 }
  0x10   :  { %161 = vmatpush.msrb.mxu1 %v76_v3  ;;  %v635_v25 = vsub.f32 %v609_v16, %v10448_v17 }
  0x11   :  { %192 = vmatpush.msra.mxu0 %v111_v11 }
  0x12   :  { %163 = vmatpush.msrb.mxu1 %v78_v4 }
  0x14   :  { %213 = vmatpush.msra.mxu1 %v76_v3  ;;  %v268_v3 = vand.u32 4294901760, %v267_v2 }
  0x16   :  { %142 = vmatmul.f32.vlgmr.msrb.gmra.mxu0 %v10364_v9  ;;  %215 = vmatpush.msra.mxu1 %v78_v4 }
  0x17   :  { %167 = vmatmul.f32.vlgmr.msrb.gmra.mxu1 %v10367_v12 }
  0x1e   :  { %194 = vmatmul.f32.vlgmr.msra.gmra.mxu0 %v10361_v6 }
  0x1f   :  { %217 = vmatmul.f32.vlgmr.msra.gmra.mxu1 %v10361_v6 }
  0x8b   :  { %v86_v20 = vpop.f32.mrf.mxu0 }
  0x8c   :  { %v117_v22 = vpop.f32.mrf.mxu1 }
  0x8d   :  { %v118_v31 = vadd.f32 %v117_v22, %v86_v20  ;;  %v10130_v20 = vld [vmem:[%s15620_s3 + $0x20] sm:$0xff] }
  0x93   :  { %v143_v28 = vpop.f32.mrf.mxu0 }
  0x94   :  { %v168_v34 = vpop.f32.mrf.mxu1  ;;  %v144_v35 = vadd.f32 %v143_v28, %v118_v31  ;;  %v612_v28 = vsel %vm221_vm1, %v10130_v20, 0  ;;  %v636_v31 = vand.u32 4294901760, %v635_v25 }
  0x95   :  { %v10468_v32 = vand.u32 4294901760, %v612_v28 }
  0x96   :  { %v169_v41 = vadd.f32 %v168_v34, %v144_v35  ;;  %v10131_v35 = vld [vmem:[%s15620_s3 + $0x28] sm:$0x3] }
  0x97   :  { %v643_v40 = vsub.f32 %v612_v28, %v10468_v32  ;;  %v615_v43 = vsel %vm221_vm1, %v10131_v35, 0 }
  0x98   :  { %v650_v48 = vand.u32 4294901760, %v615_v43 }
  0x99   :  { %v644_v47 = vand.u32 4294901760, %v643_v40 }
  0x9a   :  { %v651_v54 = vsub.f32 %v615_v43, %v650_v48 }
  0x9b   :  { %v195_v42 = vpop.f32.mrf.mxu0 }
  0x9c   :  { %v196_v46 = vadd.f32 %v195_v42, %v169_v41  ;;  %v218_v49 = vpop.f32.mrf.mxu1 }
  0x9e   :  { %v219_v50 = vadd.f32 %v218_v49, %v196_v46 }
  0xa0   :  { %v246_v55 = vand.u32 4294901760, %v219_v50 }
  0xa2   :  { %v289_v57 = vsub.f32 %v219_v50, %v246_v55  ;;  %247 = vmatpush.msra.mxu2 %v246_v55  ;;  %357 = vmatpush.msrb.mxu1 %v246_v55 }
  0xa3   :  { %253 = vmatmul.f32.vlgmr.msra.gmra.mxu2 %v252_v51  ;;  %361 = vmatmul.f32.vlgmr.msrb.gmra.mxu1 %v250_v36 }
  0xa4   :  { %324 = vmatpush.msrb.mxu0 %v289_v57  ;;  %v290_v61 = vand.u32 4294901760, %v289_v57  ;;  %495 = vmatpush.msra.mxu1 %v494_v56 }
  0xa5   :  { %327 = vmatmul.f32.vlgmr.msrb.gmra.mxu0 %v249_v29  ;;  %v10466_v29 = vsub.f32 %v10138_v19, %v10456_v21 }
  0xa6   :  { %395 = vmatpush.msrb.mxu2 %v290_v61  ;;  %v291_v62 = vsub.f32 %v289_v57, %v290_v61  ;;  %464 = vmatpush.msra.mxu0 %v10391_v26 }
  0xa7   :  { %501 = vmatpush.msra.mxu1 %v500_v60  ;;  %v878_v34 = vand.u32 4294901760, %v10466_v29 }
  0xa8   :  { %v292_v1 = vand.u32 4294901760, %v291_v62  ;;  %466 = vmatpush.msra.mxu0 %v10397_v30 }
  0xa9   :  { %548 = vmatpush.msrb.mxu1 %v10391_v26 }
  0xaa   :  { %523 = vmatpush.msrb.mxu0 %v10401_v33  ;;  %293 = vmatpush.msra.mxu3 %v292_v1 }
  0xab   :  { %550 = vmatpush.msrb.mxu1 %v10397_v30  ;;  %261 = vmatmul.f32.gmra.mxu2 %v260_v63 }
  0xac   :  { %295 = vmatmul.f32.vlgmr.msra.gmra.mxu3 %v10383_v23  ;;  %367 = vmatmul.f32.gmra.mxu1 %v258_v52 }
  0xad   :  { %425 = vmatpush.msrb.mxu3 %v246_v55  ;;  %332 = vmatmul.f32.gmra.mxu0 %v257_v44  ;;  %v879_v44 = vsub.f32 %v10466_v29, %v878_v34 }
  0xae   :  { %526 = vmatpush.msrb.mxu0 %v497_v38 }
  0xaf   :  { %v880_v51 = vand.u32 4294901760, %v879_v44 }
  0xb3   :  { %269 = vmatmul.f32.gmra.mxu2 %v268_v3 }
  0xb4   :  { %299 = vmatmul.f32.gmra.mxu3 %v10403_v37  ;;  %373 = vmatmul.f32.gmra.mxu1 %v266_v0 }
  0xb5   :  { %337 = vmatmul.f32.gmra.mxu0 %v265_v59  ;;  %v652_v59 = vand.u32 4294901760, %v651_v54 }
  0xb7   :  { %v653_v61 = vsub.f32 %v651_v54, %v652_v59 }
  0xb9   :  { %v654_v62 = vand.u32 4294901760, %v653_v61 }
  0xbb   :  { %397 = vmatmul.f32.vlgmr.msrb.gmra.mxu2 %v10383_v23 }
  0xbc   :  { %303 = vmatmul.f32.gmra.mxu3 %v264_v53  ;;  %503 = vmatmul.f32.vlgmr.msra.gmra.mxu1 %v10361_v6 }
  0xbd   :  { %472 = vmatmul.f32.vlgmr.msra.gmra.mxu0 %v10371_v18  ;;  %600 = vmatpush.msra.mxu1 %v10391_v26 }
  0xbe   :  { %575 = vmatpush.msra.mxu0 %v492_v39  ;;  %v637_v39 = vsub.f32 %v635_v25, %v636_v31 }
  0xbf   :  { %602 = vmatpush.msra.mxu1 %v10397_v30 }
  0xc0   :  { %579 = vmatpush.msra.mxu0 %v498_v45  ;;  %v638_v46 = vand.u32 4294901760, %v637_v39 }
  0xc3   :  { %401 = vmatmul.f32.gmra.mxu2 %v10403_v37 }
  0xc4   :  { %427 = vmatmul.f32.vlgmr.msrb.gmra.mxu3 %v10383_v23  ;;  %554 = vmatmul.f32.vlgmr.msrb.gmra.mxu1 %v10367_v12  ;;  %v10137_v23 = vld [vmem:[%s15618_s4 + $0x20] sm:$0xff] }
  0xc5   :  { %529 = vmatmul.f32.vlgmr.msrb.gmra.mxu0 %v10364_v9  ;;  %v10462_v26 = vand.u32 4294901760, %v10137_v23 }
  0xc7   :  { %v883_v33 = vsub.f32 %v10137_v23, %v10462_v26 }
  0xc9   :  { %v884_v41 = vand.u32 4294901760, %v883_v33 }
  0xcb   :  { %405 = vmatmul.f32.gmra.mxu2 %v264_v53  ;;  %v885_v49 = vsub.f32 %v883_v33, %v884_v41 }
  0xcc   :  { %431 = vmatmul.f32.gmra.mxu3 %v10403_v37  ;;  %604 = vmatmul.f32.vlgmr.msra.gmra.mxu1 %v10361_v6 }
  0xcd   :  { %581 = vmatmul.f32.vlgmr.msra.gmra.mxu0 %v10361_v6  ;;  %v886_v55 = vand.u32 4294901760, %v885_v49 }
  0xd4   :  { %435 = vmatmul.f32.gmra.mxu3 %v264_v53  ;;  %v645_v53 = vsub.f32 %v643_v40, %v644_v47 }
  0xd6   :  { %v646_v58 = vand.u32 4294901760, %v645_v53 }
 0x120   :  { %v10432_v4 = vpop.f32.mrf.mxu1 }
 0x122   :  { %v10434_v5 = vpop.f32.mrf.mxu0 }
 0x129   :  { %v10436_v7 = vpop.f32.mrf.mxu1 }
 0x12a   :  { %v10438_v8 = vpop.f32.mrf.mxu0 }
 0x12f   :  { %v10523_v49 = vpop.f32.mrf.mxu3 }
 0x131   :  { %v10440_v10 = vpop.f32.mrf.mxu1 }
 0x132   :  { %v10442_v11 = vpop.f32.mrf.mxu0 }
 0x139   :  { %v504_v14 = vpop.f32.mrf.mxu1 }
 0x13a   :  { %v473_v15 = vpop.f32.mrf.mxu0 }
 0x13b   :  { %v505_v27 = vadd.f32 %v504_v14, %v473_v15  ;;  %v10135_v15 = vld [vmem:[%s15620_s3 + $0x38] sm:$0xff] }
 0x141   :  { %v555_v22 = vpop.f32.mrf.mxu1 }
 0x142   :  { %v530_v24 = vpop.f32.mrf.mxu0 }
 0x143   :  { %v531_v30 = vadd.f32 %v530_v24, %v505_v27 }
 0x145   :  { %v556_v36 = vadd.f32 %v555_v22, %v531_v30 }
 0x149   :  { %v605_v38 = vpop.f32.mrf.mxu1 }
 0x14a   :  { %v582_v37 = vpop.f32.mrf.mxu0 }
 0x14b   :  { %v583_v42 = vadd.f32 %v582_v37, %v556_v36 }
 0x14d   :  { %v606_v45 = vadd.f32 %v605_v38, %v583_v42 }
 0x14f   :  { %v632_v50 = vand.u32 4294901760, %v606_v45 }
 0x151   :  { %v675_v52 = vsub.f32 %v606_v45, %v632_v50  ;;  %633 = vmatpush.msra.mxu2 %v632_v50  ;;  %743 = vmatpush.msrb.mxu1 %v632_v50 }
 0x152   :  { %639 = vmatmul.f32.vlgmr.msra.gmra.mxu2 %v638_v46  ;;  %747 = vmatmul.f32.vlgmr.msrb.gmra.mxu1 %v636_v31 }
 0x153   :  { %710 = vmatpush.msrb.mxu0 %v675_v52  ;;  %v676_v56 = vand.u32 4294901760, %v675_v52  ;;  %881 = vmatpush.msra.mxu1 %v880_v51  ;;  %v10527_v51 = vpop.f32.mrf.mxu3 }
 0x154   :  { %713 = vmatmul.f32.vlgmr.msrb.gmra.mxu0 %v635_v25  ;;  %v10136_v25 = vld [vmem:[%s15620_s3 + $0x40] sm:$0x3] }
 0x155   :  { %781 = vmatpush.msrb.mxu2 %v676_v56  ;;  %v677_v57 = vsub.f32 %v675_v52, %v676_v56  ;;  %850 = vmatpush.msra.mxu0 %v10456_v21 }
 0x156   :  { %887 = vmatpush.msra.mxu1 %v886_v55 }
 0x157   :  { %v678_v60 = vand.u32 4294901760, %v677_v57  ;;  %852 = vmatpush.msra.mxu0 %v10462_v26 }
 0x158   :  { %934 = vmatpush.msrb.mxu1 %v10456_v21 }
 0x159   :  { %909 = vmatpush.msrb.mxu0 %v10466_v29  ;;  %679 = vmatpush.msra.mxu3 %v678_v60 }
 0x15a   :  { %936 = vmatpush.msrb.mxu1 %v10462_v26  ;;  %647 = vmatmul.f32.gmra.mxu2 %v646_v58 }
 0x15b   :  { %681 = vmatmul.f32.vlgmr.msra.gmra.mxu3 %v10448_v17  ;;  %753 = vmatmul.f32.gmra.mxu1 %v644_v47  ;;  %v10531_v53 = vpop.f32.mrf.mxu3 }
 0x15c   :  { %811 = vmatpush.msrb.mxu3 %v632_v50  ;;  %718 = vmatmul.f32.gmra.mxu0 %v643_v40 }
 0x15d   :  { %912 = vmatpush.msrb.mxu0 %v883_v33 }
 0x162   :  { %655 = vmatmul.f32.gmra.mxu2 %v654_v62 }
 0x163   :  { %685 = vmatmul.f32.gmra.mxu3 %v10468_v32  ;;  %759 = vmatmul.f32.gmra.mxu1 %v652_v59  ;;  %v10535_v55 = vpop.f32.mrf.mxu3 }
 0x164   :  { %723 = vmatmul.f32.gmra.mxu0 %v651_v54 }
 0x16a   :  { %783 = vmatmul.f32.vlgmr.msrb.gmra.mxu2 %v10448_v17 }
 0x16b   :  { %689 = vmatmul.f32.gmra.mxu3 %v650_v48  ;;  %889 = vmatmul.f32.vlgmr.msra.gmra.mxu1 %v10361_v6  ;;  %v10539_v57 = vpop.f32.mrf.mxu3 }
 0x16c   :  { %858 = vmatmul.f32.vlgmr.msra.gmra.mxu0 %v10371_v18  ;;  %986 = vmatpush.msra.mxu1 %v10456_v21  ;;  %v998_v21 = vsel %vm221_vm1, %v10135_v15, 0 }
 0x16d   :  { %961 = vmatpush.msra.mxu0 %v878_v34  ;;  %v1028_v24 = vand.u32 4294901760, %v998_v21 }
 0x16e   :  { %988 = vmatpush.msra.mxu1 %v10462_v26 }
 0x16f   :  { %965 = vmatpush.msra.mxu0 %v884_v41  ;;  %v1029_v30 = vsub.f32 %v998_v21, %v1028_v24  ;;  %v1234_v21 = vld [vmem:[%s15621_s6 + $0x18] sm:$0xff] }
 0x171   :  { %v1030_v35 = vand.u32 4294901760, %v1029_v30 }
 0x172   :  { %787 = vmatmul.f32.gmra.mxu2 %v10468_v32 }
 0x173   :  { %813 = vmatmul.f32.vlgmr.msrb.gmra.mxu3 %v10448_v17  ;;  %940 = vmatmul.f32.vlgmr.msrb.gmra.mxu1 %v10367_v12  ;;  %v1031_v39 = vsub.f32 %v1029_v30, %v1030_v35  ;;  %v10543_v59 = vpop.f32.mrf.mxu3 }
 0x174   :  { %915 = vmatmul.f32.vlgmr.msrb.gmra.mxu0 %v10364_v9  ;;  %v10134_v9 = vld [vmem:[%s15620_s3 + $0x30] sm:$0xff] }
 0x175   :  { %v1032_v43 = vand.u32 4294901760, %v1031_v39 }
 0x17a   :  { %791 = vmatmul.f32.gmra.mxu2 %v650_v48 }
 0x17b   :  { %817 = vmatmul.f32.gmra.mxu3 %v10468_v32  ;;  %990 = vmatmul.f32.vlgmr.msra.gmra.mxu1 %v10361_v6  ;;  %v1001_v32 = vsel %vm221_vm1, %v10136_v25, 0  ;;  %v1233_v25 = vld [vmem:[%s15621_s6 + $0x10] sm:$0xff] }
 0x17c   :  { %967 = vmatmul.f32.vlgmr.msra.gmra.mxu0 %v10361_v6  ;;  %v995_v6 = vsel %vm221_vm1, %v10134_v9, 0  ;;  %v1036_v36 = vand.u32 4294901760, %v1001_v32 }
 0x17d   :  { %v1020_v14 = vand.u32 4294901760, %v995_v6 }
 0x17e   :  { %v1037_v40 = vsub.f32 %v1001_v32, %v1036_v36 }
 0x17f   :  { %v1021_v19 = vsub.f32 %v995_v6, %v1020_v14 }
 0x180   :  { %v1038_v44 = vand.u32 4294901760, %v1037_v40 }
 0x181   :  { %v1022_v23 = vand.u32 4294901760, %v1021_v19 }
 0x182   :  { %v1039_v46 = vsub.f32 %v1037_v40, %v1038_v44 }
 0x183   :  { %821 = vmatmul.f32.gmra.mxu3 %v650_v48  ;;  %v1023_v29 = vsub.f32 %v1021_v19, %v1022_v23  ;;  %v10521_v48 = vpop.f32.mrf.mxu2 }
 0x184   :  { %v1040_v47 = vand.u32 4294901760, %v1039_v46 }
 0x185   :  { %v1024_v34 = vand.u32 4294901760, %v1023_v29  ;;  %v1232_v29 = vld [vmem:[%s15621_s6 + $0x8] sm:$0xff] }
 0x18b   :  { %v10525_v50 = vpop.f32.mrf.mxu2 }
 0x193   :  { %v10529_v52 = vpop.f32.mrf.mxu2 }
 0x19b   :  { %v10533_v54 = vpop.f32.mrf.mxu2 }
 0x1a3   :  { %v10537_v56 = vpop.f32.mrf.mxu2 }
 0x1ab   :  { %v10541_v58 = vpop.f32.mrf.mxu2 }
 0x1cf   :  { %v10497_v18 = vpop.f32.mrf.mxu1 }
 0x1d1   :  { %v10499_v63 = vpop.f32.mrf.mxu0 }
 0x1d5   :  { %v10545_v60 = vpop.f32.mrf.mxu2 }
 0x1d8   :  { %v10501_v0 = vpop.f32.mrf.mxu1 }
 0x1d9   :  { %v10503_v1 = vpop.f32.mrf.mxu0 }
 0x1dd   :  { %v10549_v62 = vpop.f32.mrf.mxu2 }
 0x1de   :  { %v10547_v61 = vpop.f32.mrf.mxu3 }
 0x1e0   :  { %v10505_v2 = vpop.f32.mrf.mxu1 }
 0x1e1   :  { %v10507_v12 = vpop.f32.mrf.mxu0 }
 0x1e6   :  { %v10551_v9 = vpop.f32.mrf.mxu3 }
 0x1e8   :  { %v890_v3 = vpop.f32.mrf.mxu1 }
 0x1e9   :  { %v859_v13 = vpop.f32.mrf.mxu0 }
 0x1ea   :  { %v891_v20 = vadd.f32 %v890_v3, %v859_v13  ;;  %v10553_v3 = vpop.f32.mrf.mxu2 }
 0x1ee   :  { %v10555_v13 = vpop.f32.mrf.mxu3 }
 0x1f0   :  { %v941_v16 = vpop.f32.mrf.mxu1 }
 0x1f1   :  { %v916_v17 = vpop.f32.mrf.mxu0 }
 0x1f2   :  { %v917_v22 = vadd.f32 %v916_v17, %v891_v20  ;;  %v10557_v6 = vpop.f32.mrf.mxu2 }
 0x1f4   :  { %v942_v26 = vadd.f32 %v941_v16, %v917_v22  ;;  %v1235_v16 = vld [vmem:[%s15621_s6 + $0x20] sm:$0xf] }
 0x1f5   :  { %v1248_v17 = vsel %vm1246_vm2, %v1235_v16, 0 }
 0x1f6   :  { %v1261_v20 = vand.u32 4294901760, %v1248_v17 }
 0x1f8   :  { %v991_v28 = vpop.f32.mrf.mxu1 }
 0x1f9   :  { %v968_v27 = vpop.f32.mrf.mxu0 }
 0x1fa   :  { %v969_v31 = vadd.f32 %v968_v27, %v942_v26  ;;  %v10561_v15 = vpop.f32.mrf.mxu2 }
 0x1fc   :  { %v992_v33 = vadd.f32 %v991_v28, %v969_v31  ;;  %v1265_v28 = vand.u32 4294901760, %v1233_v25 }
 0x1fe   :  { %v1018_v37 = vand.u32 4294901760, %v992_v33  ;;  %v1320_v32 = vsub.f32 %v1233_v25, %v1265_v28 }
 0x200   :  { %v1061_v38 = vsub.f32 %v992_v33, %v1018_v37  ;;  %1019 = vmatpush.msra.mxu2 %v1018_v37  ;;  %1129 = vmatpush.msrb.mxu1 %v1018_v37  ;;  %v1267_v33 = vand.u32 4294901760, %v1232_v29 }
 0x201   :  { %1025 = vmatmul.f32.vlgmr.msra.gmra.mxu2 %v1024_v34  ;;  %1133 = vmatmul.f32.vlgmr.msrb.gmra.mxu1 %v1022_v23  ;;  %v1308_v23 = vsub.f32 %v1248_v17, %v1261_v20  ;;  %v1231_v34 = vld [vmem:[%s15621_s6] sm:$0xff] }
 0x202   :  { %1096 = vmatpush.msrb.mxu0 %v1061_v38  ;;  %v1062_v41 = vand.u32 4294901760, %v1061_v38  ;;  %v10572_v22 = vpop.f32.mrf.mxu2  ;;  %v1269_v39 = vand.u32 4294901760, %v1231_v34 }
 0x203   :  { %1099 = vmatmul.f32.vlgmr.msrb.gmra.mxu0 %v1021_v19  ;;  %v1309_v26 = vand.u32 4294901760, %v1308_v23 }
 0x204   :  { %1167 = vmatpush.msrb.mxu2 %v1062_v41  ;;  %v1063_v42 = vsub.f32 %v1061_v38, %v1062_v41  ;;  %1262 = vmatpush.msra.mxu0 %v1261_v20  ;;  %v1326_v38 = vsub.f32 %v1232_v29, %v1267_v33 }
 0x206   :  { %v1064_v45 = vand.u32 4294901760, %v1063_v42  ;;  %1363 = vmatpush.msra.mxu2 %v1308_v23 }
 0x208   :  { %1065 = vmatpush.msra.mxu3 %v1064_v45  ;;  %v1332_v45 = vsub.f32 %v1231_v34, %v1269_v39 }
 0x209   :  { %1033 = vmatmul.f32.gmra.mxu2 %v1032_v43  ;;  %1067 = vmatmul.f32.vlgmr.msra.gmra.mxu3 %v1020_v14 }
 0x20a   :  { %1197 = vmatpush.msrb.mxu3 %v1018_v37  ;;  %1139 = vmatmul.f32.gmra.mxu1 %v1030_v35  ;;  %v1321_v37 = vand.u32 4294901760, %v1320_v32  ;;  %v1333_v16 = vand.u32 4294901760, %v1332_v45 }
 0x20b   :  { %1104 = vmatmul.f32.gmra.mxu0 %v1029_v30  ;;  %v1310_v30 = vsub.f32 %v1308_v23, %v1309_v26 }
 0x20c   :  { %1404 = vmatpush.msra.mxu3 %v1261_v20  ;;  %v1322_v43 = vsub.f32 %v1320_v32, %v1321_v37 }
 0x20d   :  { %v1311_v35 = vand.u32 4294901760, %v1310_v30 }
 0x20e   :  { %v1323_v46 = vand.u32 4294901760, %v1322_v43 }
 0x20f   :  { %1312 = vmatpush.msra.mxu1 %v1311_v35 }
 0x211   :  { %1041 = vmatmul.f32.gmra.mxu2 %v1040_v47  ;;  %1071 = vmatmul.f32.gmra.mxu3 %v1028_v24 }
 0x212   :  { %1145 = vmatmul.f32.gmra.mxu1 %v1038_v44  ;;  %v1327_v44 = vand.u32 4294901760, %v1326_v38 }
 0x213   :  { %1109 = vmatmul.f32.gmra.mxu0 %v1037_v40 }
 0x214   :  { %v1328_v47 = vsub.f32 %v1326_v38, %v1327_v44 }
 0x216   :  { %v1329_v17 = vand.u32 4294901760, %v1328_v47 }
 0x219   :  { %1075 = vmatmul.f32.gmra.mxu3 %v1036_v36  ;;  %1169 = vmatmul.f32.vlgmr.msrb.gmra.mxu2 %v1020_v14 }
 0x221   :  { %1173 = vmatmul.f32.gmra.mxu2 %v1028_v24  ;;  %1199 = vmatmul.f32.vlgmr.msrb.gmra.mxu3 %v1020_v14  ;;  %v10559_v14 = vpop.f32.mrf.mxu3 }
 0x229   :  { %1177 = vmatmul.f32.gmra.mxu2 %v1036_v36  ;;  %1203 = vmatmul.f32.gmra.mxu3 %v1028_v24  ;;  %v10567_v19 = vpop.f32.mrf.mxu3  ;;  %v1263_v24 = vand.u32 4294901760, %v1234_v21 }
 0x22b   :  { %v1314_v27 = vsub.f32 %v1234_v21, %v1263_v24  ;;  %1406 = vmatpush.msra.mxu3 %v1263_v24  ;;  %1264 = vmatpush.msra.mxu0 %v1263_v24  ;;  %v1334_v21 = vsub.f32 %v1332_v45, %v1333_v16 }
 0x22d   :  { %v1315_v31 = vand.u32 4294901760, %v1314_v27  ;;  %1366 = vmatpush.msra.mxu2 %v1314_v27  ;;  %1408 = vmatpush.msra.mxu3 %v1265_v28  ;;  %v1335_v23 = vand.u32 4294901760, %v1334_v21 }
 0x22e   :  { %1266 = vmatpush.msra.mxu0 %v1265_v28 }
 0x22f   :  { %1369 = vmatpush.msra.mxu2 %v1320_v32  ;;  %1410 = vmatpush.msra.mxu3 %v1267_v33 }
 0x230   :  { %1268 = vmatpush.msra.mxu0 %v1267_v33 }
 0x231   :  { %1207 = vmatmul.f32.gmra.mxu3 %v1036_v36  ;;  %v1316_v36 = vsub.f32 %v1314_v27, %v1315_v31  ;;  %v10583_v40 = vpop.f32.mrf.mxu3  ;;  %1372 = vmatpush.msra.mxu2 %v1326_v38 }
 0x232   :  { %1412 = vmatpush.msra.mxu3 %v1269_v39  ;;  %1270 = vmatpush.msra.mxu0 %v1269_v39 }
 0x233   :  { %v1317_v42 = vand.u32 4294901760, %v1316_v36  ;;  %1375 = vmatpush.msra.mxu2 %v1332_v45 }
 0x234   :  { %1446 = vmatpush.msrb.mxu0 %v1309_v26  ;;  %v297_v26 = vadd.f32 %v10523_v49, %v10521_v48  ;;  %v45_v48 = vld [vmem:[%s15622_s1] sm:$0xff]  ;;  %v49_v49 = vstv %s15623_s9 }
 0x235   :  { %1318 = vmatpush.msra.mxu1 %v1317_v42 }
 0x236   :  { %1450 = vmatpush.msrb.mxu0 %v1315_v31  ;;  %v683_v31 = vadd.f32 %v10547_v61, %v10545_v60  ;;  %v329_v34 = vadd.f32 %v10434_v5, %v297_v26 }
 0x237   :  { %1324 = vmatpush.msra.mxu1 %v1323_v46 }
 0x238   :  { %1454 = vmatpush.msrb.mxu0 %v1321_v37  ;;  %v715_v35 = vadd.f32 %v10499_v63, %v683_v31  ;;  %v687_v63 = vadd.f32 %v10551_v9, %v10549_v62  ;;  %v305_v62 = vadd.f32 %v10531_v53, %v10529_v52 }
 0x239   :  { %1330 = vmatpush.msra.mxu1 %v1329_v17 }
 0x23a   :  { %1458 = vmatpush.msrb.mxu0 %v1327_v44 }
 0x23b   :  { %1336 = vmatpush.msra.mxu1 %v1335_v23 }
 0x23c   :  { %1462 = vmatpush.msrb.mxu0 %v1333_v16 }
 0x23d   :  { %1488 = vmatpush.msrb.mxu1 %v1261_v20  ;;  %v301_v20 = vadd.f32 %v10527_v51, %v10525_v50  ;;  %v749_v50 = vadd.f32 %v10497_v18, %v715_v35 }
 0x23f   :  { %1490 = vmatpush.msrb.mxu1 %v1263_v24  ;;  %v785_v38 = vadd.f32 %v10557_v6, %v749_v50 }
 0x241   :  { %1492 = vmatpush.msrb.mxu1 %v1265_v28  ;;  %v363_v28 = vadd.f32 %v10432_v4, %v329_v34  ;;  %v334_v4 = vadd.f32 %v10438_v8, %v301_v20  ;;  %v815_v42 = vadd.f32 %v10559_v14, %v785_v38 }
 0x243   :  { %1494 = vmatpush.msrb.mxu1 %v1267_v33  ;;  %v399_v5 = vadd.f32 %v10533_v54, %v363_v28  ;;  %v50_v33 = vadd.f32 %v49_v49, %v45_v48  ;;  %v369_v18 = vadd.f32 %v10436_v7, %v334_v4  ;;  %v339_v7 = vadd.f32 %v10442_v11, %v305_v62 }
 0x245   :  { %1496 = vmatpush.msrb.mxu1 %v1269_v39  ;;  %v429_v37 = vadd.f32 %v10535_v55, %v399_v5  ;;  %v403_v8 = vadd.f32 %v10537_v56, %v369_v18  ;;  %v46_v55 = vld [vmem:[%s15622_s1 + $0x8] sm:$0xff] }
 0x246   :  { %v51_v16 = vadd.f32 %v49_v49, %v46_v55 }
 0x247   :  { %v439_v9 = vadd.f32 %v429_v37, %v50_v33  ;;  %v433_v56 = vadd.f32 %v10539_v57, %v403_v8 }
 0x249   :  { %v825_v46 = vadd.f32 %v815_v42, %v439_v9 }
 0x27e   :  { %v1134_v24 = vpop.f32.mrf.mxu1 }
 0x280   :  { %v1100_v32 = vpop.f32.mrf.mxu0 }
 0x284   :  { %v1026_v41 = vpop.f32.mrf.mxu2 }
 0x287   :  { %v1140_v6 = vpop.f32.mrf.mxu1 }
 0x288   :  { %v1105_v39 = vpop.f32.mrf.mxu0 }
 0x28c   :  { %v1034_v25 = vpop.f32.mrf.mxu2  ;;  %v1068_v27 = vpop.f32.mrf.mxu3 }
 0x28d   :  { %v1069_v36 = vadd.f32 %v1068_v27, %v1026_v41  ;;  %v720_v41 = vadd.f32 %v10503_v1, %v687_v63  ;;  %v691_v1 = vadd.f32 %v10555_v13, %v10553_v3  ;;  %v375_v27 = vadd.f32 %v10440_v10, %v339_v7 }
 0x28f   :  { %v1101_v51 = vadd.f32 %v1100_v32, %v1069_v36  ;;  %v755_v45 = vadd.f32 %v10501_v0, %v720_v41  ;;  %v725_v23 = vadd.f32 %v10507_v12, %v691_v1  ;;  %v407_v57 = vadd.f32 %v10541_v58, %v375_v27  ;;  %v1146_v35 = vpop.f32.mrf.mxu1 }
 0x290   :  { %v1110_v26 = vpop.f32.mrf.mxu0 }
 0x291   :  { %v1135_v43 = vadd.f32 %v1134_v24, %v1101_v51  ;;  %v789_v17 = vadd.f32 %v10561_v15, %v755_v45  ;;  %v47_v15 = vld [vmem:[%s15622_s1 + $0x10] sm:$0x3]  ;;  %v437_v20 = vadd.f32 %v10543_v59, %v407_v57 }
 0x292   :  { %v52_v36 = vadd.f32 %v49_v49, %v47_v15 }
 0x293   :  { %v819_v3 = vadd.f32 %v10567_v19, %v789_v17 }
 0x294   :  { %v1042_v29 = vpop.f32.mrf.mxu2  ;;  %v1072_v30 = vpop.f32.mrf.mxu3  ;;  %v441_v49 = vadd.f32 %v437_v20, %v52_v36 }
 0x295   :  { %v1073_v54 = vadd.f32 %v1072_v30, %v1034_v25  ;;  %v440_v30 = vadd.f32 %v433_v56, %v51_v16  ;;  %v1226_v56 = vld [vmem:[%s15624_s5] sm:$0xff] }
 0x297   :  { %v1106_v47 = vadd.f32 %v1105_v39, %v1073_v54  ;;  %v826_v10 = vadd.f32 %v819_v3, %v440_v30 }
 0x299   :  { %v1141_v13 = vadd.f32 %v1140_v6, %v1106_v47 }
 0x29c   :  { %v1076_v60 = vpop.f32.mrf.mxu3  ;;  %v1170_v61 = vpop.f32.mrf.mxu2 }
 0x29d   :  { %v1171_v44 = vadd.f32 %v1170_v61, %v1135_v43  ;;  %v1077_v25 = vadd.f32 %v1076_v60, %v1042_v29  ;;  %v761_v29 = vadd.f32 %v10505_v2, %v725_v23  ;;  %v1512_v23 = vsel %vm1510_vm4, %v1226_v56, 0  ;;  %v10145_v56 = vld [vmem:[%s15621_s6 + $0x30] sm:$0xff] }
 0x29e   :  { %v10694_v30 = vand.u32 4294901760, %v1512_v23 }
 0x29f   :  { %v1111_v32 = vadd.f32 %v1110_v26, %v1077_v25  ;;  %v793_v24 = vadd.f32 %v10572_v22, %v761_v29 }
 0x2a1   :  { %v823_v60 = vadd.f32 %v10583_v40, %v793_v24  ;;  %v1147_v61 = vadd.f32 %v1146_v35, %v1111_v32  ;;  %v10701_v32 = vsub.f32 %v1512_v23, %v10694_v30 }
 0x2a3   :  { %v827_v4 = vadd.f32 %v823_v60, %v441_v49  ;;  %v1228_v60 = vld [vmem:[%s15624_s5 + $0x10] sm:$0xff] }
 0x2a4   :  { %v1200_v14 = vpop.f32.mrf.mxu3  ;;  %v1174_v53 = vpop.f32.mrf.mxu2 }
 0x2a5   :  { %v1201_v52 = vadd.f32 %v1200_v14, %v1171_v44  ;;  %v1175_v31 = vadd.f32 %v1174_v53, %v1141_v13 }
 0x2a7   :  { %v1211_v21 = vadd.f32 %v1201_v52, %v825_v46 }
 0x2a9   :  { %v1238_v0 = vsel %vm1236_vm3, %v1211_v21, 0 }
 0x2aa   :  { %v10626_v11 = vand.u32 4294901760, %v1238_v0 }
 0x2ac   :  { %v10633_v12 = vsub.f32 %v1238_v0, %v10626_v11  ;;  %v1204_v19 = vpop.f32.mrf.mxu3  ;;  %1338 = vmatmul.f32.vlgmr.msra.gmra.mxu1 %v10626_v11  ;;  %v1178_v48 = vpop.f32.mrf.mxu2 }
 0x2ad   :  { %v1205_v34 = vadd.f32 %v1204_v19, %v1175_v31  ;;  %v1179_v59 = vadd.f32 %v1178_v48, %v1147_v61  ;;  %v1227_v31 = vld [vmem:[%s15624_s5 + $0x8] sm:$0xff] }
 0x2ae   :  { %1378 = vmatmul.f32.vlgmr.msra.gmra.mxu2 %v10633_v12  ;;  %v10639_v58 = vand.u32 4294901760, %v10633_v12  ;;  %v1515_v29 = vsel %vm1510_vm4, %v1227_v31, 0  ;;  %v10144_v31 = vld [vmem:[%s15621_s6 + $0x28] sm:$0xff] }
 0x2af   :  { %v1212_v28 = vadd.f32 %v1205_v34, %v826_v10  ;;  %v10703_v20 = vand.u32 4294901760, %v1515_v29 }
 0x2b0   :  { %1416 = vmatmul.f32.vlgmr.msra.gmra.mxu3 %v10639_v58  ;;  %v1274_v2 = vsub.f32 %v10633_v12, %v10639_v58 }
 0x2b1   :  { %v1241_v5 = vsel %vm1236_vm3, %v1212_v28, 0 }
 0x2b2   :  { %v10648_v63 = vand.u32 4294901760, %v1241_v5  ;;  %v10650_v50 = vand.u32 4294901760, %v1274_v2  ;;  %v1551_v2 = vand.u32 4294901760, %v10701_v32 }
 0x2b4   :  { %v10653_v22 = vsub.f32 %v1241_v5, %v10648_v63  ;;  %v1208_v51 = vpop.f32.mrf.mxu3  ;;  %1276 = vmatmul.f32.vlgmr.msra.gmra.mxu0 %v10650_v50  ;;  %1342 = vmatmul.f32.gmra.mxu1 %v10648_v63  ;;  %v10148_v5 = vld [vmem:[%s15621_s6 + $0x48] sm:$0xf] }
 0x2b5   :  { %v1209_v33 = vadd.f32 %v1208_v51, %v1179_v59  ;;  %v10717_v51 = vsub.f32 %v1515_v29, %v10703_v20 }
 0x2b6   :  { %1383 = vmatmul.f32.gmra.mxu2 %v10653_v22  ;;  %v10659_v40 = vand.u32 4294901760, %v10653_v22 }
 0x2b7   :  { %v1213_v37 = vadd.f32 %v1209_v33, %v827_v4  ;;  %v1844_v4 = vsel %vm1246_vm2, %v10148_v5, 0  ;;  %v1518_v33 = vsel %vm1510_vm4, %v1228_v60, 0 }
 0x2b8   :  { %1422 = vmatmul.f32.gmra.mxu3 %v10659_v40  ;;  %v1282_v38 = vsub.f32 %v10653_v22, %v10659_v40 }
 0x2b9   :  { %v1244_v39 = vsel %vm1236_vm3, %v1213_v37, 0  ;;  %v10721_v37 = vand.u32 4294901760, %v1844_v4 }
 0x2ba   :  { %v10665_v41 = vand.u32 4294901760, %v1244_v39  ;;  %v10667_v42 = vand.u32 4294901760, %v1282_v38 }
 0x2bc   :  { %v10670_v43 = vsub.f32 %v1244_v39, %v10665_v41  ;;  %1284 = vmatmul.f32.gmra.mxu0 %v10667_v42  ;;  %1346 = vmatmul.f32.gmra.mxu1 %v10665_v41 }
 0x2be   :  { %1388 = vmatmul.f32.gmra.mxu2 %v10670_v43  ;;  %v10676_v54 = vand.u32 4294901760, %v10670_v43 }
 0x2c0   :  { %1428 = vmatmul.f32.gmra.mxu3 %v10676_v54  ;;  %v1290_v62 = vsub.f32 %v10670_v43, %v10676_v54 }
 0x2c2   :  { %v10681_v18 = vand.u32 4294901760, %v1290_v62  ;;  %v1552_v62 = vsub.f32 %v10701_v32, %v1551_v2 }
 0x2c4   :  { %1292 = vmatmul.f32.gmra.mxu0 %v10681_v18  ;;  %1498 = vmatmul.f32.vlgmr.msrb.gmra.mxu1 %v10626_v11 }
 0x2cc   :  { %1464 = vmatmul.f32.vlgmr.msrb.gmra.mxu0 %v10626_v11  ;;  %1502 = vmatmul.f32.gmra.mxu1 %v10648_v63 }
 0x2d4   :  { %1468 = vmatmul.f32.gmra.mxu0 %v10648_v63  ;;  %1506 = vmatmul.f32.gmra.mxu1 %v10665_v41 }
 0x2dc   :  { %1472 = vmatmul.f32.gmra.mxu0 %v10665_v41 }
 0x329   :  { %v1339_v9 = vpop.f32.mrf.mxu1 }
 0x331   :  { %v1277_v44 = vpop.f32.mrf.mxu0  ;;  %v1343_v8 = vpop.f32.mrf.mxu1 }
 0x332   :  { %v1379_v6 = vpop.f32.mrf.mxu2  ;;  %v1340_v53 = vadd.f32 %v1339_v9, %v1277_v44  ;;  %v10147_v9 = vld [vmem:[%s15621_s6 + $0x40] sm:$0xff] }
 0x333   :  { %v1417_v45 = vpop.f32.mrf.mxu3 }
 0x334   :  { %v1380_v21 = vadd.f32 %v1379_v6, %v1340_v53  ;;  %v1559_v6 = vand.u32 4294901760, %v10717_v51  ;;  %v1553_v53 = vand.u32 4294901760, %v1552_v62 }
 0x336   :  { %v1418_v27 = vadd.f32 %v1417_v45, %v1380_v21  ;;  %v10146_v45 = vld [vmem:[%s15621_s6 + $0x38] sm:$0xff] }
 0x339   :  { %v1285_v55 = vpop.f32.mrf.mxu0  ;;  %v1347_v1 = vpop.f32.mrf.mxu1 }
 0x33a   :  { %v1344_v47 = vadd.f32 %v1343_v8, %v1285_v55  ;;  %v1384_v52 = vpop.f32.mrf.mxu2  ;;  %v10732_v8 = vsub.f32 %v1844_v4, %v10721_v37  ;;  %v10734_v55 = vand.u32 4294901760, %v10147_v9 }
 0x33b   :  { %v1423_v17 = vpop.f32.mrf.mxu3 }
 0x33c   :  { %v1385_v16 = vadd.f32 %v1384_v52, %v1344_v47  ;;  %v1905_v47 = vand.u32 4294901760, %v10732_v8  ;;  %v10748_v52 = vsub.f32 %v10147_v9, %v10734_v55 }
 0x33e   :  { %v1424_v3 = vadd.f32 %v1423_v17, %v1385_v16  ;;  %v1906_v21 = vsub.f32 %v10732_v8, %v1905_v47  ;;  %v1911_v23 = vand.u32 4294901760, %v10748_v52 }
 0x341   :  { %v1293_v14 = vpop.f32.mrf.mxu0  ;;  %v1499_v46 = vpop.f32.mrf.mxu1 }
 0x342   :  { %v1348_v13 = vadd.f32 %v1347_v1, %v1293_v14  ;;  %v1389_v57 = vpop.f32.mrf.mxu2  ;;  %v10738_v14 = vand.u32 4294901760, %v1518_v33 }
 0x343   :  { %v1429_v34 = vpop.f32.mrf.mxu3 }
 0x344   :  { %v1390_v15 = vadd.f32 %v1389_v57, %v1348_v13 }
 0x346   :  { %v1430_v35 = vadd.f32 %v1429_v34, %v1390_v15  ;;  %v1907_v15 = vand.u32 4294901760, %v1906_v21 }
 0x349   :  { %v1465_v7 = vpop.f32.mrf.mxu0  ;;  %v1503_v25 = vpop.f32.mrf.mxu1 }
 0x34a   :  { %v1466_v19 = vadd.f32 %v1465_v7, %v1418_v27  ;;  %v10750_v7 = vand.u32 4294901760, %v10146_v45  ;;  %v1229_v27 = vld [vmem:[%s15624_s5 + $0x18] sm:$0xff] }
 0x34c   :  { %v1500_v36 = vadd.f32 %v1499_v46, %v1466_v19  ;;  %v1912_v19 = vsub.f32 %v10748_v52, %v1911_v23 }
 0x34e   :  { %v10714_v49 = vand.u32 4294901760, %v1500_v36 }
 0x350   :  { %v1616_v1 = vsub.f32 %v1500_v36, %v10714_v49 }
 0x351   :  { %v1469_v0 = vpop.f32.mrf.mxu0  ;;  %v1507_v61 = vpop.f32.mrf.mxu1 }
 0x352   :  { %v1470_v26 = vadd.f32 %v1469_v0, %v1424_v3  ;;  %v10759_v3 = vsub.f32 %v10146_v45, %v10750_v7  ;;  %v1617_v13 = vand.u32 4294901760, %v1616_v1  ;;  %v10766_v0 = vsub.f32 %v1518_v33, %v10738_v14 }
 0x354   :  { %v1504_v10 = vadd.f32 %v1503_v25, %v1470_v26  ;;  %v1560_v25 = vsub.f32 %v10717_v51, %v1559_v6  ;;  %v10771_v26 = vand.u32 4294901760, %v10145_v56  ;;  %v1917_v29 = vand.u32 4294901760, %v10759_v3 }
 0x355   :  { %v1567_v4 = vand.u32 4294901760, %v10766_v0 }
 0x356   :  { %v10705_v28 = vand.u32 4294901760, %v1504_v10  ;;  %v10783_v34 = vsub.f32 %v10145_v56, %v10771_v26  ;;  %v1918_v60 = vsub.f32 %v10759_v3, %v1917_v29 }
 0x358   :  { %v1610_v39 = vsub.f32 %v1504_v10, %v10705_v28  ;;  %v1923_v5 = vand.u32 4294901760, %v10783_v34  ;;  %v1919_v33 = vand.u32 4294901760, %v1918_v60 }
 0x359   :  { %v1473_v24 = vpop.f32.mrf.mxu0 }
 0x35a   :  { %v1474_v48 = vadd.f32 %v1473_v24, %v1430_v35  ;;  %v1611_v16 = vand.u32 4294901760, %v1610_v39  ;;  %v10785_v35 = vand.u32 4294901760, %v10144_v31  ;;  %v1521_v24 = vsel %vm1510_vm4, %v1229_v27, 0 }
 0x35b   :  { %v1924_v62 = vsub.f32 %v10783_v34, %v1923_v5 }
 0x35c   :  { %v1508_v59 = vadd.f32 %v1507_v61, %v1474_v48  ;;  %v1612_v10 = vsub.f32 %v1610_v39, %v1611_v16  ;;  %v1913_v48 = vand.u32 4294901760, %v1912_v19  ;;  %v1618_v61 = vsub.f32 %v1616_v1, %v1617_v13 }
 0x35e   :  { %v1528_v38 = vsel %vm1526_vm5, %v1508_v59, 0  ;;  %v10793_v59 = vsub.f32 %v10144_v31, %v10785_v35 }
 0x35f   :  { %v10729_v44 = vand.u32 4294901760, %v1528_v38 }
 0x360   :  { %v1929_v9 = vand.u32 4294901760, %v10793_v59 }
 0x361   :  { %v1604_v46 = vsub.f32 %v1528_v38, %v10729_v44  ;;  %1544 = vmatpush.msrb.mxu2 %v10729_v44  ;;  %1704 = vmatpush.msra.mxu1 %v10729_v44  ;;  %v1613_v38 = vand.u32 4294901760, %v1612_v10 }
 0x362   :  { %v1930_v45 = vsub.f32 %v10793_v59, %v1929_v9 }
 0x363   :  { %1546 = vmatpush.msrb.mxu2 %v10705_v28  ;;  %1657 = vmatpush.msra.mxu0 %v1604_v46  ;;  %v1605_v17 = vand.u32 4294901760, %v1604_v46 }
 0x364   :  { %1706 = vmatpush.msra.mxu1 %v10705_v28 }
 0x365   :  { %1548 = vmatpush.msrb.mxu2 %v10714_v49  ;;  %1660 = vmatpush.msra.mxu0 %v1610_v39  ;;  %v1606_v57 = vsub.f32 %v1604_v46, %v1605_v17  ;;  %v10797_v39 = vand.u32 4294901760, %v1521_v24  ;;  %v1925_v46 = vand.u32 4294901760, %v1924_v62 }
 0x366   :  { %1708 = vmatpush.msra.mxu1 %v10714_v49  ;;  %1554 = vmatmul.f32.vlgmr.msrb.gmra.mxu2 %v1553_v53  ;;  %v1568_v53 = vsub.f32 %v10766_v0, %v1567_v4 }
 0x367   :  { %1712 = vmatmul.f32.vlgmr.msra.gmra.mxu1 %v1551_v2  ;;  %1756 = vmatpush.msra.mxu2 %v1605_v17  ;;  %v1607_v36 = vand.u32 4294901760, %v1606_v57  ;;  %v1561_v2 = vand.u32 4294901760, %v1560_v25  ;;  %v1931_v17 = vand.u32 4294901760, %v1930_v45 }
 0x368   :  { %1663 = vmatpush.msra.mxu0 %v1616_v1  ;;  %1908 = vmatpush.msrb.mxu1 %v1907_v15  ;;  %v1619_v1 = vand.u32 4294901760, %v1618_v61 }
 0x369   :  { %1666 = vmatmul.f32.vlgmr.msra.gmra.mxu0 %v10701_v32  ;;  %1760 = vmatpush.msra.mxu2 %v1611_v16  ;;  %v1230_v32 = vld [vmem:[%s15624_s5 + $0x20] sm:$0x3f]  ;;  %v1574_v16 = vsub.f32 %v1521_v24, %v10797_v39 }
 0x36a   :  { %1608 = vmatpush.msrb.mxu3 %v1607_v36  ;;  %1858 = vmatpush.msrb.mxu0 %v10721_v37  ;;  %v1524_v56 = vsel %vm1510_vm4, %v1230_v32, 0 }
 0x36b   :  { %1764 = vmatpush.msra.mxu2 %v1617_v13  ;;  %1914 = vmatpush.msrb.mxu1 %v1913_v48  ;;  %v1575_v21 = vand.u32 4294901760, %v1574_v16  ;;  %v1581_v13 = vand.u32 4294901760, %v1524_v56 }
 0x36c   :  { %1614 = vmatpush.msrb.mxu3 %v1613_v38  ;;  %1860 = vmatpush.msrb.mxu0 %v10734_v55 }
 0x36d   :  { %1920 = vmatpush.msrb.mxu1 %v1919_v33  ;;  %2042 = vmatpush.msrb.mxu2 %v1905_v47  ;;  %v1569_v47 = vand.u32 4294901760, %v1568_v53 }
 0x36e   :  { %1620 = vmatpush.msrb.mxu3 %v1619_v1  ;;  %1562 = vmatmul.f32.gmra.mxu2 %v1561_v2 }
 0x36f   :  { %1622 = vmatmul.f32.vlgmr.msrb.gmra.mxu3 %v10694_v30  ;;  %1718 = vmatmul.f32.gmra.mxu1 %v1559_v6 }
 0x370   :  { %1800 = vmatpush.msra.mxu3 %v10729_v44  ;;  %1862 = vmatpush.msrb.mxu0 %v10750_v7 }
 0x371   :  { %1671 = vmatmul.f32.gmra.mxu0 %v10717_v51  ;;  %1926 = vmatpush.msrb.mxu1 %v1925_v46  ;;  %v1576_v51 = vsub.f32 %v1574_v16, %v1575_v21 }
 0x372   :  { %1802 = vmatpush.msra.mxu3 %v10705_v28  ;;  %1864 = vmatpush.msrb.mxu0 %v10771_v26  ;;  %v1582_v28 = vsub.f32 %v1524_v56, %v1581_v13 }
 0x373   :  { %1932 = vmatpush.msrb.mxu1 %v1931_v17  ;;  %2046 = vmatpush.msrb.mxu2 %v1911_v23  ;;  %v10139_v17 = vld [vmem:[%s15624_s5 + $0x28] sm:$0xff] }
 0x374   :  { %1804 = vmatpush.msra.mxu3 %v10714_v49  ;;  %1866 = vmatpush.msrb.mxu0 %v10785_v35  ;;  %v1577_v49 = vand.u32 4294901760, %v1576_v51  ;;  %v1583_v44 = vand.u32 4294901760, %v1582_v28 }
 0x375   :  { %2000 = vmatpush.msra.mxu1 %v10721_v37  ;;  %2050 = vmatpush.msrb.mxu2 %v1917_v29 }
 0x376   :  { %1959 = vmatpush.msra.mxu0 %v10732_v8  ;;  %1570 = vmatmul.f32.gmra.mxu2 %v1569_v47 }
 0x377   :  { %2084 = vmatpush.msrb.mxu3 %v10721_v37  ;;  %1724 = vmatmul.f32.gmra.mxu1 %v1567_v4  ;;  %v1584_v37 = vsub.f32 %v1582_v28, %v1583_v44 }
 0x378   :  { %1626 = vmatmul.f32.gmra.mxu3 %v10703_v20  ;;  %2002 = vmatpush.msra.mxu1 %v10734_v55 }
 0x379   :  { %1962 = vmatpush.msra.mxu0 %v10748_v52  ;;  %2054 = vmatpush.msrb.mxu2 %v1923_v5  ;;  %v1585_v8 = vand.u32 4294901760, %v1584_v37 }
 0x37a   :  { %1676 = vmatmul.f32.gmra.mxu0 %v10766_v0  ;;  %2004 = vmatpush.msra.mxu1 %v10750_v7 }
 0x37b   :  { %1965 = vmatpush.msra.mxu0 %v10759_v3  ;;  %2086 = vmatpush.msrb.mxu3 %v10734_v55 }
 0x37c   :  { %2006 = vmatpush.msra.mxu1 %v10771_v26  ;;  %2058 = vmatpush.msrb.mxu2 %v1929_v9 }
 0x37d   :  { %1968 = vmatpush.msra.mxu0 %v10783_v34  ;;  %2088 = vmatpush.msrb.mxu3 %v10750_v7 }
 0x37e   :  { %1578 = vmatmul.f32.gmra.mxu2 %v1577_v49  ;;  %2008 = vmatpush.msra.mxu1 %v10785_v35 }
 0x37f   :  { %1730 = vmatmul.f32.gmra.mxu1 %v1575_v21  ;;  %1971 = vmatpush.msra.mxu0 %v10793_v59 }
 0x380   :  { %1630 = vmatmul.f32.gmra.mxu3 %v10738_v14 }
 0x381   :  { %2090 = vmatpush.msrb.mxu3 %v10771_v26 }
 0x382   :  { %1681 = vmatmul.f32.gmra.mxu0 %v1574_v16 }
 0x383   :  { %2092 = vmatpush.msrb.mxu3 %v10785_v35 }
 0x386   :  { %1586 = vmatmul.f32.gmra.mxu2 %v1585_v8 }
 0x387   :  { %1736 = vmatmul.f32.gmra.mxu1 %v1583_v44 }
 0x388   :  { %1634 = vmatmul.f32.gmra.mxu3 %v10797_v39 }
 0x38a   :  { %1686 = vmatmul.f32.gmra.mxu0 %v1582_v28  ;;  %v2107_v28 = vsel %vm1510_vm4, %v10139_v17, 0 }
 0x38e   :  { %1766 = vmatmul.f32.vlgmr.msra.gmra.mxu2 %v10694_v30 }
 0x38f   :  { %1934 = vmatmul.f32.vlgmr.msrb.gmra.mxu1 %v10626_v11 }
 0x390   :  { %1638 = vmatmul.f32.gmra.mxu3 %v1581_v13 }
 0x392   :  { %1872 = vmatmul.f32.vlgmr.msrb.gmra.mxu0 %v10650_v50 }
 0x396   :  { %1770 = vmatmul.f32.gmra.mxu2 %v10703_v20 }
 0x397   :  { %1938 = vmatmul.f32.gmra.mxu1 %v10648_v63 }
 0x398   :  { %1806 = vmatmul.f32.vlgmr.msra.gmra.mxu3 %v10694_v30 }
 0x39a   :  { %1880 = vmatmul.f32.gmra.mxu0 %v10667_v42 }
 0x39e   :  { %1774 = vmatmul.f32.gmra.mxu2 %v10738_v14 }
 0x39f   :  { %1942 = vmatmul.f32.gmra.mxu1 %v10665_v41 }
 0x3a0   :  { %1810 = vmatmul.f32.gmra.mxu3 %v10703_v20 }
 0x3a2   :  { %1888 = vmatmul.f32.gmra.mxu0 %v10681_v18 }
 0x3a6   :  { %1778 = vmatmul.f32.gmra.mxu2 %v10797_v39 }
 0x3a7   :  { %2012 = vmatmul.f32.vlgmr.msra.gmra.mxu1 %v10639_v58 }
 0x3a8   :  { %1814 = vmatmul.f32.gmra.mxu3 %v10738_v14 }
 0x3aa   :  { %1974 = vmatmul.f32.vlgmr.msra.gmra.mxu0 %v10633_v12 }
 0x3ae   :  { %1782 = vmatmul.f32.gmra.mxu2 %v1581_v13 }
 0x3af   :  { %2018 = vmatmul.f32.gmra.mxu1 %v10659_v40 }
 0x3b0   :  { %1818 = vmatmul.f32.gmra.mxu3 %v10797_v39 }
 0x3b2   :  { %1979 = vmatmul.f32.gmra.mxu0 %v10653_v22 }
 0x3b6   :  { %2060 = vmatmul.f32.vlgmr.msrb.gmra.mxu2 %v10626_v11 }
 0x3b7   :  { %2024 = vmatmul.f32.gmra.mxu1 %v10676_v54 }
 0x3b8   :  { %1822 = vmatmul.f32.gmra.mxu3 %v1581_v13 }
 0x3ba   :  { %1984 = vmatmul.f32.gmra.mxu0 %v10670_v43 }
 0x3be   :  { %2064 = vmatmul.f32.gmra.mxu2 %v10648_v63 }
 0x3c0   :  { %2094 = vmatmul.f32.vlgmr.msrb.gmra.mxu3 %v10626_v11 }
 0x3c6   :  { %2068 = vmatmul.f32.gmra.mxu2 %v10665_v41 }
 0x3c8   :  { %2098 = vmatmul.f32.gmra.mxu3 %v10648_v63 }
 0x3d0   :  { %2102 = vmatmul.f32.gmra.mxu3 %v10665_v41 }
 0x3e4   :  { %v10871_v20 = vpop.f32.mrf.mxu1 }
 0x3e6   :  { %v10869_v30 = vpop.f32.mrf.mxu0 }
 0x3e9   :  { %v10873_v55 = vpop.f32.mrf.mxu2 }
 0x3ec   :  { %v10881_v7 = vpop.f32.mrf.mxu1 }
 0x3ed   :  { %15709 = vst [vmem:[#allocation5_spill] sm:$0xff] %v10881_v7 }
 0x3ee   :  { %v10875_v6 = vpop.f32.mrf.mxu0 }
 0x3f1   :  { %v10877_v14 = vpop.f32.mrf.mxu2 }
 0x3f2   :  { %v10879_v52 = vpop.f32.mrf.mxu3 }
 0x3f4   :  { %v10889_v0 = vpop.f32.mrf.mxu1 }
 0x3f5   :  { %15710 = vst [vmem:[#allocation6_spill] sm:$0xff] %v10889_v0 }
 0x3f7   :  { %v10883_v23 = vpop.f32.mrf.mxu0 }
 0x3f9   :  { %v10885_v3 = vpop.f32.mrf.mxu2 }
 0x3fb   :  { %v10887_v25 = vpop.f32.mrf.mxu3 }
 0x3fc   :  { %v10897_v57 = vpop.f32.mrf.mxu1 }
 0x3fd   :  { %15712 = vst [vmem:[#allocation8_spill] sm:$0xff] %v10897_v57 }
 0x3ff   :  { %v10893_v26 = vpop.f32.mrf.mxu0 }
 0x400   :  { %15711 = vst [vmem:[#allocation7_spill] sm:$0xff] %v10893_v26 }
 0x401   :  { %v10891_v27 = vpop.f32.mrf.mxu2 }
 0x403   :  { %v10895_v31 = vpop.f32.mrf.mxu3 }
 0x404   :  { %v10905_v10 = vpop.f32.mrf.mxu1 }
 0x405   :  { %15715 = vst [vmem:[#allocation11_spill] sm:$0xff] %v10905_v10 }
 0x407   :  { %v10903_v29 = vpop.f32.mrf.mxu0 }
 0x408   :  { %15714 = vst [vmem:[#allocation10_spill] sm:$0xff] %v10903_v29 }
 0x409   :  { %v10899_v15 = vpop.f32.mrf.mxu2 }
 0x40a   :  { %15713 = vst [vmem:[#allocation9_spill] sm:$0xff] %v10899_v15 }
 0x40b   :  { %v10901_v19 = vpop.f32.mrf.mxu3 }
 0x40c   :  { %v1935_v60 = vpop.f32.mrf.mxu1 }
 0x40f   :  { %v1873_v36 = vpop.f32.mrf.mxu0 }
 0x410   :  { %v1936_v13 = vadd.f32 %v1935_v60, %v1873_v36 }
 0x411   :  { %v10907_v34 = vpop.f32.mrf.mxu2 }
 0x412   :  { %15716 = vst [vmem:[#allocation12_spill] sm:$0xff] %v10907_v34 }
 0x413   :  { %v10909_v35 = vpop.f32.mrf.mxu3 }
 0x414   :  { %15717 = vst [vmem:[#allocation13_spill] sm:$0xff] %v10909_v35  ;;  %v1939_v2 = vpop.f32.mrf.mxu1  ;;  %v10142_v35 = vld [vmem:[%s15624_s5 + $0x40] sm:$0xff] }
 0x417   :  { %v1881_v61 = vpop.f32.mrf.mxu0 }
 0x418   :  { %v1940_v56 = vadd.f32 %v1939_v2, %v1881_v61  ;;  %v10140_v61 = vld [vmem:[%s15624_s5 + $0x30] sm:$0xff] }
 0x419   :  { %v10911_v24 = vpop.f32.mrf.mxu2  ;;  %v2110_v29 = vsel %vm1510_vm4, %v10140_v61, 0  ;;  %v10157_v61 = vld [vmem:[%s15621_s6 + $0x68] sm:$0xff] }
 0x41a   :  { %15718 = vst [vmem:[#allocation14_spill] sm:$0xff] %v10911_v24  ;;  %v10942_v17 = vand.u32 4294901760, %v2110_v29 }
 0x41b   :  { %v10913_v48 = vpop.f32.mrf.mxu3 }
 0x41c   :  { %15719 = vst [vmem:[#allocation15_spill] sm:$0xff] %v10913_v48  ;;  %v1943_v39 = vpop.f32.mrf.mxu1 }
 0x41f   :  { %v1889_v33 = vpop.f32.mrf.mxu0 }
 0x420   :  { %v1944_v37 = vadd.f32 %v1943_v39, %v1889_v33 }
 0x421   :  { %v10915_v5 = vpop.f32.mrf.mxu2 }
 0x422   :  { %15720 = vst [vmem:[#allocation16_spill] sm:$0xff] %v10915_v5 }
 0x423   :  { %v10917_v59 = vpop.f32.mrf.mxu3 }
 0x424   :  { %15721 = vst [vmem:[#allocation17_spill] sm:$0xff] %v10917_v59  ;;  %v2013_v32 = vpop.f32.mrf.mxu1 }
 0x427   :  { %v1975_v1 = vpop.f32.mrf.mxu0 }
 0x428   :  { %v1976_v49 = vadd.f32 %v1975_v1, %v1936_v13 }
 0x429   :  { %v10919_v4 = vpop.f32.mrf.mxu2 }
 0x42a   :  { %15722 = vst [vmem:[#allocation18_spill] sm:$0xff] %v10919_v4  ;;  %v2014_v10 = vadd.f32 %v2013_v32, %v1976_v49  ;;  %v10141_v32 = vld [vmem:[%s15624_s5 + $0x38] sm:$0xff] }
 0x42b   :  { %v10921_v38 = vpop.f32.mrf.mxu3 }
 0x42c   :  { %15723 = vst [vmem:[#allocation19_spill] sm:$0xff] %v10921_v38  ;;  %v2019_v47 = vpop.f32.mrf.mxu1 }
 0x42f   :  { %v1980_v53 = vpop.f32.mrf.mxu0 }
 0x430   :  { %v1981_v51 = vadd.f32 %v1980_v53, %v1940_v56 }
 0x431   :  { %v10923_v62 = vpop.f32.mrf.mxu2 }
 0x432   :  { %15724 = vst [vmem:[#allocation20_spill] sm:$0xff] %v10923_v62  ;;  %v2020_v8 = vadd.f32 %v2019_v47, %v1981_v51  ;;  %v10933_v62 = vand.u32 4294901760, %v2107_v28 }
 0x433   :  { %v10925_v9 = vpop.f32.mrf.mxu3 }
 0x434   :  { %15725 = vst [vmem:[#allocation21_spill] sm:$0xff] %v10925_v9  ;;  %v10940_v53 = vsub.f32 %v2107_v28, %v10933_v62  ;;  %v2025_v1 = vpop.f32.mrf.mxu1  ;;  %v2113_v28 = vsel %vm1510_vm4, %v10141_v32, 0 }
 0x436   :  { %v2145_v51 = vand.u32 4294901760, %v10940_v53 }
 0x437   :  { %v1985_v44 = vpop.f32.mrf.mxu0 }
 0x439   :  { %v2061_v46 = vpop.f32.mrf.mxu2 }
 0x43a   :  { %v2062_v36 = vadd.f32 %v2061_v46, %v2014_v10 }
 0x43b   :  { %v10927_v45 = vpop.f32.mrf.mxu3 }
 0x43c   :  { %15726 = vst [vmem:[#allocation22_spill] sm:$0xff] %v10927_v45  ;;  %v1986_v45 = vadd.f32 %v1985_v44, %v1944_v37 }
 0x43e   :  { %v2026_v56 = vadd.f32 %v2025_v1, %v1986_v45  ;;  %v10956_v45 = vsub.f32 %v2110_v29, %v10942_v17 }
 0x441   :  { %v2065_v21 = vpop.f32.mrf.mxu2 }
 0x442   :  { %v2066_v9 = vadd.f32 %v2065_v21, %v2020_v8  ;;  %v2146_v8 = vsub.f32 %v10940_v53, %v2145_v51 }
 0x443   :  { %v2095_v16 = vpop.f32.mrf.mxu3 }
 0x444   :  { %v2096_v39 = vadd.f32 %v2095_v16, %v2062_v36  ;;  %v10973_v36 = vand.u32 4294901760, %v10157_v61 }
 0x446   :  { %v10953_v46 = vand.u32 4294901760, %v2096_v39 }
 0x448   :  { %v2210_v1 = vsub.f32 %v2096_v39, %v10953_v46 }
 0x449   :  { %v2069_v33 = vpop.f32.mrf.mxu2 }
 0x44a   :  { %v2070_v47 = vadd.f32 %v2069_v33, %v2026_v56  ;;  %v10156_v56 = vld [vmem:[%s15621_s6 + $0x60] sm:$0xff] }
 0x44b   :  { %v2099_v2 = vpop.f32.mrf.mxu3  ;;  %v10989_v39 = vand.u32 4294901760, %v10156_v56 }
 0x44c   :  { %v2100_v60 = vadd.f32 %v2099_v2, %v2066_v9  ;;  %v10158_v9 = vld [vmem:[%s15621_s6 + $0x70] sm:$0xf] }
 0x44d   :  { %v2438_v21 = vsel %vm1246_vm2, %v10158_v9, 0  ;;  %v2147_v9 = vand.u32 4294901760, %v2146_v8  ;;  %v10998_v4 = vsub.f32 %v10156_v56, %v10989_v39  ;;  %v15727_v8 = vand.u32 4294901760, %v10956_v45  ;;  %v10154_v56 = vld [vmem:[%s15621_s6 + $0x50] sm:$0xff] }
 0x44e   :  { %v10944_v13 = vand.u32 4294901760, %v2100_v60  ;;  %v10960_v49 = vand.u32 4294901760, %v2438_v21  ;;  %v11024_v34 = vand.u32 4294901760, %v10154_v56 }
 0x44f   :  { %v2154_v5 = vsub.f32 %v10956_v45, %v15727_v8  ;;  %v2511_v0 = vand.u32 4294901760, %v10998_v4 }
 0x450   :  { %v2204_v44 = vsub.f32 %v2100_v60, %v10944_v13  ;;  %v10971_v29 = vsub.f32 %v2438_v21, %v10960_v49  ;;  %v10977_v60 = vand.u32 4294901760, %v2113_v28  ;;  %v10155_v21 = vld [vmem:[%s15621_s6 + $0x58] sm:$0xff] }
 0x451   :  { %v11010_v15 = vand.u32 4294901760, %v10155_v21 }
 0x452   :  { %v2499_v32 = vand.u32 4294901760, %v10971_v29  ;;  %v11005_v57 = vsub.f32 %v2113_v28, %v10977_v60 }
 0x453   :  { %v2103_v10 = vpop.f32.mrf.mxu3  ;;  %v11022_v24 = vsub.f32 %v10155_v21, %v11010_v15 }
 0x454   :  { %v2104_v16 = vadd.f32 %v2103_v10, %v2070_v47  ;;  %v10987_v10 = vsub.f32 %v10157_v61, %v10973_v36  ;;  %v2500_v33 = vsub.f32 %v10971_v29, %v2499_v32  ;;  %v2211_v61 = vand.u32 4294901760, %v2210_v1 }
 0x456   :  { %v2122_v37 = vsel %vm1526_vm5, %v2104_v16, 0  ;;  %v2205_v16 = vand.u32 4294901760, %v2204_v44  ;;  %v2501_v59 = vand.u32 4294901760, %v2500_v33  ;;  %v15728_v8 = vand.u32 4294901760, %v10987_v10 }
 0x457   :  { %v10968_v2 = vand.u32 4294901760, %v2122_v37  ;;  %v2116_v33 = vsel %vm1510_vm4, %v10142_v35, 0  ;;  %v2212_v7 = vsub.f32 %v2210_v1, %v2211_v61 }
 0x458   :  { %v2506_v28 = vsub.f32 %v10987_v10, %v15728_v8  ;;  %v2206_v48 = vsub.f32 %v2204_v44, %v2205_v16  ;;  %v2512_v8 = vsub.f32 %v10998_v4, %v2511_v0 }
 0x459   :  { %v2198_v47 = vsub.f32 %v2122_v37, %v10968_v2  ;;  %2138 = vmatpush.msrb.mxu0 %v10968_v2  ;;  %2298 = vmatpush.msra.mxu3 %v10968_v2 }
 0x45a   :  { %v2513_v35 = vand.u32 4294901760, %v2512_v8  ;;  %v2207_v21 = vand.u32 4294901760, %v2206_v48  ;;  %v15730_v8 = vand.u32 4294901760, %v10987_v10 }
 0x45b   :  { %2140 = vmatpush.msrb.mxu0 %v10944_v13  ;;  %2251 = vmatpush.msra.mxu2 %v2198_v47  ;;  %v2199_v37 = vand.u32 4294901760, %v2198_v47 }
 0x45c   :  { %2300 = vmatpush.msra.mxu3 %v10944_v13 }
 0x45d   :  { %2142 = vmatpush.msrb.mxu0 %v10953_v46  ;;  %2254 = vmatpush.msra.mxu2 %v2204_v44  ;;  %v2200_v38 = vsub.f32 %v2198_v47, %v2199_v37  ;;  %v2507_v47 = vand.u32 4294901760, %v2506_v28  ;;  %v2517_v44 = vand.u32 4294901760, %v11022_v24 }
 0x45e   :  { %2302 = vmatpush.msra.mxu3 %v10953_v46  ;;  %2148 = vmatmul.f32.vlgmr.msrb.gmra.mxu0 %v2147_v9  ;;  %v11032_v9 = vsub.f32 %v10154_v56, %v11024_v34  ;;  %v2213_v56 = vand.u32 4294901760, %v2212_v7  ;;  %v15729_v7 = vand.u32 4294901760, %v10956_v45 }
 0x45f   :  { %2306 = vmatmul.f32.vlgmr.msra.gmra.mxu3 %v2145_v51  ;;  %2350 = vmatpush.msra.mxu0 %v2199_v37  ;;  %v2201_v26 = vand.u32 4294901760, %v2200_v38  ;;  %v2155_v51 = vand.u32 4294901760, %v2154_v5  ;;  %v2161_v38 = vand.u32 4294901760, %v11005_v57  ;;  %v11036_v37 = vand.u32 4294901760, %v2116_v33  ;;  %v10143_v5 = vld [vmem:[%s15624_s5 + $0x48] sm:$0x3f] }
 0x460   :  { %2257 = vmatpush.msra.mxu2 %v2210_v1  ;;  %2502 = vmatpush.msrb.mxu3 %v2501_v59  ;;  %v2518_v59 = vsub.f32 %v11022_v24, %v2517_v44  ;;  %v2523_v1 = vand.u32 4294901760, %v11032_v9 }
 0x461   :  { %2260 = vmatmul.f32.vlgmr.msra.gmra.mxu2 %v10940_v53  ;;  %2354 = vmatpush.msra.mxu0 %v2205_v16  ;;  %v2162_v53 = vsub.f32 %v11005_v57, %v2161_v38  ;;  %v2168_v16 = vsub.f32 %v2116_v33, %v11036_v37 }
 0x462   :  { %2202 = vmatpush.msrb.mxu1 %v2201_v26  ;;  %2452 = vmatpush.msrb.mxu2 %v10960_v49  ;;  %v2524_v26 = vsub.f32 %v11032_v9, %v2523_v1  ;;  %v2519_v48 = vand.u32 4294901760, %v2518_v59 }
 0x463   :  { %2358 = vmatpush.msra.mxu0 %v2211_v61  ;;  %2508 = vmatpush.msrb.mxu3 %v2507_v47  ;;  %v2119_v61 = vsel %vm1510_vm4, %v10143_v5, 0  ;;  %v2169_v47 = vand.u32 4294901760, %v2168_v16 }
 0x464   :  { %2208 = vmatpush.msrb.mxu1 %v2207_v21  ;;  %2454 = vmatpush.msrb.mxu2 %v10973_v36  ;;  %v2525_v28 = vand.u32 4294901760, %v2524_v26  ;;  %v2175_v33 = vand.u32 4294901760, %v2119_v61 }
 0x465   :  { %2514 = vmatpush.msrb.mxu3 %v2513_v35  ;;  %2636 = vmatpush.msrb.mxu0 %v2499_v32  ;;  %v2163_v32 = vand.u32 4294901760, %v2162_v53 }
 0x466   :  { %2214 = vmatpush.msrb.mxu1 %v2213_v56  ;;  %2156 = vmatmul.f32.gmra.mxu0 %v2155_v51 }
 0x467   :  { %2216 = vmatmul.f32.vlgmr.msrb.gmra.mxu1 %v10933_v62  ;;  %2312 = vmatmul.f32.gmra.mxu3 %v15729_v7 }
 0x468   :  { %2394 = vmatpush.msra.mxu1 %v10968_v2  ;;  %2456 = vmatpush.msrb.mxu2 %v10989_v39 }
 0x469   :  { %2265 = vmatmul.f32.gmra.mxu2 %v10956_v45  ;;  %2520 = vmatpush.msrb.mxu3 %v2519_v48  ;;  %v2170_v45 = vsub.f32 %v2168_v16, %v2169_v47 }
 0x46a   :  { %2396 = vmatpush.msra.mxu1 %v10944_v13  ;;  %2458 = vmatpush.msrb.mxu2 %v11010_v15  ;;  %v2176_v13 = vsub.f32 %v2119_v61, %v2175_v33 }
 0x46b   :  { %2526 = vmatpush.msrb.mxu3 %v2525_v28  ;;  %2640 = vmatpush.msrb.mxu0 %v15730_v8 }
 0x46c   :  { %2398 = vmatpush.msra.mxu1 %v10953_v46  ;;  %2460 = vmatpush.msrb.mxu2 %v11024_v34  ;;  %v2171_v46 = vand.u32 4294901760, %v2170_v45  ;;  %v2177_v2 = vand.u32 4294901760, %v2176_v13 }
 0x46d   :  { %2594 = vmatpush.msra.mxu3 %v10960_v49  ;;  %2644 = vmatpush.msrb.mxu0 %v2511_v0 }
 0x46e   :  { %2553 = vmatpush.msra.mxu2 %v10971_v29  ;;  %2164 = vmatmul.f32.gmra.mxu0 %v2163_v32  ;;  %v10149_v32 = vld [vmem:[%s15624_s5 + $0x50] sm:$0xff] }
 0x46f   :  { %2678 = vmatpush.msrb.mxu1 %v10960_v49  ;;  %2318 = vmatmul.f32.gmra.mxu3 %v2161_v38 }
 0x470   :  { %2220 = vmatmul.f32.gmra.mxu1 %v10942_v17  ;;  %2596 = vmatpush.msra.mxu3 %v10973_v36 }
 0x471   :  { %2556 = vmatpush.msra.mxu2 %v10987_v10  ;;  %2648 = vmatpush.msrb.mxu0 %v2517_v44 }
 0x472   :  { %2270 = vmatmul.f32.gmra.mxu2 %v11005_v57  ;;  %2598 = vmatpush.msra.mxu3 %v10989_v39  ;;  %v2178_v57 = vsub.f32 %v2176_v13, %v2177_v2 }
 0x473   :  { %2559 = vmatpush.msra.mxu2 %v10998_v4  ;;  %2680 = vmatpush.msrb.mxu1 %v10973_v36 }
 0x474   :  { %2600 = vmatpush.msra.mxu3 %v11010_v15  ;;  %2652 = vmatpush.msrb.mxu0 %v2523_v1  ;;  %v2179_v0 = vand.u32 4294901760, %v2178_v57 }
 0x475   :  { %2562 = vmatpush.msra.mxu2 %v11022_v24  ;;  %2682 = vmatpush.msrb.mxu1 %v10989_v39 }
 0x476   :  { %2172 = vmatmul.f32.gmra.mxu0 %v2171_v46  ;;  %2602 = vmatpush.msra.mxu3 %v11024_v34  ;;  %v2701_v46 = vsel %vm1510_vm4, %v10149_v32, 0 }
 0x477   :  { %2324 = vmatmul.f32.gmra.mxu3 %v2169_v47  ;;  %2565 = vmatpush.msra.mxu2 %v11032_v9 }
 0x478   :  { %2224 = vmatmul.f32.gmra.mxu1 %v10977_v60 }
 0x479   :  { %2684 = vmatpush.msrb.mxu1 %v11010_v15 }
 0x47a   :  { %2275 = vmatmul.f32.gmra.mxu2 %v2168_v16 }
 0x47b   :  { %2686 = vmatpush.msrb.mxu1 %v11024_v34 }
 0x47e   :  { %2180 = vmatmul.f32.gmra.mxu0 %v2179_v0 }
 0x47f   :  { %2330 = vmatmul.f32.gmra.mxu3 %v2177_v2 }
 0x480   :  { %2228 = vmatmul.f32.gmra.mxu1 %v11036_v37 }
 0x482   :  { %2280 = vmatmul.f32.gmra.mxu2 %v2176_v13 }
 0x486   :  { %2360 = vmatmul.f32.vlgmr.msra.gmra.mxu0 %v10933_v62 }
 0x487   :  { %2528 = vmatmul.f32.vlgmr.msrb.gmra.mxu3 %v10626_v11 }
 0x488   :  { %2232 = vmatmul.f32.gmra.mxu1 %v2175_v33 }
 0x48a   :  { %2466 = vmatmul.f32.vlgmr.msrb.gmra.mxu2 %v10650_v50 }
 0x48e   :  { %2364 = vmatmul.f32.gmra.mxu0 %v10942_v17 }
 0x48f   :  { %2532 = vmatmul.f32.gmra.mxu3 %v10648_v63 }
 0x490   :  { %2400 = vmatmul.f32.vlgmr.msra.gmra.mxu1 %v10933_v62 }
 0x492   :  { %2474 = vmatmul.f32.gmra.mxu2 %v10667_v42 }
 0x496   :  { %2368 = vmatmul.f32.gmra.mxu0 %v10977_v60 }
 0x497   :  { %2536 = vmatmul.f32.gmra.mxu3 %v10665_v41 }
 0x498   :  { %2404 = vmatmul.f32.gmra.mxu1 %v10942_v17 }
 0x49a   :  { %2482 = vmatmul.f32.gmra.mxu2 %v10681_v18 }
 0x49e   :  { %2372 = vmatmul.f32.gmra.mxu0 %v11036_v37 }
 0x49f   :  { %2606 = vmatmul.f32.vlgmr.msra.gmra.mxu3 %v10639_v58 }
 0x4a0   :  { %2408 = vmatmul.f32.gmra.mxu1 %v10977_v60 }
 0x4a2   :  { %2568 = vmatmul.f32.vlgmr.msra.gmra.mxu2 %v10633_v12 }
 0x4a6   :  { %2376 = vmatmul.f32.gmra.mxu0 %v2175_v33 }
 0x4a7   :  { %2612 = vmatmul.f32.gmra.mxu3 %v10659_v40 }
 0x4a8   :  { %2412 = vmatmul.f32.gmra.mxu1 %v11036_v37 }
 0x4aa   :  { %2573 = vmatmul.f32.gmra.mxu2 %v10653_v22 }
 0x4ae   :  { %2654 = vmatmul.f32.vlgmr.msrb.gmra.mxu0 %v10626_v11 }
 0x4af   :  { %2618 = vmatmul.f32.gmra.mxu3 %v10676_v54 }
 0x4b0   :  { %2416 = vmatmul.f32.gmra.mxu1 %v2175_v33 }
 0x4b2   :  { %2578 = vmatmul.f32.gmra.mxu2 %v10670_v43 }
 0x4b6   :  { %2658 = vmatmul.f32.gmra.mxu0 %v10648_v63 }
 0x4b8   :  { %2688 = vmatmul.f32.vlgmr.msrb.gmra.mxu1 %v10626_v11 }
 0x4be   :  { %2662 = vmatmul.f32.gmra.mxu0 %v10665_v41 }
 0x4c0   :  { %2692 = vmatmul.f32.gmra.mxu1 %v10648_v63 }
 0x4c8   :  { %2696 = vmatmul.f32.gmra.mxu1 %v10665_v41 }
 0x4db   :  { %v11108_v12 = vpop.f32.mrf.mxu0 }
 0x4e2   :  { %v11110_v58 = vpop.f32.mrf.mxu3 }
 0x4e3   :  { %v11112_v50 = vpop.f32.mrf.mxu0 }
 0x4e4   :  { %v11114_v22 = vpop.f32.mrf.mxu1  ;;  %v11116_v40 = vpop.f32.mrf.mxu2 }
 0x4ea   :  { %v11118_v42 = vpop.f32.mrf.mxu3 }
 0x4eb   :  { %v11120_v43 = vpop.f32.mrf.mxu0 }
 0x4ec   :  { %v11124_v54 = vpop.f32.mrf.mxu2 }
 0x4ed   :  { %v11122_v11 = vpop.f32.mrf.mxu1 }
 0x4f2   :  { %v11126_v63 = vpop.f32.mrf.mxu3 }
 0x4f3   :  { %v11128_v41 = vpop.f32.mrf.mxu0 }
 0x4f5   :  { %v11130_v18 = vpop.f32.mrf.mxu1  ;;  %v11132_v15 = vpop.f32.mrf.mxu2 }
 0x4fa   :  { %v11134_v34 = vpop.f32.mrf.mxu3 }
 0x4fb   :  { %15731 = vst [vmem:[#allocation23_spill] sm:$0xff] %v11134_v34  ;;  %v11136_v24 = vpop.f32.mrf.mxu0 }
 0x4fc   :  { %15732 = vst [vmem:[#allocation24_spill] sm:$0xff] %v11136_v24 }
 0x4fd   :  { %v11138_v4 = vpop.f32.mrf.mxu1  ;;  %v11140_v62 = vpop.f32.mrf.mxu2 }
 0x502   :  { %v11142_v17 = vpop.f32.mrf.mxu3 }
 0x503   :  { %15733 = vst [vmem:[#allocation25_spill] sm:$0xff] %v11142_v17  ;;  %v11144_v49 = vpop.f32.mrf.mxu0 }
 0x505   :  { %v11146_v29 = vpop.f32.mrf.mxu1  ;;  %v11148_v36 = vpop.f32.mrf.mxu2 }
 0x506   :  { %15734 = vst [vmem:[#allocation26_spill] sm:$0xff] %v11146_v29 }
 0x507   :  { %15735 = vst [vmem:[#allocation27_spill] sm:$0xff] %v11148_v36 }
 0x50a   :  { %v2529_v44 = vpop.f32.mrf.mxu3 }
 0x50b   :  { %v11150_v60 = vpop.f32.mrf.mxu0 }
 0x50c   :  { %15736 = vst [vmem:[#allocation28_spill] sm:$0xff] %v11150_v60 }
 0x50d   :  { %v11152_v10 = vpop.f32.mrf.mxu1  ;;  %v2467_v39 = vpop.f32.mrf.mxu2 }
 0x50e   :  { %v2530_v47 = vadd.f32 %v2529_v44, %v2467_v39 }
 0x512   :  { %v2533_v35 = vpop.f32.mrf.mxu3 }
 0x513   :  { %v11154_v9 = vpop.f32.mrf.mxu0 }
 0x514   :  { %15737 = vst [vmem:[#allocation29_spill] sm:$0xff] %v11154_v9 }
 0x515   :  { %v11156_v51 = vpop.f32.mrf.mxu1  ;;  %v2475_v38 = vpop.f32.mrf.mxu2 }
 0x516   :  { %15738 = vst [vmem:[#allocation30_spill] sm:$0xff] %v11156_v51  ;;  %v2534_v61 = vadd.f32 %v2533_v35, %v2475_v38 }
 0x51a   :  { %v2537_v1 = vpop.f32.mrf.mxu3 }
 0x51b   :  { %v11158_v21 = vpop.f32.mrf.mxu0 }
 0x51c   :  { %15739 = vst [vmem:[#allocation31_spill] sm:$0xff] %v11158_v21 }
 0x51d   :  { %v11160_v37 = vpop.f32.mrf.mxu1  ;;  %v2483_v59 = vpop.f32.mrf.mxu2 }
 0x51e   :  { %15740 = vst [vmem:[#allocation32_spill] sm:$0xff] %v11160_v37  ;;  %v2538_v0 = vadd.f32 %v2537_v1, %v2483_v59 }
 0x522   :  { %v2607_v48 = vpop.f32.mrf.mxu3 }
 0x523   :  { %v11162_v56 = vpop.f32.mrf.mxu0 }
 0x524   :  { %15741 = vst [vmem:[#allocation33_spill] sm:$0xff] %v11162_v56  ;;  %v11172_v56 = vand.u32 4294901760, %v2701_v46 }
 0x525   :  { %v11164_v5 = vpop.f32.mrf.mxu1  ;;  %v2569_v26 = vpop.f32.mrf.mxu2 }
 0x526   :  { %15742 = vst [vmem:[#allocation34_spill] sm:$0xff] %v11164_v5  ;;  %v2570_v13 = vadd.f32 %v2569_v26, %v2530_v47  ;;  %v10150_v5 = vld [vmem:[%s15624_s5 + $0x58] sm:$0xff] }
 0x527   :  { %v2704_v47 = vsel %vm1510_vm4, %v10150_v5, 0 }
 0x52a   :  { %v2613_v33 = vpop.f32.mrf.mxu3 }
 0x52b   :  { %v2655_v16 = vpop.f32.mrf.mxu0 }
 0x52d   :  { %v11166_v53 = vpop.f32.mrf.mxu1  ;;  %v2574_v7 = vpop.f32.mrf.mxu2 }
 0x52e   :  { %15743 = vst [vmem:[#allocation35_spill] sm:$0xff] %v11166_v53  ;;  %v2575_v8 = vadd.f32 %v2574_v7, %v2534_v61  ;;  %v2608_v53 = vadd.f32 %v2607_v48, %v2570_v13  ;;  %v2738_v7 = vsub.f32 %v2701_v46, %v11172_v56 }
 0x530   :  { %v2614_v57 = vadd.f32 %v2613_v33, %v2575_v8  ;;  %v2656_v39 = vadd.f32 %v2655_v16, %v2608_v53  ;;  %v2739_v48 = vand.u32 4294901760, %v2738_v7  ;;  %v11179_v8 = vand.u32 4294901760, %v2704_v47 }
 0x532   :  { %v2619_v26 = vpop.f32.mrf.mxu3  ;;  %v2746_v46 = vsub.f32 %v2704_v47, %v11179_v8 }
 0x533   :  { %v2659_v45 = vpop.f32.mrf.mxu0 }
 0x534   :  { %v2660_v17 = vadd.f32 %v2659_v45, %v2614_v57 }
 0x535   :  { %v2689_v28 = vpop.f32.mrf.mxu1  ;;  %v2579_v2 = vpop.f32.mrf.mxu2 }
 0x536   :  { %v2580_v35 = vadd.f32 %v2579_v2, %v2538_v0  ;;  %v2690_v61 = vadd.f32 %v2689_v28, %v2656_v39  ;;  %v2740_v28 = vsub.f32 %v2738_v7, %v2739_v48 }
 0x538   :  { %v2620_v59 = vadd.f32 %v2619_v26, %v2580_v35  ;;  %v2735_v45 = vand.u32 4294901760, %v2690_v61  ;;  %v2741_v39 = vand.u32 4294901760, %v2740_v28  ;;  %v2747_v26 = vand.u32 4294901760, %v2746_v46 }
 0x53a   :  { %v2804_v5 = vsub.f32 %v2690_v61, %v2735_v45  ;;  %v10152_v61 = vld [vmem:[%s15624_s5 + $0x68] sm:$0xff] }
 0x53b   :  { %v2663_v32 = vpop.f32.mrf.mxu0  ;;  %v2710_v28 = vsel %vm1510_vm4, %v10152_v61, 0 }
 0x53c   :  { %v2664_v33 = vadd.f32 %v2663_v32, %v2620_v59  ;;  %v2805_v59 = vand.u32 4294901760, %v2804_v5 }
 0x53d   :  { %v2693_v38 = vpop.f32.mrf.mxu1 }
 0x53e   :  { %v2694_v44 = vadd.f32 %v2693_v38, %v2660_v17  ;;  %v10151_v17 = vld [vmem:[%s15624_s5 + $0x60] sm:$0xff] }
 0x53f   :  { %v2707_v0 = vsel %vm1510_vm4, %v10151_v17, 0 }
 0x540   :  { %v2733_v1 = vand.u32 4294901760, %v2694_v44  ;;  %v11187_v32 = vand.u32 4294901760, %v2707_v0 }
 0x542   :  { %v2798_v53 = vsub.f32 %v2694_v44, %v2733_v1 }
 0x544   :  { %v2799_v35 = vand.u32 4294901760, %v2798_v53 }
 0x545   :  { %v2697_v13 = vpop.f32.mrf.mxu1 }
 0x546   :  { %v2698_v2 = vadd.f32 %v2697_v13, %v2664_v33  ;;  %v2800_v33 = vsub.f32 %v2798_v53, %v2799_v35  ;;  %v2748_v13 = vsub.f32 %v2746_v46, %v2747_v26 }
 0x548   :  { %v2716_v16 = vsel %vm1526_vm5, %v2698_v2, 0  ;;  %v2754_v2 = vsub.f32 %v2707_v0, %v11187_v32  ;;  %v2801_v36 = vand.u32 4294901760, %v2800_v33  ;;  %v2749_v21 = vand.u32 4294901760, %v2748_v13  ;;  %v10153_v0 = vld [vmem:[%s15624_s5 + $0x70] sm:$0x3f] }
 0x549   :  { %v2731_v57 = vand.u32 4294901760, %v2716_v16 }
 0x54a   :  { %v2755_v29 = vand.u32 4294901760, %v2754_v2 }
 0x54b   :  { %v2792_v38 = vsub.f32 %v2716_v16, %v2731_v57  ;;  %2732 = vmatpush.msrb.mxu2 %v2731_v57  ;;  %2892 = vmatpush.msra.mxu1 %v2731_v57  ;;  %v2806_v16 = vsub.f32 %v2804_v5, %v2805_v59 }
 0x54d   :  { %2734 = vmatpush.msrb.mxu2 %v2733_v1  ;;  %2845 = vmatpush.msra.mxu0 %v2792_v38  ;;  %v2793_v44 = vand.u32 4294901760, %v2792_v38 }
 0x54e   :  { %2894 = vmatpush.msra.mxu1 %v2733_v1 }
 0x54f   :  { %2736 = vmatpush.msrb.mxu2 %v2735_v45  ;;  %2848 = vmatpush.msra.mxu0 %v2798_v53  ;;  %v2794_v47 = vsub.f32 %v2792_v38, %v2793_v44  ;;  %v2761_v38 = vand.u32 4294901760, %v2710_v28  ;;  %v2807_v53 = vand.u32 4294901760, %v2806_v16 }
 0x550   :  { %2896 = vmatpush.msra.mxu1 %v2735_v45  ;;  %2742 = vmatmul.f32.vlgmr.msrb.gmra.mxu2 %v2741_v39 }
 0x551   :  { %2944 = vmatpush.msra.mxu2 %v2793_v44  ;;  %2851 = vmatpush.msra.mxu0 %v2804_v5  ;;  %v2795_v17 = vand.u32 4294901760, %v2794_v47  ;;  %v2756_v5 = vsub.f32 %v2754_v2, %v2755_v29 }
 0x552   :  { %2854 = vmatmul.f32.vlgmr.msra.gmra.mxu0 %v2738_v7  ;;  %2900 = vmatmul.f32.vlgmr.msra.gmra.mxu1 %v2739_v48  ;;  %v2762_v7 = vsub.f32 %v2710_v28, %v2761_v38  ;;  %v2713_v48 = vsel %vm1510_vm4, %v10153_v0, 0  ;;  %v3030_v0 = vld [vmem:[%s15625_s8 + $0x28] sm:$0xff] }
 0x553   :  { %2948 = vmatpush.msra.mxu2 %v2799_v35  ;;  %2796 = vmatpush.msrb.mxu3 %v2795_v17  ;;  %v2757_v35 = vand.u32 4294901760, %v2756_v5  ;;  %v3031_v17 = vld [vmem:[%s15625_s8 + $0x30] sm:$0xff] }
 0x554   :  { %v2763_v39 = vand.u32 4294901760, %v2762_v7 }
 0x555   :  { %2952 = vmatpush.msra.mxu2 %v2805_v59  ;;  %2802 = vmatpush.msrb.mxu3 %v2801_v36  ;;  %v2769_v36 = vand.u32 4294901760, %v2713_v48 }
 0x556   :  { %v2764_v44 = vsub.f32 %v2762_v7, %v2763_v39 }
 0x557   :  { %2808 = vmatpush.msrb.mxu3 %v2807_v53  ;;  %v2770_v59 = vsub.f32 %v2713_v48, %v2769_v36  ;;  %v11248_v53 = vand.u32 4294901760, %v3031_v17 }
 0x558   :  { %2750 = vmatmul.f32.gmra.mxu2 %v2749_v21  ;;  %2810 = vmatmul.f32.vlgmr.msrb.gmra.mxu3 %v11172_v56  ;;  %v2765_v21 = vand.u32 4294901760, %v2764_v44 }
 0x559   :  { %2988 = vmatpush.msra.mxu3 %v2731_v57  ;;  %v2771_v61 = vand.u32 4294901760, %v2770_v59 }
 0x55a   :  { %2859 = vmatmul.f32.gmra.mxu0 %v2746_v46  ;;  %2906 = vmatmul.f32.gmra.mxu1 %v2747_v26 }
 0x55b   :  { %2990 = vmatpush.msra.mxu3 %v2733_v1  ;;  %v2772_v57 = vsub.f32 %v2770_v59, %v2771_v61 }
 0x55d   :  { %2992 = vmatpush.msra.mxu3 %v2735_v45  ;;  %v2773_v1 = vand.u32 4294901760, %v2772_v57 }
 0x560   :  { %2758 = vmatmul.f32.gmra.mxu2 %v2757_v35  ;;  %2814 = vmatmul.f32.gmra.mxu3 %v11179_v8  ;;  %v11260_v35 = vsub.f32 %v3031_v17, %v11248_v53 }
 0x562   :  { %2864 = vmatmul.f32.gmra.mxu0 %v2754_v2  ;;  %2912 = vmatmul.f32.gmra.mxu1 %v2755_v29  ;;  %v3034_v29 = vld [vmem:[%s15625_s8 + $0x48] sm:$0xf] }
 0x563   :  { %v3052_v45 = vsel %vm1246_vm2, %v3034_v29, 0 }
 0x564   :  { %v11211_v46 = vand.u32 4294901760, %v3052_v45 }
 0x566   :  { %3277 = vmatpush.msrb.mxu3 %v11211_v46  ;;  %3061 = vmatpush.msrb.mxu0 %v11211_v46 }
 0x568   :  { %2766 = vmatmul.f32.gmra.mxu2 %v2765_v21  ;;  %2818 = vmatmul.f32.gmra.mxu3 %v11187_v32  ;;  %v15631_v21 = vand.u32 4294901760, %v11260_v35 }
 0x56a   :  { %2869 = vmatmul.f32.gmra.mxu0 %v2762_v7  ;;  %2918 = vmatmul.f32.gmra.mxu1 %v2763_v39  ;;  %v11264_v39 = vand.u32 4294901760, %v3030_v0 }
 0x56c   :  { %v11278_v57 = vsub.f32 %v3030_v0, %v11264_v39 }
 0x56e   :  { %v15634_v0 = vand.u32 4294901760, %v11278_v57 }
 0x570   :  { %2774 = vmatmul.f32.gmra.mxu2 %v2773_v1  ;;  %2822 = vmatmul.f32.gmra.mxu3 %v2761_v38  ;;  %v3028_v1 = vld [vmem:[%s15625_s8 + $0x18] sm:$0xff] }
 0x572   :  { %2874 = vmatmul.f32.gmra.mxu0 %v2770_v59  ;;  %2924 = vmatmul.f32.gmra.mxu1 %v2771_v61 }
 0x578   :  { %2826 = vmatmul.f32.gmra.mxu3 %v2769_v36  ;;  %2954 = vmatmul.f32.vlgmr.msra.gmra.mxu2 %v11172_v56 }
 0x580   :  { %2958 = vmatmul.f32.gmra.mxu2 %v11179_v8  ;;  %2994 = vmatmul.f32.vlgmr.msra.gmra.mxu3 %v11172_v56  ;;  %v3033_v56 = vld [vmem:[%s15625_s8 + $0x40] sm:$0xff] }
 0x581   :  { %v11219_v26 = vand.u32 4294901760, %v3033_v56 }
 0x583   :  { %v11230_v13 = vsub.f32 %v3033_v56, %v11219_v26  ;;  %3279 = vmatpush.msrb.mxu3 %v11219_v26  ;;  %3063 = vmatpush.msrb.mxu0 %v11219_v26 }
 0x585   :  { %v15633_v28 = vand.u32 4294901760, %v11230_v13 }
 0x587   :  { %v3136_v7 = vsub.f32 %v11230_v13, %v15633_v28 }
 0x588   :  { %2962 = vmatmul.f32.gmra.mxu2 %v11187_v32  ;;  %2998 = vmatmul.f32.gmra.mxu3 %v11179_v8  ;;  %v11217_v8 = vsub.f32 %v3052_v45, %v11211_v46 }
 0x589   :  { %v3137_v44 = vand.u32 4294901760, %v3136_v7 }
 0x58a   :  { %v15635_v33 = vand.u32 4294901760, %v11217_v8  ;;  %3216 = vmatpush.msrb.mxu2 %v11217_v8 }
 0x58c   :  { %v3130_v16 = vsub.f32 %v11217_v8, %v15635_v33  ;;  %3219 = vmatpush.msrb.mxu2 %v11230_v13  ;;  %v3025_v33 = vld [vmem:[%s15625_s8] sm:$0xff] }
 0x58e   :  { %v3131_v5 = vand.u32 4294901760, %v3130_v16  ;;  %v11295_v16 = vand.u32 4294901760, %v3028_v1 }
 0x590   :  { %2966 = vmatmul.f32.gmra.mxu2 %v2761_v38  ;;  %3002 = vmatmul.f32.gmra.mxu3 %v11187_v32  ;;  %v3032_v32 = vld [vmem:[%s15625_s8 + $0x38] sm:$0xff] }
 0x591   :  { %v11233_v2 = vand.u32 4294901760, %v3032_v32  ;;  %3132 = vmatpush.msrb.mxu1 %v3131_v5  ;;  %v3027_v5 = vld [vmem:[%s15625_s8 + $0x10] sm:$0xff] }
 0x593   :  { %3281 = vmatpush.msrb.mxu3 %v11233_v2  ;;  %3065 = vmatpush.msrb.mxu0 %v11233_v2 }
 0x594   :  { %3138 = vmatpush.msrb.mxu1 %v3137_v44 }
 0x595   :  { %3283 = vmatpush.msrb.mxu3 %v11248_v53  ;;  %3067 = vmatpush.msrb.mxu0 %v11248_v53 }
 0x597   :  { %3285 = vmatpush.msrb.mxu3 %v11264_v39  ;;  %3069 = vmatpush.msrb.mxu0 %v11264_v39 }
 0x598   :  { %2970 = vmatmul.f32.gmra.mxu2 %v2769_v36  ;;  %3006 = vmatmul.f32.gmra.mxu3 %v2761_v38  ;;  %v11245_v38 = vsub.f32 %v3032_v32, %v11233_v2  ;;  %v3148_v32 = vsub.f32 %v11260_v35, %v15631_v21  ;;  %v3154_v21 = vsub.f32 %v11278_v57, %v15634_v0 }
 0x59a   :  { %v15632_v48 = vand.u32 4294901760, %v11245_v38  ;;  %3222 = vmatpush.msrb.mxu2 %v11245_v38  ;;  %v3149_v7 = vand.u32 4294901760, %v3148_v32  ;;  %v3155_v0 = vand.u32 4294901760, %v3154_v21  ;;  %v11338_v21 = vand.u32 4294901760, %v3025_v33 }
 0x59c   :  { %v3142_v59 = vsub.f32 %v11245_v38, %v15632_v48  ;;  %3225 = vmatpush.msrb.mxu2 %v11260_v35 }
 0x59e   :  { %v3143_v56 = vand.u32 4294901760, %v3142_v59  ;;  %3228 = vmatpush.msrb.mxu2 %v11278_v57  ;;  %v11305_v59 = vsub.f32 %v3028_v1, %v11295_v16 }
 0x5a0   :  { %3010 = vmatmul.f32.gmra.mxu3 %v2769_v36  ;;  %v3029_v36 = vld [vmem:[%s15625_s8 + $0x20] sm:$0xff]  ;;  %3144 = vmatpush.msrb.mxu1 %v3143_v56  ;;  %v3026_v56 = vld [vmem:[%s15625_s8 + $0x8] sm:$0xff]  ;;  %v3165_v32 = vand.u32 4294901760, %v11305_v59 }
 0x5a1   :  { %v11275_v61 = vand.u32 4294901760, %v3029_v36  ;;  %v11323_v28 = vand.u32 4294901760, %v3026_v56 }
 0x5a2   :  { %3150 = vmatpush.msrb.mxu1 %v3149_v7 }
 0x5a3   :  { %v11293_v17 = vsub.f32 %v3029_v36, %v11275_v61  ;;  %3287 = vmatpush.msrb.mxu3 %v11275_v61  ;;  %v11307_v36 = vand.u32 4294901760, %v3027_v5  ;;  %3071 = vmatpush.msrb.mxu0 %v11275_v61 }
 0x5a4   :  { %3156 = vmatpush.msrb.mxu1 %v3155_v0  ;;  %v11349_v0 = vsub.f32 %v3025_v33, %v11338_v21 }
 0x5a5   :  { %v3159_v44 = vand.u32 4294901760, %v11293_v17  ;;  %3231 = vmatpush.msrb.mxu2 %v11293_v17  ;;  %3289 = vmatpush.msrb.mxu3 %v11295_v16  ;;  %v11321_v48 = vsub.f32 %v3027_v5, %v11307_v36  ;;  %v11334_v5 = vsub.f32 %v3026_v56, %v11323_v28 }
 0x5a6   :  { %3073 = vmatpush.msrb.mxu0 %v11295_v16 }
 0x5a7   :  { %v3160_v1 = vsub.f32 %v11293_v17, %v3159_v44  ;;  %3234 = vmatpush.msrb.mxu2 %v11305_v59  ;;  %3291 = vmatpush.msrb.mxu3 %v11307_v36  ;;  %v3166_v17 = vsub.f32 %v11305_v59, %v3165_v32  ;;  %v3171_v24 = vand.u32 4294901760, %v11321_v48  ;;  %v3177_v59 = vand.u32 4294901760, %v11334_v5 }
 0x5a8   :  { %3075 = vmatpush.msrb.mxu0 %v11307_v36 }
 0x5a9   :  { %v3161_v7 = vand.u32 4294901760, %v3160_v1  ;;  %3237 = vmatpush.msrb.mxu2 %v11321_v48  ;;  %v3167_v51 = vand.u32 4294901760, %v3166_v17  ;;  %v3172_v1 = vsub.f32 %v11321_v48, %v3171_v24  ;;  %3293 = vmatpush.msrb.mxu3 %v11323_v28  ;;  %v3183_v48 = vand.u32 4294901760, %v11349_v0 }
 0x5aa   :  { %3077 = vmatpush.msrb.mxu0 %v11323_v28 }
 0x5ab   :  { %3162 = vmatpush.msrb.mxu1 %v3161_v7  ;;  %3240 = vmatpush.msrb.mxu2 %v11334_v5  ;;  %v3173_v56 = vand.u32 4294901760, %v3172_v1  ;;  %v15745_v7 = vand.u32 4294901760, %v11217_v8  ;;  %v3184_v33 = vsub.f32 %v11349_v0, %v3183_v48  ;;  %v15746_v1 = vand.u32 4294901760, %v11230_v13 }
 0x5ac   :  { %3295 = vmatpush.msrb.mxu3 %v11338_v21  ;;  %3079 = vmatpush.msrb.mxu0 %v11338_v21  ;;  %v15748_v8 = vand.u32 4294901760, %v11260_v35  ;;  %v1628_v13 = vadd.f32 %v10887_v25, %v10877_v14  ;;  %v1636_v14 = vadd.f32 %v10901_v19, %v10891_v27  ;;  %v1214_v27 = vld [vmem:[%s15626_s2] sm:$0xff]  ;;  %v11402_v19 = vstv %s15627_s10  ;;  %v15753_v35 = vld [vmem:[#allocation14_spill] sm:$0xff] }
 0x5ad   :  { %3168 = vmatpush.msrb.mxu1 %v3167_v51  ;;  %3243 = vmatpush.msrb.mxu2 %v11349_v0  ;;  %v15747_v51 = vand.u32 4294901760, %v11245_v38  ;;  %v15749_v0 = vand.u32 4294901760, %v11278_v57  ;;  %v1216_v57 = vld [vmem:[%s15626_s2 + $0x10] sm:$0xff] }
 0x5ae   :  { %3336 = vmatpush.msra.mxu0 %v15745_v7  ;;  %v15754_v7 = vld [vmem:[#allocation15_spill] sm:$0xff] }
 0x5af   :  { %3174 = vmatpush.msrb.mxu1 %v3173_v56 }
 0x5b0   :  { %3340 = vmatpush.msra.mxu0 %v15746_v1  ;;  %v15756_v1 = vld [vmem:[#allocation17_spill] sm:$0xff] }
 0x5b2   :  { %3344 = vmatpush.msra.mxu0 %v15747_v51  ;;  %v15758_v51 = vld [vmem:[#allocation13_spill] sm:$0xff] }
 0x5b4   :  { %3348 = vmatpush.msra.mxu0 %v15748_v8  ;;  %v15759_v8 = vld [vmem:[#allocation8_spill] sm:$0xff] }
 0x5b6   :  { %3352 = vmatpush.msra.mxu0 %v15749_v0  ;;  %v11438_v0 = vadd.f32 %v11402_v19, %v1216_v57 }
 0x5b8   :  { %3356 = vmatpush.msra.mxu0 %v3159_v44  ;;  %v2222_v44 = vadd.f32 %v11122_v11, %v11112_v50  ;;  %v15755_v50 = vld [vmem:[#allocation6_spill] sm:$0xff] }
 0x5ba   :  { %3360 = vmatpush.msra.mxu0 %v3165_v32  ;;  %v2226_v32 = vadd.f32 %v11130_v18, %v11120_v43 }
 0x5bc   :  { %3364 = vmatpush.msra.mxu0 %v3171_v24 }
 0x5be   :  { %3368 = vmatpush.msra.mxu0 %v3177_v59 }
 0x5c0   :  { %3372 = vmatpush.msra.mxu0 %v3183_v48 }
 0x5cf   :  { %v2855_v56 = vpop.f32.mrf.mxu0 }
 0x5d3   :  { %v11226_v47 = vpop.f32.mrf.mxu2 }
 0x5db   :  { %v11285_v29 = vpop.f32.mrf.mxu2  ;;  %v11287_v45 = vpop.f32.mrf.mxu3 }
 0x5e3   :  { %v11340_v34 = vpop.f32.mrf.mxu2  ;;  %v11342_v37 = vpop.f32.mrf.mxu3 }
 0x5e4   :  { %15744 = vst [vmem:[#allocation36_spill] sm:$0xff] %v11340_v34  ;;  %v3178_v34 = vsub.f32 %v11334_v5, %v3177_v59  ;;  %v3185_v5 = vand.u32 4294901760, %v3184_v33  ;;  %v10174_v33 = vld [vmem:[%s15625_s8 + $0x98] sm:$0xf] }
 0x5e6   :  { %v3179_v17 = vand.u32 4294901760, %v3178_v34  ;;  %v1624_v34 = vadd.f32 %v10879_v52, %v10873_v55  ;;  %v1673_v55 = vadd.f32 %v10875_v6, %v1628_v13  ;;  %v1632_v52 = vadd.f32 %v10895_v31, %v10885_v3  ;;  %v15750_v3 = vld [vmem:[#allocation5_spill] sm:$0xff] }
 0x5e8   :  { %3180 = vmatpush.msrb.mxu1 %v3179_v17  ;;  %v1668_v38 = vadd.f32 %v10869_v30, %v1624_v34  ;;  %v1678_v6 = vadd.f32 %v10883_v23, %v1632_v52  ;;  %v1720_v31 = vadd.f32 %v15750_v3, %v1673_v55  ;;  %v15752_v23 = vld [vmem:[#allocation12_spill] sm:$0xff]  ;;  %v1221_v17 = vadd.f32 %v11402_v19, %v1214_v27 }
 0x5e9   :  { %v2272_v55 = vadd.f32 %v11132_v15, %v2226_v32  ;;  %v15761_v15 = vld [vmem:[#allocation18_spill] sm:$0xff] }
 0x5ea   :  { %3186 = vmatpush.msrb.mxu1 %v3185_v5  ;;  %v1714_v30 = vadd.f32 %v10871_v20, %v1668_v38  ;;  %v1215_v20 = vld [vmem:[%s15626_s2 + $0x8] sm:$0xff]  ;;  %v1726_v11 = vadd.f32 %v15755_v50, %v1678_v6  ;;  %v15757_v5 = vld [vmem:[#allocation9_spill] sm:$0xff]  ;;  %v15760_v6 = vld [vmem:[#allocation16_spill] sm:$0xff] }
 0x5eb   :  { %v11362_v9 = vpop.f32.mrf.mxu2  ;;  %v11364_v60 = vpop.f32.mrf.mxu3  ;;  %v1222_v59 = vadd.f32 %v11402_v19, %v1215_v20  ;;  %v11434_v34 = vadd.f32 %v15758_v51, %v15757_v5  ;;  %v10172_v20 = vld [vmem:[%s15625_s8 + $0x88] sm:$0xff] }
 0x5ec   :  { %3401 = vmatpush.msra.mxu1 %v11211_v46  ;;  %v2218_v46 = vadd.f32 %v11114_v22, %v11108_v12  ;;  %v15751_v22 = vld [vmem:[#allocation7_spill] sm:$0xff]  ;;  %v1776_v3 = vadd.f32 %v15760_v6, %v1726_v11 }
 0x5ed   :  { %v1683_v24 = vadd.f32 %v15751_v22, %v1636_v14  ;;  %v10173_v14 = vld [vmem:[%s15625_s8 + $0x90] sm:$0xff] }
 0x5ee   :  { %3403 = vmatpush.msra.mxu1 %v11219_v26  ;;  %v2262_v12 = vadd.f32 %v11116_v40, %v2218_v46  ;;  %v2812_v40 = vadd.f32 %v11287_v45, %v11226_v47  ;;  %v2860_v47 = vpop.f32.mrf.mxu0  ;;  %v3460_v45 = vsel %vm1246_vm2, %v10174_v33, 0 }
 0x5ef   :  { %v1732_v13 = vadd.f32 %v15759_v8, %v1683_v24  ;;  %v11442_v38 = vand.u32 4294901760, %v3460_v45  ;;  %v15764_v8 = vld [vmem:[#allocation29_spill] sm:$0xff] }
 0x5f0   :  { %3405 = vmatpush.msra.mxu1 %v11233_v2  ;;  %v2901_v2 = vpop.f32.mrf.mxu1  ;;  %v2308_v18 = vadd.f32 %v11110_v58, %v2262_v12  ;;  %v2267_v58 = vadd.f32 %v11124_v54, %v2222_v44  ;;  %v2856_v46 = vadd.f32 %v2855_v56, %v2812_v40  ;;  %v2230_v56 = vadd.f32 %v11138_v4, %v11128_v41  ;;  %v15762_v12 = vld [vmem:[#allocation19_spill] sm:$0xff]  ;;  %v10170_v40 = vld [vmem:[%s15625_s8 + $0x78] sm:$0xff] }
 0x5f1   :  { %3469 = vmatpush.msra.mxu2 %v11442_v38  ;;  %v11471_v22 = vadd.f32 %v15762_v12, %v1776_v3  ;;  %v2320_v4 = vadd.f32 %v11126_v63, %v2272_v55  ;;  %v11510_v33 = vand.u32 4294901760, %v10170_v40  ;;  %v10167_v12 = vld [vmem:[%s15625_s8 + $0x60] sm:$0xff] }
 0x5f2   :  { %3407 = vmatpush.msra.mxu1 %v11248_v53  ;;  %v1768_v53 = vadd.f32 %v15752_v23, %v1714_v30  ;;  %v2362_v52 = vadd.f32 %v11144_v49, %v2308_v18  ;;  %v11462_v49 = vadd.f32 %v15761_v15, %v1732_v13  ;;  %v11475_v23 = vand.u32 4294901760, %v10172_v20  ;;  %v15766_v15 = vld [vmem:[#allocation30_spill] sm:$0xff] }
 0x5f3   :  { %v11387_v25 = vpop.f32.mrf.mxu2  ;;  %v11389_v26 = vpop.f32.mrf.mxu3  ;;  %v2314_v41 = vadd.f32 %v11118_v42, %v2267_v58  ;;  %v11499_v63 = vadd.f32 %v11140_v62, %v2230_v56  ;;  %v2370_v13 = vadd.f32 %v15764_v8, %v2320_v4 }
 0x5f4   :  { %3409 = vmatpush.msra.mxu1 %v11264_v39  ;;  %v1772_v39 = vadd.f32 %v15753_v35, %v1720_v31  ;;  %v11454_v31 = vsub.f32 %v3460_v45, %v11442_v38  ;;  %v2402_v27 = vadd.f32 %v11152_v10, %v2362_v52  ;;  %v2902_v10 = vadd.f32 %v2901_v2, %v2856_v46  ;;  %v10168_v46 = vld [vmem:[%s15625_s8 + $0x68] sm:$0xff] }
 0x5f5   :  { %v2816_v35 = vadd.f32 %v11342_v37, %v11285_v29  ;;  %v11496_v42 = vsub.f32 %v10172_v20, %v11475_v23  ;;  %v15763_v37 = vld [vmem:[#allocation28_spill] sm:$0xff]  ;;  %v11536_v6 = vand.u32 4294901760, %v10168_v46 }
 0x5f6   :  { %3411 = vmatpush.msra.mxu1 %v11275_v61  ;;  %v1808_v61 = vadd.f32 %v15754_v7, %v1768_v53  ;;  %v1812_v43 = vadd.f32 %v15756_v1, %v1772_v39  ;;  %v10171_v39 = vld [vmem:[%s15625_s8 + $0x80] sm:$0xff]  ;;  %v2366_v29 = vadd.f32 %v15763_v37, %v2314_v41  ;;  %v2865_v18 = vpop.f32.mrf.mxu0 }
 0x5f7   :  { %v11493_v44 = vand.u32 4294901760, %v10171_v39  ;;  %v3549_v62 = vand.u32 4294901760, %v11496_v42  ;;  %v2861_v50 = vadd.f32 %v2860_v47, %v2816_v35  ;;  %v11525_v47 = vsub.f32 %v10170_v40, %v11510_v33 }
 0x5f8   :  { %3413 = vmatpush.msra.mxu1 %v11295_v16  ;;  %v1826_v30 = vadd.f32 %v1808_v61, %v1221_v17  ;;  %v11459_v54 = vadd.f32 %v1812_v43, %v1222_v59  ;;  %v2907_v24 = vpop.f32.mrf.mxu1  ;;  %v10169_v43 = vld [vmem:[%s15625_s8 + $0x70] sm:$0xff]  ;;  %v11556_v35 = vand.u32 4294901760, %v10167_v12 }
 0x5f9   :  { %v11513_v1 = vsub.f32 %v10171_v39, %v11493_v44  ;;  %v3550_v5 = vsub.f32 %v11496_v42, %v3549_v62  ;;  %v11522_v51 = vand.u32 4294901760, %v10169_v43  ;;  %v2908_v56 = vadd.f32 %v2907_v24, %v2861_v50 }
 0x5fa   :  { %3415 = vmatpush.msra.mxu1 %v11307_v36  ;;  %v11456_v36 = vand.u32 4294901760, %v10173_v14  ;;  %v2420_v2 = vadd.f32 %v2402_v27, %v1826_v30  ;;  %v3561_v30 = vand.u32 4294901760, %v11525_v47 }
 0x5fb   :  { %v11440_v16 = vpop.f32.mrf.mxu3  ;;  %v2955_v48 = vpop.f32.mrf.mxu2  ;;  %v3555_v52 = vand.u32 4294901760, %v11513_v1  ;;  %v11539_v3 = vsub.f32 %v10169_v43, %v11522_v51 }
 0x5fc   :  { %3417 = vmatpush.msra.mxu1 %v11323_v28  ;;  %3471 = vmatpush.msra.mxu2 %v11456_v36  ;;  %v3537_v28 = vand.u32 4294901760, %v11454_v31  ;;  %v11478_v53 = vsub.f32 %v10173_v14, %v11456_v36  ;;  %v2956_v32 = vadd.f32 %v2955_v48, %v2902_v10  ;;  %v15765_v48 = vld [vmem:[#allocation36_spill] sm:$0xff]  ;;  %v3551_v14 = vand.u32 4294901760, %v3550_v5 }
 0x5fd   :  { %v2820_v58 = vadd.f32 %v11364_v60, %v15765_v48  ;;  %v2406_v60 = vadd.f32 %v15766_v15, %v2366_v29  ;;  %v3556_v20 = vsub.f32 %v11513_v1, %v3555_v52  ;;  %v3562_v10 = vsub.f32 %v11525_v47, %v3561_v30 }
 0x5fe   :  { %3419 = vmatpush.msra.mxu1 %v11338_v21  ;;  %v3538_v57 = vsub.f32 %v11454_v31, %v3537_v28  ;;  %3473 = vmatpush.msra.mxu2 %v11475_v23  ;;  %v3543_v21 = vand.u32 4294901760, %v11478_v53  ;;  %v3567_v24 = vand.u32 4294901760, %v11539_v3  ;;  %v11559_v29 = vsub.f32 %v10168_v46, %v11536_v6 }
 0x5ff   :  { %v2866_v39 = vadd.f32 %v2865_v18, %v2820_v58  ;;  %v3557_v37 = vand.u32 4294901760, %v3556_v20  ;;  %v2421_v50 = vadd.f32 %v2406_v60, %v11459_v54  ;;  %v11577_v18 = vsub.f32 %v10167_v12, %v11556_v35  ;;  %v15770_v58 = vld [vmem:[#allocation32_spill] sm:$0xff] }
 0x600   :  { %v3539_v61 = vand.u32 4294901760, %v3538_v57  ;;  %v3544_v59 = vsub.f32 %v11478_v53, %v3543_v21  ;;  %3475 = vmatpush.msra.mxu2 %v11493_v44  ;;  %v2913_v41 = vpop.f32.mrf.mxu1  ;;  %v3573_v43 = vand.u32 4294901760, %v11559_v29  ;;  %v2824_v12 = vadd.f32 %v11389_v26, %v11362_v9 }
 0x601   :  { %v3579_v15 = vand.u32 4294901760, %v11577_v18  ;;  %v2914_v60 = vadd.f32 %v2913_v41, %v2866_v39  ;;  %v1828_v26 = vadd.f32 %v11471_v22, %v11438_v0 }
 0x602   :  { %3540 = vmatpush.msra.mxu3 %v3539_v61  ;;  %v3545_v45 = vand.u32 4294901760, %v3544_v59  ;;  %3477 = vmatpush.msra.mxu2 %v11510_v33  ;;  %v3563_v61 = vand.u32 4294901760, %v3562_v10 }
 0x603   :  { %v2959_v17 = vpop.f32.mrf.mxu2  ;;  %v2995_v7 = vpop.f32.mrf.mxu3  ;;  %v3580_v39 = vsub.f32 %v11577_v18, %v3579_v15 }
 0x604   :  { %v2996_v11 = vadd.f32 %v2995_v7, %v2956_v32  ;;  %3546 = vmatpush.msra.mxu3 %v3545_v45  ;;  %3479 = vmatpush.msra.mxu2 %v11522_v51  ;;  %v2960_v57 = vadd.f32 %v2959_v17, %v2908_v56  ;;  %v3568_v17 = vsub.f32 %v11539_v3, %v3567_v24  ;;  %v10165_v45 = vld [vmem:[%s15625_s8 + $0x50] sm:$0xff]  ;;  %v2870_v56 = vpop.f32.mrf.mxu0 }
 0x605   :  { %v11587_v54 = vand.u32 4294901760, %v10165_v45 }
 0x606   :  { %v3014_v55 = vadd.f32 %v2996_v11, %v2420_v2  ;;  %3552 = vmatpush.msra.mxu3 %v3551_v14  ;;  %3481 = vmatpush.msra.mxu2 %v11536_v6  ;;  %v10166_v2 = vld [vmem:[%s15625_s8 + $0x58] sm:$0xff]  ;;  %v3569_v8 = vand.u32 4294901760, %v3568_v17  ;;  %v3574_v14 = vsub.f32 %v11559_v29, %v3573_v43 }
 0x607   :  { %v11572_v59 = vand.u32 4294901760, %v10166_v2 }
 0x608   :  { %v3037_v27 = vsel %vm3035_vm6, %v3014_v55, 0  ;;  %3483 = vmatpush.msra.mxu2 %v11556_v35  ;;  %3558 = vmatpush.msra.mxu3 %v3557_v37  ;;  %v2410_v55 = vadd.f32 %v15770_v58, %v2370_v13  ;;  %v11603_v13 = vsub.f32 %v10165_v45, %v11587_v54  ;;  %v3575_v41 = vand.u32 4294901760, %v3574_v14  ;;  %v15773_v45 = vld [vmem:[#allocation24_spill] sm:$0xff] }
 0x609   :  { %v11549_v4 = vand.u32 4294901760, %v3037_v27  ;;  %v11590_v48 = vsub.f32 %v10166_v2, %v11572_v59 }
 0x60a   :  { %3564 = vmatpush.msra.mxu3 %v3563_v61  ;;  %3485 = vmatpush.msra.mxu2 %v11572_v59  ;;  %v3591_v9 = vand.u32 4294901760, %v11603_v13  ;;  %v15772_v61 = vld [vmem:[#allocation23_spill] sm:$0xff] }
 0x60b   :  { %15767 = vst [vmem:[#allocation5_spill] sm:$0xff] %v11549_v4  ;;  %v11565_v32 = vsub.f32 %v3037_v27, %v11549_v4  ;;  %v2963_v40 = vpop.f32.mrf.mxu2  ;;  %v2999_v7 = vpop.f32.mrf.mxu3  ;;  %3188 = vmatmul.f32.vlgmr.msrb.gmra.mxu1 %v11549_v4  ;;  %v3585_v20 = vand.u32 4294901760, %v11590_v48  ;;  %v2326_v17 = vadd.f32 %v15772_v61, %v11499_v63  ;;  %v2422_v63 = vadd.f32 %v2410_v55, %v1828_v26  ;;  %v15778_v55 = vld [vmem:[#allocation21_spill] sm:$0xff] }
 0x60c   :  { %v3000_v11 = vadd.f32 %v2999_v7, %v2960_v57  ;;  %3685 = vmatpush.msrb.mxu1 %v11442_v38  ;;  %3570 = vmatpush.msra.mxu3 %v3569_v8  ;;  %v1217_v7 = vld [vmem:[%s15626_s2 + $0x18] sm:$0xff]  ;;  %v15774_v8 = vld [vmem:[#allocation26_spill] sm:$0xff]  ;;  %v3592_v22 = vsub.f32 %v11603_v13, %v3591_v9 }
 0x60d   :  { %15768 = vst [vmem:[#allocation7_spill] sm:$0xff] %v11565_v32  ;;  %3246 = vmatmul.f32.vlgmr.msrb.gmra.mxu2 %v11565_v32  ;;  %v11585_v5 = vand.u32 4294901760, %v11565_v32  ;;  %v3586_v2 = vsub.f32 %v11590_v48, %v3585_v20  ;;  %v2234_v58 = vadd.f32 %v15774_v8, %v15773_v45 }
 0x60e   :  { %v3015_v46 = vadd.f32 %v3000_v11, %v2421_v50  ;;  %3687 = vmatpush.msrb.mxu1 %v11456_v36  ;;  %3487 = vmatpush.msra.mxu2 %v11587_v54  ;;  %v2964_v50 = vadd.f32 %v2963_v40, %v2914_v60  ;;  %v3581_v11 = vand.u32 4294901760, %v3580_v39  ;;  %v2871_v40 = vadd.f32 %v2870_v56, %v2824_v12  ;;  %v15779_v12 = vld [vmem:[#allocation31_spill] sm:$0xff] }
 0x60f   :  { %15769 = vst [vmem:[#allocation12_spill] sm:$0xff] %v11585_v5  ;;  %3299 = vmatmul.f32.vlgmr.msrb.gmra.mxu3 %v11585_v5  ;;  %v3083_v27 = vsub.f32 %v11565_v32, %v11585_v5  ;;  %v3587_v0 = vand.u32 4294901760, %v3586_v2  ;;  %v3593_v61 = vand.u32 4294901760, %v3592_v22  ;;  %v1820_v56 = vadd.f32 %v15778_v55, %v11462_v49  ;;  %v15789_v55 = vld [vmem:[#allocation22_spill] sm:$0xff] }
 0x610   :  { %v3040_v10 = vsel %vm3035_vm6, %v3015_v46, 0  ;;  %3744 = vmatpush.msrb.mxu2 %v3537_v28  ;;  %3689 = vmatpush.msrb.mxu1 %v11475_v23  ;;  %v2919_v46 = vpop.f32.mrf.mxu1  ;;  %v2374_v26 = vadd.f32 %v15779_v12, %v2326_v17  ;;  %v2828_v49 = vadd.f32 %v11440_v16, %v11387_v25  ;;  %v1218_v25 = vld [vmem:[%s15626_s2 + $0x20] sm:$0x3f] }
 0x611   :  { %v11613_v57 = vand.u32 4294901760, %v3040_v10  ;;  %v11615_v37 = vand.u32 4294901760, %v3083_v27  ;;  %3576 = vmatpush.msra.mxu3 %v3575_v41  ;;  %v15776_v27 = vld [vmem:[#allocation10_spill] sm:$0xff]  ;;  %v1224_v41 = vadd.f32 %v11402_v19, %v1217_v7  ;;  %v2920_v8 = vadd.f32 %v2919_v46, %v2871_v40  ;;  %v15785_v46 = vld [vmem:[#allocation20_spill] sm:$0xff]  ;;  %v15786_v40 = vld [vmem:[#allocation25_spill] sm:$0xff] }
 0x612   :  { %3748 = vmatpush.msrb.mxu2 %v3543_v21  ;;  %3691 = vmatpush.msrb.mxu1 %v11493_v44  ;;  %v15790_v12 = vld [vmem:[#allocation33_spill] sm:$0xff] }
 0x613   :  { %15771 = vst [vmem:[#allocation14_spill] sm:$0xff] %v11613_v57  ;;  %v11634_v28 = vsub.f32 %v3040_v10, %v11613_v57  ;;  %v3003_v14 = vpop.f32.mrf.mxu3  ;;  %3085 = vmatmul.f32.vlgmr.msrb.gmra.mxu0 %v11615_v37  ;;  %3192 = vmatmul.f32.gmra.mxu1 %v11613_v57  ;;  %v1688_v10 = vadd.f32 %v15776_v27, %v11434_v34  ;;  %v2967_v39 = vpop.f32.mrf.mxu2  ;;  %v15780_v34 = vld [vmem:[#allocation27_spill] sm:$0xff] }
 0x614   :  { %v3004_v60 = vadd.f32 %v3003_v14, %v2964_v50  ;;  %3582 = vmatpush.msra.mxu3 %v3581_v11  ;;  %3752 = vmatpush.msrb.mxu2 %v3549_v62  ;;  %v2282_v7 = vadd.f32 %v15780_v34, %v2234_v58  ;;  %v15781_v11 = vld [vmem:[#allocation34_spill] sm:$0xff]  ;;  %v15782_v62 = vld [vmem:[#allocation11_spill] sm:$0xff]  ;;  %v2875_v14 = vpop.f32.mrf.mxu0  ;;  %v2968_v16 = vadd.f32 %v2967_v39, %v2920_v8 }
 0x615   :  { %15775 = vst [vmem:[#allocation15_spill] sm:$0xff] %v11634_v28  ;;  %3251 = vmatmul.f32.gmra.mxu2 %v11634_v28  ;;  %v11648_v2 = vand.u32 4294901760, %v11634_v28  ;;  %3624 = vmatpush.msrb.mxu0 %v11454_v31  ;;  %v2414_v45 = vadd.f32 %v15781_v11, %v2374_v26  ;;  %v1738_v58 = vadd.f32 %v15782_v62, %v1688_v10 }
 0x616   :  { %v3016_v21 = vadd.f32 %v3004_v60, %v2422_v63  ;;  %3588 = vmatpush.msra.mxu3 %v3587_v0  ;;  %3693 = vmatpush.msrb.mxu1 %v11510_v33  ;;  %v1829_v31 = vadd.f32 %v1820_v56, %v1224_v41  ;;  %v2332_v60 = vadd.f32 %v15786_v40, %v2282_v7 }
 0x617   :  { %15777 = vst [vmem:[#allocation6_spill] sm:$0xff] %v11648_v2  ;;  %3305 = vmatmul.f32.gmra.mxu3 %v11648_v2  ;;  %v3091_v50 = vsub.f32 %v11634_v28, %v11648_v2  ;;  %3756 = vmatpush.msrb.mxu2 %v3555_v52  ;;  %v1784_v63 = vadd.f32 %v15785_v46, %v1738_v58 }
 0x618   :  { %v3043_v17 = vsel %vm3035_vm6, %v3016_v21, 0  ;;  %3594 = vmatpush.msra.mxu3 %v3593_v61  ;;  %3627 = vmatpush.msrb.mxu0 %v11478_v53  ;;  %v2423_v52 = vadd.f32 %v2414_v45, %v1829_v31  ;;  %v2876_v10 = vadd.f32 %v2875_v14, %v2828_v49  ;;  %v1225_v53 = vadd.f32 %v11402_v19, %v1218_v25  ;;  %v2925_v39 = vpop.f32.mrf.mxu1  ;;  %v10187_v14 = vld [vmem:[%s15625_s8 + $0xd0] sm:$0xff] }
 0x619   :  { %v11667_v0 = vand.u32 4294901760, %v3043_v17  ;;  %v11669_v22 = vand.u32 4294901760, %v3091_v50  ;;  %3695 = vmatpush.msrb.mxu1 %v11522_v51  ;;  %3760 = vmatpush.msrb.mxu2 %v3561_v30  ;;  %v1824_v56 = vadd.f32 %v15789_v55, %v1784_v63  ;;  %v2378_v26 = vadd.f32 %v15790_v12, %v2332_v60  ;;  %v15791_v30 = vld [vmem:[#allocation35_spill] sm:$0xff]  ;;  %v10186_v63 = vld [vmem:[%s15625_s8 + $0xc8] sm:$0xff] }
 0x61a   :  { %3809 = vmatpush.msrb.mxu3 %v11442_v38  ;;  %3630 = vmatpush.msrb.mxu0 %v11496_v42  ;;  %v2926_v34 = vadd.f32 %v2925_v39, %v2876_v10  ;;  %v11818_v46 = vand.u32 4294901760, %v10187_v14  ;;  %v11836_v10 = vand.u32 4294901760, %v10186_v63 }
 0x61b   :  { %15783 = vst [vmem:[#allocation17_spill] sm:$0xff] %v11667_v0  ;;  %v11682_v27 = vsub.f32 %v3043_v17, %v11667_v0  ;;  %v3007_v38 = vpop.f32.mrf.mxu3  ;;  %3093 = vmatmul.f32.gmra.mxu0 %v11669_v22  ;;  %3196 = vmatmul.f32.gmra.mxu1 %v11667_v0  ;;  %v2418_v42 = vadd.f32 %v15791_v30, %v2378_v26  ;;  %v10184_v26 = vld [vmem:[%s15625_s8 + $0xb8] sm:$0xff] }
 0x61c   :  { %15784 = vst [vmem:[#allocation9_spill] sm:$0xff] %v11669_v22  ;;  %v3008_v41 = vadd.f32 %v3007_v38, %v2968_v16  ;;  %3811 = vmatpush.msrb.mxu3 %v11456_v36  ;;  %3697 = vmatpush.msrb.mxu1 %v11536_v6  ;;  %v2971_v36 = vpop.f32.mrf.mxu2  ;;  %v1830_v11 = vadd.f32 %v1824_v56, %v1225_v53  ;;  %v11865_v30 = vand.u32 4294901760, %v10184_v26 }
 0x61d   :  { %15787 = vst [vmem:[#allocation13_spill] sm:$0xff] %v11682_v27  ;;  %3256 = vmatmul.f32.gmra.mxu2 %v11682_v27  ;;  %v11692_v61 = vand.u32 4294901760, %v11682_v27  ;;  %3633 = vmatpush.msrb.mxu0 %v11513_v1  ;;  %v11850_v12 = vsub.f32 %v10186_v63, %v11836_v10 }
 0x61e   :  { %v3017_v21 = vadd.f32 %v3008_v41, %v2423_v52  ;;  %3813 = vmatpush.msrb.mxu3 %v11475_v23  ;;  %3764 = vmatpush.msrb.mxu2 %v3567_v24  ;;  %v2972_v24 = vadd.f32 %v2971_v36, %v2926_v34  ;;  %v2424_v1 = vadd.f32 %v2418_v42, %v1830_v11  ;;  %v10185_v41 = vld [vmem:[%s15625_s8 + $0xc0] sm:$0xff]  ;;  %v10183_v34 = vld [vmem:[%s15625_s8 + $0xb0] sm:$0xff] }
 0x61f   :  { %15788 = vst [vmem:[#allocation8_spill] sm:$0xff] %v11692_v61  ;;  %3311 = vmatmul.f32.gmra.mxu3 %v11692_v61  ;;  %v3099_v19 = vsub.f32 %v11682_v27, %v11692_v61  ;;  %3699 = vmatpush.msrb.mxu1 %v11556_v35  ;;  %v11832_v52 = vsub.f32 %v10187_v14, %v11818_v46  ;;  %v11846_v56 = vand.u32 4294901760, %v10185_v41  ;;  %v3969_v42 = vand.u32 4294901760, %v11850_v12 }
 0x620   :  { %v3046_v7 = vsel %vm3035_vm6, %v3017_v21, 0  ;;  %3815 = vmatpush.msrb.mxu3 %v11493_v44  ;;  %3768 = vmatpush.msrb.mxu2 %v3573_v43 }
 0x621   :  { %v11708_v23 = vand.u32 4294901760, %v3046_v7  ;;  %v11710_v50 = vand.u32 4294901760, %v3099_v19  ;;  %3636 = vmatpush.msrb.mxu0 %v11525_v47  ;;  %3701 = vmatpush.msrb.mxu1 %v11572_v59  ;;  %v3963_v55 = vand.u32 4294901760, %v11832_v52  ;;  %v11863_v19 = vsub.f32 %v10185_v41, %v11846_v56 }
 0x622   :  { %3817 = vmatpush.msrb.mxu3 %v11510_v33  ;;  %3772 = vmatpush.msrb.mxu2 %v3579_v15  ;;  %v10189_v15 = vld [vmem:[%s15625_s8 + $0xe0] sm:$0xff] }
 0x623   :  { %15792 = vst [vmem:[#allocation16_spill] sm:$0xff] %v11708_v23  ;;  %v11718_v45 = vsub.f32 %v3046_v7, %v11708_v23  ;;  %v3011_v44 = vpop.f32.mrf.mxu3  ;;  %3101 = vmatmul.f32.gmra.mxu0 %v11710_v50  ;;  %3200 = vmatmul.f32.gmra.mxu1 %v11708_v23  ;;  %v3964_v36 = vsub.f32 %v11832_v52, %v3963_v55  ;;  %v3975_v11 = vand.u32 4294901760, %v11863_v19 }
 0x624   :  { %15793 = vst [vmem:[#allocation18_spill] sm:$0xff] %v11710_v50  ;;  %v3012_v8 = vadd.f32 %v3011_v44, %v2972_v24  ;;  %3819 = vmatpush.msrb.mxu3 %v11522_v51  ;;  %3639 = vmatpush.msrb.mxu0 %v11539_v3  ;;  %v11875_v24 = vsub.f32 %v10184_v26, %v11865_v30  ;;  %v11877_v44 = vand.u32 4294901760, %v10183_v34 }
 0x625   :  { %15794 = vst [vmem:[#allocation19_spill] sm:$0xff] %v11718_v45  ;;  %3261 = vmatmul.f32.gmra.mxu2 %v11718_v45  ;;  %v11726_v33 = vand.u32 4294901760, %v11718_v45  ;;  %3703 = vmatpush.msrb.mxu1 %v11587_v54  ;;  %v3965_v7 = vand.u32 4294901760, %v3964_v36 }
 0x626   :  { %v3018_v47 = vadd.f32 %v3012_v8, %v2424_v1  ;;  %3821 = vmatpush.msrb.mxu3 %v11536_v6  ;;  %3776 = vmatpush.msrb.mxu2 %v3585_v20  ;;  %v3970_v1 = vsub.f32 %v11850_v12, %v3969_v42  ;;  %v10182_v8 = vld [vmem:[%s15625_s8 + $0xa8] sm:$0xff] }
 0x627   :  { %15795 = vst [vmem:[#allocation28_spill] sm:$0xff] %v11726_v33  ;;  %3317 = vmatmul.f32.gmra.mxu3 %v11726_v33  ;;  %v3107_v51 = vsub.f32 %v11718_v45, %v11726_v33  ;;  %3642 = vmatpush.msrb.mxu0 %v11559_v29 }
 0x628   :  { %v3049_v43 = vsel %vm3035_vm6, %v3018_v47, 0  ;;  %3823 = vmatpush.msrb.mxu3 %v11556_v35  ;;  %3780 = vmatpush.msrb.mxu2 %v3591_v9  ;;  %v10188_v9 = vld [vmem:[%s15625_s8 + $0xd8] sm:$0xff]  ;;  %v3976_v47 = vsub.f32 %v11863_v19, %v3975_v11 }
 0x629   :  { %v11740_v3 = vand.u32 4294901760, %v3049_v43  ;;  %v11742_v49 = vand.u32 4294901760, %v3107_v51  ;;  %3645 = vmatpush.msrb.mxu0 %v11577_v18  ;;  %v10190_v18 = vld [vmem:[%s15625_s8 + $0xe8] sm:$0xf]  ;;  %v11803_v58 = vand.u32 4294901760, %v10188_v9  ;;  %v3981_v51 = vand.u32 4294901760, %v11875_v24 }
 0x62a   :  { %3825 = vmatpush.msrb.mxu3 %v11572_v59 }
 0x62b   :  { %15796 = vst [vmem:[#allocation29_spill] sm:$0xff] %v11740_v3  ;;  %v11749_v6 = vsub.f32 %v3049_v43, %v11740_v3  ;;  %3109 = vmatmul.f32.gmra.mxu0 %v11742_v49  ;;  %3204 = vmatmul.f32.gmra.mxu1 %v11740_v3  ;;  %v11816_v16 = vsub.f32 %v10188_v9, %v11803_v58 }
 0x62c   :  { %15797 = vst [vmem:[#allocation36_spill] sm:$0xff] %v11742_v49  ;;  %3827 = vmatpush.msrb.mxu3 %v11587_v54  ;;  %3648 = vmatpush.msrb.mxu0 %v11590_v48  ;;  %v3868_v54 = vsel %vm1246_vm2, %v10190_v18, 0  ;;  %v11893_v43 = vsub.f32 %v10183_v34, %v11877_v44  ;;  %v3971_v18 = vand.u32 4294901760, %v3970_v1  ;;  %v3982_v9 = vsub.f32 %v11875_v24, %v3981_v51 }
 0x62d   :  { %15798 = vst [vmem:[#allocation30_spill] sm:$0xff] %v11749_v6  ;;  %3266 = vmatmul.f32.gmra.mxu2 %v11749_v6  ;;  %v11757_v35 = vand.u32 4294901760, %v11749_v6  ;;  %v11782_v48 = vand.u32 4294901760, %v3868_v54  ;;  %v3957_v38 = vand.u32 4294901760, %v11816_v16 }
 0x62e   :  { %3651 = vmatpush.msrb.mxu0 %v11603_v13  ;;  %v11790_v13 = vand.u32 4294901760, %v10189_v15  ;;  %v3987_v14 = vand.u32 4294901760, %v11893_v43 }
 0x62f   :  { %15799 = vst [vmem:[#allocation32_spill] sm:$0xff] %v11757_v35  ;;  %3323 = vmatmul.f32.gmra.mxu3 %v11757_v35  ;;  %v3115_v29 = vsub.f32 %v11749_v6, %v11757_v35  ;;  %v11788_v20 = vsub.f32 %v3868_v54, %v11782_v48  ;;  %v3958_v39 = vsub.f32 %v11816_v16, %v3957_v38  ;;  %v10181_v54 = vld [vmem:[%s15625_s8 + $0xa0] sm:$0xff] }
 0x630   :  { %v11801_v62 = vsub.f32 %v10189_v15, %v11790_v13  ;;  %v3977_v15 = vand.u32 4294901760, %v3976_v47  ;;  %v3894_v63 = vand.u32 4294901760, %v10181_v54 }
 0x631   :  { %v11764_v59 = vand.u32 4294901760, %v3115_v29  ;;  %v3945_v17 = vand.u32 4294901760, %v11788_v20  ;;  %v3959_v21 = vand.u32 4294901760, %v3958_v39  ;;  %v11896_v29 = vand.u32 4294901760, %v10182_v8 }
 0x632   :  { %v3951_v25 = vand.u32 4294901760, %v11801_v62 }
 0x633   :  { %15800 = vst [vmem:[#allocation23_spill] sm:$0xff] %v11764_v59  ;;  %3117 = vmatmul.f32.gmra.mxu0 %v11764_v59  ;;  %3421 = vmatmul.f32.vlgmr.msra.gmra.mxu1 %v11549_v4  ;;  %v3946_v31 = vsub.f32 %v11788_v20, %v3945_v17 }
 0x634   :  { %v3952_v60 = vsub.f32 %v11801_v62, %v3951_v25 }
 0x635   :  { %3493 = vmatmul.f32.vlgmr.msra.gmra.mxu2 %v11615_v37  ;;  %v3947_v40 = vand.u32 4294901760, %v3946_v31  ;;  %v11907_v31 = vsub.f32 %v10182_v8, %v11896_v29 }
 0x636   :  { %4032 = vmatpush.msra.mxu2 %v11788_v20  ;;  %v3953_v53 = vand.u32 4294901760, %v3952_v60  ;;  %v3988_v60 = vsub.f32 %v11893_v43, %v3987_v14 }
 0x637   :  { %3596 = vmatmul.f32.vlgmr.msra.gmra.mxu3 %v11549_v4  ;;  %3948 = vmatpush.msra.mxu1 %v3947_v40  ;;  %v3983_v40 = vand.u32 4294901760, %v3982_v9  ;;  %v3993_v41 = vand.u32 4294901760, %v11907_v31 }
 0x638   :  { %4093 = vmatpush.msra.mxu3 %v11782_v48  ;;  %4035 = vmatpush.msra.mxu2 %v11801_v62  ;;  %v3989_v39 = vand.u32 4294901760, %v3988_v60 }
 0x639   :  { %3954 = vmatpush.msra.mxu1 %v3953_v53  ;;  %v3998_v53 = vsub.f32 %v10181_v54, %v3894_v63  ;;  %v3994_v26 = vsub.f32 %v11907_v31, %v3993_v41 }
 0x63a   :  { %4095 = vmatpush.msra.mxu3 %v11790_v13  ;;  %4038 = vmatpush.msra.mxu2 %v11816_v16 }
 0x63b   :  { %3374 = vmatmul.f32.vlgmr.msra.gmra.mxu0 %v11549_v4  ;;  %3425 = vmatmul.f32.gmra.mxu1 %v11613_v57  ;;  %v3995_v36 = vand.u32 4294901760, %v3994_v26 }
 0x63c   :  { %3877 = vmatpush.msra.mxu0 %v11782_v48  ;;  %4097 = vmatpush.msra.mxu3 %v11803_v58 }
 0x63d   :  { %3501 = vmatmul.f32.gmra.mxu2 %v11669_v22  ;;  %3960 = vmatpush.msra.mxu1 %v3959_v21  ;;  %v3999_v21 = vand.u32 4294901760, %v3998_v53 }
 0x63e   :  { %3879 = vmatpush.msra.mxu0 %v11790_v13  ;;  %4099 = vmatpush.msra.mxu3 %v11818_v46 }
 0x63f   :  { %3600 = vmatmul.f32.gmra.mxu3 %v11613_v57  ;;  %4041 = vmatpush.msra.mxu2 %v11832_v52  ;;  %v4000_v34 = vsub.f32 %v3998_v53, %v3999_v21 }
 0x640   :  { %3881 = vmatpush.msra.mxu0 %v11803_v58  ;;  %4101 = vmatpush.msra.mxu3 %v11836_v10 }
 0x641   :  { %4044 = vmatpush.msra.mxu2 %v11850_v12  ;;  %3966 = vmatpush.msra.mxu1 %v3965_v7  ;;  %v4001_v7 = vand.u32 4294901760, %v4000_v34 }
 0x642   :  { %3883 = vmatpush.msra.mxu0 %v11818_v46  ;;  %4103 = vmatpush.msra.mxu3 %v11846_v56 }
 0x643   :  { %3378 = vmatmul.f32.gmra.mxu0 %v11613_v57  ;;  %3429 = vmatmul.f32.gmra.mxu1 %v11667_v0 }
 0x644   :  { %4047 = vmatpush.msra.mxu2 %v11863_v19  ;;  %3885 = vmatpush.msra.mxu0 %v11836_v10 }
 0x645   :  { %3509 = vmatmul.f32.gmra.mxu2 %v11710_v50  ;;  %4105 = vmatpush.msra.mxu3 %v11865_v30 }
 0x646   :  { %4050 = vmatpush.msra.mxu2 %v11875_v24  ;;  %3887 = vmatpush.msra.mxu0 %v11846_v56 }
 0x647   :  { %3604 = vmatmul.f32.gmra.mxu3 %v11667_v0  ;;  %3972 = vmatpush.msra.mxu1 %v3971_v18 }
 0x648   :  { %4053 = vmatpush.msra.mxu2 %v11893_v43  ;;  %4107 = vmatpush.msra.mxu3 %v11877_v44 }
 0x649   :  { %3978 = vmatpush.msra.mxu1 %v3977_v15  ;;  %3889 = vmatpush.msra.mxu0 %v11865_v30 }
 0x64a   :  { %4056 = vmatpush.msra.mxu2 %v11907_v31  ;;  %4109 = vmatpush.msra.mxu3 %v11896_v29 }
 0x64b   :  { %3382 = vmatmul.f32.gmra.mxu0 %v11667_v0  ;;  %3433 = vmatmul.f32.gmra.mxu1 %v11708_v23 }
 0x64c   :  { %3984 = vmatpush.msra.mxu1 %v3983_v40  ;;  %4059 = vmatpush.msra.mxu2 %v3998_v53 }
 0x64d   :  { %3517 = vmatmul.f32.gmra.mxu2 %v11742_v49  ;;  %3891 = vmatpush.msra.mxu0 %v11877_v44 }
 0x64e   :  { %3990 = vmatpush.msra.mxu1 %v3989_v39  ;;  %4111 = vmatpush.msra.mxu3 %v3894_v63 }
 0x64f   :  { %3608 = vmatmul.f32.gmra.mxu3 %v11708_v23  ;;  %3893 = vmatpush.msra.mxu0 %v11896_v29 }
 0x650   :  { %3996 = vmatpush.msra.mxu1 %v3995_v36 }
 0x651   :  { %3895 = vmatpush.msra.mxu0 %v3894_v63 }
 0x652   :  { %4002 = vmatpush.msra.mxu1 %v4001_v7 }
 0x653   :  { %3386 = vmatmul.f32.gmra.mxu0 %v11708_v23  ;;  %3437 = vmatmul.f32.gmra.mxu1 %v11740_v3 }
 0x655   :  { %3525 = vmatmul.f32.gmra.mxu2 %v11764_v59 }
 0x657   :  { %3612 = vmatmul.f32.gmra.mxu3 %v11740_v3 }
 0x65b   :  { %3390 = vmatmul.f32.gmra.mxu0 %v11740_v3  ;;  %3707 = vmatmul.f32.vlgmr.msrb.gmra.mxu1 %v11585_v5 }
 0x65c   :  { %4217 = vmatpush.msrb.mxu1 %v11782_v48 }
 0x65d   :  { %3782 = vmatmul.f32.vlgmr.msrb.gmra.mxu2 %v11549_v4 }
 0x65e   :  { %4219 = vmatpush.msrb.mxu1 %v11790_v13 }
 0x65f   :  { %3829 = vmatmul.f32.vlgmr.msrb.gmra.mxu3 %v11549_v4 }
 0x660   :  { %4221 = vmatpush.msrb.mxu1 %v11803_v58 }
 0x662   :  { %4223 = vmatpush.msrb.mxu1 %v11818_v46 }
 0x663   :  { %3654 = vmatmul.f32.vlgmr.msrb.gmra.mxu0 %v11565_v32  ;;  %3713 = vmatmul.f32.gmra.mxu1 %v11648_v2 }
 0x664   :  { %4152 = vmatpush.msrb.mxu0 %v3945_v17  ;;  %4225 = vmatpush.msrb.mxu1 %v11836_v10 }
 0x665   :  { %3786 = vmatmul.f32.gmra.mxu2 %v11613_v57 }
 0x666   :  { %4156 = vmatpush.msrb.mxu0 %v3951_v25  ;;  %4227 = vmatpush.msrb.mxu1 %v11846_v56 }
 0x667   :  { %3833 = vmatmul.f32.gmra.mxu3 %v11613_v57 }
 0x668   :  { %4160 = vmatpush.msrb.mxu0 %v3957_v38  ;;  %4229 = vmatpush.msrb.mxu1 %v11865_v30 }
 0x66a   :  { %4164 = vmatpush.msrb.mxu0 %v3963_v55  ;;  %4231 = vmatpush.msrb.mxu1 %v11877_v44 }
 0x66b   :  { %3659 = vmatmul.f32.gmra.mxu0 %v11634_v28  ;;  %3719 = vmatmul.f32.gmra.mxu1 %v11692_v61 }
 0x66c   :  { %4168 = vmatpush.msrb.mxu0 %v3969_v42  ;;  %4233 = vmatpush.msrb.mxu1 %v11896_v29 }
 0x66d   :  { %3790 = vmatmul.f32.gmra.mxu2 %v11667_v0 }
 0x66e   :  { %4172 = vmatpush.msrb.mxu0 %v3975_v11  ;;  %4235 = vmatpush.msrb.mxu1 %v3894_v63 }
 0x66f   :  { %3837 = vmatmul.f32.gmra.mxu3 %v11667_v0 }
 0x670   :  { %4176 = vmatpush.msrb.mxu0 %v3981_v51 }
 0x672   :  { %4180 = vmatpush.msrb.mxu0 %v3987_v14 }
 0x673   :  { %3664 = vmatmul.f32.gmra.mxu0 %v11682_v27  ;;  %3725 = vmatmul.f32.gmra.mxu1 %v11726_v33 }
 0x674   :  { %4184 = vmatpush.msrb.mxu0 %v3993_v41 }
 0x675   :  { %3794 = vmatmul.f32.gmra.mxu2 %v11708_v23 }
 0x676   :  { %4188 = vmatpush.msrb.mxu0 %v3999_v21 }
 0x677   :  { %3841 = vmatmul.f32.gmra.mxu3 %v11708_v23 }
 0x67b   :  { %3669 = vmatmul.f32.gmra.mxu0 %v11718_v45  ;;  %3731 = vmatmul.f32.gmra.mxu1 %v11757_v35 }
 0x67d   :  { %3798 = vmatmul.f32.gmra.mxu2 %v11740_v3 }
 0x67f   :  { %3845 = vmatmul.f32.gmra.mxu3 %v11740_v3 }
 0x683   :  { %3674 = vmatmul.f32.gmra.mxu0 %v11749_v6  ;;  %4004 = vmatmul.f32.vlgmr.msra.gmra.mxu1 %v11549_v4 }
 0x685   :  { %4062 = vmatmul.f32.vlgmr.msra.gmra.mxu2 %v11565_v32 }
 0x687   :  { %4115 = vmatmul.f32.vlgmr.msra.gmra.mxu3 %v11585_v5 }
 0x688   :  { %v11968_v48 = vpop.f32.mrf.mxu1 }
 0x68b   :  { %3901 = vmatmul.f32.vlgmr.msra.gmra.mxu0 %v11615_v37  ;;  %4008 = vmatmul.f32.gmra.mxu1 %v11613_v57 }
 0x68d   :  { %4067 = vmatmul.f32.gmra.mxu2 %v11634_v28 }
 0x68f   :  { %4121 = vmatmul.f32.gmra.mxu3 %v11648_v2 }
 0x690   :  { %v11974_v20 = vpop.f32.mrf.mxu0  ;;  %v11976_v13 = vpop.f32.mrf.mxu1 }
 0x691   :  { %v11978_v17 = vpop.f32.mrf.mxu2 }
 0x692   :  { %v11980_v62 = vpop.f32.mrf.mxu3 }
 0x693   :  { %3909 = vmatmul.f32.gmra.mxu0 %v11669_v22  ;;  %4012 = vmatmul.f32.gmra.mxu1 %v11667_v0 }
 0x695   :  { %4072 = vmatmul.f32.gmra.mxu2 %v11682_v27 }
 0x697   :  { %4127 = vmatmul.f32.gmra.mxu3 %v11692_v61 }
 0x698   :  { %v11986_v58 = vpop.f32.mrf.mxu0  ;;  %v11988_v25 = vpop.f32.mrf.mxu1 }
 0x699   :  { %v11990_v16 = vpop.f32.mrf.mxu2 }
 0x69a   :  { %v11992_v46 = vpop.f32.mrf.mxu3 }
 0x69b   :  { %3917 = vmatmul.f32.gmra.mxu0 %v11710_v50  ;;  %4016 = vmatmul.f32.gmra.mxu1 %v11708_v23 }
 0x69d   :  { %4077 = vmatmul.f32.gmra.mxu2 %v11718_v45 }
 0x69f   :  { %4133 = vmatmul.f32.gmra.mxu3 %v11726_v33 }
 0x6a0   :  { %v11998_v38 = vpop.f32.mrf.mxu0  ;;  %v12000_v52 = vpop.f32.mrf.mxu1 }
 0x6a1   :  { %v12002_v10 = vpop.f32.mrf.mxu2  ;;  %v3198_v2 = vadd.f32 %v11988_v25, %v11998_v38 }
 0x6a2   :  { %v12004_v55 = vpop.f32.mrf.mxu3 }
 0x6a3   :  { %3925 = vmatmul.f32.gmra.mxu0 %v11742_v49  ;;  %4020 = vmatmul.f32.gmra.mxu1 %v11740_v3 }
 0x6a5   :  { %4082 = vmatmul.f32.gmra.mxu2 %v11749_v6 }
 0x6a7   :  { %4139 = vmatmul.f32.gmra.mxu3 %v11757_v35 }
 0x6a8   :  { %v12010_v56 = vpop.f32.mrf.mxu0  ;;  %v12012_v12 = vpop.f32.mrf.mxu1 }
 0x6a9   :  { %v12014_v19 = vpop.f32.mrf.mxu2  ;;  %v3202_v50 = vadd.f32 %v12000_v52, %v12010_v56  ;;  %v3258_v52 = vadd.f32 %v12002_v10, %v3198_v2 }
 0x6aa   :  { %v12018_v30 = vpop.f32.mrf.mxu3 }
 0x6ab   :  { %3933 = vmatmul.f32.gmra.mxu0 %v11764_v59  ;;  %4237 = vmatmul.f32.vlgmr.msrb.gmra.mxu1 %v11549_v4 }
 0x6b0   :  { %v12020_v42 = vpop.f32.mrf.mxu0  ;;  %v12022_v11 = vpop.f32.mrf.mxu1 }
 0x6b1   :  { %v12024_v24 = vpop.f32.mrf.mxu2 }
 0x6b2   :  { %v12028_v44 = vpop.f32.mrf.mxu3 }
 0x6b3   :  { %4190 = vmatmul.f32.vlgmr.msrb.gmra.mxu0 %v11549_v4  ;;  %4241 = vmatmul.f32.gmra.mxu1 %v11613_v57 }
 0x6b8   :  { %v12030_v1 = vpop.f32.mrf.mxu0  ;;  %v12032_v8 = vpop.f32.mrf.mxu1 }
 0x6b9   :  { %v12036_v47 = vpop.f32.mrf.mxu2 }
 0x6ba   :  { %15801 = vst [vmem:[#allocation24_spill] sm:$0xff] %v12036_v47  ;;  %v12042_v29 = vpop.f32.mrf.mxu3 }
 0x6bb   :  { %4194 = vmatmul.f32.gmra.mxu0 %v11613_v57  ;;  %4245 = vmatmul.f32.gmra.mxu1 %v11667_v0  ;;  %15802 = vst [vmem:[#allocation26_spill] sm:$0xff] %v12042_v29 }
 0x6c0   :  { %v12038_v51 = vpop.f32.mrf.mxu0  ;;  %v12040_v43 = vpop.f32.mrf.mxu1 }
 0x6c1   :  { %v12046_v18 = vpop.f32.mrf.mxu2 }
 0x6c2   :  { %15803 = vst [vmem:[#allocation10_spill] sm:$0xff] %v12046_v18  ;;  %v12052_v9 = vpop.f32.mrf.mxu3 }
 0x6c3   :  { %4198 = vmatmul.f32.gmra.mxu0 %v11667_v0  ;;  %4249 = vmatmul.f32.gmra.mxu1 %v11708_v23  ;;  %15804 = vst [vmem:[#allocation21_spill] sm:$0xff] %v12052_v9 }
 0x6c8   :  { %v12048_v54 = vpop.f32.mrf.mxu0  ;;  %v12050_v15 = vpop.f32.mrf.mxu1 }
 0x6c9   :  { %v12060_v63 = vpop.f32.mrf.mxu2 }
 0x6ca   :  { %15805 = vst [vmem:[#allocation31_spill] sm:$0xff] %v12060_v63  ;;  %v12063_v40 = vpop.f32.mrf.mxu3 }
 0x6cb   :  { %4202 = vmatmul.f32.gmra.mxu0 %v11708_v23  ;;  %4253 = vmatmul.f32.gmra.mxu1 %v11740_v3  ;;  %15806 = vst [vmem:[#allocation27_spill] sm:$0xff] %v12063_v40 }
 0x6d0   :  { %v12056_v14 = vpop.f32.mrf.mxu0  ;;  %v12058_v31 = vpop.f32.mrf.mxu1 }
 0x6d1   :  { %v12067_v53 = vpop.f32.mrf.mxu2 }
 0x6d2   :  { %15808 = vst [vmem:[#allocation11_spill] sm:$0xff] %v12067_v53  ;;  %v12069_v39 = vpop.f32.mrf.mxu3 }
 0x6d3   :  { %4206 = vmatmul.f32.gmra.mxu0 %v11740_v3  ;;  %15809 = vst [vmem:[#allocation20_spill] sm:$0xff] %v12069_v39 }
 0x6d8   :  { %v3391_v60 = vpop.f32.mrf.mxu0  ;;  %v12065_v41 = vpop.f32.mrf.mxu1 }
 0x6d9   :  { %15807 = vst [vmem:[#allocation34_spill] sm:$0xff] %v12065_v41  ;;  %v12075_v36 = vpop.f32.mrf.mxu2 }
 0x6da   :  { %15812 = vst [vmem:[#allocation33_spill] sm:$0xff] %v12075_v36  ;;  %v12081_v29 = vpop.f32.mrf.mxu3 }
 0x6db   :  { %15815 = vst [vmem:[#allocation38_spill] sm:$0xff] %v12081_v29 }
 0x6e0   :  { %v12071_v26 = vpop.f32.mrf.mxu0  ;;  %v12073_v21 = vpop.f32.mrf.mxu1 }
 0x6e1   :  { %15810 = vst [vmem:[#allocation25_spill] sm:$0xff] %v12071_v26  ;;  %v12083_v47 = vpop.f32.mrf.mxu2 }
 0x6e2   :  { %15811 = vst [vmem:[#allocation22_spill] sm:$0xff] %v12073_v21  ;;  %v12089_v18 = vpop.f32.mrf.mxu3 }
 0x6e3   :  { %15816 = vst [vmem:[#allocation39_spill] sm:$0xff] %v12083_v47 }
 0x6e4   :  { %15819 = vst [vmem:[#allocation42_spill] sm:$0xff] %v12089_v18 }
 0x6e8   :  { %v12077_v34 = vpop.f32.mrf.mxu0  ;;  %v12079_v7 = vpop.f32.mrf.mxu1 }
 0x6e9   :  { %15813 = vst [vmem:[#allocation35_spill] sm:$0xff] %v12077_v34  ;;  %v12095_v21 = vpop.f32.mrf.mxu2 }
 0x6ea   :  { %15814 = vst [vmem:[#allocation37_spill] sm:$0xff] %v12079_v7  ;;  %v12097_v63 = vpop.f32.mrf.mxu3 }
 0x6eb   :  { %15822 = vst [vmem:[#allocation45_spill] sm:$0xff] %v12095_v21 }
 0x6ec   :  { %15823 = vst [vmem:[#allocation46_spill] sm:$0xff] %v12097_v63 }
 0x6f0   :  { %v12085_v9 = vpop.f32.mrf.mxu0  ;;  %v12087_v41 = vpop.f32.mrf.mxu1 }
 0x6f1   :  { %15817 = vst [vmem:[#allocation40_spill] sm:$0xff] %v12085_v9  ;;  %v12101_v39 = vpop.f32.mrf.mxu2 }
 0x6f2   :  { %15818 = vst [vmem:[#allocation41_spill] sm:$0xff] %v12087_v41  ;;  %v12103_v47 = vpop.f32.mrf.mxu3 }
 0x6f3   :  { %15825 = vst [vmem:[#allocation48_spill] sm:$0xff] %v12101_v39 }
 0x6f4   :  { %15826 = vst [vmem:[#allocation49_spill] sm:$0xff] %v12103_v47 }
 0x6f8   :  { %v12091_v40 = vpop.f32.mrf.mxu0  ;;  %v12093_v26 = vpop.f32.mrf.mxu1 }
 0x6f9   :  { %15820 = vst [vmem:[#allocation43_spill] sm:$0xff] %v12091_v40  ;;  %v12105_v41 = vpop.f32.mrf.mxu2 }
 0x6fa   :  { %15821 = vst [vmem:[#allocation44_spill] sm:$0xff] %v12093_v26  ;;  %v12107_v40 = vpop.f32.mrf.mxu3 }
 0x6fb   :  { %15827 = vst [vmem:[#allocation50_spill] sm:$0xff] %v12105_v41 }
 0x6fc   :  { %15828 = vst [vmem:[#allocation51_spill] sm:$0xff] %v12107_v40 }
 0x700   :  { %v12099_v34 = vpop.f32.mrf.mxu0  ;;  %v4005_v7 = vpop.f32.mrf.mxu1 }
 0x701   :  { %15824 = vst [vmem:[#allocation47_spill] sm:$0xff] %v12099_v34  ;;  %v12109_v26 = vpop.f32.mrf.mxu2 }
 0x702   :  { %15829 = vst [vmem:[#allocation52_spill] sm:$0xff] %v12109_v26  ;;  %v12111_v63 = vpop.f32.mrf.mxu3  ;;  %v3206_v26 = vadd.f32 %v12012_v12, %v12020_v42  ;;  %v3194_v12 = vadd.f32 %v11976_v13, %v11986_v58  ;;  %v3313_v58 = vadd.f32 %v12004_v55, %v3258_v52 }
 0x703   :  { %15830 = vst [vmem:[#allocation53_spill] sm:$0xff] %v12111_v63 }
 0x704   :  { %v3268_v63 = vadd.f32 %v12024_v24, %v3206_v26  ;;  %v3263_v24 = vadd.f32 %v12014_v19, %v3202_v50  ;;  %v3253_v13 = vadd.f32 %v11990_v16, %v3194_v12  ;;  %v3384_v38 = vadd.f32 %v12048_v54, %v3313_v58  ;;  %v10176_v54 = vld [vmem:[%s15628_s7 + $0x68] sm:$0xff]  ;;  %v10177_v58 = vld [vmem:[%s15628_s7 + $0x70] sm:$0xff] }
 0x706   :  { %v3325_v4 = vadd.f32 %v12028_v44, %v3268_v63 }
 0x708   :  { %v3902_v9 = vpop.f32.mrf.mxu0  ;;  %v4009_v53 = vpop.f32.mrf.mxu1  ;;  %v3392_v26 = vadd.f32 %v3391_v60, %v3325_v4  ;;  %v3319_v4 = vadd.f32 %v12018_v30, %v3263_v24 }
 0x709   :  { %v4063_v6 = vpop.f32.mrf.mxu2 }
 0x70a   :  { %v4116_v39 = vpop.f32.mrf.mxu3  ;;  %v3388_v25 = vadd.f32 %v12056_v14, %v3319_v4 }
 0x710   :  { %v3910_v18 = vpop.f32.mrf.mxu0  ;;  %v4013_v29 = vpop.f32.mrf.mxu1 }
 0x711   :  { %v4068_v23 = vpop.f32.mrf.mxu2  ;;  %v4010_v42 = vadd.f32 %v4009_v53, %v3910_v18  ;;  %v3435_v18 = vadd.f32 %v12050_v15, %v3388_v25 }
 0x712   :  { %v4122_v59 = vpop.f32.mrf.mxu3 }
 0x713   :  { %v4069_v50 = vadd.f32 %v4068_v23, %v4010_v42  ;;  %v3307_v23 = vadd.f32 %v11992_v46, %v3253_v13  ;;  %v12163_v53 = vand.u32 4294901760, %v3435_v18 }
 0x715   :  { %v3380_v55 = vadd.f32 %v12038_v51, %v3307_v23 }
 0x718   :  { %v3918_v21 = vpop.f32.mrf.mxu0  ;;  %v4017_v36 = vpop.f32.mrf.mxu1 }
 0x719   :  { %v4073_v33 = vpop.f32.mrf.mxu2  ;;  %v4014_v28 = vadd.f32 %v4013_v29, %v3918_v21 }
 0x71a   :  { %v4128_v0 = vpop.f32.mrf.mxu3 }
 0x720   :  { %v3926_v34 = vpop.f32.mrf.mxu0  ;;  %v4021_v3 = vpop.f32.mrf.mxu1 }
 0x721   :  { %v4018_v27 = vadd.f32 %v4017_v36, %v3926_v34  ;;  %v4078_v61 = vpop.f32.mrf.mxu2  ;;  %v4006_v36 = vadd.f32 %v4005_v7, %v3902_v9  ;;  %v4074_v34 = vadd.f32 %v4073_v33, %v4014_v28  ;;  %v3439_v28 = vadd.f32 %v12058_v31, %v3392_v26 }
 0x722   :  { %v4134_v32 = vpop.f32.mrf.mxu3  ;;  %v3431_v31 = vadd.f32 %v12040_v43, %v3384_v38 }
 0x723   :  { %v4079_v22 = vadd.f32 %v4078_v61, %v4018_v27  ;;  %v10175_v27 = vld [vmem:[%s15628_s7 + $0x60] sm:$0xff]  ;;  %v3190_v61 = vadd.f32 %v11968_v48, %v11974_v20  ;;  %v4129_v33 = vadd.f32 %v4128_v0, %v4074_v34  ;;  %v4123_v20 = vadd.f32 %v4122_v59, %v4069_v50 }
 0x724   :  { %v4652_v10 = vsel %vm4276_vm8, %v3439_v28, 0  ;;  %v12173_v42 = vand.u32 4294901760, %v3431_v31  ;;  %v12189_v34 = vsub.f32 %v3435_v18, %v12163_v53 }
 0x725   :  { %v4135_v56 = vadd.f32 %v4134_v32, %v4079_v22  ;;  %v4064_v22 = vadd.f32 %v4063_v6, %v4006_v36  ;;  %v3248_v48 = vadd.f32 %v11978_v17, %v3190_v61  ;;  %v12148_v9 = vand.u32 4294901760, %v4652_v10 }
 0x727   :  { %v3301_v14 = vadd.f32 %v11980_v62, %v3248_v48  ;;  %v12167_v62 = vsub.f32 %v4652_v10, %v12148_v9 }
 0x728   :  { %v3934_v35 = vpop.f32.mrf.mxu0  ;;  %v12113_v47 = vpop.f32.mrf.mxu1 }
 0x729   :  { %v4022_v5 = vadd.f32 %v4021_v3, %v3934_v35  ;;  %v4083_v2 = vpop.f32.mrf.mxu2  ;;  %v4259_v35 = vsel %vm4257_vm7, %v10175_v27, 0 }
 0x72a   :  { %v4140_v19 = vpop.f32.mrf.mxu3  ;;  %v12144_v0 = vand.u32 4294901760, %v4259_v35 }
 0x72b   :  { %v4084_v3 = vadd.f32 %v4083_v2, %v4022_v5  ;;  %v4117_v5 = vadd.f32 %v4116_v39, %v4064_v22  ;;  %v4262_v39 = vsel %vm4257_vm7, %v10176_v54, 0  ;;  %v4743_v22 = vand.u32 4294901760, %v12189_v34 }
 0x72c   :  { %v12158_v51 = vsub.f32 %v4259_v35, %v12144_v0  ;;  %v12183_v26 = vand.u32 4294901760, %v4262_v39 }
 0x72d   :  { %v4141_v30 = vadd.f32 %v4140_v19, %v4084_v3  ;;  %v4744_v19 = vsub.f32 %v12189_v34, %v4743_v22 }
 0x72e   :  { %v12211_v4 = vsub.f32 %v4262_v39, %v12183_v26 }
 0x72f   :  { %v4745_v54 = vand.u32 4294901760, %v4744_v19 }
 0x730   :  { %v4191_v41 = vpop.f32.mrf.mxu0  ;;  %v12115_v45 = vpop.f32.mrf.mxu1  ;;  %v4311_v38 = vand.u32 4294901760, %v12211_v4 }
 0x731   :  { %v4192_v59 = vadd.f32 %v4191_v41, %v4117_v5  ;;  %v3427_v41 = vadd.f32 %v12032_v8, %v3380_v55  ;;  %v4303_v8 = vand.u32 4294901760, %v12158_v51  ;;  %v4265_v5 = vsel %vm4257_vm7, %v10177_v58, 0 }
 0x733   :  { %v4239_v43 = vadd.f32 %v12113_v47, %v4192_v59  ;;  %v12186_v47 = vand.u32 4294901760, %v3427_v41  ;;  %v4304_v61 = vsub.f32 %v12158_v51, %v4303_v8 }
 0x735   :  { %v12216_v2 = vsub.f32 %v3427_v41, %v12186_v47  ;;  %v4305_v48 = vand.u32 4294901760, %v4304_v61 }
 0x738   :  { %v4195_v40 = vpop.f32.mrf.mxu0  ;;  %v4246_v49 = vpop.f32.mrf.mxu1 }
 0x739   :  { %v4196_v44 = vadd.f32 %v4195_v40, %v4123_v20 }
 0x73b   :  { %v4243_v15 = vadd.f32 %v12115_v45, %v4196_v44 }
 0x73d   :  { %v12181_v24 = vand.u32 4294901760, %v4243_v15 }
 0x73f   :  { %v12208_v50 = vsub.f32 %v4243_v15, %v12181_v24 }
 0x740   :  { %v4199_v57 = vpop.f32.mrf.mxu0  ;;  %v4250_v29 = vpop.f32.mrf.mxu1 }
 0x741   :  { %v4200_v16 = vadd.f32 %v4199_v57, %v4129_v33 }
 0x743   :  { %v4247_v57 = vadd.f32 %v4246_v49, %v4200_v16  ;;  %v3376_v49 = vadd.f32 %v12030_v1, %v3301_v14  ;;  %v4381_v16 = vand.u32 4294901760, %v12208_v50 }
 0x745   :  { %v12170_v7 = vand.u32 4294901760, %v4247_v57  ;;  %v3423_v36 = vadd.f32 %v12022_v11, %v3376_v49  ;;  %v12201_v11 = vsub.f32 %v3431_v31, %v12173_v42  ;;  %v4382_v59 = vsub.f32 %v12208_v50, %v4381_v16 }
 0x747   :  { %v12213_v28 = vand.u32 4294901760, %v3423_v36  ;;  %v4749_v20 = vand.u32 4294901760, %v12201_v11  ;;  %v4383_v41 = vand.u32 4294901760, %v4382_v59 }
 0x748   :  { %v4203_v21 = vpop.f32.mrf.mxu0  ;;  %v4254_v40 = vpop.f32.mrf.mxu1 }
 0x749   :  { %v4204_v32 = vadd.f32 %v4203_v21, %v4135_v56  ;;  %v12194_v56 = vand.u32 4294901760, %v4239_v43  ;;  %v4737_v21 = vand.u32 4294901760, %v12167_v62  ;;  %v12240_v10 = vsub.f32 %v3423_v36, %v12213_v28 }
 0x74b   :  { %v4251_v6 = vadd.f32 %v4250_v29, %v4204_v32  ;;  %v12197_v29 = vsub.f32 %v4247_v57, %v12170_v7  ;;  %v4738_v33 = vsub.f32 %v12167_v62, %v4737_v21  ;;  %v12226_v3 = vsub.f32 %v4239_v43, %v12194_v56 }
 0x74c   :  { %v4312_v57 = vsub.f32 %v12211_v4, %v4311_v38  ;;  %v4761_v31 = vand.u32 4294901760, %v12240_v10 }
 0x74d   :  { %v12155_v63 = vand.u32 4294901760, %v4251_v6  ;;  %v4375_v35 = vand.u32 4294901760, %v12197_v29  ;;  %v4387_v55 = vand.u32 4294901760, %v12226_v3 }
 0x74e   :  { %v4313_v39 = vand.u32 4294901760, %v4312_v57  ;;  %v3023_v57 = vld [vmem:[%s15628_s7 + $0x20] sm:$0xff] }
 0x74f   :  { %v12178_v1 = vsub.f32 %v4251_v6, %v12155_v63  ;;  %v4755_v6 = vand.u32 4294901760, %v12216_v2  ;;  %v4376_v44 = vsub.f32 %v12197_v29, %v4375_v35  ;;  %v4388_v15 = vsub.f32 %v12226_v3, %v4387_v55 }
 0x750   :  { %v4207_v17 = vpop.f32.mrf.mxu0 }
 0x751   :  { %v4208_v46 = vadd.f32 %v4207_v17, %v4141_v30  ;;  %v4369_v13 = vand.u32 4294901760, %v12178_v1  ;;  %v4739_v30 = vand.u32 4294901760, %v4738_v33  ;;  %v4750_v17 = vsub.f32 %v12201_v11, %v4749_v20 }
 0x752   :  { %v4756_v14 = vsub.f32 %v12216_v2, %v4755_v6 }
 0x753   :  { %v4255_v60 = vadd.f32 %v4254_v40, %v4208_v46  ;;  %v4370_v23 = vsub.f32 %v12178_v1, %v4369_v13  ;;  %v12257_v46 = vand.u32 4294901760, %v4265_v5  ;;  %v4377_v40 = vand.u32 4294901760, %v4376_v44 }
 0x754   :  { %v4751_v49 = vand.u32 4294901760, %v4750_v17 }
 0x755   :  { %v4278_v12 = vsel %vm4276_vm8, %v4255_v60, 0  ;;  %v4371_v18 = vand.u32 4294901760, %v4370_v23  ;;  %v10178_v60 = vld [vmem:[%s15628_s7 + $0x78] sm:$0xff]  ;;  %v4318_v43 = vsub.f32 %v4265_v5, %v12257_v46  ;;  %v3021_v23 = vld [vmem:[%s15628_s7 + $0x10] sm:$0xff] }
 0x756   :  { %v12175_v45 = vand.u32 4294901760, %v4278_v12  ;;  %v3022_v5 = vld [vmem:[%s15628_s7 + $0x18] sm:$0xff] }
 0x757   :  { %v4319_v36 = vand.u32 4294901760, %v4318_v43 }
 0x758   :  { %v4362_v52 = vsub.f32 %v4278_v12, %v12175_v45  ;;  %4292 = vmatpush.msrb.mxu2 %v12175_v45  ;;  %4485 = vmatpush.msra.mxu1 %v12175_v45  ;;  %v4762_v12 = vsub.f32 %v12240_v10, %v4761_v31 }
 0x759   :  { %v4320_v61 = vsub.f32 %v4318_v43, %v4319_v36 }
 0x75a   :  { %4294 = vmatpush.msrb.mxu2 %v12155_v63  ;;  %4429 = vmatpush.msra.mxu0 %v4362_v52  ;;  %v4363_v27 = vand.u32 4294901760, %v4362_v52 }
 0x75b   :  { %4487 = vmatpush.msra.mxu1 %v12155_v63 }
 0x75c   :  { %4296 = vmatpush.msrb.mxu2 %v12170_v7  ;;  %4432 = vmatpush.msra.mxu0 %v12178_v1  ;;  %v4364_v32 = vsub.f32 %v4362_v52, %v4363_v27  ;;  %v4268_v1 = vsel %vm4257_vm7, %v10178_v60, 0  ;;  %v3024_v60 = vld [vmem:[%s15628_s7 + $0x28] sm:$0x3f] }
 0x75d   :  { %4489 = vmatpush.msra.mxu1 %v12170_v7  ;;  %v12277_v52 = vand.u32 4294901760, %v4268_v1 }
 0x75e   :  { %4298 = vmatpush.msrb.mxu2 %v12181_v24  ;;  %4435 = vmatpush.msra.mxu0 %v12197_v29  ;;  %v4365_v25 = vand.u32 4294901760, %v4364_v32  ;;  %v4763_v29 = vand.u32 4294901760, %v4762_v12 }
 0x75f   :  { %4491 = vmatpush.msra.mxu1 %v12181_v24 }
 0x760   :  { %4300 = vmatpush.msrb.mxu2 %v12194_v56  ;;  %4366 = vmatpush.msrb.mxu3 %v4365_v25 }
 0x761   :  { %4438 = vmatpush.msra.mxu0 %v12208_v50  ;;  %4493 = vmatpush.msra.mxu1 %v12194_v56  ;;  %v4321_v50 = vand.u32 4294901760, %v4320_v61  ;;  %v10205_v61 = vld [vmem:[%s15625_s8 + $0x180] sm:$0xff] }
 0x762   :  { %4306 = vmatmul.f32.vlgmr.msrb.gmra.mxu2 %v4305_v48  ;;  %4497 = vmatmul.f32.vlgmr.msra.gmra.mxu1 %v4303_v8  ;;  %v4389_v8 = vand.u32 4294901760, %v4388_v15 }
 0x763   :  { %4545 = vmatpush.msra.mxu2 %v4363_v27  ;;  %4740 = vmatpush.msrb.mxu1 %v4739_v30  ;;  %v10179_v27 = vld [vmem:[%s15628_s7 + $0x80] sm:$0xff] }
 0x764   :  { %4372 = vmatpush.msrb.mxu3 %v4371_v18  ;;  %4441 = vmatpush.msra.mxu0 %v12226_v3 }
 0x765   :  { %4444 = vmatmul.f32.vlgmr.msra.gmra.mxu0 %v12158_v51  ;;  %4549 = vmatpush.msra.mxu2 %v4369_v13  ;;  %v4757_v51 = vand.u32 4294901760, %v4756_v14  ;;  %v4326_v13 = vsub.f32 %v4268_v1, %v12277_v52 }
 0x766   :  { %4666 = vmatpush.msrb.mxu0 %v12148_v9  ;;  %4746 = vmatpush.msrb.mxu1 %v4745_v54 }
 0x767   :  { %4378 = vmatpush.msrb.mxu3 %v4377_v40  ;;  %4553 = vmatpush.msra.mxu2 %v4375_v35  ;;  %v4327_v32 = vand.u32 4294901760, %v4326_v13 }
 0x768   :  { %4668 = vmatpush.msrb.mxu0 %v12163_v53  ;;  %4752 = vmatpush.msrb.mxu1 %v4751_v49 }
 0x769   :  { %4384 = vmatpush.msrb.mxu3 %v4383_v41  ;;  %4557 = vmatpush.msra.mxu2 %v4381_v16 }
 0x76a   :  { %4670 = vmatpush.msrb.mxu0 %v12173_v42  ;;  %4758 = vmatpush.msrb.mxu1 %v4757_v51 }
 0x76b   :  { %4390 = vmatpush.msrb.mxu3 %v4389_v8  ;;  %4314 = vmatmul.f32.gmra.mxu2 %v4313_v39  ;;  %v4649_v39 = vsel %vm4257_vm7, %v3024_v60, 0 }
 0x76c   :  { %4392 = vmatmul.f32.vlgmr.msrb.gmra.mxu3 %v12144_v0  ;;  %4503 = vmatmul.f32.gmra.mxu1 %v4311_v38  ;;  %v4640_v38 = vsel %vm4257_vm7, %v3021_v23, 0  ;;  %v12408_v51 = vand.u32 4294901760, %v4649_v39  ;;  %v10200_v23 = vld [vmem:[%s15625_s8 + $0x158] sm:$0xff] }
 0x76d   :  { %4561 = vmatpush.msra.mxu2 %v4387_v55  ;;  %4599 = vmatpush.msra.mxu3 %v12175_v45  ;;  %v4271_v45 = vsel %vm4257_vm7, %v10179_v27, 0  ;;  %v4643_v55 = vsel %vm4257_vm7, %v3022_v5, 0  ;;  %v10206_v27 = vld [vmem:[%s15625_s8 + $0x188] sm:$0xf] }
 0x76e   :  { %4672 = vmatpush.msrb.mxu0 %v12186_v47  ;;  %4764 = vmatpush.msrb.mxu1 %v4763_v29  ;;  %v12376_v59 = vand.u32 4294901760, %v4643_v55  ;;  %v12416_v1 = vsub.f32 %v4649_v39, %v12408_v51  ;;  %v10197_v39 = vld [vmem:[%s15625_s8 + $0x140] sm:$0xff] }
 0x76f   :  { %4803 = vmatpush.msrb.mxu2 %v12167_v62  ;;  %4449 = vmatmul.f32.gmra.mxu0 %v12211_v4  ;;  %v12298_v4 = vand.u32 4294901760, %v4271_v45  ;;  %v4328_v62 = vsub.f32 %v4326_v13, %v4327_v32 }
 0x770   :  { %4973 = vmatpush.msra.mxu1 %v12148_v9  ;;  %4601 = vmatpush.msra.mxu3 %v12155_v63  ;;  %v10180_v63 = vld [vmem:[%s15628_s7 + $0x88] sm:$0x3f]  ;;  %v12387_v14 = vsub.f32 %v4643_v55, %v12376_v59 }
 0x771   :  { %4674 = vmatpush.msrb.mxu0 %v12213_v28  ;;  %4806 = vmatpush.msrb.mxu2 %v12189_v34  ;;  %v4329_v34 = vand.u32 4294901760, %v4328_v62 }
 0x772   :  { %4975 = vmatpush.msra.mxu1 %v12163_v53  ;;  %4603 = vmatpush.msra.mxu3 %v12170_v7  ;;  %v4334_v7 = vsub.f32 %v4271_v45, %v12298_v4  ;;  %v12437_v45 = vand.u32 4294901760, %v10205_v61 }
 0x773   :  { %4919 = vmatpush.msra.mxu0 %v4737_v21  ;;  %4809 = vmatpush.msrb.mxu2 %v12201_v11 }
 0x774   :  { %4977 = vmatpush.msra.mxu1 %v12173_v42  ;;  %4605 = vmatpush.msra.mxu3 %v12181_v24  ;;  %v4274_v24 = vsel %vm4257_vm7, %v10180_v63, 0  ;;  %v4335_v21 = vand.u32 4294901760, %v4334_v7  ;;  %v12453_v63 = vsub.f32 %v10205_v61, %v12437_v45 }
 0x775   :  { %4923 = vmatpush.msra.mxu0 %v4743_v22  ;;  %4812 = vmatpush.msrb.mxu2 %v12216_v2  ;;  %v12321_v11 = vand.u32 4294901760, %v4274_v24 }
 0x776   :  { %4979 = vmatpush.msra.mxu1 %v12186_v47  ;;  %4322 = vmatmul.f32.gmra.mxu2 %v4321_v50 }
 0x777   :  { %4927 = vmatpush.msra.mxu0 %v4749_v20  ;;  %4396 = vmatmul.f32.gmra.mxu3 %v12183_v26 }
 0x778   :  { %4509 = vmatmul.f32.gmra.mxu1 %v4319_v36  ;;  %4607 = vmatpush.msra.mxu3 %v12194_v56  ;;  %v4342_v56 = vsub.f32 %v4274_v24, %v12321_v11  ;;  %v4717_v36 = vand.u32 4294901760, %v12416_v1 }
 0x779   :  { %4815 = vmatpush.msrb.mxu2 %v12240_v10  ;;  %4931 = vmatpush.msra.mxu0 %v4755_v6  ;;  %v12360_v6 = vand.u32 4294901760, %v4640_v38 }
 0x77a   :  { %4859 = vmatpush.msrb.mxu3 %v12148_v9  ;;  %4981 = vmatpush.msra.mxu1 %v12213_v28  ;;  %v4336_v9 = vsub.f32 %v4334_v7, %v4335_v21  ;;  %v4343_v22 = vand.u32 4294901760, %v4342_v56 }
 0x77b   :  { %4454 = vmatmul.f32.gmra.mxu0 %v4318_v43  ;;  %v12371_v44 = vsub.f32 %v4640_v38, %v12360_v6  ;;  %v12509_v38 = vand.u32 4294901760, %v10200_v23 }
 0x77c   :  { %4861 = vmatpush.msrb.mxu3 %v12163_v53  ;;  %4935 = vmatpush.msra.mxu0 %v4761_v31  ;;  %v3019_v53 = vld [vmem:[%s15628_s7] sm:$0xff]  ;;  %v4337_v2 = vand.u32 4294901760, %v4336_v9  ;;  %v4646_v31 = vsel %vm4257_vm7, %v3023_v57, 0  ;;  %v10202_v9 = vld [vmem:[%s15625_s8 + $0x168] sm:$0xff] }
 0x77d   :  { %v4693_v17 = vand.u32 4294901760, %v12371_v44  ;;  %v12392_v15 = vand.u32 4294901760, %v4646_v31 }
 0x77e   :  { %4863 = vmatpush.msrb.mxu3 %v12173_v42  ;;  %4330 = vmatmul.f32.gmra.mxu2 %v4329_v34  ;;  %v4634_v42 = vsel %vm4257_vm7, %v3019_v53, 0 }
 0x77f   :  { %4400 = vmatmul.f32.gmra.mxu3 %v12257_v46  ;;  %v12334_v33 = vand.u32 4294901760, %v4634_v42  ;;  %v4694_v54 = vsub.f32 %v12371_v44, %v4693_v17  ;;  %v12403_v41 = vsub.f32 %v4646_v31, %v12392_v15  ;;  %v10198_v31 = vld [vmem:[%s15625_s8 + $0x148] sm:$0xff] }
 0x780   :  { %4865 = vmatpush.msrb.mxu3 %v12186_v47  ;;  %4515 = vmatmul.f32.gmra.mxu1 %v4327_v32  ;;  %v4344_v47 = vsub.f32 %v4342_v56, %v4343_v22  ;;  %v10204_v32 = vld [vmem:[%s15625_s8 + $0x178] sm:$0xff]  ;;  %v12540_v60 = vand.u32 4294901760, %v10198_v31 }
 0x781   :  { %v12341_v35 = vsub.f32 %v4634_v42, %v12334_v33  ;;  %v4695_v40 = vand.u32 4294901760, %v4694_v54  ;;  %v10201_v42 = vld [vmem:[%s15625_s8 + $0x160] sm:$0xff] }
 0x782   :  { %4867 = vmatpush.msrb.mxu3 %v12213_v28  ;;  %v3020_v28 = vld [vmem:[%s15628_s7 + $0x8] sm:$0xff]  ;;  %v4345_v3 = vand.u32 4294901760, %v4344_v47 }
 0x783   :  { %4459 = vmatmul.f32.gmra.mxu0 %v4326_v13  ;;  %v4637_v58 = vsel %vm4257_vm7, %v3020_v28, 0  ;;  %v4677_v25 = vand.u32 4294901760, %v12341_v35 }
 0x784   :  { %v12345_v48 = vand.u32 4294901760, %v4637_v58 }
 0x785   :  { %v4678_v20 = vsub.f32 %v12341_v35, %v4677_v25 }
 0x786   :  { %4338 = vmatmul.f32.gmra.mxu2 %v4337_v2  ;;  %v12355_v16 = vsub.f32 %v4637_v58, %v12345_v48 }
 0x787   :  { %4404 = vmatmul.f32.gmra.mxu3 %v12277_v52  ;;  %v4679_v10 = vand.u32 4294901760, %v4678_v20 }
 0x788   :  { %4521 = vmatmul.f32.gmra.mxu1 %v4335_v21  ;;  %v4685_v19 = vand.u32 4294901760, %v12355_v16 }
 0x78a   :  { %v4686_v30 = vsub.f32 %v12355_v16, %v4685_v19 }
 0x78b   :  { %4464 = vmatmul.f32.gmra.mxu0 %v4334_v7  ;;  %v10203_v7 = vld [vmem:[%s15625_s8 + $0x170] sm:$0xff] }
 0x78c   :  { %v4687_v18 = vand.u32 4294901760, %v4686_v30  ;;  %v12462_v24 = vand.u32 4294901760, %v10203_v7 }
 0x78e   :  { %4346 = vmatmul.f32.gmra.mxu2 %v4345_v3  ;;  %v12481_v2 = vsub.f32 %v10203_v7, %v12462_v24 }
 0x78f   :  { %4408 = vmatmul.f32.gmra.mxu3 %v12298_v4 }
 0x790   :  { %4527 = vmatmul.f32.gmra.mxu1 %v4343_v22  ;;  %v5121_v58 = vand.u32 4294901760, %v12481_v2 }
 0x792   :  { %v5122_v5 = vsub.f32 %v12481_v2, %v5121_v58 }
 0x793   :  { %4469 = vmatmul.f32.gmra.mxu0 %v4342_v56  ;;  %v12478_v56 = vand.u32 4294901760, %v10202_v9 }
 0x794   :  { %v5123_v54 = vand.u32 4294901760, %v5122_v5  ;;  %v15855_v5 = vld [vmem:[#allocation36_spill] sm:$0xff] }
 0x795   :  { %v12496_v3 = vsub.f32 %v10202_v9, %v12478_v56 }
 0x796   :  { %4563 = vmatmul.f32.vlgmr.msra.gmra.mxu2 %v12144_v0 }
 0x797   :  { %4412 = vmatmul.f32.gmra.mxu3 %v12321_v11  ;;  %v5127_v30 = vand.u32 4294901760, %v12496_v3 }
 0x798   :  { %4766 = vmatmul.f32.vlgmr.msrb.gmra.mxu1 %v12334_v33 }
 0x799   :  { %v5128_v57 = vsub.f32 %v12496_v3, %v5127_v30 }
 0x79b   :  { %4680 = vmatmul.f32.vlgmr.msrb.gmra.mxu0 %v4679_v10 }
 0x79e   :  { %4567 = vmatmul.f32.gmra.mxu2 %v12183_v26 }
 0x79f   :  { %4609 = vmatmul.f32.vlgmr.msra.gmra.mxu3 %v12144_v0  ;;  %v4701_v0 = vand.u32 4294901760, %v12387_v14 }
 0x7a0   :  { %4770 = vmatmul.f32.gmra.mxu1 %v12345_v48 }
 0x7a1   :  { %v4702_v49 = vsub.f32 %v12387_v14, %v4701_v0 }
 0x7a3   :  { %4688 = vmatmul.f32.gmra.mxu0 %v4687_v18  ;;  %v4703_v43 = vand.u32 4294901760, %v4702_v49  ;;  %v12527_v18 = vsub.f32 %v10200_v23, %v12509_v38  ;;  %v15852_v23 = vld [vmem:[#allocation13_spill] sm:$0xff] }
 0x7a6   :  { %4571 = vmatmul.f32.gmra.mxu2 %v12257_v46 }
 0x7a7   :  { %4613 = vmatmul.f32.gmra.mxu3 %v12183_v26  ;;  %v4709_v26 = vand.u32 4294901760, %v12403_v41 }
 0x7a8   :  { %4774 = vmatmul.f32.gmra.mxu1 %v12360_v6 }
 0x7a9   :  { %v4710_v12 = vsub.f32 %v12403_v41, %v4709_v26 }
 0x7ab   :  { %4696 = vmatmul.f32.gmra.mxu0 %v4695_v40  ;;  %v4711_v8 = vand.u32 4294901760, %v4710_v12  ;;  %v5129_v12 = vand.u32 4294901760, %v5128_v57 }
 0x7ae   :  { %4575 = vmatmul.f32.gmra.mxu2 %v12277_v52 }
 0x7af   :  { %4617 = vmatmul.f32.gmra.mxu3 %v12257_v46  ;;  %v4718_v46 = vsub.f32 %v12416_v1, %v4717_v36 }
 0x7b0   :  { %4778 = vmatmul.f32.gmra.mxu1 %v12376_v59 }
 0x7b1   :  { %v4719_v29 = vand.u32 4294901760, %v4718_v46  ;;  %v12558_v46 = vsub.f32 %v10198_v31, %v12540_v60  ;;  %v15863_v31 = vld [vmem:[#allocation16_spill] sm:$0xff] }
 0x7b3   :  { %4704 = vmatmul.f32.gmra.mxu0 %v4703_v43  ;;  %v5151_v61 = vand.u32 4294901760, %v12558_v46 }
 0x7b6   :  { %4579 = vmatmul.f32.gmra.mxu2 %v12298_v4 }
 0x7b7   :  { %4621 = vmatmul.f32.gmra.mxu3 %v12277_v52  ;;  %v5026_v52 = vsel %vm1246_vm2, %v10206_v27, 0 }
 0x7b8   :  { %4782 = vmatmul.f32.gmra.mxu1 %v12392_v15  ;;  %v12435_v13 = vand.u32 4294901760, %v5026_v52 }
 0x7ba   :  { %5035 = vmatpush.msra.mxu2 %v12435_v13  ;;  %5251 = vmatpush.msrb.mxu1 %v12435_v13  ;;  %v12442_v50 = vsub.f32 %v5026_v52, %v12435_v13 }
 0x7bb   :  { %4712 = vmatmul.f32.gmra.mxu0 %v4711_v8  ;;  %v12555_v8 = vand.u32 4294901760, %v10197_v39 }
 0x7bc   :  { %v5103_v62 = vand.u32 4294901760, %v12442_v50  ;;  %5037 = vmatpush.msra.mxu2 %v12437_v45  ;;  %5190 = vmatpush.msrb.mxu0 %v12442_v50 }
 0x7bd   :  { %5253 = vmatpush.msrb.mxu1 %v12437_v45  ;;  %v12569_v52 = vsub.f32 %v10197_v39, %v12555_v8 }
 0x7be   :  { %4583 = vmatmul.f32.gmra.mxu2 %v12321_v11  ;;  %v5104_v21 = vsub.f32 %v12442_v50, %v5103_v62  ;;  %5193 = vmatpush.msrb.mxu0 %v12453_v63  ;;  %v15838_v50 = vld [vmem:[#allocation7_spill] sm:$0xff] }
 0x7bf   :  { %4625 = vmatmul.f32.gmra.mxu3 %v12298_v4  ;;  %v12450_v4 = vand.u32 4294901760, %v10204_v32 }
 0x7c0   :  { %4786 = vmatmul.f32.gmra.mxu1 %v12408_v51  ;;  %v5105_v53 = vand.u32 4294901760, %v5104_v21  ;;  %v5152_v21 = vsub.f32 %v12558_v46, %v5151_v61 }
 0x7c1   :  { %v12465_v34 = vsub.f32 %v10204_v32, %v12450_v4  ;;  %5039 = vmatpush.msra.mxu2 %v12450_v4  ;;  %5255 = vmatpush.msrb.mxu1 %v12450_v4 }
 0x7c2   :  { %5106 = vmatpush.msra.mxu3 %v5105_v53 }
 0x7c3   :  { %4720 = vmatmul.f32.gmra.mxu0 %v4719_v29  ;;  %5041 = vmatpush.msra.mxu2 %v12462_v24  ;;  %v5115_v47 = vand.u32 4294901760, %v12465_v34 }
 0x7c4   :  { %5196 = vmatpush.msrb.mxu0 %v12465_v34  ;;  %5257 = vmatpush.msrb.mxu1 %v12462_v24 }
 0x7c5   :  { %v5116_v20 = vsub.f32 %v12465_v34, %v5115_v47  ;;  %5043 = vmatpush.msra.mxu2 %v12478_v56  ;;  %v15844_v34 = vld [vmem:[#allocation15_spill] sm:$0xff] }
 0x7c6   :  { %4818 = vmatmul.f32.vlgmr.msrb.gmra.mxu2 %v12341_v35  ;;  %5199 = vmatpush.msrb.mxu0 %v12481_v2  ;;  %v10199_v35 = vld [vmem:[%s15625_s8 + $0x150] sm:$0xff] }
 0x7c7   :  { %4629 = vmatmul.f32.gmra.mxu3 %v12321_v11  ;;  %v5109_v11 = vand.u32 4294901760, %v12453_v63  ;;  %v5117_v55 = vand.u32 4294901760, %v5116_v20  ;;  %5259 = vmatpush.msrb.mxu1 %v12478_v56 }
 0x7c8   :  { %4983 = vmatmul.f32.vlgmr.msra.gmra.mxu1 %v12334_v33  ;;  %5202 = vmatpush.msrb.mxu0 %v12496_v3  ;;  %v15850_v3 = vld [vmem:[#allocation8_spill] sm:$0xff] }
 0x7c9   :  { %v5110_v22 = vsub.f32 %v12453_v63, %v5109_v11 }
 0x7cb   :  { %4937 = vmatmul.f32.vlgmr.msra.gmra.mxu0 %v12334_v33  ;;  %v12493_v33 = vand.u32 4294901760, %v10201_v42  ;;  %v5111_v28 = vand.u32 4294901760, %v5110_v22 }
 0x7cd   :  { %v12512_v10 = vsub.f32 %v10201_v42, %v12493_v33  ;;  %5112 = vmatpush.msra.mxu3 %v5111_v28  ;;  %5045 = vmatpush.msra.mxu2 %v12493_v33  ;;  %v15849_v28 = vld [vmem:[#allocation14_spill] sm:$0xff] }
 0x7ce   :  { %4823 = vmatmul.f32.gmra.mxu2 %v12355_v16  ;;  %5261 = vmatpush.msrb.mxu1 %v12493_v33  ;;  %v5157_v16 = vand.u32 4294901760, %v12569_v52 }
 0x7cf   :  { %4871 = vmatmul.f32.vlgmr.msrb.gmra.mxu3 %v4677_v25  ;;  %v12524_v25 = vand.u32 4294901760, %v10199_v35  ;;  %v5133_v40 = vand.u32 4294901760, %v12512_v10  ;;  %5047 = vmatpush.msra.mxu2 %v12509_v38 }
 0x7d0   :  { %4987 = vmatmul.f32.gmra.mxu1 %v12345_v48  ;;  %5118 = vmatpush.msra.mxu3 %v5117_v55  ;;  %v5158_v53 = vsub.f32 %v12569_v52, %v5157_v16  ;;  %v15857_v55 = vld [vmem:[#allocation28_spill] sm:$0xff] }
 0x7d1   :  { %v12543_v49 = vsub.f32 %v10199_v35, %v12524_v25  ;;  %v5134_v43 = vsub.f32 %v12512_v10, %v5133_v40  ;;  %5205 = vmatpush.msrb.mxu0 %v12512_v10  ;;  %5263 = vmatpush.msrb.mxu1 %v12509_v38 }
 0x7d2   :  { %5124 = vmatpush.msra.mxu3 %v5123_v54  ;;  %5049 = vmatpush.msra.mxu2 %v12524_v25  ;;  %v5159_v22 = vand.u32 4294901760, %v5158_v53  ;;  %v15862_v54 = vld [vmem:[#allocation23_spill] sm:$0xff] }
 0x7d3   :  { %4941 = vmatmul.f32.gmra.mxu0 %v12345_v48  ;;  %v5139_v48 = vand.u32 4294901760, %v12527_v18  ;;  %v5145_v29 = vand.u32 4294901760, %v12543_v49  ;;  %v5135_v32 = vand.u32 4294901760, %v5134_v43  ;;  %5265 = vmatpush.msrb.mxu1 %v12524_v25 }
 0x7d4   :  { %5208 = vmatpush.msrb.mxu0 %v12527_v18  ;;  %5130 = vmatpush.msra.mxu3 %v5129_v12  ;;  %v15870_v12 = vld [vmem:[#allocation29_spill] sm:$0xff] }
 0x7d5   :  { %v5140_v27 = vsub.f32 %v12527_v18, %v5139_v48  ;;  %v5146_v7 = vsub.f32 %v12543_v49, %v5145_v29  ;;  %5051 = vmatpush.msra.mxu2 %v12540_v60  ;;  %5267 = vmatpush.msrb.mxu1 %v12540_v60  ;;  %v15860_v18 = vld [vmem:[#allocation19_spill] sm:$0xff] }
 0x7d6   :  { %4828 = vmatmul.f32.gmra.mxu2 %v12371_v44  ;;  %5211 = vmatpush.msrb.mxu0 %v12543_v49 }
 0x7d7   :  { %4877 = vmatmul.f32.gmra.mxu3 %v4685_v19  ;;  %v5141_v19 = vand.u32 4294901760, %v5140_v27  ;;  %5053 = vmatpush.msra.mxu2 %v12555_v8  ;;  %v5147_v9 = vand.u32 4294901760, %v5146_v7 }
 0x7d8   :  { %4991 = vmatmul.f32.gmra.mxu1 %v12360_v6  ;;  %5136 = vmatpush.msra.mxu3 %v5135_v32 }
 0x7d9   :  { %5214 = vmatpush.msrb.mxu0 %v12558_v46  ;;  %5269 = vmatpush.msrb.mxu1 %v12555_v8 }
 0x7da   :  { %5142 = vmatpush.msra.mxu3 %v5141_v19  ;;  %5310 = vmatpush.msrb.mxu2 %v5103_v62  ;;  %v15843_v62 = vld [vmem:[#allocation6_spill] sm:$0xff] }
 0x7db   :  { %4945 = vmatmul.f32.gmra.mxu0 %v12360_v6  ;;  %v5153_v6 = vand.u32 4294901760, %v5152_v21 }
 0x7dc   :  { %5217 = vmatpush.msrb.mxu0 %v12569_v52  ;;  %5148 = vmatpush.msra.mxu3 %v5147_v9 }
 0x7dd   :  { %5314 = vmatpush.msrb.mxu2 %v5109_v11 }
 0x7de   :  { %4833 = vmatmul.f32.gmra.mxu2 %v12387_v14  ;;  %5154 = vmatpush.msra.mxu3 %v5153_v6 }
 0x7df   :  { %4883 = vmatmul.f32.gmra.mxu3 %v4693_v17  ;;  %5318 = vmatpush.msrb.mxu2 %v5115_v47  ;;  %v12610_v17 = vpop.f32.mrf.mxu1  ;;  %v15847_v47 = vld [vmem:[#allocation18_spill] sm:$0xff] }
 0x7e0   :  { %4995 = vmatmul.f32.gmra.mxu1 %v12376_v59  ;;  %5160 = vmatpush.msra.mxu3 %v5159_v22  ;;  %15832 = vst [vmem:[#allocation55_spill] sm:$0xff] %v12610_v17 }
 0x7e1   :  { %5322 = vmatpush.msrb.mxu2 %v5121_v58 }
 0x7e2   :  { %5375 = vmatpush.msrb.mxu3 %v12435_v13  ;;  %v12601_v44 = vpop.f32.mrf.mxu0 }
 0x7e3   :  { %4949 = vmatmul.f32.gmra.mxu0 %v12376_v59  ;;  %15831 = vst [vmem:[#allocation54_spill] sm:$0xff] %v12601_v44  ;;  %5326 = vmatpush.msrb.mxu2 %v5127_v30  ;;  %v15856_v30 = vld [vmem:[#allocation17_spill] sm:$0xff] }
 0x7e4   :  { %5377 = vmatpush.msrb.mxu3 %v12437_v45 }
 0x7e5   :  { %v4307_v42 = vpop.f32.mrf.mxu2  ;;  %5330 = vmatpush.msrb.mxu2 %v5133_v40  ;;  %v15864_v40 = vld [vmem:[#allocation32_spill] sm:$0xff] }
 0x7e6   :  { %4838 = vmatmul.f32.gmra.mxu2 %v12403_v41  ;;  %5379 = vmatpush.msrb.mxu3 %v12450_v4  ;;  %v15836_v41 = vld [vmem:[#allocation12_spill] sm:$0xff] }
 0x7e7   :  { %4889 = vmatmul.f32.gmra.mxu3 %v4701_v0  ;;  %5334 = vmatpush.msrb.mxu2 %v5139_v48  ;;  %v15867_v48 = vld [vmem:[#allocation30_spill] sm:$0xff] }
 0x7e8   :  { %4999 = vmatmul.f32.gmra.mxu1 %v12392_v15  ;;  %5381 = vmatpush.msrb.mxu3 %v12462_v24 }
 0x7e9   :  { %5338 = vmatpush.msrb.mxu2 %v5145_v29  ;;  %v12633_v13 = vpop.f32.mrf.mxu1 }
 0x7ea   :  { %5383 = vmatpush.msrb.mxu3 %v12478_v56  ;;  %15835 = vst [vmem:[#allocation58_spill] sm:$0xff] %v12633_v13 }
 0x7eb   :  { %4953 = vmatmul.f32.gmra.mxu0 %v12392_v15  ;;  %5342 = vmatpush.msrb.mxu2 %v5151_v61 }
 0x7ec   :  { %v12625_v15 = vpop.f32.mrf.mxu0  ;;  %5385 = vmatpush.msrb.mxu3 %v12493_v33 }
 0x7ed   :  { %15834 = vst [vmem:[#allocation57_spill] sm:$0xff] %v12625_v15  ;;  %5346 = vmatpush.msrb.mxu2 %v5157_v16 }
 0x7ee   :  { %4843 = vmatmul.f32.gmra.mxu2 %v12416_v1  ;;  %v4315_v14 = vpop.f32.mrf.mxu2  ;;  %5387 = vmatpush.msrb.mxu3 %v12509_v38  ;;  %v15841_v1 = vld [vmem:[#allocation9_spill] sm:$0xff] }
 0x7ef   :  { %v4393_v59 = vpop.f32.mrf.mxu3  ;;  %4895 = vmatmul.f32.gmra.mxu3 %v4709_v26 }
 0x7f0   :  { %5003 = vmatmul.f32.gmra.mxu1 %v12408_v51  ;;  %v12623_v0 = vadd.f32 %v4393_v59, %v4307_v42  ;;  %5389 = vmatpush.msrb.mxu3 %v12524_v25 }
 0x7f2   :  { %15833 = vst [vmem:[#allocation56_spill] sm:$0xff] %v12623_v0  ;;  %5391 = vmatpush.msrb.mxu3 %v12540_v60 }
 0x7f3   :  { %4957 = vmatmul.f32.gmra.mxu0 %v12408_v51 }
 0x7f4   :  { %5393 = vmatpush.msrb.mxu3 %v12555_v8 }
 0x7f5   :  { %v12649_v63 = vpop.f32.mrf.mxu1 }
 0x7f6   :  { %5059 = vmatmul.f32.vlgmr.msra.gmra.mxu2 %v11615_v37  ;;  %15840 = vst [vmem:[#allocation59_spill] sm:$0xff] %v12649_v63 }
 0x7f7   :  { %4901 = vmatmul.f32.gmra.mxu3 %v4717_v36  ;;  %v15842_v36 = vld [vmem:[#allocation5_spill] sm:$0xff] }
 0x7f8   :  { %5273 = vmatmul.f32.vlgmr.msrb.gmra.mxu1 %v15836_v41  ;;  %v12642_v45 = vpop.f32.mrf.mxu0 }
 0x7f9   :  { %v4323_v26 = vpop.f32.mrf.mxu2  ;;  %15837 = vst [vmem:[#allocation12_spill] sm:$0xff] %v12642_v45 }
 0x7fa   :  { %v4397_v51 = vpop.f32.mrf.mxu3 }
 0x7fb   :  { %5220 = vmatmul.f32.vlgmr.msrb.gmra.mxu0 %v15838_v50  ;;  %v12645_v4 = vadd.f32 %v4397_v51, %v4315_v14 }
 0x7fd   :  { %15839 = vst [vmem:[#allocation7_spill] sm:$0xff] %v12645_v4  ;;  %v12660_v33 = vpop.f32.mrf.mxu1 }
 0x7fe   :  { %5067 = vmatmul.f32.gmra.mxu2 %v15841_v1  ;;  %15848 = vst [vmem:[#allocation6_spill] sm:$0xff] %v12660_v33 }
 0x7ff   :  { %5162 = vmatmul.f32.vlgmr.msra.gmra.mxu3 %v15842_v36 }
 0x800   :  { %5279 = vmatmul.f32.gmra.mxu1 %v15843_v62  ;;  %v12657_v2 = vpop.f32.mrf.mxu0 }
 0x801   :  { %v4331_v24 = vpop.f32.mrf.mxu2  ;;  %15846 = vst [vmem:[#allocation5_spill] sm:$0xff] %v12657_v2 }
 0x802   :  { %v4401_v11 = vpop.f32.mrf.mxu3 }
 0x803   :  { %5225 = vmatmul.f32.gmra.mxu0 %v15844_v34  ;;  %v12655_v56 = vadd.f32 %v4401_v11, %v4323_v26 }
 0x805   :  { %15845 = vst [vmem:[#allocation9_spill] sm:$0xff] %v12655_v56  ;;  %v12674_v35 = vpop.f32.mrf.mxu1 }
 0x806   :  { %5075 = vmatmul.f32.gmra.mxu2 %v15847_v47  ;;  %15858 = vst [vmem:[#allocation13_spill] sm:$0xff] %v12674_v35 }
 0x807   :  { %5166 = vmatmul.f32.gmra.mxu3 %v15849_v28 }
 0x808   :  { %5285 = vmatmul.f32.gmra.mxu1 %v15850_v3  ;;  %v12669_v10 = vpop.f32.mrf.mxu0 }
 0x809   :  { %v12664_v58 = vpop.f32.mrf.mxu2  ;;  %15854 = vst [vmem:[#allocation14_spill] sm:$0xff] %v12669_v10 }
 0x80a   :  { %15851 = vst [vmem:[#allocation15_spill] sm:$0xff] %v12664_v58  ;;  %v4405_v20 = vpop.f32.mrf.mxu3  ;;  %v10191_v58 = vld [vmem:[%s15628_s7 + $0xc0] sm:$0xff] }
 0x80b   :  { %5230 = vmatmul.f32.gmra.mxu0 %v15852_v23  ;;  %v12667_v38 = vadd.f32 %v4405_v20, %v4331_v24 }
 0x80d   :  { %15853 = vst [vmem:[#allocation18_spill] sm:$0xff] %v12667_v38  ;;  %v12691_v43 = vpop.f32.mrf.mxu1 }
 0x80e   :  { %5083 = vmatmul.f32.gmra.mxu2 %v15855_v5  ;;  %15869 = vst [vmem:[#allocation60_spill] sm:$0xff] %v12691_v43 }
 0x80f   :  { %5170 = vmatmul.f32.gmra.mxu3 %v15856_v30 }
 0x810   :  { %5291 = vmatmul.f32.gmra.mxu1 %v15857_v55  ;;  %v12684_v60 = vpop.f32.mrf.mxu0 }
 0x811   :  { %v12676_v25 = vpop.f32.mrf.mxu2  ;;  %15865 = vst [vmem:[#allocation19_spill] sm:$0xff] %v12684_v60 }
 0x812   :  { %15859 = vst [vmem:[#allocation36_spill] sm:$0xff] %v12676_v25  ;;  %v12679_v57 = vpop.f32.mrf.mxu3 }
 0x813   :  { %5235 = vmatmul.f32.gmra.mxu0 %v15860_v18  ;;  %15861 = vst [vmem:[#allocation17_spill] sm:$0xff] %v12679_v57 }
 0x815   :  { %v12701_v27 = vpop.f32.mrf.mxu1 }
 0x816   :  { %5091 = vmatmul.f32.gmra.mxu2 %v15862_v54  ;;  %15874 = vst [vmem:[#allocation64_spill] sm:$0xff] %v12701_v27 }
 0x817   :  { %5174 = vmatmul.f32.gmra.mxu3 %v15863_v31 }
 0x818   :  { %5297 = vmatmul.f32.gmra.mxu1 %v15864_v40  ;;  %v12697_v46 = vpop.f32.mrf.mxu0 }
 0x819   :  { %v12686_v49 = vpop.f32.mrf.mxu2  ;;  %15872 = vst [vmem:[#allocation62_spill] sm:$0xff] %v12697_v46 }
 0x81a   :  { %15866 = vst [vmem:[#allocation23_spill] sm:$0xff] %v12686_v49  ;;  %v12689_v39 = vpop.f32.mrf.mxu3 }
 0x81b   :  { %5240 = vmatmul.f32.gmra.mxu0 %v15867_v48  ;;  %15868 = vst [vmem:[#allocation16_spill] sm:$0xff] %v12689_v39 }
 0x81d   :  { %v12712_v7 = vpop.f32.mrf.mxu1 }
 0x81e   :  { %5348 = vmatmul.f32.vlgmr.msrb.gmra.mxu2 %v15842_v36  ;;  %15878 = vst [vmem:[#allocation68_spill] sm:$0xff] %v12712_v7 }
 0x81f   :  { %5178 = vmatmul.f32.gmra.mxu3 %v15870_v12 }
 0x820   :  { %v12709_v32 = vpop.f32.mrf.mxu0 }
 0x821   :  { %v12695_v8 = vpop.f32.mrf.mxu2  ;;  %15877 = vst [vmem:[#allocation67_spill] sm:$0xff] %v12709_v32 }
 0x822   :  { %15871 = vst [vmem:[#allocation61_spill] sm:$0xff] %v12695_v8  ;;  %v12699_v29 = vpop.f32.mrf.mxu3 }
 0x823   :  { %15873 = vst [vmem:[#allocation63_spill] sm:$0xff] %v12699_v29 }
 0x825   :  { %v12723_v9 = vpop.f32.mrf.mxu1 }
 0x826   :  { %5352 = vmatmul.f32.gmra.mxu2 %v15849_v28  ;;  %15882 = vst [vmem:[#allocation72_spill] sm:$0xff] %v12723_v9 }
 0x827   :  { %5395 = vmatmul.f32.vlgmr.msrb.gmra.mxu3 %v15842_v36 }
 0x828   :  { %v12719_v21 = vpop.f32.mrf.mxu0 }
 0x829   :  { %v12705_v52 = vpop.f32.mrf.mxu2  ;;  %15881 = vst [vmem:[#allocation71_spill] sm:$0xff] %v12719_v21 }
 0x82a   :  { %15875 = vst [vmem:[#allocation65_spill] sm:$0xff] %v12705_v52  ;;  %v12707_v61 = vpop.f32.mrf.mxu3 }
 0x82b   :  { %15876 = vst [vmem:[#allocation66_spill] sm:$0xff] %v12707_v61 }
 0x82d   :  { %v12737_v14 = vpop.f32.mrf.mxu1 }
 0x82e   :  { %5356 = vmatmul.f32.gmra.mxu2 %v15856_v30  ;;  %15888 = vst [vmem:[#allocation78_spill] sm:$0xff] %v12737_v14 }
 0x82f   :  { %5399 = vmatmul.f32.gmra.mxu3 %v15849_v28 }
 0x830   :  { %v12731_v22 = vpop.f32.mrf.mxu0 }
 0x831   :  { %v12715_v16 = vpop.f32.mrf.mxu2  ;;  %15885 = vst [vmem:[#allocation75_spill] sm:$0xff] %v12731_v22 }
 0x832   :  { %15879 = vst [vmem:[#allocation69_spill] sm:$0xff] %v12715_v16  ;;  %v12717_v19 = vpop.f32.mrf.mxu3 }
 0x833   :  { %15880 = vst [vmem:[#allocation70_spill] sm:$0xff] %v12717_v19 }
 0x835   :  { %v12746_v11 = vpop.f32.mrf.mxu1 }
 0x836   :  { %5360 = vmatmul.f32.gmra.mxu2 %v15863_v31  ;;  %15892 = vst [vmem:[#allocation82_spill] sm:$0xff] %v12746_v11 }
 0x837   :  { %5403 = vmatmul.f32.gmra.mxu3 %v15856_v30 }
 0x838   :  { %v12742_v51 = vpop.f32.mrf.mxu0 }
 0x839   :  { %v12725_v53 = vpop.f32.mrf.mxu2  ;;  %15890 = vst [vmem:[#allocation80_spill] sm:$0xff] %v12742_v51 }
 0x83a   :  { %15883 = vst [vmem:[#allocation73_spill] sm:$0xff] %v12725_v53  ;;  %v12727_v6 = vpop.f32.mrf.mxu3 }
 0x83b   :  { %15884 = vst [vmem:[#allocation74_spill] sm:$0xff] %v12727_v6 }
 0x83d   :  { %v12754_v27 = vpop.f32.mrf.mxu1 }
 0x83e   :  { %5364 = vmatmul.f32.gmra.mxu2 %v15870_v12  ;;  %15896 = vst [vmem:[#allocation86_spill] sm:$0xff] %v12754_v27 }
 0x83f   :  { %5407 = vmatmul.f32.gmra.mxu3 %v15863_v31 }
 0x840   :  { %v12752_v7 = vpop.f32.mrf.mxu0 }
 0x841   :  { %v12733_v42 = vpop.f32.mrf.mxu2  ;;  %15895 = vst [vmem:[#allocation85_spill] sm:$0xff] %v12752_v7 }
 0x842   :  { %15886 = vst [vmem:[#allocation76_spill] sm:$0xff] %v12733_v42  ;;  %v12735_v59 = vpop.f32.mrf.mxu3 }
 0x843   :  { %15887 = vst [vmem:[#allocation77_spill] sm:$0xff] %v12735_v59 }
 0x847   :  { %5411 = vmatmul.f32.gmra.mxu3 %v15870_v12 }
 0x848   :  { %v12760_v42 = vpop.f32.mrf.mxu0 }
 0x849   :  { %v12740_v26 = vpop.f32.mrf.mxu2  ;;  %15899 = vst [vmem:[#allocation89_spill] sm:$0xff] %v12760_v42 }
 0x84a   :  { %15889 = vst [vmem:[#allocation79_spill] sm:$0xff] %v12740_v26  ;;  %v12744_v24 = vpop.f32.mrf.mxu3  ;;  %v12762_v26 = vpop.f32.mrf.mxu1 }
 0x84b   :  { %15891 = vst [vmem:[#allocation81_spill] sm:$0xff] %v12744_v24 }
 0x84c   :  { %15900 = vst [vmem:[#allocation90_spill] sm:$0xff] %v12762_v26 }
 0x850   :  { %v12768_v11 = vpop.f32.mrf.mxu0 }
 0x851   :  { %v12748_v20 = vpop.f32.mrf.mxu2  ;;  %15903 = vst [vmem:[#allocation93_spill] sm:$0xff] %v12768_v11 }
 0x852   :  { %15893 = vst [vmem:[#allocation83_spill] sm:$0xff] %v12748_v20  ;;  %v12750_v9 = vpop.f32.mrf.mxu3  ;;  %v12774_v7 = vpop.f32.mrf.mxu1 }
 0x853   :  { %15894 = vst [vmem:[#allocation84_spill] sm:$0xff] %v12750_v9 }
 0x854   :  { %15906 = vst [vmem:[#allocation96_spill] sm:$0xff] %v12774_v7 }
 0x859   :  { %v12756_v59 = vpop.f32.mrf.mxu2 }
 0x85a   :  { %15897 = vst [vmem:[#allocation87_spill] sm:$0xff] %v12756_v59  ;;  %v12758_v14 = vpop.f32.mrf.mxu3  ;;  %v12778_v59 = vpop.f32.mrf.mxu0 }
 0x85b   :  { %15898 = vst [vmem:[#allocation88_spill] sm:$0xff] %v12758_v14  ;;  %v12782_v42 = vpop.f32.mrf.mxu1 }
 0x85c   :  { %15908 = vst [vmem:[#allocation98_spill] sm:$0xff] %v12778_v59 }
 0x85d   :  { %15910 = vst [vmem:[#allocation100_spill] sm:$0xff] %v12782_v42 }
 0x861   :  { %v12764_v51 = vpop.f32.mrf.mxu2 }
 0x862   :  { %15901 = vst [vmem:[#allocation91_spill] sm:$0xff] %v12764_v51  ;;  %v12766_v24 = vpop.f32.mrf.mxu3 }
 0x863   :  { %15902 = vst [vmem:[#allocation92_spill] sm:$0xff] %v12766_v24  ;;  %v12786_v24 = vpop.f32.mrf.mxu0  ;;  %v12788_v11 = vpop.f32.mrf.mxu1 }
 0x864   :  { %15912 = vst [vmem:[#allocation102_spill] sm:$0xff] %v12786_v24 }
 0x865   :  { %15913 = vst [vmem:[#allocation103_spill] sm:$0xff] %v12788_v11 }
 0x869   :  { %v12770_v20 = vpop.f32.mrf.mxu2 }
 0x86a   :  { %15904 = vst [vmem:[#allocation94_spill] sm:$0xff] %v12770_v20  ;;  %v12772_v9 = vpop.f32.mrf.mxu3 }
 0x86b   :  { %15905 = vst [vmem:[#allocation95_spill] sm:$0xff] %v12772_v9  ;;  %v12790_v9 = vpop.f32.mrf.mxu0  ;;  %v12792_v7 = vpop.f32.mrf.mxu1 }
 0x86c   :  { %15914 = vst [vmem:[#allocation104_spill] sm:$0xff] %v12790_v9 }
 0x86d   :  { %15915 = vst [vmem:[#allocation105_spill] sm:$0xff] %v12792_v7 }
 0x871   :  { %v12776_v27 = vpop.f32.mrf.mxu2 }
 0x872   :  { %15907 = vst [vmem:[#allocation97_spill] sm:$0xff] %v12776_v27  ;;  %v12780_v14 = vpop.f32.mrf.mxu3 }
 0x873   :  { %15909 = vst [vmem:[#allocation99_spill] sm:$0xff] %v12780_v14  ;;  %v12794_v59 = vpop.f32.mrf.mxu0  ;;  %v12796_v42 = vpop.f32.mrf.mxu1 }
 0x874   :  { %15916 = vst [vmem:[#allocation106_spill] sm:$0xff] %v12794_v59 }
 0x875   :  { %15917 = vst [vmem:[#allocation107_spill] sm:$0xff] %v12796_v42 }
 0x879   :  { %v5060_v26 = vpop.f32.mrf.mxu2 }
 0x87a   :  { %v12784_v51 = vpop.f32.mrf.mxu3 }
 0x87b   :  { %15911 = vst [vmem:[#allocation101_spill] sm:$0xff] %v12784_v51  ;;  %v5221_v51 = vpop.f32.mrf.mxu0  ;;  %v5274_v24 = vpop.f32.mrf.mxu1 }
 0x881   :  { %v5068_v20 = vpop.f32.mrf.mxu2 }
 0x882   :  { %v5163_v22 = vpop.f32.mrf.mxu3 }
 0x883   :  { %v5226_v46 = vpop.f32.mrf.mxu0  ;;  %v5280_v6 = vpop.f32.mrf.mxu1  ;;  %v5164_v39 = vadd.f32 %v5163_v22, %v5060_v26 }
 0x885   :  { %v5222_v17 = vadd.f32 %v5221_v51, %v5164_v39 }
 0x889   :  { %v5076_v27 = vpop.f32.mrf.mxu2 }
 0x88a   :  { %v5167_v53 = vpop.f32.mrf.mxu3 }
 0x88b   :  { %v5231_v19 = vpop.f32.mrf.mxu0  ;;  %v5286_v7 = vpop.f32.mrf.mxu1  ;;  %v5168_v33 = vadd.f32 %v5167_v53, %v5068_v20  ;;  %v5416_v53 = vsel %vm4257_vm7, %v10191_v58, 0  ;;  %v10193_v20 = vld [vmem:[%s15628_s7 + $0xd0] sm:$0xff] }
 0x88d   :  { %v5227_v63 = vadd.f32 %v5226_v46, %v5168_v33 }
 0x891   :  { %v5084_v14 = vpop.f32.mrf.mxu2 }
 0x892   :  { %v5171_v43 = vpop.f32.mrf.mxu3 }
 0x893   :  { %v5236_v10 = vpop.f32.mrf.mxu0  ;;  %v5292_v52 = vpop.f32.mrf.mxu1  ;;  %v5172_v42 = vadd.f32 %v5171_v43, %v5076_v27  ;;  %v5275_v27 = vadd.f32 %v5274_v24, %v5222_v17 }
 0x895   :  { %v5232_v13 = vadd.f32 %v5231_v19, %v5172_v42 }
 0x897   :  { %v5287_v43 = vadd.f32 %v5286_v7, %v5232_v13 }
 0x899   :  { %v5092_v35 = vpop.f32.mrf.mxu2 }
 0x89a   :  { %v5175_v21 = vpop.f32.mrf.mxu3 }
 0x89b   :  { %v5176_v59 = vadd.f32 %v5175_v21, %v5084_v14  ;;  %v5241_v2 = vpop.f32.mrf.mxu0  ;;  %v5281_v14 = vadd.f32 %v5280_v6, %v5227_v63  ;;  %v5298_v22 = vpop.f32.mrf.mxu1 }
 0x89d   :  { %v5237_v8 = vadd.f32 %v5236_v10, %v5176_v59 }
 0x89f   :  { %v5293_v57 = vadd.f32 %v5292_v52, %v5237_v8  ;;  %v12802_v8 = vand.u32 4294901760, %v5416_v53 }
 0x8a1   :  { %v5349_v32 = vpop.f32.mrf.mxu2  ;;  %v12810_v17 = vsub.f32 %v5416_v53, %v12802_v8 }
 0x8a2   :  { %v5179_v11 = vpop.f32.mrf.mxu3  ;;  %v5350_v52 = vadd.f32 %v5349_v32, %v5275_v27 }
 0x8a3   :  { %v5180_v25 = vadd.f32 %v5179_v11, %v5092_v35  ;;  %v15677_v7 = vand.u32 4294901760, %v12810_v17 }
 0x8a5   :  { %v5242_v21 = vadd.f32 %v5241_v2, %v5180_v25  ;;  %v10192_v2 = vld [vmem:[%s15628_s7 + $0xc8] sm:$0xff]  ;;  %v5460_v27 = vsub.f32 %v12810_v17, %v15677_v7 }
 0x8a7   :  { %v5299_v19 = vadd.f32 %v5298_v22, %v5242_v21  ;;  %v10221_v21 = vld [vmem:[%s15625_s8 + $0x220] sm:$0xff] }
 0x8a9   :  { %v5353_v60 = vpop.f32.mrf.mxu2 }
 0x8aa   :  { %v5396_v9 = vpop.f32.mrf.mxu3  ;;  %v5354_v35 = vadd.f32 %v5353_v60, %v5281_v14  ;;  %v12855_v14 = vand.u32 4294901760, %v10221_v21 }
 0x8ab   :  { %v5397_v63 = vadd.f32 %v5396_v9, %v5350_v52 }
 0x8ac   :  { %v12876_v52 = vsub.f32 %v10221_v21, %v12855_v14  ;;  %v10218_v21 = vld [vmem:[%s15625_s8 + $0x208] sm:$0xff] }
 0x8ad   :  { %v12928_v7 = vand.u32 4294901760, %v10218_v21 }
 0x8b1   :  { %v5357_v16 = vpop.f32.mrf.mxu2 }
 0x8b2   :  { %v5400_v61 = vpop.f32.mrf.mxu3  ;;  %v5358_v33 = vadd.f32 %v5357_v16, %v5287_v43 }
 0x8b3   :  { %v5401_v42 = vadd.f32 %v5400_v61, %v5354_v35  ;;  %v10222_v61 = vld [vmem:[%s15625_s8 + $0x228] sm:$0xf]  ;;  %v10220_v35 = vld [vmem:[%s15625_s8 + $0x218] sm:$0xff] }
 0x8b4   :  { %v5814_v9 = vsel %vm1246_vm2, %v10222_v61, 0 }
 0x8b5   :  { %v12813_v25 = vand.u32 4294901760, %v5401_v42  ;;  %v12832_v6 = vand.u32 4294901760, %v5814_v9 }
 0x8b7   :  { %v12835_v26 = vsub.f32 %v5401_v42, %v12813_v25  ;;  %v12853_v53 = vsub.f32 %v5814_v9, %v12832_v6  ;;  %v5461_v9 = vand.u32 4294901760, %v5460_v27 }
 0x8b9   :  { %v5361_v49 = vpop.f32.mrf.mxu2 }
 0x8ba   :  { %v5404_v29 = vpop.f32.mrf.mxu3  ;;  %v5362_v38 = vadd.f32 %v5361_v49, %v5293_v57  ;;  %v12820_v49 = vand.u32 4294901760, %v5397_v63 }
 0x8bb   :  { %v5405_v39 = vadd.f32 %v5404_v29, %v5358_v33  ;;  %v5422_v33 = vsel %vm4257_vm7, %v10193_v20, 0 }
 0x8bc   :  { %v12858_v43 = vsub.f32 %v5397_v63, %v12820_v49  ;;  %v15678_v63 = vand.u32 4294901760, %v12835_v26  ;;  %v12904_v20 = vand.u32 4294901760, %v5422_v33 }
 0x8bd   :  { %v12815_v57 = vand.u32 4294901760, %v5405_v39 }
 0x8be   :  { %v12947_v44 = vsub.f32 %v5422_v33, %v12904_v20 }
 0x8bf   :  { %v12838_v51 = vsub.f32 %v5405_v39, %v12815_v57 }
 0x8c1   :  { %v5365_v46 = vpop.f32.mrf.mxu2 }
 0x8c2   :  { %v5408_v45 = vpop.f32.mrf.mxu3  ;;  %v5366_v13 = vadd.f32 %v5365_v46, %v5299_v19  ;;  %v15674_v46 = vand.u32 4294901760, %v12853_v53  ;;  %v12878_v19 = vand.u32 4294901760, %v10220_v35 }
 0x8c3   :  { %v5409_v10 = vadd.f32 %v5408_v45, %v5362_v38  ;;  %v5419_v38 = vsel %vm4257_vm7, %v10192_v2, 0  ;;  %v15679_v2 = vand.u32 4294901760, %v12838_v51 }
 0x8c4   :  { %v12829_v16 = vand.u32 4294901760, %v5419_v38 }
 0x8c5   :  { %v12804_v59 = vand.u32 4294901760, %v5409_v10 }
 0x8c6   :  { %v12867_v22 = vsub.f32 %v5419_v38, %v12829_v16  ;;  %v12897_v38 = vsub.f32 %v10220_v35, %v12878_v19  ;;  %v5538_v35 = vsub.f32 %v12835_v26, %v15678_v63 }
 0x8c7   :  { %v12818_v60 = vsub.f32 %v5409_v10, %v12804_v59 }
 0x8c8   :  { %v15919_v15 = vand.u32 4294901760, %v12867_v22 }
 0x8c9   :  { %v15675_v11 = vand.u32 4294901760, %v12818_v60 }
 0x8ca   :  { %v5412_v45 = vpop.f32.mrf.mxu3  ;;  %v5468_v4 = vsub.f32 %v12867_v22, %v15919_v15 }
 0x8cb   :  { %v5413_v58 = vadd.f32 %v5412_v45, %v5366_v13  ;;  %v5526_v39 = vsub.f32 %v12818_v60, %v15675_v11  ;;  %v10219_v13 = vld [vmem:[%s15625_s8 + $0x210] sm:$0xff]  ;;  %v5892_v45 = vsub.f32 %v12853_v53, %v15674_v46  ;;  %v15680_v11 = vand.u32 4294901760, %v12897_v38 }
 0x8cd   :  { %v5434_v29 = vsel %vm4276_vm8, %v5413_v58, 0  ;;  %v15676_v58 = vand.u32 4294901760, %v12876_v52  ;;  %v5904_v63 = vsub.f32 %v12897_v38, %v15680_v11  ;;  %v10216_v11 = vld [vmem:[%s15625_s8 + $0x1f8] sm:$0xff] }
 0x8ce   :  { %v12826_v32 = vand.u32 4294901760, %v5434_v29  ;;  %v12964_v55 = vand.u32 4294901760, %v10216_v11 }
 0x8cf   :  { %v5898_v46 = vsub.f32 %v12876_v52, %v15676_v58  ;;  %v10194_v58 = vld [vmem:[%s15628_s7 + $0xd8] sm:$0xff] }
 0x8d0   :  { %v12841_v24 = vsub.f32 %v5434_v29, %v12826_v32  ;;  %5448 = vmatpush.msra.mxu0 %v12826_v32  ;;  %5641 = vmatpush.msra.mxu3 %v12826_v32  ;;  %v12899_v29 = vand.u32 4294901760, %v10219_v13 }
 0x8d1   :  { %v5899_v0 = vand.u32 4294901760, %v5898_v46  ;;  %v15921_v46 = vand.u32 4294901760, %v12818_v60 }
 0x8d2   :  { %v5519_v10 = vand.u32 4294901760, %v12841_v24  ;;  %5450 = vmatpush.msra.mxu0 %v12804_v59  ;;  %5585 = vmatpush.msra.mxu2 %v12841_v24  ;;  %v12916_v27 = vsub.f32 %v10219_v13, %v12899_v29  ;;  %v10217_v13 = vld [vmem:[%s15625_s8 + $0x200] sm:$0xff] }
 0x8d3   :  { %5643 = vmatpush.msra.mxu3 %v12804_v59  ;;  %v12939_v56 = vand.u32 4294901760, %v10217_v13 }
 0x8d4   :  { %5452 = vmatpush.msra.mxu0 %v12815_v57  ;;  %5588 = vmatpush.msra.mxu2 %v12818_v60  ;;  %v5520_v42 = vsub.f32 %v12841_v24, %v5519_v10  ;;  %v5893_v24 = vand.u32 4294901760, %v5892_v45  ;;  %v15918_v45 = vand.u32 4294901760, %v12810_v17  ;;  %v10214_v60 = vld [vmem:[%s15625_s8 + $0x1e8] sm:$0xff] }
 0x8d5   :  { %5645 = vmatpush.msra.mxu3 %v12815_v57  ;;  %v12960_v15 = vsub.f32 %v10217_v13, %v12939_v56  ;;  %v15922_v13 = vand.u32 4294901760, %v12916_v27 }
 0x8d6   :  { %5454 = vmatpush.msra.mxu0 %v12813_v25  ;;  %5591 = vmatpush.msra.mxu2 %v12838_v51  ;;  %v5521_v61 = vand.u32 4294901760, %v5520_v42  ;;  %v5532_v42 = vsub.f32 %v12838_v51, %v15679_v2  ;;  %v5425_v2 = vsel %vm4257_vm7, %v10194_v58, 0  ;;  %v5905_v58 = vand.u32 4294901760, %v5904_v63 }
 0x8d7   :  { %5647 = vmatpush.msra.mxu3 %v12813_v25  ;;  %v12979_v40 = vand.u32 4294901760, %v5425_v2  ;;  %v15923_v63 = vand.u32 4294901760, %v12838_v51  ;;  %v15925_v51 = vand.u32 4294901760, %v12835_v26 }
 0x8d8   :  { %5456 = vmatpush.msra.mxu0 %v12820_v49  ;;  %5522 = vmatpush.msra.mxu1 %v5521_v61  ;;  %v5527_v61 = vand.u32 4294901760, %v5526_v39  ;;  %v12950_v39 = vsub.f32 %v10218_v21, %v12928_v7  ;;  %v5533_v33 = vand.u32 4294901760, %v5532_v42  ;;  %v5539_v21 = vand.u32 4294901760, %v5538_v35 }
 0x8d9   :  { %5594 = vmatpush.msra.mxu2 %v12835_v26  ;;  %5649 = vmatpush.msra.mxu3 %v12820_v49  ;;  %v5910_v42 = vsub.f32 %v12916_v27, %v15922_v13  ;;  %v12996_v13 = vand.u32 4294901760, %v10214_v60  ;;  %v13016_v3 = vsub.f32 %v5425_v2, %v12979_v40 }
 0x8da   :  { %5462 = vmatmul.f32.vlgmr.msra.gmra.mxu0 %v5461_v9  ;;  %5653 = vmatmul.f32.vlgmr.msra.gmra.mxu3 %v15918_v45  ;;  %v15920_v9 = vand.u32 4294901760, %v12858_v43 }
 0x8db   :  { %5701 = vmatpush.msrb.mxu0 %v5519_v10  ;;  %5528 = vmatpush.msra.mxu1 %v5527_v61  ;;  %v10215_v10 = vld [vmem:[%s15625_s8 + $0x1f0] sm:$0xff]  ;;  %v5469_v61 = vand.u32 4294901760, %v5468_v4 }
 0x8dc   :  { %v5544_v45 = vsub.f32 %v12858_v43, %v15920_v9  ;;  %5597 = vmatpush.msra.mxu2 %v12858_v43  ;;  %5894 = vmatpush.msrb.mxu3 %v5893_v24  ;;  %v12976_v35 = vand.u32 4294901760, %v10215_v10  ;;  %v5475_v9 = vand.u32 4294901760, %v12947_v44  ;;  %v10195_v24 = vld [vmem:[%s15628_s7 + $0xe0] sm:$0xff] }
 0x8dd   :  { %5600 = vmatmul.f32.vlgmr.msra.gmra.mxu2 %v12810_v17  ;;  %5705 = vmatpush.msrb.mxu0 %v15921_v46  ;;  %v12983_v17 = vsub.f32 %v10216_v11, %v12964_v55 }
 0x8de   :  { %5534 = vmatpush.msra.mxu1 %v5533_v33  ;;  %5823 = vmatpush.msrb.mxu2 %v12832_v6  ;;  %v15924_v33 = vand.u32 4294901760, %v12950_v39  ;;  %v12994_v46 = vsub.f32 %v10215_v10, %v12976_v35  ;;  %v5545_v11 = vand.u32 4294901760, %v5544_v45  ;;  %v5911_v10 = vand.u32 4294901760, %v5910_v42 }
 0x8df   :  { %5709 = vmatpush.msrb.mxu0 %v15923_v63  ;;  %5900 = vmatpush.msrb.mxu3 %v5899_v0  ;;  %v10213_v0 = vld [vmem:[%s15625_s8 + $0x1e0] sm:$0xff]  ;;  %v15926_v63 = vand.u32 4294901760, %v12960_v15  ;;  %v5927_v45 = vand.u32 4294901760, %v12983_v17  ;;  %v5476_v48 = vsub.f32 %v12947_v44, %v5475_v9  ;;  %v5428_v42 = vsel %vm4257_vm7, %v10195_v24, 0 }
 0x8e0   :  { %v5916_v4 = vsub.f32 %v12950_v39, %v15924_v33  ;;  %5540 = vmatpush.msra.mxu1 %v5539_v21  ;;  %5825 = vmatpush.msrb.mxu2 %v12855_v14  ;;  %v13012_v33 = vsub.f32 %v10214_v60, %v12996_v13  ;;  %v13018_v26 = vand.u32 4294901760, %v10213_v0  ;;  %v5933_v60 = vand.u32 4294901760, %v12994_v46 }
 0x8e1   :  { %5713 = vmatpush.msrb.mxu0 %v15925_v51  ;;  %5906 = vmatpush.msrb.mxu3 %v5905_v58  ;;  %v5922_v21 = vsub.f32 %v12960_v15, %v15926_v63  ;;  %v15927_v58 = vand.u32 4294901760, %v12867_v22  ;;  %v5928_v63 = vsub.f32 %v12983_v17, %v5927_v45 }
 0x8e2   :  { %5546 = vmatpush.msra.mxu1 %v5545_v11  ;;  %5470 = vmatmul.f32.gmra.mxu0 %v5469_v61  ;;  %v5917_v51 = vand.u32 4294901760, %v5916_v4  ;;  %v15928_v11 = vand.u32 4294901760, %v12858_v43  ;;  %v13029_v2 = vsub.f32 %v10213_v0, %v13018_v26  ;;  %v5939_v24 = vand.u32 4294901760, %v13012_v33 }
 0x8e3   :  { %5548 = vmatmul.f32.vlgmr.msra.gmra.mxu1 %v12802_v8  ;;  %5659 = vmatmul.f32.gmra.mxu3 %v15927_v58  ;;  %v5923_v61 = vand.u32 4294901760, %v5922_v21  ;;  %v5477_v4 = vand.u32 4294901760, %v5476_v48  ;;  %v5483_v43 = vand.u32 4294901760, %v13016_v3  ;;  %v13038_v58 = vand.u32 4294901760, %v5428_v42  ;;  %v10196_v48 = vld [vmem:[%s15628_s7 + $0xe8] sm:$0x3f] }
 0x8e4   :  { %5717 = vmatpush.msrb.mxu0 %v15928_v11  ;;  %5755 = vmatpush.msrb.mxu1 %v12826_v32  ;;  %v5934_v32 = vsub.f32 %v12994_v46, %v5933_v60  ;;  %v5940_v0 = vsub.f32 %v13012_v33, %v5939_v24  ;;  %v5431_v21 = vsel %vm4257_vm7, %v10196_v48, 0  ;;  %v15929_v48 = vand.u32 4294901760, %v12853_v53 }
 0x8e5   :  { %5605 = vmatmul.f32.gmra.mxu2 %v12867_v22  ;;  %5912 = vmatpush.msrb.mxu3 %v5911_v10  ;;  %v5929_v22 = vand.u32 4294901760, %v5928_v63  ;;  %v5490_v10 = vsub.f32 %v5428_v42, %v13038_v58  ;;  %v13066_v63 = vand.u32 4294901760, %v5431_v21 }
 0x8e6   :  { %5757 = vmatpush.msrb.mxu1 %v12804_v59  ;;  %5827 = vmatpush.msrb.mxu2 %v12878_v19  ;;  %v5945_v59 = vand.u32 4294901760, %v13029_v2 }
 0x8e7   :  { %5918 = vmatpush.msrb.mxu3 %v5917_v51  ;;  %5978 = vmatpush.msra.mxu0 %v12853_v53  ;;  %v5935_v51 = vand.u32 4294901760, %v5934_v32  ;;  %v5491_v42 = vand.u32 4294901760, %v5490_v10 }
 0x8e8   :  { %5759 = vmatpush.msrb.mxu1 %v12815_v57  ;;  %5829 = vmatpush.msrb.mxu2 %v12899_v29  ;;  %v5484_v57 = vsub.f32 %v13016_v3, %v5483_v43  ;;  %v5946_v11 = vsub.f32 %v13029_v2, %v5945_v59 }
 0x8e9   :  { %5924 = vmatpush.msrb.mxu3 %v5923_v61  ;;  %5981 = vmatpush.msra.mxu0 %v12876_v52 }
 0x8ea   :  { %5761 = vmatpush.msrb.mxu1 %v12813_v25  ;;  %5478 = vmatmul.f32.gmra.mxu0 %v5477_v4  ;;  %v5941_v25 = vand.u32 4294901760, %v5940_v0  ;;  %v5485_v61 = vand.u32 4294901760, %v5484_v57 }
 0x8eb   :  { %5552 = vmatmul.f32.gmra.mxu1 %v12829_v16  ;;  %5665 = vmatmul.f32.gmra.mxu3 %v5475_v9  ;;  %v5498_v9 = vsub.f32 %v5431_v21, %v13066_v63 }
 0x8ec   :  { %5763 = vmatpush.msrb.mxu1 %v12820_v49  ;;  %5831 = vmatpush.msrb.mxu2 %v12928_v7  ;;  %v5947_v49 = vand.u32 4294901760, %v5946_v11 }
 0x8ed   :  { %5610 = vmatmul.f32.gmra.mxu2 %v12947_v44  ;;  %5930 = vmatpush.msrb.mxu3 %v5929_v22  ;;  %v5492_v44 = vsub.f32 %v5490_v10, %v5491_v42  ;;  %v5499_v32 = vand.u32 4294901760, %v5498_v9 }
 0x8ee   :  { %5833 = vmatpush.msrb.mxu2 %v12939_v56  ;;  %5984 = vmatpush.msra.mxu0 %v12897_v38 }
 0x8ef   :  { %5936 = vmatpush.msrb.mxu3 %v5935_v51  ;;  %6039 = vmatpush.msra.mxu1 %v12832_v6  ;;  %v5493_v4 = vand.u32 4294901760, %v5492_v44 }
 0x8f0   :  { %5835 = vmatpush.msrb.mxu2 %v12964_v55  ;;  %5987 = vmatpush.msra.mxu0 %v12916_v27 }
 0x8f1   :  { %5942 = vmatpush.msrb.mxu3 %v5941_v25  ;;  %6041 = vmatpush.msra.mxu1 %v12855_v14 }
 0x8f2   :  { %5486 = vmatmul.f32.gmra.mxu0 %v5485_v61  ;;  %5837 = vmatpush.msrb.mxu2 %v12976_v35 }
 0x8f3   :  { %5556 = vmatmul.f32.gmra.mxu1 %v12904_v20  ;;  %5671 = vmatmul.f32.gmra.mxu3 %v5483_v43  ;;  %v15930_v43 = vand.u32 4294901760, %v12876_v52  ;;  %v15933_v52 = vand.u32 4294901760, %v12950_v39 }
 0x8f4   :  { %5839 = vmatpush.msrb.mxu2 %v12996_v13  ;;  %5948 = vmatpush.msrb.mxu3 %v5947_v49 }
 0x8f5   :  { %5615 = vmatmul.f32.gmra.mxu2 %v13016_v3  ;;  %5990 = vmatpush.msra.mxu0 %v12950_v39  ;;  %v5500_v3 = vsub.f32 %v5498_v9, %v5499_v32 }
 0x8f6   :  { %6163 = vmatpush.msra.mxu3 %v12832_v6  ;;  %5841 = vmatpush.msrb.mxu2 %v13018_v26  ;;  %v15931_v6 = vand.u32 4294901760, %v12897_v38 }
 0x8f7   :  { %5993 = vmatpush.msra.mxu0 %v12960_v15  ;;  %6043 = vmatpush.msra.mxu1 %v12878_v19  ;;  %v5501_v53 = vand.u32 4294901760, %v5500_v3 }
 0x8f8   :  { %6098 = vmatpush.msra.mxu2 %v15929_v48  ;;  %6165 = vmatpush.msra.mxu3 %v12855_v14  ;;  %v15932_v14 = vand.u32 4294901760, %v12916_v27 }
 0x8f9   :  { %6045 = vmatpush.msra.mxu1 %v12899_v29  ;;  %5996 = vmatpush.msra.mxu0 %v12983_v17 }
 0x8fa   :  { %6102 = vmatpush.msra.mxu2 %v15930_v43  ;;  %6167 = vmatpush.msra.mxu3 %v12878_v19  ;;  %v15934_v19 = vand.u32 4294901760, %v12960_v15 }
 0x8fb   :  { %5494 = vmatmul.f32.gmra.mxu0 %v5493_v4  ;;  %5560 = vmatmul.f32.gmra.mxu1 %v12979_v40 }
 0x8fc   :  { %5677 = vmatmul.f32.gmra.mxu3 %v5491_v42  ;;  %6106 = vmatpush.msra.mxu2 %v15931_v6 }
 0x8fd   :  { %6169 = vmatpush.msra.mxu3 %v12899_v29  ;;  %5620 = vmatmul.f32.gmra.mxu2 %v5490_v10 }
 0x8fe   :  { %6110 = vmatpush.msra.mxu2 %v15932_v14  ;;  %5999 = vmatpush.msra.mxu0 %v12994_v46 }
 0x8ff   :  { %6171 = vmatpush.msra.mxu3 %v12928_v7  ;;  %6047 = vmatpush.msra.mxu1 %v12928_v7 }
 0x900   :  { %6114 = vmatpush.msra.mxu2 %v15933_v52  ;;  %6002 = vmatpush.msra.mxu0 %v13012_v33 }
 0x901   :  { %6173 = vmatpush.msra.mxu3 %v12939_v56  ;;  %6049 = vmatpush.msra.mxu1 %v12939_v56  ;;  %v15935_v56 = vld [vmem:[#allocation8_spill] sm:$0xff] }
 0x902   :  { %6118 = vmatpush.msra.mxu2 %v15934_v19  ;;  %6005 = vmatpush.msra.mxu0 %v13029_v2 }
 0x903   :  { %5502 = vmatmul.f32.gmra.mxu0 %v5501_v53  ;;  %5564 = vmatmul.f32.gmra.mxu1 %v13038_v58 }
 0x904   :  { %5683 = vmatmul.f32.gmra.mxu3 %v5499_v32  ;;  %6122 = vmatpush.msra.mxu2 %v5927_v45 }
 0x905   :  { %6175 = vmatpush.msra.mxu3 %v12964_v55  ;;  %5625 = vmatmul.f32.gmra.mxu2 %v5498_v9 }
 0x906   :  { %6126 = vmatpush.msra.mxu2 %v5933_v60  ;;  %6051 = vmatpush.msra.mxu1 %v12964_v55 }
 0x907   :  { %6177 = vmatpush.msra.mxu3 %v12976_v35 }
 0x908   :  { %6130 = vmatpush.msra.mxu2 %v5939_v24  ;;  %6053 = vmatpush.msra.mxu1 %v12976_v35 }
 0x909   :  { %6179 = vmatpush.msra.mxu3 %v12996_v13 }
 0x90a   :  { %6134 = vmatpush.msra.mxu2 %v5945_v59  ;;  %6055 = vmatpush.msra.mxu1 %v12996_v13 }
 0x90b   :  { %5719 = vmatmul.f32.vlgmr.msrb.gmra.mxu0 %v12802_v8  ;;  %6181 = vmatpush.msra.mxu3 %v13018_v26 }
 0x90c   :  { %5568 = vmatmul.f32.gmra.mxu1 %v13066_v63  ;;  %5950 = vmatmul.f32.vlgmr.msrb.gmra.mxu3 %v15842_v36 }
 0x90d   :  { %5847 = vmatmul.f32.vlgmr.msrb.gmra.mxu2 %v11615_v37  ;;  %6057 = vmatpush.msra.mxu1 %v13018_v26 }
 0x913   :  { %5723 = vmatmul.f32.gmra.mxu0 %v12829_v16 }
 0x914   :  { %5765 = vmatmul.f32.vlgmr.msrb.gmra.mxu1 %v12802_v8  ;;  %5954 = vmatmul.f32.gmra.mxu3 %v15849_v28  ;;  %v15938_v8 = vld [vmem:[#allocation28_spill] sm:$0xff] }
 0x915   :  { %5855 = vmatmul.f32.gmra.mxu2 %v15841_v1 }
 0x91b   :  { %5727 = vmatmul.f32.gmra.mxu0 %v12904_v20 }
 0x91c   :  { %5769 = vmatmul.f32.gmra.mxu1 %v12829_v16  ;;  %5958 = vmatmul.f32.gmra.mxu3 %v15856_v30 }
 0x91d   :  { %5863 = vmatmul.f32.gmra.mxu2 %v15847_v47 }
 0x923   :  { %5731 = vmatmul.f32.gmra.mxu0 %v12979_v40 }
 0x924   :  { %5773 = vmatmul.f32.gmra.mxu1 %v12904_v20  ;;  %5962 = vmatmul.f32.gmra.mxu3 %v15863_v31  ;;  %v15943_v20 = vld [vmem:[#allocation32_spill] sm:$0xff] }
 0x925   :  { %5871 = vmatmul.f32.gmra.mxu2 %v15855_v5 }
 0x92b   :  { %5735 = vmatmul.f32.gmra.mxu0 %v13038_v58 }
 0x92c   :  { %5777 = vmatmul.f32.gmra.mxu1 %v12979_v40  ;;  %5966 = vmatmul.f32.gmra.mxu3 %v15870_v12  ;;  %v15937_v40 = vld [vmem:[#allocation30_spill] sm:$0xff] }
 0x92d   :  { %5879 = vmatmul.f32.gmra.mxu2 %v15862_v54 }
 0x933   :  { %5739 = vmatmul.f32.gmra.mxu0 %v13066_v63 }
 0x934   :  { %5781 = vmatmul.f32.gmra.mxu1 %v13038_v58  ;;  %6183 = vmatmul.f32.vlgmr.msra.gmra.mxu3 %v15842_v36 }
 0x935   :  { %6136 = vmatmul.f32.vlgmr.msra.gmra.mxu2 %v15842_v36 }
 0x93b   :  { %6008 = vmatmul.f32.vlgmr.msra.gmra.mxu0 %v15838_v50 }
 0x93c   :  { %5785 = vmatmul.f32.gmra.mxu1 %v13066_v63  ;;  %6187 = vmatmul.f32.gmra.mxu3 %v15849_v28 }
 0x93d   :  { %6140 = vmatmul.f32.gmra.mxu2 %v15849_v28 }
 0x943   :  { %6013 = vmatmul.f32.gmra.mxu0 %v15844_v34 }
 0x944   :  { %6061 = vmatmul.f32.vlgmr.msra.gmra.mxu1 %v15836_v41  ;;  %6191 = vmatmul.f32.gmra.mxu3 %v15856_v30 }
 0x945   :  { %6144 = vmatmul.f32.gmra.mxu2 %v15856_v30 }
 0x94b   :  { %6018 = vmatmul.f32.gmra.mxu0 %v15852_v23 }
 0x94c   :  { %6067 = vmatmul.f32.gmra.mxu1 %v15843_v62  ;;  %6195 = vmatmul.f32.gmra.mxu3 %v15863_v31 }
 0x94d   :  { %6148 = vmatmul.f32.gmra.mxu2 %v15863_v31 }
 0x953   :  { %6023 = vmatmul.f32.gmra.mxu0 %v15860_v18 }
 0x954   :  { %6073 = vmatmul.f32.gmra.mxu1 %v15935_v56  ;;  %6199 = vmatmul.f32.gmra.mxu3 %v15870_v12 }
 0x955   :  { %6152 = vmatmul.f32.gmra.mxu2 %v15870_v12 }
 0x957   :  { %v13166_v55 = vpop.f32.mrf.mxu0 }
 0x958   :  { %15936 = vst [vmem:[#allocation108_spill] sm:$0xff] %v13166_v55 }
 0x95b   :  { %6028 = vmatmul.f32.gmra.mxu0 %v15937_v40 }
 0x95c   :  { %6079 = vmatmul.f32.gmra.mxu1 %v15938_v8 }
 0x95d   :  { %v13170_v7 = vpop.f32.mrf.mxu3 }
 0x95e   :  { %15939 = vst [vmem:[#allocation109_spill] sm:$0xff] %v13170_v7 }
 0x95f   :  { %v13172_v16 = vpop.f32.mrf.mxu0 }
 0x960   :  { %15940 = vst [vmem:[#allocation110_spill] sm:$0xff] %v13172_v16  ;;  %v13174_v38 = vpop.f32.mrf.mxu1  ;;  %v13176_v29 = vpop.f32.mrf.mxu2 }
 0x961   :  { %15941 = vst [vmem:[#allocation111_spill] sm:$0xff] %v13174_v38 }
 0x962   :  { %15942 = vst [vmem:[#allocation112_spill] sm:$0xff] %v13176_v29 }
 0x964   :  { %6085 = vmatmul.f32.gmra.mxu1 %v15943_v20 }
 0x966   :  { %v13179_v27 = vpop.f32.mrf.mxu3 }
 0x967   :  { %15944 = vst [vmem:[#allocation113_spill] sm:$0xff] %v13179_v27  ;;  %v13181_v39 = vpop.f32.mrf.mxu0 }
 0x968   :  { %15945 = vst [vmem:[#allocation114_spill] sm:$0xff] %v13181_v39  ;;  %v13183_v15 = vpop.f32.mrf.mxu1  ;;  %v13185_v35 = vpop.f32.mrf.mxu2 }
 0x969   :  { %15946 = vst [vmem:[#allocation115_spill] sm:$0xff] %v13183_v15 }
 0x96a   :  { %15947 = vst [vmem:[#allocation116_spill] sm:$0xff] %v13185_v35 }
 0x96e   :  { %v13187_v17 = vpop.f32.mrf.mxu3 }
 0x96f   :  { %15948 = vst [vmem:[#allocation117_spill] sm:$0xff] %v13187_v17  ;;  %v13189_v46 = vpop.f32.mrf.mxu0 }
 0x970   :  { %15949 = vst [vmem:[#allocation118_spill] sm:$0xff] %v13189_v46  ;;  %v13191_v13 = vpop.f32.mrf.mxu1  ;;  %v13193_v45 = vpop.f32.mrf.mxu2 }
 0x971   :  { %15950 = vst [vmem:[#allocation119_spill] sm:$0xff] %v13191_v13 }
 0x972   :  { %15951 = vst [vmem:[#allocation120_spill] sm:$0xff] %v13193_v45 }
 0x976   :  { %v13195_v33 = vpop.f32.mrf.mxu3 }
 0x977   :  { %15952 = vst [vmem:[#allocation121_spill] sm:$0xff] %v13195_v33 }
 0x978   :  { %v13197_v26 = vpop.f32.mrf.mxu0  ;;  %v13199_v60 = vpop.f32.mrf.mxu1 }
 0x979   :  { %15953 = vst [vmem:[#allocation122_spill] sm:$0xff] %v13197_v26  ;;  %v13201_v2 = vpop.f32.mrf.mxu2 }
 0x97a   :  { %15954 = vst [vmem:[#allocation123_spill] sm:$0xff] %v13199_v60 }
 0x97b   :  { %15955 = vst [vmem:[#allocation124_spill] sm:$0xff] %v13201_v2 }
 0x97f   :  { %v13203_v24 = vpop.f32.mrf.mxu3 }
 0x980   :  { %15956 = vst [vmem:[#allocation125_spill] sm:$0xff] %v13203_v24  ;;  %v13205_v58 = vpop.f32.mrf.mxu0  ;;  %v13207_v59 = vpop.f32.mrf.mxu1 }
 0x981   :  { %15957 = vst [vmem:[#allocation126_spill] sm:$0xff] %v13205_v58  ;;  %v13209_v22 = vpop.f32.mrf.mxu2 }
 0x982   :  { %15958 = vst [vmem:[#allocation127_spill] sm:$0xff] %v13207_v59 }
 0x983   :  { %15959 = vst [vmem:[#allocation128_spill] sm:$0xff] %v13209_v22 }
 0x987   :  { %v13211_v0 = vpop.f32.mrf.mxu3 }
 0x988   :  { %15960 = vst [vmem:[#allocation129_spill] sm:$0xff] %v13211_v0  ;;  %v13213_v57 = vpop.f32.mrf.mxu0 }
 0x989   :  { %15961 = vst [vmem:[#allocation130_spill] sm:$0xff] %v13213_v57  ;;  %v13215_v10 = vpop.f32.mrf.mxu1  ;;  %v13217_v21 = vpop.f32.mrf.mxu2  ;;  %v10207_v57 = vld [vmem:[%s15628_s7 + $0x120] sm:$0xff] }
 0x98a   :  { %15962 = vst [vmem:[#allocation131_spill] sm:$0xff] %v13215_v10 }
 0x98b   :  { %15963 = vst [vmem:[#allocation132_spill] sm:$0xff] %v13217_v21 }
 0x98f   :  { %v5951_v51 = vpop.f32.mrf.mxu3 }
 0x990   :  { %v13219_v11 = vpop.f32.mrf.mxu0 }
 0x991   :  { %15964 = vst [vmem:[#allocation133_spill] sm:$0xff] %v13219_v11  ;;  %v13221_v25 = vpop.f32.mrf.mxu1  ;;  %v5848_v61 = vpop.f32.mrf.mxu2 }
 0x992   :  { %15965 = vst [vmem:[#allocation134_spill] sm:$0xff] %v13221_v25  ;;  %v5952_v46 = vadd.f32 %v5951_v51, %v5848_v61  ;;  %v6204_v51 = vsel %vm4257_vm7, %v10207_v57, 0 }
 0x997   :  { %v5955_v42 = vpop.f32.mrf.mxu3 }
 0x998   :  { %v13223_v63 = vpop.f32.mrf.mxu0 }
 0x999   :  { %15966 = vst [vmem:[#allocation135_spill] sm:$0xff] %v13223_v63  ;;  %v13225_v49 = vpop.f32.mrf.mxu1  ;;  %v5856_v44 = vpop.f32.mrf.mxu2 }
 0x99a   :  { %15967 = vst [vmem:[#allocation136_spill] sm:$0xff] %v13225_v49  ;;  %v5956_v60 = vadd.f32 %v5955_v42, %v5856_v44 }
 0x99f   :  { %v5959_v9 = vpop.f32.mrf.mxu3 }
 0x9a0   :  { %v13227_v4 = vpop.f32.mrf.mxu0 }
 0x9a1   :  { %15968 = vst [vmem:[#allocation137_spill] sm:$0xff] %v13227_v4  ;;  %v13229_v32 = vpop.f32.mrf.mxu1  ;;  %v5864_v48 = vpop.f32.mrf.mxu2 }
 0x9a2   :  { %15969 = vst [vmem:[#allocation138_spill] sm:$0xff] %v13229_v32 }
 0x9a7   :  { %v5963_v43 = vpop.f32.mrf.mxu3 }
 0x9a8   :  { %v13231_v3 = vpop.f32.mrf.mxu0 }
 0x9a9   :  { %15970 = vst [vmem:[#allocation139_spill] sm:$0xff] %v13231_v3  ;;  %v13233_v6 = vpop.f32.mrf.mxu1  ;;  %v5872_v53 = vpop.f32.mrf.mxu2 }
 0x9aa   :  { %15971 = vst [vmem:[#allocation140_spill] sm:$0xff] %v13233_v6 }
 0x9af   :  { %v5967_v0 = vpop.f32.mrf.mxu3 }
 0x9b0   :  { %v13235_v14 = vpop.f32.mrf.mxu0 }
 0x9b1   :  { %15972 = vst [vmem:[#allocation141_spill] sm:$0xff] %v13235_v14  ;;  %v13237_v52 = vpop.f32.mrf.mxu1  ;;  %v5880_v19 = vpop.f32.mrf.mxu2  ;;  %v5964_v14 = vadd.f32 %v5963_v43, %v5872_v53 }
 0x9b2   :  { %15973 = vst [vmem:[#allocation142_spill] sm:$0xff] %v13237_v52  ;;  %v5960_v52 = vadd.f32 %v5959_v9, %v5864_v48  ;;  %v5968_v42 = vadd.f32 %v5967_v0, %v5880_v19 }
 0x9b7   :  { %v6184_v58 = vpop.f32.mrf.mxu3 }
 0x9b8   :  { %v6009_v21 = vpop.f32.mrf.mxu0 }
 0x9b9   :  { %v13239_v24 = vpop.f32.mrf.mxu1  ;;  %v6137_v10 = vpop.f32.mrf.mxu2  ;;  %v6010_v45 = vadd.f32 %v6009_v21, %v5952_v46 }
 0x9ba   :  { %15974 = vst [vmem:[#allocation143_spill] sm:$0xff] %v13239_v24 }
 0x9bf   :  { %v6188_v59 = vpop.f32.mrf.mxu3 }
 0x9c0   :  { %v6014_v4 = vpop.f32.mrf.mxu0 }
 0x9c1   :  { %v6062_v22 = vpop.f32.mrf.mxu1  ;;  %v6141_v33 = vpop.f32.mrf.mxu2  ;;  %v6015_v17 = vadd.f32 %v6014_v4, %v5956_v60 }
 0x9c2   :  { %v6063_v7 = vadd.f32 %v6062_v22, %v6010_v45  ;;  %v10208_v45 = vld [vmem:[%s15628_s7 + $0x128] sm:$0xff] }
 0x9c4   :  { %v6138_v61 = vadd.f32 %v6137_v10, %v6063_v7 }
 0x9c7   :  { %v6192_v6 = vpop.f32.mrf.mxu3 }
 0x9c8   :  { %v6019_v26 = vpop.f32.mrf.mxu0 }
 0x9c9   :  { %v6068_v3 = vpop.f32.mrf.mxu1  ;;  %v6145_v32 = vpop.f32.mrf.mxu2  ;;  %v6020_v11 = vadd.f32 %v6019_v26, %v5960_v52  ;;  %v10237_v52 = vld [vmem:[%s15625_s8 + $0x2c0] sm:$0xff] }
 0x9ca   :  { %v6069_v13 = vadd.f32 %v6068_v3, %v6015_v17 }
 0x9cf   :  { %v6196_v39 = vpop.f32.mrf.mxu3 }
 0x9d0   :  { %v6024_v2 = vpop.f32.mrf.mxu0 }
 0x9d1   :  { %v6074_v63 = vpop.f32.mrf.mxu1  ;;  %v6025_v49 = vadd.f32 %v6024_v2, %v5964_v14  ;;  %v6149_v24 = vpop.f32.mrf.mxu2  ;;  %v6142_v2 = vadd.f32 %v6141_v33, %v6069_v13  ;;  %v10209_v14 = vld [vmem:[%s15628_s7 + $0x130] sm:$0xff] }
 0x9d2   :  { %v6075_v35 = vadd.f32 %v6074_v63, %v6020_v11 }
 0x9d3   :  { %v6189_v21 = vadd.f32 %v6188_v59, %v6142_v2 }
 0x9d4   :  { %v6146_v60 = vadd.f32 %v6145_v32, %v6075_v35 }
 0x9d5   :  { %v13261_v59 = vand.u32 4294901760, %v6189_v21 }
 0x9d6   :  { %v6193_v11 = vadd.f32 %v6192_v6, %v6146_v60 }
 0x9d7   :  { %v6200_v13 = vpop.f32.mrf.mxu3  ;;  %v13286_v6 = vsub.f32 %v6189_v21, %v13261_v59 }
 0x9d8   :  { %v6029_v43 = vpop.f32.mrf.mxu0  ;;  %v13256_v35 = vand.u32 4294901760, %v6193_v11 }
 0x9d9   :  { %v6080_v27 = vpop.f32.mrf.mxu1  ;;  %v6030_v44 = vadd.f32 %v6029_v43, %v5968_v42  ;;  %v6153_v63 = vpop.f32.mrf.mxu2  ;;  %v13298_v43 = vand.u32 4294901760, %v10237_v52 }
 0x9da   :  { %v6081_v25 = vadd.f32 %v6080_v27, %v6025_v49  ;;  %v13245_v27 = vand.u32 4294901760, %v6204_v51  ;;  %v13283_v3 = vsub.f32 %v6193_v11, %v13256_v35 }
 0x9dc   :  { %v6150_v15 = vadd.f32 %v6149_v24, %v6081_v25  ;;  %v6185_v24 = vadd.f32 %v6184_v58, %v6138_v61  ;;  %v10238_v58 = vld [vmem:[%s15625_s8 + $0x2c8] sm:$0xf]  ;;  %v6210_v61 = vsel %vm4257_vm7, %v10209_v14, 0 }
 0x9dd   :  { %v6602_v4 = vsel %vm1246_vm2, %v10238_v58, 0  ;;  %v10234_v14 = vld [vmem:[%s15625_s8 + $0x2a8] sm:$0xff] }
 0x9de   :  { %v6197_v26 = vadd.f32 %v6196_v39, %v6150_v15  ;;  %v13253_v39 = vsub.f32 %v6204_v51, %v13245_v27  ;;  %v6207_v15 = vsel %vm4257_vm7, %v10208_v45, 0  ;;  %v13264_v57 = vand.u32 4294901760, %v6185_v24 }
 0x9df   :  { %v13272_v9 = vand.u32 4294901760, %v6207_v15  ;;  %v13275_v32 = vand.u32 4294901760, %v6602_v4  ;;  %v15684_v45 = vand.u32 4294901760, %v13286_v6 }
 0x9e0   :  { %v13247_v49 = vand.u32 4294901760, %v6197_v26  ;;  %v15686_v25 = vand.u32 4294901760, %v13253_v39  ;;  %v13307_v2 = vsub.f32 %v6185_v24, %v13264_v57  ;;  %v10235_v24 = vld [vmem:[%s15625_s8 + $0x2b0] sm:$0xff] }
 0x9e1   :  { %v6086_v46 = vpop.f32.mrf.mxu1  ;;  %v13296_v19 = vsub.f32 %v6602_v4, %v13275_v32  ;;  %v13310_v60 = vsub.f32 %v6207_v15, %v13272_v9  ;;  %v13342_v15 = vand.u32 4294901760, %v10235_v24  ;;  %v13371_v4 = vand.u32 4294901760, %v10234_v14 }
 0x9e2   :  { %v6087_v17 = vadd.f32 %v6086_v46, %v6030_v44  ;;  %v13259_v33 = vsub.f32 %v6197_v26, %v13247_v49  ;;  %v6248_v51 = vsub.f32 %v13253_v39, %v15686_v25  ;;  %v10236_v26 = vld [vmem:[%s15625_s8 + $0x2b8] sm:$0xff]  ;;  %v13319_v46 = vsub.f32 %v10237_v52, %v13298_v43 }
 0x9e3   :  { %v15681_v44 = vand.u32 4294901760, %v13296_v19  ;;  %v15976_v16 = vand.u32 4294901760, %v13310_v60 }
 0x9e4   :  { %v6154_v22 = vadd.f32 %v6153_v63, %v6087_v17  ;;  %v15682_v53 = vand.u32 4294901760, %v13259_v33  ;;  %v13321_v17 = vand.u32 4294901760, %v10236_v26  ;;  %v15685_v63 = vand.u32 4294901760, %v13283_v3 }
 0x9e5   :  { %v6249_v58 = vand.u32 4294901760, %v6248_v51  ;;  %v13359_v51 = vsub.f32 %v10235_v24, %v13342_v15  ;;  %v10233_v24 = vld [vmem:[%s15625_s8 + $0x2a0] sm:$0xff]  ;;  %v6256_v29 = vsub.f32 %v13310_v60, %v15976_v16 }
 0x9e6   :  { %v6201_v7 = vadd.f32 %v6200_v13, %v6154_v22  ;;  %v6314_v11 = vsub.f32 %v13259_v33, %v15682_v53  ;;  %v6680_v22 = vsub.f32 %v13296_v19, %v15681_v44  ;;  %v15683_v13 = vand.u32 4294901760, %v13319_v46 }
 0x9e7   :  { %v6326_v53 = vsub.f32 %v13286_v6, %v15684_v45  ;;  %v13382_v25 = vand.u32 4294901760, %v10233_v24 }
 0x9e8   :  { %v6222_v0 = vsel %vm4276_vm8, %v6201_v7, 0  ;;  %v13340_v7 = vsub.f32 %v10236_v26, %v13321_v17  ;;  %v6686_v26 = vsub.f32 %v13319_v46, %v15683_v13  ;;  %v10210_v13 = vld [vmem:[%s15628_s7 + $0x138] sm:$0xff]  ;;  %v6681_v52 = vand.u32 4294901760, %v6680_v22 }
 0x9e9   :  { %v13269_v10 = vand.u32 4294901760, %v6222_v0  ;;  %v15975_v22 = vand.u32 4294901760, %v13253_v39  ;;  %v13403_v16 = vsub.f32 %v10233_v24, %v13382_v25  ;;  %v15979_v24 = vand.u32 4294901760, %v13359_v51 }
 0x9ea   :  { %v15687_v44 = vand.u32 4294901760, %v13340_v7  ;;  %v6687_v55 = vand.u32 4294901760, %v6686_v26 }
 0x9eb   :  { %6236 = vmatpush.msrb.mxu0 %v13269_v10  ;;  %6429 = vmatpush.msrb.mxu3 %v13269_v10  ;;  %v13280_v48 = vsub.f32 %v6222_v0, %v13269_v10 }
 0x9ec   :  { %v6692_v45 = vsub.f32 %v13340_v7, %v15687_v44  ;;  %v10232_v44 = vld [vmem:[%s15625_s8 + $0x298] sm:$0xff] }
 0x9ed   :  { %6238 = vmatpush.msrb.mxu0 %v13247_v49  ;;  %6373 = vmatpush.msrb.mxu2 %v13280_v48  ;;  %v6307_v42 = vand.u32 4294901760, %v13280_v48  ;;  %v13407_v8 = vand.u32 4294901760, %v10232_v44 }
 0x9ee   :  { %6431 = vmatpush.msrb.mxu3 %v13247_v49  ;;  %v6693_v26 = vand.u32 4294901760, %v6692_v45  ;;  %v15980_v45 = vand.u32 4294901760, %v13283_v3 }
 0x9ef   :  { %6240 = vmatpush.msrb.mxu0 %v13256_v35  ;;  %6376 = vmatpush.msrb.mxu2 %v13259_v33  ;;  %v6308_v21 = vsub.f32 %v13280_v48, %v6307_v42  ;;  %v13347_v48 = vand.u32 4294901760, %v6210_v61 }
 0x9f0   :  { %6433 = vmatpush.msrb.mxu3 %v13256_v35 }
 0x9f1   :  { %6242 = vmatpush.msrb.mxu0 %v13261_v59  ;;  %6379 = vmatpush.msrb.mxu2 %v13283_v3  ;;  %v6309_v0 = vand.u32 4294901760, %v6308_v21  ;;  %v6320_v21 = vsub.f32 %v13283_v3, %v15685_v63  ;;  %v13390_v38 = vsub.f32 %v6210_v61, %v13347_v48  ;;  %v6213_v63 = vsel %vm4257_vm7, %v10210_v13, 0 }
 0x9f2   :  { %6435 = vmatpush.msrb.mxu3 %v13261_v59  ;;  %v15978_v13 = vand.u32 4294901760, %v13259_v33  ;;  %v13422_v20 = vand.u32 4294901760, %v6213_v63  ;;  %v10230_v33 = vld [vmem:[%s15625_s8 + $0x288] sm:$0xff]  ;;  %v15982_v3 = vand.u32 4294901760, %v13286_v6 }
 0x9f3   :  { %6244 = vmatpush.msrb.mxu0 %v13264_v57  ;;  %6310 = vmatpush.msrb.mxu1 %v6309_v0  ;;  %v6315_v0 = vand.u32 4294901760, %v6314_v11  ;;  %v13393_v11 = vsub.f32 %v10234_v14, %v13371_v4  ;;  %v6321_v61 = vand.u32 4294901760, %v6320_v21  ;;  %v6327_v14 = vand.u32 4294901760, %v6326_v53  ;;  %v10211_v53 = vld [vmem:[%s15628_s7 + $0x140] sm:$0xff] }
 0x9f4   :  { %6382 = vmatpush.msrb.mxu2 %v13286_v6  ;;  %6437 = vmatpush.msrb.mxu3 %v13264_v57  ;;  %v6698_v21 = vsub.f32 %v13359_v51, %v15979_v24  ;;  %v13439_v24 = vand.u32 4294901760, %v10230_v33  ;;  %v13459_v56 = vsub.f32 %v6213_v63, %v13422_v20 }
 0x9f5   :  { %6250 = vmatmul.f32.vlgmr.msrb.gmra.mxu0 %v6249_v58  ;;  %6441 = vmatmul.f32.vlgmr.msrb.gmra.mxu3 %v15975_v22  ;;  %v15977_v58 = vand.u32 4294901760, %v13307_v2 }
 0x9f6   :  { %6489 = vmatpush.msra.mxu0 %v6307_v42  ;;  %6316 = vmatpush.msrb.mxu1 %v6315_v0  ;;  %v10231_v42 = vld [vmem:[%s15625_s8 + $0x290] sm:$0xff]  ;;  %v6257_v0 = vand.u32 4294901760, %v6256_v29 }
 0x9f7   :  { %v6332_v22 = vsub.f32 %v13307_v2, %v15977_v58  ;;  %6385 = vmatpush.msrb.mxu2 %v13307_v2  ;;  %6682 = vmatpush.msra.mxu3 %v6681_v52  ;;  %v13419_v52 = vand.u32 4294901760, %v10231_v42  ;;  %v6263_v58 = vand.u32 4294901760, %v13390_v38 }
 0x9f8   :  { %6388 = vmatmul.f32.vlgmr.msrb.gmra.mxu2 %v13253_v39  ;;  %6493 = vmatpush.msra.mxu0 %v15978_v13  ;;  %v13426_v39 = vsub.f32 %v10232_v44, %v13407_v8 }
 0x9f9   :  { %6322 = vmatpush.msrb.mxu1 %v6321_v61  ;;  %6611 = vmatpush.msra.mxu2 %v13275_v32  ;;  %v15981_v61 = vand.u32 4294901760, %v13393_v11  ;;  %v13437_v13 = vsub.f32 %v10231_v42, %v13419_v52  ;;  %v6333_v44 = vand.u32 4294901760, %v6332_v22  ;;  %v6699_v42 = vand.u32 4294901760, %v6698_v21 }
 0x9fa   :  { %6497 = vmatpush.msra.mxu0 %v15980_v45  ;;  %6688 = vmatpush.msra.mxu3 %v6687_v55  ;;  %v10229_v55 = vld [vmem:[%s15625_s8 + $0x280] sm:$0xff]  ;;  %v15983_v45 = vand.u32 4294901760, %v13403_v16  ;;  %v6715_v22 = vand.u32 4294901760, %v13426_v39  ;;  %v6264_v40 = vsub.f32 %v13390_v38, %v6263_v58  ;;  %v6216_v21 = vsel %vm4257_vm7, %v10211_v53, 0 }
 0x9fb   :  { %v6704_v29 = vsub.f32 %v13393_v11, %v15981_v61  ;;  %6328 = vmatpush.msrb.mxu1 %v6327_v14  ;;  %6613 = vmatpush.msra.mxu2 %v13298_v43  ;;  %v13455_v61 = vsub.f32 %v10230_v33, %v13439_v24  ;;  %v13461_v6 = vand.u32 4294901760, %v10229_v55  ;;  %v6721_v33 = vand.u32 4294901760, %v13437_v13 }
 0x9fc   :  { %6501 = vmatpush.msra.mxu0 %v15982_v3  ;;  %6694 = vmatpush.msra.mxu3 %v6693_v26  ;;  %v6710_v14 = vsub.f32 %v13403_v16, %v15983_v45  ;;  %v15984_v26 = vand.u32 4294901760, %v13310_v60  ;;  %v6716_v45 = vsub.f32 %v13426_v39, %v6715_v22 }
 0x9fd   :  { %6334 = vmatpush.msrb.mxu1 %v6333_v44  ;;  %6258 = vmatmul.f32.gmra.mxu0 %v6257_v0  ;;  %v6705_v3 = vand.u32 4294901760, %v6704_v29  ;;  %v15985_v44 = vand.u32 4294901760, %v13307_v2  ;;  %v13472_v63 = vsub.f32 %v10229_v55, %v13461_v6  ;;  %v6727_v53 = vand.u32 4294901760, %v13455_v61 }
 0x9fe   :  { %6336 = vmatmul.f32.vlgmr.msrb.gmra.mxu1 %v13245_v27  ;;  %6447 = vmatmul.f32.gmra.mxu3 %v15984_v26  ;;  %v6711_v0 = vand.u32 4294901760, %v6710_v14  ;;  %v6265_v29 = vand.u32 4294901760, %v6264_v40  ;;  %v6271_v2 = vand.u32 4294901760, %v13459_v56  ;;  %v13481_v26 = vand.u32 4294901760, %v6216_v21  ;;  %v10212_v40 = vld [vmem:[%s15628_s7 + $0x148] sm:$0x3f] }
 0x9ff   :  { %6505 = vmatpush.msra.mxu0 %v15985_v44  ;;  %6543 = vmatpush.msra.mxu1 %v13269_v10  ;;  %v6722_v10 = vsub.f32 %v13437_v13, %v6721_v33  ;;  %v6728_v55 = vsub.f32 %v13455_v61, %v6727_v53  ;;  %v6219_v14 = vsel %vm4257_vm7, %v10212_v40, 0  ;;  %v15986_v40 = vand.u32 4294901760, %v13296_v19 }
 0xa00   :  { %6393 = vmatmul.f32.gmra.mxu2 %v13310_v60  ;;  %6700 = vmatpush.msra.mxu3 %v6699_v42  ;;  %v6717_v60 = vand.u32 4294901760, %v6716_v45  ;;  %v6278_v42 = vsub.f32 %v6216_v21, %v13481_v26  ;;  %v13509_v45 = vand.u32 4294901760, %v6219_v14 }
 0xa01   :  { %6545 = vmatpush.msra.mxu1 %v13247_v49  ;;  %6615 = vmatpush.msra.mxu2 %v13321_v17  ;;  %v6733_v49 = vand.u32 4294901760, %v13472_v63 }
 0xa02   :  { %6706 = vmatpush.msra.mxu3 %v6705_v3  ;;  %6766 = vmatpush.msrb.mxu0 %v13296_v19  ;;  %v6723_v3 = vand.u32 4294901760, %v6722_v10  ;;  %v6279_v21 = vand.u32 4294901760, %v6278_v42 }
 0xa03   :  { %6547 = vmatpush.msra.mxu1 %v13256_v35  ;;  %6617 = vmatpush.msra.mxu2 %v13342_v15  ;;  %v6272_v35 = vsub.f32 %v13459_v56, %v6271_v2  ;;  %v6734_v44 = vsub.f32 %v13472_v63, %v6733_v49 }
 0xa04   :  { %6712 = vmatpush.msra.mxu3 %v6711_v0  ;;  %6769 = vmatpush.msrb.mxu0 %v13319_v46 }
 0xa05   :  { %6549 = vmatpush.msra.mxu1 %v13261_v59  ;;  %6266 = vmatmul.f32.gmra.mxu0 %v6265_v29  ;;  %v6729_v59 = vand.u32 4294901760, %v6728_v55  ;;  %v6273_v0 = vand.u32 4294901760, %v6272_v35 }
 0xa06   :  { %6340 = vmatmul.f32.gmra.mxu1 %v13272_v9  ;;  %6453 = vmatmul.f32.gmra.mxu3 %v6263_v58  ;;  %v6286_v58 = vsub.f32 %v6219_v14, %v13509_v45 }
 0xa07   :  { %6551 = vmatpush.msra.mxu1 %v13264_v57  ;;  %6619 = vmatpush.msra.mxu2 %v13371_v4  ;;  %v6735_v57 = vand.u32 4294901760, %v6734_v44 }
 0xa08   :  { %6398 = vmatmul.f32.gmra.mxu2 %v13390_v38  ;;  %6718 = vmatpush.msra.mxu3 %v6717_v60  ;;  %v6280_v38 = vsub.f32 %v6278_v42, %v6279_v21  ;;  %v6287_v10 = vand.u32 4294901760, %v6286_v58 }
 0xa09   :  { %6621 = vmatpush.msra.mxu2 %v13382_v25  ;;  %6772 = vmatpush.msrb.mxu0 %v13340_v7 }
 0xa0a   :  { %6724 = vmatpush.msra.mxu3 %v6723_v3  ;;  %6827 = vmatpush.msrb.mxu1 %v13275_v32  ;;  %v6281_v29 = vand.u32 4294901760, %v6280_v38 }
 0xa0b   :  { %6623 = vmatpush.msra.mxu2 %v13407_v8  ;;  %6775 = vmatpush.msrb.mxu0 %v13359_v51 }
 0xa0c   :  { %6730 = vmatpush.msra.mxu3 %v6729_v59  ;;  %6829 = vmatpush.msrb.mxu1 %v13298_v43 }
 0xa0d   :  { %6274 = vmatmul.f32.gmra.mxu0 %v6273_v0  ;;  %6625 = vmatpush.msra.mxu2 %v13419_v52 }
 0xa0e   :  { %6344 = vmatmul.f32.gmra.mxu1 %v13347_v48  ;;  %6459 = vmatmul.f32.gmra.mxu3 %v6271_v2  ;;  %v15987_v2 = vand.u32 4294901760, %v13319_v46  ;;  %v15990_v46 = vand.u32 4294901760, %v13393_v11 }
 0xa0f   :  { %6627 = vmatpush.msra.mxu2 %v13439_v24  ;;  %6736 = vmatpush.msra.mxu3 %v6735_v57 }
 0xa10   :  { %6403 = vmatmul.f32.gmra.mxu2 %v13459_v56  ;;  %6778 = vmatpush.msrb.mxu0 %v13393_v11  ;;  %v6288_v56 = vsub.f32 %v6286_v58, %v6287_v10 }
 0xa11   :  { %6951 = vmatpush.msrb.mxu3 %v13275_v32  ;;  %6629 = vmatpush.msra.mxu2 %v13461_v6  ;;  %v15988_v32 = vand.u32 4294901760, %v13340_v7 }
 0xa12   :  { %6781 = vmatpush.msrb.mxu0 %v13403_v16  ;;  %6831 = vmatpush.msrb.mxu1 %v13321_v17  ;;  %v6289_v19 = vand.u32 4294901760, %v6288_v56 }
 0xa13   :  { %6886 = vmatpush.msrb.mxu2 %v15986_v40  ;;  %6953 = vmatpush.msrb.mxu3 %v13298_v43  ;;  %v15989_v43 = vand.u32 4294901760, %v13359_v51 }
 0xa14   :  { %6833 = vmatpush.msrb.mxu1 %v13342_v15  ;;  %6784 = vmatpush.msrb.mxu0 %v13426_v39 }
 0xa15   :  { %6890 = vmatpush.msrb.mxu2 %v15987_v2  ;;  %6955 = vmatpush.msrb.mxu3 %v13321_v17  ;;  %v15991_v17 = vand.u32 4294901760, %v13403_v16 }
 0xa16   :  { %6282 = vmatmul.f32.gmra.mxu0 %v6281_v29  ;;  %6348 = vmatmul.f32.gmra.mxu1 %v13422_v20 }
 0xa17   :  { %6465 = vmatmul.f32.gmra.mxu3 %v6279_v21  ;;  %6894 = vmatpush.msrb.mxu2 %v15988_v32 }
 0xa18   :  { %6957 = vmatpush.msrb.mxu3 %v13342_v15  ;;  %6408 = vmatmul.f32.gmra.mxu2 %v6278_v42 }
 0xa19   :  { %6898 = vmatpush.msrb.mxu2 %v15989_v43  ;;  %6787 = vmatpush.msrb.mxu0 %v13437_v13 }
 0xa1a   :  { %6959 = vmatpush.msrb.mxu3 %v13371_v4  ;;  %6835 = vmatpush.msrb.mxu1 %v13371_v4 }
 0xa1b   :  { %6902 = vmatpush.msrb.mxu2 %v15990_v46  ;;  %6790 = vmatpush.msrb.mxu0 %v13455_v61 }
 0xa1c   :  { %6961 = vmatpush.msrb.mxu3 %v13382_v25  ;;  %6837 = vmatpush.msrb.mxu1 %v13382_v25  ;;  %v15995_v25 = vld [vmem:[#allocation28_spill] sm:$0xff] }
 0xa1d   :  { %6906 = vmatpush.msrb.mxu2 %v15991_v17  ;;  %6793 = vmatpush.msrb.mxu0 %v13472_v63 }
 0xa1e   :  { %6290 = vmatmul.f32.gmra.mxu0 %v6289_v19  ;;  %6352 = vmatmul.f32.gmra.mxu1 %v13481_v26 }
 0xa1f   :  { %6471 = vmatmul.f32.gmra.mxu3 %v6287_v10  ;;  %6910 = vmatpush.msrb.mxu2 %v6715_v22 }
 0xa20   :  { %6963 = vmatpush.msrb.mxu3 %v13407_v8  ;;  %6413 = vmatmul.f32.gmra.mxu2 %v6286_v58 }
 0xa21   :  { %6914 = vmatpush.msrb.mxu2 %v6721_v33  ;;  %6839 = vmatpush.msrb.mxu1 %v13407_v8  ;;  %v15992_v8 = vld [vmem:[#allocation8_spill] sm:$0xff] }
 0xa22   :  { %6965 = vmatpush.msrb.mxu3 %v13419_v52 }
 0xa23   :  { %6918 = vmatpush.msrb.mxu2 %v6727_v53  ;;  %6841 = vmatpush.msrb.mxu1 %v13419_v52 }
 0xa24   :  { %6967 = vmatpush.msrb.mxu3 %v13439_v24 }
 0xa25   :  { %6922 = vmatpush.msrb.mxu2 %v6733_v49  ;;  %6843 = vmatpush.msrb.mxu1 %v13439_v24 }
 0xa26   :  { %6507 = vmatmul.f32.vlgmr.msra.gmra.mxu0 %v13245_v27  ;;  %6969 = vmatpush.msrb.mxu3 %v13461_v6 }
 0xa27   :  { %6356 = vmatmul.f32.gmra.mxu1 %v13509_v45  ;;  %6738 = vmatmul.f32.vlgmr.msra.gmra.mxu3 %v15842_v36 }
 0xa28   :  { %6635 = vmatmul.f32.vlgmr.msra.gmra.mxu2 %v11615_v37  ;;  %6845 = vmatpush.msrb.mxu1 %v13461_v6 }
 0xa2e   :  { %6511 = vmatmul.f32.gmra.mxu0 %v13272_v9 }
 0xa2f   :  { %6553 = vmatmul.f32.vlgmr.msra.gmra.mxu1 %v13245_v27  ;;  %6742 = vmatmul.f32.gmra.mxu3 %v15849_v28  ;;  %v15994_v27 = vld [vmem:[#allocation30_spill] sm:$0xff] }
 0xa30   :  { %6643 = vmatmul.f32.gmra.mxu2 %v15841_v1 }
 0xa36   :  { %6515 = vmatmul.f32.gmra.mxu0 %v13347_v48 }
 0xa37   :  { %6557 = vmatmul.f32.gmra.mxu1 %v13272_v9  ;;  %6746 = vmatmul.f32.gmra.mxu3 %v15856_v30 }
 0xa38   :  { %6651 = vmatmul.f32.gmra.mxu2 %v15847_v47 }
 0xa3e   :  { %6519 = vmatmul.f32.gmra.mxu0 %v13422_v20 }
 0xa3f   :  { %6561 = vmatmul.f32.gmra.mxu1 %v13347_v48  ;;  %6750 = vmatmul.f32.gmra.mxu3 %v15863_v31  ;;  %v16000_v48 = vld [vmem:[#allocation32_spill] sm:$0xff] }
 0xa40   :  { %6659 = vmatmul.f32.gmra.mxu2 %v15855_v5 }
 0xa46   :  { %6523 = vmatmul.f32.gmra.mxu0 %v13481_v26 }
 0xa47   :  { %6565 = vmatmul.f32.gmra.mxu1 %v13422_v20  ;;  %6754 = vmatmul.f32.gmra.mxu3 %v15870_v12 }
 0xa48   :  { %6667 = vmatmul.f32.gmra.mxu2 %v15862_v54 }
 0xa4e   :  { %6527 = vmatmul.f32.gmra.mxu0 %v13509_v45 }
 0xa4f   :  { %6569 = vmatmul.f32.gmra.mxu1 %v13481_v26  ;;  %6971 = vmatmul.f32.vlgmr.msrb.gmra.mxu3 %v15842_v36 }
 0xa50   :  { %6924 = vmatmul.f32.vlgmr.msrb.gmra.mxu2 %v15842_v36 }
 0xa56   :  { %6796 = vmatmul.f32.vlgmr.msrb.gmra.mxu0 %v15838_v50 }
 0xa57   :  { %6573 = vmatmul.f32.gmra.mxu1 %v13509_v45  ;;  %6975 = vmatmul.f32.gmra.mxu3 %v15849_v28 }
 0xa58   :  { %6928 = vmatmul.f32.gmra.mxu2 %v15849_v28 }
 0xa5e   :  { %6801 = vmatmul.f32.gmra.mxu0 %v15844_v34 }
 0xa5f   :  { %6849 = vmatmul.f32.vlgmr.msrb.gmra.mxu1 %v15836_v41  ;;  %6979 = vmatmul.f32.gmra.mxu3 %v15856_v30 }
 0xa60   :  { %6932 = vmatmul.f32.gmra.mxu2 %v15856_v30 }
 0xa66   :  { %6806 = vmatmul.f32.gmra.mxu0 %v15852_v23 }
 0xa67   :  { %6855 = vmatmul.f32.gmra.mxu1 %v15843_v62  ;;  %6983 = vmatmul.f32.gmra.mxu3 %v15863_v31 }
 0xa68   :  { %6936 = vmatmul.f32.gmra.mxu2 %v15863_v31 }
 0xa6e   :  { %6811 = vmatmul.f32.gmra.mxu0 %v15860_v18 }
 0xa6f   :  { %6861 = vmatmul.f32.gmra.mxu1 %v15992_v8  ;;  %6987 = vmatmul.f32.gmra.mxu3 %v15870_v12 }
 0xa70   :  { %6940 = vmatmul.f32.gmra.mxu2 %v15870_v12 }
 0xa72   :  { %v13609_v20 = vpop.f32.mrf.mxu0 }
 0xa73   :  { %15993 = vst [vmem:[#allocation144_spill] sm:$0xff] %v13609_v20 }
 0xa76   :  { %6816 = vmatmul.f32.gmra.mxu0 %v15994_v27 }
 0xa77   :  { %6867 = vmatmul.f32.gmra.mxu1 %v15995_v25 }
 0xa78   :  { %v13613_v9 = vpop.f32.mrf.mxu3 }
 0xa79   :  { %15996 = vst [vmem:[#allocation145_spill] sm:$0xff] %v13613_v9 }
 0xa7a   :  { %v13615_v7 = vpop.f32.mrf.mxu0 }
 0xa7b   :  { %15997 = vst [vmem:[#allocation146_spill] sm:$0xff] %v13615_v7  ;;  %v13617_v15 = vpop.f32.mrf.mxu1  ;;  %v13619_v4 = vpop.f32.mrf.mxu2 }
 0xa7c   :  { %15998 = vst [vmem:[#allocation147_spill] sm:$0xff] %v13617_v15 }
 0xa7d   :  { %15999 = vst [vmem:[#allocation148_spill] sm:$0xff] %v13619_v4 }
 0xa7f   :  { %6873 = vmatmul.f32.gmra.mxu1 %v16000_v48 }
 0xa81   :  { %v13622_v51 = vpop.f32.mrf.mxu3 }
 0xa82   :  { %16001 = vst [vmem:[#allocation149_spill] sm:$0xff] %v13622_v51  ;;  %v13624_v11 = vpop.f32.mrf.mxu0 }
 0xa83   :  { %16002 = vst [vmem:[#allocation150_spill] sm:$0xff] %v13624_v11  ;;  %v13626_v16 = vpop.f32.mrf.mxu1  ;;  %v13628_v52 = vpop.f32.mrf.mxu2 }
 0xa84   :  { %16003 = vst [vmem:[#allocation151_spill] sm:$0xff] %v13626_v16 }
 0xa85   :  { %16004 = vst [vmem:[#allocation152_spill] sm:$0xff] %v13628_v52 }
 0xa89   :  { %v13630_v39 = vpop.f32.mrf.mxu3 }
 0xa8a   :  { %16005 = vst [vmem:[#allocation153_spill] sm:$0xff] %v13630_v39  ;;  %v13632_v13 = vpop.f32.mrf.mxu0 }
 0xa8b   :  { %16006 = vst [vmem:[#allocation154_spill] sm:$0xff] %v13632_v13  ;;  %v13634_v24 = vpop.f32.mrf.mxu1  ;;  %v13636_v22 = vpop.f32.mrf.mxu2 }
 0xa8c   :  { %16007 = vst [vmem:[#allocation155_spill] sm:$0xff] %v13634_v24 }
 0xa8d   :  { %16008 = vst [vmem:[#allocation156_spill] sm:$0xff] %v13636_v22 }
 0xa91   :  { %v13638_v61 = vpop.f32.mrf.mxu3 }
 0xa92   :  { %16009 = vst [vmem:[#allocation157_spill] sm:$0xff] %v13638_v61 }
 0xa93   :  { %v13640_v6 = vpop.f32.mrf.mxu0  ;;  %v13642_v33 = vpop.f32.mrf.mxu1 }
 0xa94   :  { %16010 = vst [vmem:[#allocation158_spill] sm:$0xff] %v13640_v6  ;;  %v13644_v63 = vpop.f32.mrf.mxu2 }
 0xa95   :  { %16011 = vst [vmem:[#allocation159_spill] sm:$0xff] %v13642_v33 }
 0xa96   :  { %16012 = vst [vmem:[#allocation160_spill] sm:$0xff] %v13644_v63 }
 0xa9a   :  { %v13646_v53 = vpop.f32.mrf.mxu3 }
 0xa9b   :  { %16013 = vst [vmem:[#allocation161_spill] sm:$0xff] %v13646_v53  ;;  %v13648_v26 = vpop.f32.mrf.mxu0  ;;  %v13650_v49 = vpop.f32.mrf.mxu1 }
 0xa9c   :  { %16014 = vst [vmem:[#allocation162_spill] sm:$0xff] %v13648_v26  ;;  %v13652_v60 = vpop.f32.mrf.mxu2 }
 0xa9d   :  { %16015 = vst [vmem:[#allocation163_spill] sm:$0xff] %v13650_v49 }
 0xa9e   :  { %16016 = vst [vmem:[#allocation164_spill] sm:$0xff] %v13652_v60 }
 0xaa2   :  { %v13654_v55 = vpop.f32.mrf.mxu3 }
 0xaa3   :  { %16017 = vst [vmem:[#allocation165_spill] sm:$0xff] %v13654_v55  ;;  %v13656_v35 = vpop.f32.mrf.mxu0 }
 0xaa4   :  { %16018 = vst [vmem:[#allocation166_spill] sm:$0xff] %v13656_v35  ;;  %v13658_v42 = vpop.f32.mrf.mxu1  ;;  %v13660_v14 = vpop.f32.mrf.mxu2  ;;  %v10223_v35 = vld [vmem:[%s15628_s7 + $0x180] sm:$0xff] }
 0xaa5   :  { %16019 = vst [vmem:[#allocation167_spill] sm:$0xff] %v13658_v42 }
 0xaa6   :  { %16020 = vst [vmem:[#allocation168_spill] sm:$0xff] %v13660_v14 }
 0xaaa   :  { %v6739_v3 = vpop.f32.mrf.mxu3 }
 0xaab   :  { %v13662_v44 = vpop.f32.mrf.mxu0 }
 0xaac   :  { %16021 = vst [vmem:[#allocation169_spill] sm:$0xff] %v13662_v44  ;;  %v13664_v59 = vpop.f32.mrf.mxu1  ;;  %v6636_v0 = vpop.f32.mrf.mxu2 }
 0xaad   :  { %16022 = vst [vmem:[#allocation170_spill] sm:$0xff] %v13664_v59  ;;  %v6740_v33 = vadd.f32 %v6739_v3, %v6636_v0  ;;  %v6992_v3 = vsel %vm4257_vm7, %v10223_v35, 0 }
 0xab2   :  { %v6743_v21 = vpop.f32.mrf.mxu3 }
 0xab3   :  { %v13666_v45 = vpop.f32.mrf.mxu0 }
 0xab4   :  { %16023 = vst [vmem:[#allocation171_spill] sm:$0xff] %v13666_v45  ;;  %v13668_v57 = vpop.f32.mrf.mxu1  ;;  %v6644_v38 = vpop.f32.mrf.mxu2 }
 0xab5   :  { %16024 = vst [vmem:[#allocation172_spill] sm:$0xff] %v13668_v57  ;;  %v6744_v39 = vadd.f32 %v6743_v21, %v6644_v38 }
 0xaba   :  { %v6747_v58 = vpop.f32.mrf.mxu3 }
 0xabb   :  { %v13670_v29 = vpop.f32.mrf.mxu0 }
 0xabc   :  { %16025 = vst [vmem:[#allocation173_spill] sm:$0xff] %v13670_v29  ;;  %v13672_v10 = vpop.f32.mrf.mxu1  ;;  %v6652_v40 = vpop.f32.mrf.mxu2 }
 0xabd   :  { %16026 = vst [vmem:[#allocation174_spill] sm:$0xff] %v13672_v10 }
 0xac2   :  { %v6751_v2 = vpop.f32.mrf.mxu3 }
 0xac3   :  { %v13674_v56 = vpop.f32.mrf.mxu0 }
 0xac4   :  { %16027 = vst [vmem:[#allocation175_spill] sm:$0xff] %v13674_v56  ;;  %v13676_v32 = vpop.f32.mrf.mxu1  ;;  %v6660_v19 = vpop.f32.mrf.mxu2 }
 0xac5   :  { %16028 = vst [vmem:[#allocation176_spill] sm:$0xff] %v13676_v32 }
 0xaca   :  { %v6755_v55 = vpop.f32.mrf.mxu3 }
 0xacb   :  { %v13678_v43 = vpop.f32.mrf.mxu0 }
 0xacc   :  { %16029 = vst [vmem:[#allocation177_spill] sm:$0xff] %v13678_v43  ;;  %v13680_v46 = vpop.f32.mrf.mxu1  ;;  %v6668_v17 = vpop.f32.mrf.mxu2  ;;  %v6752_v43 = vadd.f32 %v6751_v2, %v6660_v19 }
 0xacd   :  { %16030 = vst [vmem:[#allocation178_spill] sm:$0xff] %v13680_v46  ;;  %v6748_v46 = vadd.f32 %v6747_v58, %v6652_v40  ;;  %v6756_v21 = vadd.f32 %v6755_v55, %v6668_v17 }
 0xad2   :  { %v6972_v26 = vpop.f32.mrf.mxu3 }
 0xad3   :  { %v6797_v14 = vpop.f32.mrf.mxu0 }
 0xad4   :  { %v13682_v53 = vpop.f32.mrf.mxu1  ;;  %v6925_v42 = vpop.f32.mrf.mxu2  ;;  %v6798_v51 = vadd.f32 %v6797_v14, %v6740_v33 }
 0xad5   :  { %16031 = vst [vmem:[#allocation179_spill] sm:$0xff] %v13682_v53 }
 0xada   :  { %v6976_v49 = vpop.f32.mrf.mxu3 }
 0xadb   :  { %v6802_v60 = vpop.f32.mrf.mxu0 }
 0xadc   :  { %v6850_v29 = vpop.f32.mrf.mxu1  ;;  %v6929_v61 = vpop.f32.mrf.mxu2  ;;  %v6803_v57 = vadd.f32 %v6802_v60, %v6744_v39 }
 0xadd   :  { %v6851_v9 = vadd.f32 %v6850_v29, %v6798_v51  ;;  %v10224_v51 = vld [vmem:[%s15628_s7 + $0x188] sm:$0xff] }
 0xadf   :  { %v6926_v60 = vadd.f32 %v6925_v42, %v6851_v9 }
 0xae2   :  { %v6980_v32 = vpop.f32.mrf.mxu3 }
 0xae3   :  { %v6807_v6 = vpop.f32.mrf.mxu0 }
 0xae4   :  { %v6856_v56 = vpop.f32.mrf.mxu1  ;;  %v6933_v10 = vpop.f32.mrf.mxu2  ;;  %v6808_v22 = vadd.f32 %v6807_v6, %v6748_v46  ;;  %v10253_v46 = vld [vmem:[%s15625_s8 + $0x130] sm:$0xff] }
 0xae5   :  { %v6857_v11 = vadd.f32 %v6856_v56, %v6803_v57 }
 0xae7   :  { %v6930_v0 = vadd.f32 %v6929_v61, %v6857_v11 }
 0xaea   :  { %v6984_v59 = vpop.f32.mrf.mxu3 }
 0xaeb   :  { %v6812_v45 = vpop.f32.mrf.mxu0 }
 0xaec   :  { %v6862_v63 = vpop.f32.mrf.mxu1  ;;  %v6813_v13 = vadd.f32 %v6812_v45, %v6752_v43  ;;  %v6937_v53 = vpop.f32.mrf.mxu2  ;;  %v10225_v43 = vld [vmem:[%s15628_s7 + $0x190] sm:$0xff] }
 0xaed   :  { %v6863_v52 = vadd.f32 %v6862_v63, %v6808_v22  ;;  %v6977_v22 = vadd.f32 %v6976_v49, %v6930_v0 }
 0xaef   :  { %v6934_v39 = vadd.f32 %v6933_v10, %v6863_v52  ;;  %v6995_v52 = vsel %vm4257_vm7, %v10224_v51, 0  ;;  %v13704_v55 = vand.u32 4294901760, %v6977_v22 }
 0xaf0   :  { %v13715_v58 = vand.u32 4294901760, %v6995_v52 }
 0xaf1   :  { %v6981_v63 = vadd.f32 %v6980_v32, %v6934_v39  ;;  %v13729_v32 = vsub.f32 %v6977_v22, %v13704_v55 }
 0xaf2   :  { %v6988_v11 = vpop.f32.mrf.mxu3  ;;  %v13753_v39 = vsub.f32 %v6995_v52, %v13715_v58 }
 0xaf3   :  { %v6817_v2 = vpop.f32.mrf.mxu0  ;;  %v13699_v61 = vand.u32 4294901760, %v6981_v63  ;;  %v15691_v51 = vand.u32 4294901760, %v13729_v32 }
 0xaf4   :  { %v6868_v44 = vpop.f32.mrf.mxu1  ;;  %v6818_v45 = vadd.f32 %v6817_v2, %v6756_v21  ;;  %v13741_v2 = vand.u32 4294901760, %v10253_v46  ;;  %v16033_v7 = vand.u32 4294901760, %v13753_v39 }
 0xaf5   :  { %v6869_v24 = vadd.f32 %v6868_v44, %v6813_v13  ;;  %v13688_v13 = vand.u32 4294901760, %v6992_v3  ;;  %v6941_v44 = vpop.f32.mrf.mxu2  ;;  %v13726_v56 = vsub.f32 %v6981_v63, %v13699_v61 }
 0xaf6   :  { %v7044_v4 = vsub.f32 %v13753_v39, %v16033_v7 }
 0xaf7   :  { %v6938_v16 = vadd.f32 %v6937_v53, %v6869_v24  ;;  %v6973_v24 = vadd.f32 %v6972_v26, %v6926_v60  ;;  %v10254_v26 = vld [vmem:[%s15625_s8 + $0x138] sm:$0xf]  ;;  %v6998_v60 = vsel %vm4257_vm7, %v10225_v43, 0 }
 0xaf8   :  { %v7390_v29 = vsel %vm1246_vm2, %v10254_v26, 0  ;;  %v10250_v43 = vld [vmem:[%s15625_s8 + $0x118] sm:$0xff] }
 0xaf9   :  { %v6985_v6 = vadd.f32 %v6984_v59, %v6938_v16  ;;  %v13696_v16 = vsub.f32 %v6992_v3, %v13688_v13  ;;  %v13707_v42 = vand.u32 4294901760, %v6973_v24  ;;  %v13718_v10 = vand.u32 4294901760, %v7390_v29 }
 0xafb   :  { %v13690_v57 = vand.u32 4294901760, %v6985_v6  ;;  %v15693_v38 = vand.u32 4294901760, %v13696_v16  ;;  %v13739_v17 = vsub.f32 %v7390_v29, %v13718_v10  ;;  %v13750_v0 = vsub.f32 %v6973_v24, %v13707_v42  ;;  %v10251_v24 = vld [vmem:[%s15625_s8 + $0x120] sm:$0xff] }
 0xafc   :  { %v6874_v33 = vpop.f32.mrf.mxu1  ;;  %v13785_v52 = vand.u32 4294901760, %v10251_v24  ;;  %v13814_v29 = vand.u32 4294901760, %v10250_v43 }
 0xafd   :  { %v6875_v14 = vadd.f32 %v6874_v33, %v6818_v45  ;;  %v13702_v49 = vsub.f32 %v6985_v6, %v13690_v57  ;;  %v7036_v3 = vsub.f32 %v13696_v16, %v15693_v38  ;;  %v10252_v6 = vld [vmem:[%s15625_s8 + $0x128] sm:$0xff]  ;;  %v15688_v45 = vand.u32 4294901760, %v13739_v17 }
 0xafe   :  { %v13762_v33 = vsub.f32 %v10253_v46, %v13741_v2 }
 0xaff   :  { %v6942_v53 = vadd.f32 %v6941_v44, %v6875_v14  ;;  %v15689_v19 = vand.u32 4294901760, %v13702_v49  ;;  %v13764_v14 = vand.u32 4294901760, %v10252_v6  ;;  %v15692_v44 = vand.u32 4294901760, %v13726_v56 }
 0xb00   :  { %v7037_v26 = vand.u32 4294901760, %v7036_v3  ;;  %v13802_v3 = vsub.f32 %v10251_v24, %v13785_v52  ;;  %v10249_v24 = vld [vmem:[%s15625_s8 + $0x110] sm:$0xff] }
 0xb01   :  { %v6989_v9 = vadd.f32 %v6988_v11, %v6942_v53  ;;  %v7102_v63 = vsub.f32 %v13702_v49, %v15689_v19  ;;  %v7468_v53 = vsub.f32 %v13739_v17, %v15688_v45  ;;  %v15690_v11 = vand.u32 4294901760, %v13762_v33 }
 0xb02   :  { %v7114_v19 = vsub.f32 %v13729_v32, %v15691_v51  ;;  %v13825_v38 = vand.u32 4294901760, %v10249_v24 }
 0xb03   :  { %v7010_v35 = vsel %vm4276_vm8, %v6989_v9, 0  ;;  %v13783_v9 = vsub.f32 %v10252_v6, %v13764_v14  ;;  %v7474_v6 = vsub.f32 %v13762_v33, %v15690_v11  ;;  %v10226_v11 = vld [vmem:[%s15628_s7 + $0x198] sm:$0xff]  ;;  %v7469_v46 = vand.u32 4294901760, %v7468_v53 }
 0xb04   :  { %v13712_v59 = vand.u32 4294901760, %v7010_v35  ;;  %v16032_v53 = vand.u32 4294901760, %v13696_v16  ;;  %v13846_v7 = vsub.f32 %v10249_v24, %v13825_v38  ;;  %v16036_v24 = vand.u32 4294901760, %v13802_v3 }
 0xb05   :  { %v15694_v45 = vand.u32 4294901760, %v13783_v9  ;;  %v7475_v20 = vand.u32 4294901760, %v7474_v6 }
 0xb06   :  { %7024 = vmatpush.msra.mxu0 %v13712_v59  ;;  %7217 = vmatpush.msra.mxu3 %v13712_v59  ;;  %v13723_v40 = vsub.f32 %v7010_v35, %v13712_v59 }
 0xb07   :  { %v7480_v51 = vsub.f32 %v13783_v9, %v15694_v45  ;;  %v10248_v45 = vld [vmem:[%s15625_s8 + $0x108] sm:$0xff] }
 0xb08   :  { %7026 = vmatpush.msra.mxu0 %v13690_v57  ;;  %7161 = vmatpush.msra.mxu2 %v13723_v40  ;;  %v7095_v21 = vand.u32 4294901760, %v13723_v40  ;;  %v13850_v25 = vand.u32 4294901760, %v10248_v45 }
 0xb09   :  { %7219 = vmatpush.msra.mxu3 %v13690_v57  ;;  %v7481_v6 = vand.u32 4294901760, %v7480_v51  ;;  %v16037_v51 = vand.u32 4294901760, %v13726_v56 }
 0xb0a   :  { %7028 = vmatpush.msra.mxu0 %v13699_v61  ;;  %7164 = vmatpush.msra.mxu2 %v13702_v49  ;;  %v7096_v22 = vsub.f32 %v13723_v40, %v7095_v21  ;;  %v13790_v40 = vand.u32 4294901760, %v6998_v60 }
 0xb0b   :  { %7221 = vmatpush.msra.mxu3 %v13699_v61 }
 0xb0c   :  { %7030 = vmatpush.msra.mxu0 %v13704_v55  ;;  %7167 = vmatpush.msra.mxu2 %v13726_v56  ;;  %v7097_v35 = vand.u32 4294901760, %v7096_v22  ;;  %v7108_v22 = vsub.f32 %v13726_v56, %v15692_v44  ;;  %v13833_v15 = vsub.f32 %v6998_v60, %v13790_v40  ;;  %v7001_v44 = vsel %vm4257_vm7, %v10226_v11, 0 }
 0xb0d   :  { %7223 = vmatpush.msra.mxu3 %v13704_v55  ;;  %v16035_v11 = vand.u32 4294901760, %v13702_v49  ;;  %v13865_v48 = vand.u32 4294901760, %v7001_v44  ;;  %v10246_v49 = vld [vmem:[%s15625_s8 + $0xf8] sm:$0xff]  ;;  %v16039_v56 = vand.u32 4294901760, %v13729_v32 }
 0xb0e   :  { %7032 = vmatpush.msra.mxu0 %v13707_v42  ;;  %7098 = vmatpush.msra.mxu1 %v7097_v35  ;;  %v7103_v35 = vand.u32 4294901760, %v7102_v63  ;;  %v13836_v63 = vsub.f32 %v10250_v43, %v13814_v29  ;;  %v7109_v60 = vand.u32 4294901760, %v7108_v22  ;;  %v7115_v43 = vand.u32 4294901760, %v7114_v19  ;;  %v10227_v19 = vld [vmem:[%s15628_s7 + $0x1a0] sm:$0xff] }
 0xb0f   :  { %7170 = vmatpush.msra.mxu2 %v13729_v32  ;;  %7225 = vmatpush.msra.mxu3 %v13707_v42  ;;  %v7486_v22 = vsub.f32 %v13802_v3, %v16036_v24  ;;  %v13882_v24 = vand.u32 4294901760, %v10246_v49  ;;  %v13902_v8 = vsub.f32 %v7001_v44, %v13865_v48 }
 0xb10   :  { %7038 = vmatmul.f32.vlgmr.msra.gmra.mxu0 %v7037_v26  ;;  %7229 = vmatmul.f32.vlgmr.msra.gmra.mxu3 %v16032_v53  ;;  %v16034_v26 = vand.u32 4294901760, %v13750_v0 }
 0xb11   :  { %7277 = vmatpush.msrb.mxu0 %v7095_v21  ;;  %7104 = vmatpush.msra.mxu1 %v7103_v35  ;;  %v10247_v21 = vld [vmem:[%s15625_s8 + $0x100] sm:$0xff]  ;;  %v7045_v35 = vand.u32 4294901760, %v7044_v4 }
 0xb12   :  { %v7120_v53 = vsub.f32 %v13750_v0, %v16034_v26  ;;  %7173 = vmatpush.msra.mxu2 %v13750_v0  ;;  %7470 = vmatpush.msrb.mxu3 %v7469_v46  ;;  %v13862_v46 = vand.u32 4294901760, %v10247_v21  ;;  %v7051_v26 = vand.u32 4294901760, %v13833_v15 }
 0xb13   :  { %7176 = vmatmul.f32.vlgmr.msra.gmra.mxu2 %v13696_v16  ;;  %7281 = vmatpush.msrb.mxu0 %v16035_v11  ;;  %v13869_v16 = vsub.f32 %v10248_v45, %v13850_v25 }
 0xb14   :  { %7110 = vmatpush.msra.mxu1 %v7109_v60  ;;  %7399 = vmatpush.msrb.mxu2 %v13718_v10  ;;  %v16038_v60 = vand.u32 4294901760, %v13836_v63  ;;  %v13880_v11 = vsub.f32 %v10247_v21, %v13862_v46  ;;  %v7121_v45 = vand.u32 4294901760, %v7120_v53  ;;  %v7487_v21 = vand.u32 4294901760, %v7486_v22 }
 0xb15   :  { %7285 = vmatpush.msrb.mxu0 %v16037_v51  ;;  %7476 = vmatpush.msrb.mxu3 %v7475_v20  ;;  %v10245_v20 = vld [vmem:[%s15625_s8 + $0xf0] sm:$0xff]  ;;  %v16040_v51 = vand.u32 4294901760, %v13846_v7  ;;  %v7503_v53 = vand.u32 4294901760, %v13869_v16  ;;  %v7052_v27 = vsub.f32 %v13833_v15, %v7051_v26  ;;  %v7004_v22 = vsel %vm4257_vm7, %v10227_v19, 0 }
 0xb16   :  { %v7492_v4 = vsub.f32 %v13836_v63, %v16038_v60  ;;  %7116 = vmatpush.msra.mxu1 %v7115_v43  ;;  %7401 = vmatpush.msrb.mxu2 %v13741_v2  ;;  %v13898_v60 = vsub.f32 %v10246_v49, %v13882_v24  ;;  %v13904_v32 = vand.u32 4294901760, %v10245_v20  ;;  %v7509_v49 = vand.u32 4294901760, %v13880_v11 }
 0xb17   :  { %7289 = vmatpush.msrb.mxu0 %v16039_v56  ;;  %7482 = vmatpush.msrb.mxu3 %v7481_v6  ;;  %v7498_v43 = vsub.f32 %v13846_v7, %v16040_v51  ;;  %v16041_v6 = vand.u32 4294901760, %v13753_v39  ;;  %v7504_v51 = vsub.f32 %v13869_v16, %v7503_v53 }
 0xb18   :  { %7122 = vmatpush.msra.mxu1 %v7121_v45  ;;  %7046 = vmatmul.f32.gmra.mxu0 %v7045_v35  ;;  %v7493_v56 = vand.u32 4294901760, %v7492_v4  ;;  %v16042_v45 = vand.u32 4294901760, %v13750_v0  ;;  %v13915_v44 = vsub.f32 %v10245_v20, %v13904_v32  ;;  %v7515_v19 = vand.u32 4294901760, %v13898_v60 }
 0xb19   :  { %7124 = vmatmul.f32.vlgmr.msra.gmra.mxu1 %v13688_v13  ;;  %7235 = vmatmul.f32.gmra.mxu3 %v16041_v6  ;;  %v7499_v35 = vand.u32 4294901760, %v7498_v43  ;;  %v7053_v4 = vand.u32 4294901760, %v7052_v27  ;;  %v7059_v0 = vand.u32 4294901760, %v13902_v8  ;;  %v13924_v6 = vand.u32 4294901760, %v7004_v22  ;;  %v10228_v27 = vld [vmem:[%s15628_s7 + $0x1a8] sm:$0x3f] }
 0xb1a   :  { %7293 = vmatpush.msrb.mxu0 %v16042_v45  ;;  %7331 = vmatpush.msrb.mxu1 %v13712_v59  ;;  %v7510_v59 = vsub.f32 %v13880_v11, %v7509_v49  ;;  %v7516_v20 = vsub.f32 %v13898_v60, %v7515_v19  ;;  %v7007_v43 = vsel %vm4257_vm7, %v10228_v27, 0  ;;  %v16043_v27 = vand.u32 4294901760, %v13739_v17 }
 0xb1b   :  { %7181 = vmatmul.f32.gmra.mxu2 %v13753_v39  ;;  %7488 = vmatpush.msrb.mxu3 %v7487_v21  ;;  %v7505_v39 = vand.u32 4294901760, %v7504_v51  ;;  %v7066_v21 = vsub.f32 %v7004_v22, %v13924_v6  ;;  %v13952_v51 = vand.u32 4294901760, %v7007_v43 }
 0xb1c   :  { %7333 = vmatpush.msrb.mxu1 %v13690_v57  ;;  %7403 = vmatpush.msrb.mxu2 %v13764_v14  ;;  %v7521_v57 = vand.u32 4294901760, %v13915_v44 }
 0xb1d   :  { %7494 = vmatpush.msrb.mxu3 %v7493_v56  ;;  %7554 = vmatpush.msra.mxu0 %v13739_v17  ;;  %v7511_v56 = vand.u32 4294901760, %v7510_v59  ;;  %v7067_v22 = vand.u32 4294901760, %v7066_v21 }
 0xb1e   :  { %7335 = vmatpush.msrb.mxu1 %v13699_v61  ;;  %7405 = vmatpush.msrb.mxu2 %v13785_v52  ;;  %v7060_v61 = vsub.f32 %v13902_v8, %v7059_v0  ;;  %v7522_v45 = vsub.f32 %v13915_v44, %v7521_v57 }
 0xb1f   :  { %7500 = vmatpush.msrb.mxu3 %v7499_v35  ;;  %7557 = vmatpush.msra.mxu0 %v13762_v33 }
 0xb20   :  { %7337 = vmatpush.msrb.mxu1 %v13704_v55  ;;  %7054 = vmatmul.f32.gmra.mxu0 %v7053_v4  ;;  %v7517_v55 = vand.u32 4294901760, %v7516_v20  ;;  %v7061_v35 = vand.u32 4294901760, %v7060_v61 }
 0xb21   :  { %7128 = vmatmul.f32.gmra.mxu1 %v13715_v58  ;;  %7241 = vmatmul.f32.gmra.mxu3 %v7051_v26  ;;  %v7074_v26 = vsub.f32 %v7007_v43, %v13952_v51 }
 0xb22   :  { %7339 = vmatpush.msrb.mxu1 %v13707_v42  ;;  %7407 = vmatpush.msrb.mxu2 %v13814_v29  ;;  %v7523_v42 = vand.u32 4294901760, %v7522_v45 }
 0xb23   :  { %7186 = vmatmul.f32.gmra.mxu2 %v13833_v15  ;;  %7506 = vmatpush.msrb.mxu3 %v7505_v39  ;;  %v7068_v15 = vsub.f32 %v7066_v21, %v7067_v22  ;;  %v7075_v59 = vand.u32 4294901760, %v7074_v26 }
 0xb24   :  { %7409 = vmatpush.msrb.mxu2 %v13825_v38  ;;  %7560 = vmatpush.msra.mxu0 %v13783_v9 }
 0xb25   :  { %7512 = vmatpush.msrb.mxu3 %v7511_v56  ;;  %7615 = vmatpush.msra.mxu1 %v13718_v10  ;;  %v7069_v4 = vand.u32 4294901760, %v7068_v15 }
 0xb26   :  { %7411 = vmatpush.msrb.mxu2 %v13850_v25  ;;  %7563 = vmatpush.msra.mxu0 %v13802_v3 }
 0xb27   :  { %7518 = vmatpush.msrb.mxu3 %v7517_v55  ;;  %7617 = vmatpush.msra.mxu1 %v13741_v2 }
 0xb28   :  { %7062 = vmatmul.f32.gmra.mxu0 %v7061_v35  ;;  %7413 = vmatpush.msrb.mxu2 %v13862_v46 }
 0xb29   :  { %7132 = vmatmul.f32.gmra.mxu1 %v13790_v40  ;;  %7247 = vmatmul.f32.gmra.mxu3 %v7059_v0  ;;  %v16044_v0 = vand.u32 4294901760, %v13762_v33  ;;  %v16047_v33 = vand.u32 4294901760, %v13836_v63 }
 0xb2a   :  { %7415 = vmatpush.msrb.mxu2 %v13882_v24  ;;  %7524 = vmatpush.msrb.mxu3 %v7523_v42 }
 0xb2b   :  { %7191 = vmatmul.f32.gmra.mxu2 %v13902_v8  ;;  %7566 = vmatpush.msra.mxu0 %v13836_v63  ;;  %v7076_v8 = vsub.f32 %v7074_v26, %v7075_v59 }
 0xb2c   :  { %7739 = vmatpush.msra.mxu3 %v13718_v10  ;;  %7417 = vmatpush.msrb.mxu2 %v13904_v32  ;;  %v16045_v10 = vand.u32 4294901760, %v13783_v9 }
 0xb2d   :  { %7569 = vmatpush.msra.mxu0 %v13846_v7  ;;  %7619 = vmatpush.msra.mxu1 %v13764_v14  ;;  %v7077_v17 = vand.u32 4294901760, %v7076_v8 }
 0xb2e   :  { %7674 = vmatpush.msra.mxu2 %v16043_v27  ;;  %7741 = vmatpush.msra.mxu3 %v13741_v2  ;;  %v16046_v2 = vand.u32 4294901760, %v13802_v3 }
 0xb2f   :  { %7621 = vmatpush.msra.mxu1 %v13785_v52  ;;  %7572 = vmatpush.msra.mxu0 %v13869_v16 }
 0xb30   :  { %7678 = vmatpush.msra.mxu2 %v16044_v0  ;;  %7743 = vmatpush.msra.mxu3 %v13764_v14  ;;  %v16048_v14 = vand.u32 4294901760, %v13846_v7 }
 0xb31   :  { %7070 = vmatmul.f32.gmra.mxu0 %v7069_v4  ;;  %7136 = vmatmul.f32.gmra.mxu1 %v13865_v48 }
 0xb32   :  { %7253 = vmatmul.f32.gmra.mxu3 %v7067_v22  ;;  %7682 = vmatpush.msra.mxu2 %v16045_v10 }
 0xb33   :  { %7745 = vmatpush.msra.mxu3 %v13785_v52  ;;  %7196 = vmatmul.f32.gmra.mxu2 %v7066_v21 }
 0xb34   :  { %7686 = vmatpush.msra.mxu2 %v16046_v2  ;;  %7575 = vmatpush.msra.mxu0 %v13880_v11 }
 0xb35   :  { %7747 = vmatpush.msra.mxu3 %v13814_v29  ;;  %7623 = vmatpush.msra.mxu1 %v13814_v29 }
 0xb36   :  { %7690 = vmatpush.msra.mxu2 %v16047_v33  ;;  %7578 = vmatpush.msra.mxu0 %v13898_v60 }
 0xb37   :  { %7749 = vmatpush.msra.mxu3 %v13825_v38  ;;  %7625 = vmatpush.msra.mxu1 %v13825_v38  ;;  %v16052_v38 = vld [vmem:[#allocation28_spill] sm:$0xff] }
 0xb38   :  { %7694 = vmatpush.msra.mxu2 %v16048_v14  ;;  %7581 = vmatpush.msra.mxu0 %v13915_v44 }
 0xb39   :  { %7078 = vmatmul.f32.gmra.mxu0 %v7077_v17  ;;  %7140 = vmatmul.f32.gmra.mxu1 %v13924_v6 }
 0xb3a   :  { %7259 = vmatmul.f32.gmra.mxu3 %v7075_v59  ;;  %7698 = vmatpush.msra.mxu2 %v7503_v53 }
 0xb3b   :  { %7751 = vmatpush.msra.mxu3 %v13850_v25  ;;  %7201 = vmatmul.f32.gmra.mxu2 %v7074_v26 }
 0xb3c   :  { %7702 = vmatpush.msra.mxu2 %v7509_v49  ;;  %7627 = vmatpush.msra.mxu1 %v13850_v25  ;;  %v16049_v25 = vld [vmem:[#allocation8_spill] sm:$0xff] }
 0xb3d   :  { %7753 = vmatpush.msra.mxu3 %v13862_v46 }
 0xb3e   :  { %7706 = vmatpush.msra.mxu2 %v7515_v19  ;;  %7629 = vmatpush.msra.mxu1 %v13862_v46 }
 0xb3f   :  { %7755 = vmatpush.msra.mxu3 %v13882_v24 }
 0xb40   :  { %7710 = vmatpush.msra.mxu2 %v7521_v57  ;;  %7631 = vmatpush.msra.mxu1 %v13882_v24 }
 0xb41   :  { %7295 = vmatmul.f32.vlgmr.msrb.gmra.mxu0 %v13688_v13  ;;  %7757 = vmatpush.msra.mxu3 %v13904_v32 }
 0xb42   :  { %7144 = vmatmul.f32.gmra.mxu1 %v13952_v51  ;;  %7526 = vmatmul.f32.vlgmr.msrb.gmra.mxu3 %v15842_v36 }
 0xb43   :  { %7423 = vmatmul.f32.vlgmr.msrb.gmra.mxu2 %v11615_v37  ;;  %7633 = vmatpush.msra.mxu1 %v13904_v32 }
 0xb49   :  { %7299 = vmatmul.f32.gmra.mxu0 %v13715_v58 }
 0xb4a   :  { %7341 = vmatmul.f32.vlgmr.msrb.gmra.mxu1 %v13688_v13  ;;  %7530 = vmatmul.f32.gmra.mxu3 %v15849_v28  ;;  %v16051_v13 = vld [vmem:[#allocation30_spill] sm:$0xff] }
 0xb4b   :  { %7431 = vmatmul.f32.gmra.mxu2 %v15841_v1 }
 0xb51   :  { %7303 = vmatmul.f32.gmra.mxu0 %v13790_v40 }
 0xb52   :  { %7345 = vmatmul.f32.gmra.mxu1 %v13715_v58  ;;  %7534 = vmatmul.f32.gmra.mxu3 %v15856_v30 }
 0xb53   :  { %7439 = vmatmul.f32.gmra.mxu2 %v15847_v47 }
 0xb59   :  { %7307 = vmatmul.f32.gmra.mxu0 %v13865_v48 }
 0xb5a   :  { %7349 = vmatmul.f32.gmra.mxu1 %v13790_v40  ;;  %7538 = vmatmul.f32.gmra.mxu3 %v15863_v31  ;;  %v16057_v40 = vld [vmem:[#allocation32_spill] sm:$0xff] }
 0xb5b   :  { %7447 = vmatmul.f32.gmra.mxu2 %v15855_v5 }
 0xb61   :  { %7311 = vmatmul.f32.gmra.mxu0 %v13924_v6 }
 0xb62   :  { %7353 = vmatmul.f32.gmra.mxu1 %v13865_v48  ;;  %7542 = vmatmul.f32.gmra.mxu3 %v15870_v12 }
 0xb63   :  { %7455 = vmatmul.f32.gmra.mxu2 %v15862_v54 }
 0xb69   :  { %7315 = vmatmul.f32.gmra.mxu0 %v13952_v51 }
 0xb6a   :  { %7357 = vmatmul.f32.gmra.mxu1 %v13924_v6  ;;  %7759 = vmatmul.f32.vlgmr.msra.gmra.mxu3 %v15842_v36 }
 0xb6b   :  { %7712 = vmatmul.f32.vlgmr.msra.gmra.mxu2 %v15842_v36 }
 0xb71   :  { %7584 = vmatmul.f32.vlgmr.msra.gmra.mxu0 %v15838_v50 }
 0xb72   :  { %7361 = vmatmul.f32.gmra.mxu1 %v13952_v51  ;;  %7763 = vmatmul.f32.gmra.mxu3 %v15849_v28 }
 0xb73   :  { %7716 = vmatmul.f32.gmra.mxu2 %v15849_v28 }
 0xb79   :  { %7589 = vmatmul.f32.gmra.mxu0 %v15844_v34 }
 0xb7a   :  { %7637 = vmatmul.f32.vlgmr.msra.gmra.mxu1 %v15836_v41  ;;  %7767 = vmatmul.f32.gmra.mxu3 %v15856_v30 }
 0xb7b   :  { %7720 = vmatmul.f32.gmra.mxu2 %v15856_v30 }
 0xb81   :  { %7594 = vmatmul.f32.gmra.mxu0 %v15852_v23 }
 0xb82   :  { %7643 = vmatmul.f32.gmra.mxu1 %v15843_v62  ;;  %7771 = vmatmul.f32.gmra.mxu3 %v15863_v31 }
 0xb83   :  { %7724 = vmatmul.f32.gmra.mxu2 %v15863_v31 }
 0xb89   :  { %7599 = vmatmul.f32.gmra.mxu0 %v15860_v18 }
 0xb8a   :  { %7649 = vmatmul.f32.gmra.mxu1 %v16049_v25  ;;  %7775 = vmatmul.f32.gmra.mxu3 %v15870_v12 }
 0xb8b   :  { %7728 = vmatmul.f32.gmra.mxu2 %v15870_v12 }
 0xb8d   :  { %v14052_v48 = vpop.f32.mrf.mxu0 }
 0xb8e   :  { %16050 = vst [vmem:[#allocation180_spill] sm:$0xff] %v14052_v48 }
 0xb91   :  { %7604 = vmatmul.f32.gmra.mxu0 %v16051_v13 }
 0xb92   :  { %7655 = vmatmul.f32.gmra.mxu1 %v16052_v38 }
 0xb93   :  { %v14056_v58 = vpop.f32.mrf.mxu3 }
 0xb94   :  { %16053 = vst [vmem:[#allocation181_spill] sm:$0xff] %v14056_v58 }
 0xb95   :  { %v14058_v9 = vpop.f32.mrf.mxu0 }
 0xb96   :  { %16054 = vst [vmem:[#allocation182_spill] sm:$0xff] %v14058_v9  ;;  %v14060_v52 = vpop.f32.mrf.mxu1  ;;  %v14062_v29 = vpop.f32.mrf.mxu2 }
 0xb97   :  { %16055 = vst [vmem:[#allocation183_spill] sm:$0xff] %v14060_v52  ;;  %v16101_v52 = vld [vmem:[#allocation52_spill] sm:$0xff] }
 0xb98   :  { %16056 = vst [vmem:[#allocation184_spill] sm:$0xff] %v14062_v29 }
 0xb9a   :  { %7661 = vmatmul.f32.gmra.mxu1 %v16057_v40 }
 0xb9c   :  { %v14065_v3 = vpop.f32.mrf.mxu3 }
 0xb9d   :  { %16058 = vst [vmem:[#allocation185_spill] sm:$0xff] %v14065_v3  ;;  %v14067_v63 = vpop.f32.mrf.mxu0 }
 0xb9e   :  { %16059 = vst [vmem:[#allocation186_spill] sm:$0xff] %v14067_v63  ;;  %v14069_v7 = vpop.f32.mrf.mxu1  ;;  %v14071_v46 = vpop.f32.mrf.mxu2  ;;  %v16095_v63 = vld [vmem:[#allocation31_spill] sm:$0xff] }
 0xb9f   :  { %16060 = vst [vmem:[#allocation187_spill] sm:$0xff] %v14069_v7 }
 0xba0   :  { %16061 = vst [vmem:[#allocation188_spill] sm:$0xff] %v14071_v46 }
 0xba4   :  { %v14073_v16 = vpop.f32.mrf.mxu3 }
 0xba5   :  { %16062 = vst [vmem:[#allocation189_spill] sm:$0xff] %v14073_v16  ;;  %v14075_v11 = vpop.f32.mrf.mxu0 }
 0xba6   :  { %16063 = vst [vmem:[#allocation190_spill] sm:$0xff] %v14075_v11  ;;  %v14077_v24 = vpop.f32.mrf.mxu1  ;;  %v14079_v53 = vpop.f32.mrf.mxu2  ;;  %v16092_v11 = vld [vmem:[#allocation11_spill] sm:$0xff] }
 0xba7   :  { %16064 = vst [vmem:[#allocation191_spill] sm:$0xff] %v14077_v24 }
 0xba8   :  { %16065 = vst [vmem:[#allocation192_spill] sm:$0xff] %v14079_v53 }
 0xbac   :  { %v14081_v60 = vpop.f32.mrf.mxu3 }
 0xbad   :  { %16066 = vst [vmem:[#allocation193_spill] sm:$0xff] %v14081_v60 }
 0xbae   :  { %v14083_v32 = vpop.f32.mrf.mxu0  ;;  %v14085_v49 = vpop.f32.mrf.mxu1 }
 0xbaf   :  { %16067 = vst [vmem:[#allocation194_spill] sm:$0xff] %v14083_v32  ;;  %v14087_v44 = vpop.f32.mrf.mxu2  ;;  %v16089_v32 = vld [vmem:[#allocation33_spill] sm:$0xff] }
 0xbb0   :  { %16068 = vst [vmem:[#allocation195_spill] sm:$0xff] %v14085_v49 }
 0xbb1   :  { %16069 = vst [vmem:[#allocation196_spill] sm:$0xff] %v14087_v44  ;;  %v16091_v44 = vld [vmem:[#allocation47_spill] sm:$0xff] }
 0xbb5   :  { %v14089_v19 = vpop.f32.mrf.mxu3 }
 0xbb6   :  { %16070 = vst [vmem:[#allocation197_spill] sm:$0xff] %v14089_v19  ;;  %v14091_v6 = vpop.f32.mrf.mxu0  ;;  %v14093_v57 = vpop.f32.mrf.mxu1 }
 0xbb7   :  { %16071 = vst [vmem:[#allocation198_spill] sm:$0xff] %v14091_v6  ;;  %v14095_v39 = vpop.f32.mrf.mxu2 }
 0xbb8   :  { %16072 = vst [vmem:[#allocation199_spill] sm:$0xff] %v14093_v57 }
 0xbb9   :  { %16073 = vst [vmem:[#allocation200_spill] sm:$0xff] %v14095_v39 }
 0xbbd   :  { %v14097_v20 = vpop.f32.mrf.mxu3 }
 0xbbe   :  { %16074 = vst [vmem:[#allocation201_spill] sm:$0xff] %v14097_v20  ;;  %v14099_v61 = vpop.f32.mrf.mxu0 }
 0xbbf   :  { %16075 = vst [vmem:[#allocation202_spill] sm:$0xff] %v14099_v61  ;;  %v14101_v21 = vpop.f32.mrf.mxu1  ;;  %v14103_v43 = vpop.f32.mrf.mxu2  ;;  %v16097_v61 = vld [vmem:[#allocation43_spill] sm:$0xff] }
 0xbc0   :  { %16076 = vst [vmem:[#allocation203_spill] sm:$0xff] %v14101_v21 }
 0xbc1   :  { %16077 = vst [vmem:[#allocation204_spill] sm:$0xff] %v14103_v43 }
 0xbc5   :  { %v7527_v56 = vpop.f32.mrf.mxu3 }
 0xbc6   :  { %v14105_v45 = vpop.f32.mrf.mxu0 }
 0xbc7   :  { %16078 = vst [vmem:[#allocation205_spill] sm:$0xff] %v14105_v45  ;;  %v14107_v55 = vpop.f32.mrf.mxu1  ;;  %v7424_v35 = vpop.f32.mrf.mxu2  ;;  %v16094_v45 = vld [vmem:[#allocation44_spill] sm:$0xff] }
 0xbc8   :  { %16079 = vst [vmem:[#allocation206_spill] sm:$0xff] %v14107_v55  ;;  %v16096_v55 = vld [vmem:[#allocation27_spill] sm:$0xff] }
 0xbc9   :  { %v3606_v46 = vadd.f32 %v16096_v55, %v16095_v63 }
 0xbcd   :  { %v7531_v22 = vpop.f32.mrf.mxu3 }
 0xbce   :  { %v14109_v51 = vpop.f32.mrf.mxu0 }
 0xbcf   :  { %16080 = vst [vmem:[#allocation207_spill] sm:$0xff] %v14109_v51  ;;  %v14111_v42 = vpop.f32.mrf.mxu1  ;;  %v7432_v15 = vpop.f32.mrf.mxu2 }
 0xbd0   :  { %16081 = vst [vmem:[#allocation208_spill] sm:$0xff] %v14111_v42  ;;  %v16093_v42 = vld [vmem:[#allocation20_spill] sm:$0xff] }
 0xbd1   :  { %v3610_v53 = vadd.f32 %v16093_v42, %v16092_v11  ;;  %v7532_v11 = vadd.f32 %v7531_v22, %v7432_v15  ;;  %v16107_v22 = vld [vmem:[#allocation53_spill] sm:$0xff] }
 0xbd3   :  { %v3671_v58 = vadd.f32 %v16097_v61, %v3610_v53  ;;  %v7528_v53 = vadd.f32 %v7527_v56, %v7424_v35 }
 0xbd5   :  { %v7535_v26 = vpop.f32.mrf.mxu3 }
 0xbd6   :  { %v14113_v4 = vpop.f32.mrf.mxu0 }
 0xbd7   :  { %16082 = vst [vmem:[#allocation209_spill] sm:$0xff] %v14113_v4  ;;  %v14115_v59 = vpop.f32.mrf.mxu1  ;;  %v7440_v27 = vpop.f32.mrf.mxu2 }
 0xbd8   :  { %16083 = vst [vmem:[#allocation210_spill] sm:$0xff] %v14115_v59  ;;  %v7536_v7 = vadd.f32 %v7535_v26, %v7440_v27  ;;  %v16105_v26 = vld [vmem:[#allocation26_spill] sm:$0xff] }
 0xbdd   :  { %v7539_v0 = vpop.f32.mrf.mxu3 }
 0xbde   :  { %v14117_v8 = vpop.f32.mrf.mxu0 }
 0xbdf   :  { %16084 = vst [vmem:[#allocation211_spill] sm:$0xff] %v14117_v8  ;;  %v14119_v10 = vpop.f32.mrf.mxu1  ;;  %v7448_v17 = vpop.f32.mrf.mxu2 }
 0xbe0   :  { %16085 = vst [vmem:[#allocation212_spill] sm:$0xff] %v14119_v10  ;;  %v7540_v24 = vadd.f32 %v7539_v0, %v7448_v17  ;;  %v16103_v17 = vld [vmem:[#allocation41_spill] sm:$0xff] }
 0xbe1   :  { %v3727_v63 = vadd.f32 %v16103_v17, %v3671_v58 }
 0xbe5   :  { %v7543_v20 = vpop.f32.mrf.mxu3 }
 0xbe6   :  { %v14121_v2 = vpop.f32.mrf.mxu0 }
 0xbe7   :  { %16086 = vst [vmem:[#allocation213_spill] sm:$0xff] %v14121_v2  ;;  %v14123_v33 = vpop.f32.mrf.mxu1  ;;  %v7456_v14 = vpop.f32.mrf.mxu2  ;;  %v16090_v2 = vld [vmem:[#allocation38_spill] sm:$0xff] }
 0xbe8   :  { %16087 = vst [vmem:[#allocation214_spill] sm:$0xff] %v14123_v33  ;;  %v3614_v59 = vadd.f32 %v16090_v2, %v16089_v32  ;;  %v16098_v32 = vld [vmem:[#allocation10_spill] sm:$0xff]  ;;  %v16099_v2 = vld [vmem:[#allocation21_spill] sm:$0xff] }
 0xbe9   :  { %v3602_v29 = vadd.f32 %v16099_v2, %v16098_v32  ;;  %v16108_v32 = vld [vmem:[#allocation25_spill] sm:$0xff] }
 0xbea   :  { %v3676_v51 = vadd.f32 %v16091_v44, %v3614_v59  ;;  %v16100_v44 = vld [vmem:[#allocation40_spill] sm:$0xff] }
 0xbeb   :  { %v3666_v59 = vadd.f32 %v16100_v44, %v3606_v46  ;;  %v16104_v46 = vld [vmem:[#allocation24_spill] sm:$0xff]  ;;  %v16109_v44 = vld [vmem:[#allocation22_spill] sm:$0xff] }
 0xbec   :  { %v3733_v3 = vadd.f32 %v16094_v45, %v3676_v51  ;;  %v16102_v51 = vld [vmem:[#allocation35_spill] sm:$0xff] }
 0xbed   :  { %v14129_v6 = vpop.f32.mrf.mxu3  ;;  %v3661_v0 = vadd.f32 %v16102_v51, %v3602_v29  ;;  %v7544_v29 = vadd.f32 %v7543_v20, %v7456_v14  ;;  %v16111_v51 = vld [vmem:[#allocation48_spill] sm:$0xff]  ;;  %v16112_v14 = vld [vmem:[#allocation34_spill] sm:$0xff] }
 0xbee   :  { %v7585_v43 = vpop.f32.mrf.mxu0  ;;  %v3800_v48 = vadd.f32 %v16101_v52, %v3733_v3  ;;  %v3598_v52 = vadd.f32 %v16105_v26, %v16104_v46  ;;  %v16106_v3 = vld [vmem:[#allocation37_spill] sm:$0xff] }
 0xbef   :  { %v14125_v19 = vpop.f32.mrf.mxu1  ;;  %v14127_v21 = vpop.f32.mrf.mxu2  ;;  %v3721_v27 = vadd.f32 %v16106_v3, %v3666_v59  ;;  %v7586_v15 = vadd.f32 %v7585_v43, %v7528_v53  ;;  %v3715_v56 = vadd.f32 %v16109_v44, %v3661_v0  ;;  %v16114_v0 = vld [vmem:[#allocation51_spill] sm:$0xff]  ;;  %v16115_v26 = vld [vmem:[#allocation49_spill] sm:$0xff] }
 0xbf0   :  { %16088 = vst [vmem:[#allocation215_spill] sm:$0xff] %v14125_v19  ;;  %v3656_v2 = vadd.f32 %v16108_v32, %v3598_v52 }
 0xbf1   :  { %v3792_v59 = vadd.f32 %v16111_v51, %v3721_v27 }
 0xbf5   :  { %v14131_v8 = vpop.f32.mrf.mxu3 }
 0xbf6   :  { %v7590_v39 = vpop.f32.mrf.mxu0 }
 0xbf7   :  { %v7638_v4 = vpop.f32.mrf.mxu1  ;;  %v7717_v60 = vpop.f32.mrf.mxu2 }
 0xbf8   :  { %v7639_v35 = vadd.f32 %v7638_v4, %v7586_v15 }
 0xbfd   :  { %v7768_v16 = vpop.f32.mrf.mxu3 }
 0xbfe   :  { %v7595_v10 = vpop.f32.mrf.mxu0 }
 0xbff   :  { %v7644_v57 = vpop.f32.mrf.mxu1  ;;  %v7721_v33 = vpop.f32.mrf.mxu2  ;;  %v7596_v42 = vadd.f32 %v7595_v10, %v7536_v7  ;;  %v3847_v7 = vadd.f32 %v16107_v22, %v3800_v48 }
 0xc01   :  { %v8172_v48 = vsel %vm4276_vm8, %v3847_v7, 0 }
 0xc02   :  { %v14166_v4 = vand.u32 4294901760, %v8172_v48 }
 0xc05   :  { %v7772_v55 = vpop.f32.mrf.mxu3 }
 0xc06   :  { %v7600_v19 = vpop.f32.mrf.mxu0 }
 0xc07   :  { %v7650_v49 = vpop.f32.mrf.mxu1  ;;  %v7601_v9 = vadd.f32 %v7600_v19, %v7540_v24  ;;  %v7725_v12 = vpop.f32.mrf.mxu2  ;;  %v10239_v24 = vld [vmem:[%s15628_s7 + $0x90] sm:$0xff]  ;;  %v7591_v19 = vadd.f32 %v7590_v39, %v7532_v11  ;;  %v16110_v39 = vld [vmem:[#allocation50_spill] sm:$0xff] }
 0xc08   :  { %v7651_v61 = vadd.f32 %v7650_v49, %v7596_v42  ;;  %v7780_v10 = vsel %vm4257_vm7, %v10239_v24, 0  ;;  %v3796_v49 = vadd.f32 %v16110_v39, %v3727_v63  ;;  %v16113_v24 = vld [vmem:[#allocation45_spill] sm:$0xff] }
 0xc09   :  { %v7645_v58 = vadd.f32 %v7644_v57, %v7591_v19  ;;  %v14161_v20 = vand.u32 4294901760, %v7780_v10  ;;  %v3788_v53 = vadd.f32 %v16113_v24, %v3715_v56 }
 0xc0a   :  { %v7722_v11 = vadd.f32 %v7721_v33, %v7651_v61  ;;  %v3843_v19 = vadd.f32 %v16114_v0, %v3796_v49  ;;  %v7714_v33 = vadd.f32 %v14127_v21, %v7639_v35  ;;  %v16117_v21 = vld [vmem:[#allocation46_spill] sm:$0xff] }
 0xc0b   :  { %v7718_v57 = vadd.f32 %v7717_v60, %v7645_v58  ;;  %v3839_v60 = vadd.f32 %v16115_v26, %v3792_v59  ;;  %v14176_v27 = vsub.f32 %v7780_v10, %v14161_v20  ;;  %v14185_v58 = vsub.f32 %v8172_v48, %v14166_v4  ;;  %v10241_v26 = vld [vmem:[%s15628_s7 + $0xa0] sm:$0xff] }
 0xc0c   :  { %v7769_v61 = vadd.f32 %v7768_v16, %v7722_v11  ;;  %v3835_v16 = vadd.f32 %v16117_v21, %v3788_v53  ;;  %v7761_v32 = vadd.f32 %v14129_v6, %v7714_v33  ;;  %v16118_v11 = vld [vmem:[#allocation42_spill] sm:$0xff] }
 0xc0d   :  { %v7776_v52 = vpop.f32.mrf.mxu3  ;;  %v7765_v22 = vadd.f32 %v14131_v8, %v7718_v57  ;;  %v14191_v44 = vand.u32 4294901760, %v3839_v60  ;;  %v7823_v39 = vand.u32 4294901760, %v14176_v27  ;;  %v8257_v48 = vand.u32 4294901760, %v14185_v58 }
 0xc0e   :  { %v14189_v10 = vand.u32 4294901760, %v7769_v61  ;;  %v14204_v6 = vand.u32 4294901760, %v3835_v16 }
 0xc0f   :  { %v7656_v13 = vpop.f32.mrf.mxu1  ;;  %v7729_v63 = vpop.f32.mrf.mxu2  ;;  %v14199_v49 = vand.u32 4294901760, %v7765_v22  ;;  %v14219_v57 = vsub.f32 %v3839_v60, %v14191_v44 }
 0xc10   :  { %v7657_v45 = vadd.f32 %v7656_v13, %v7601_v9  ;;  %v7605_v13 = vpop.f32.mrf.mxu0 }
 0xc11   :  { %v7606_v42 = vadd.f32 %v7605_v13, %v7544_v29  ;;  %v16116_v13 = vld [vmem:[#allocation39_spill] sm:$0xff]  ;;  %v14181_v29 = vand.u32 4294901760, %v3843_v19  ;;  %v14226_v24 = vsub.f32 %v7765_v22, %v14199_v49 }
 0xc12   :  { %v7726_v9 = vadd.f32 %v7725_v12, %v7657_v45  ;;  %v3709_v45 = vadd.f32 %v16112_v14, %v3656_v2  ;;  %v7824_v14 = vsub.f32 %v14176_v27, %v7823_v39 }
 0xc13   :  { %v14207_v51 = vsub.f32 %v3843_v19, %v14181_v29  ;;  %v14234_v19 = vsub.f32 %v3835_v16, %v14204_v6 }
 0xc14   :  { %v7773_v17 = vadd.f32 %v7772_v55, %v7726_v9  ;;  %v10240_v55 = vld [vmem:[%s15628_s7 + $0x98] sm:$0xff]  ;;  %v3784_v9 = vadd.f32 %v16116_v13, %v3709_v45  ;;  %v7901_v13 = vand.u32 4294901760, %v14226_v24 }
 0xc15   :  { %v7783_v15 = vsel %vm4257_vm7, %v10240_v55, 0  ;;  %v8263_v33 = vand.u32 4294901760, %v14207_v51 }
 0xc16   :  { %v14173_v3 = vand.u32 4294901760, %v7773_v17  ;;  %v14201_v35 = vand.u32 4294901760, %v7783_v15 }
 0xc17   :  { %v7662_v12 = vpop.f32.mrf.mxu1  ;;  %v8264_v16 = vsub.f32 %v14207_v51, %v8263_v33 }
 0xc18   :  { %v7663_v43 = vadd.f32 %v7662_v12, %v7606_v42  ;;  %v14196_v56 = vsub.f32 %v7773_v17, %v14173_v3  ;;  %v3831_v42 = vadd.f32 %v16118_v11, %v3784_v9  ;;  %v14214_v17 = vsub.f32 %v7769_v61, %v14189_v10 }
 0xc19   :  { %v14216_v12 = vand.u32 4294901760, %v7761_v32  ;;  %v14229_v53 = vsub.f32 %v7783_v15, %v14201_v35  ;;  %v8258_v61 = vsub.f32 %v14185_v58, %v8257_v48  ;;  %v8275_v15 = vand.u32 4294901760, %v14234_v19 }
 0xc1a   :  { %v7730_v46 = vadd.f32 %v7729_v63, %v7663_v43  ;;  %v7889_v45 = vand.u32 4294901760, %v14196_v56  ;;  %v14231_v0 = vand.u32 4294901760, %v3831_v42  ;;  %v7895_v55 = vand.u32 4294901760, %v14214_v17 }
 0xc1b   :  { %v7831_v9 = vand.u32 4294901760, %v14229_v53 }
 0xc1c   :  { %v7777_v7 = vadd.f32 %v7776_v52, %v7730_v46  ;;  %v14244_v46 = vsub.f32 %v7761_v32, %v14216_v12  ;;  %v7825_v52 = vand.u32 4294901760, %v7824_v14  ;;  %v7890_v22 = vsub.f32 %v14196_v56, %v7889_v45 }
 0xc1d   :  { %v14258_v21 = vsub.f32 %v3831_v42, %v14231_v0  ;;  %v7786_v32 = vsel %vm4257_vm7, %v10241_v26, 0  ;;  %v7902_v14 = vsub.f32 %v14226_v24, %v7901_v13 }
 0xc1e   :  { %v7798_v2 = vsel %vm4276_vm8, %v7777_v7, 0  ;;  %v8269_v7 = vand.u32 4294901760, %v14219_v57  ;;  %v7907_v11 = vand.u32 4294901760, %v14244_v46  ;;  %v7891_v42 = vand.u32 4294901760, %v7890_v22 }
 0xc1f   :  { %v14193_v8 = vand.u32 4294901760, %v7798_v2  ;;  %v14275_v26 = vand.u32 4294901760, %v7786_v32  ;;  %v7903_v22 = vand.u32 4294901760, %v7902_v14 }
 0xc21   :  { %7812 = vmatpush.msrb.mxu0 %v14193_v8  ;;  %8005 = vmatpush.msrb.mxu3 %v14193_v8  ;;  %v7882_v59 = vsub.f32 %v7798_v2, %v14193_v8  ;;  %v8259_v2 = vand.u32 4294901760, %v8258_v61  ;;  %v8281_v61 = vand.u32 4294901760, %v14258_v21 }
 0xc23   :  { %7814 = vmatpush.msrb.mxu0 %v14173_v3  ;;  %7949 = vmatpush.msrb.mxu2 %v7882_v59  ;;  %v7883_v43 = vand.u32 4294901760, %v7882_v59 }
 0xc24   :  { %8007 = vmatpush.msrb.mxu3 %v14173_v3 }
 0xc25   :  { %7816 = vmatpush.msrb.mxu0 %v14189_v10  ;;  %7952 = vmatpush.msrb.mxu2 %v14196_v56  ;;  %v7884_v63 = vsub.f32 %v7882_v59, %v7883_v43  ;;  %v7896_v56 = vsub.f32 %v14214_v17, %v7895_v55  ;;  %v8270_v59 = vsub.f32 %v14219_v57, %v8269_v7 }
 0xc26   :  { %8009 = vmatpush.msrb.mxu3 %v14189_v10 }
 0xc27   :  { %7818 = vmatpush.msrb.mxu0 %v14199_v49  ;;  %7955 = vmatpush.msrb.mxu2 %v14214_v17  ;;  %v7885_v60 = vand.u32 4294901760, %v7884_v63  ;;  %v7832_v63 = vsub.f32 %v14229_v53, %v7831_v9  ;;  %v8265_v17 = vand.u32 4294901760, %v8264_v16 }
 0xc28   :  { %8011 = vmatpush.msrb.mxu3 %v14199_v49 }
 0xc29   :  { %7820 = vmatpush.msrb.mxu0 %v14216_v12  ;;  %7886 = vmatpush.msrb.mxu1 %v7885_v60  ;;  %v10242_v60 = vld [vmem:[%s15628_s7 + $0xa8] sm:$0xff]  ;;  %v7833_v16 = vand.u32 4294901760, %v7832_v63 }
 0xc2a   :  { %7958 = vmatpush.msrb.mxu2 %v14226_v24  ;;  %8013 = vmatpush.msrb.mxu3 %v14216_v12  ;;  %v7908_v24 = vsub.f32 %v14244_v46, %v7907_v11 }
 0xc2b   :  { %7826 = vmatmul.f32.vlgmr.msrb.gmra.mxu0 %v7825_v52  ;;  %8017 = vmatmul.f32.vlgmr.msrb.gmra.mxu3 %v7823_v39  ;;  %v8276_v39 = vsub.f32 %v14234_v19, %v8275_v15  ;;  %v8271_v52 = vand.u32 4294901760, %v8270_v59 }
 0xc2c   :  { %8065 = vmatpush.msra.mxu0 %v7883_v43  ;;  %8260 = vmatpush.msra.mxu3 %v8259_v2  ;;  %v7897_v43 = vand.u32 4294901760, %v7896_v56  ;;  %v7838_v2 = vsub.f32 %v7786_v32, %v14275_v26  ;;  %v7909_v56 = vand.u32 4294901760, %v7908_v24 }
 0xc2d   :  { %7892 = vmatpush.msrb.mxu1 %v7891_v42  ;;  %7961 = vmatpush.msrb.mxu2 %v14244_v46  ;;  %v7789_v46 = vsel %vm4257_vm7, %v10242_v60, 0 }
 0xc2e   :  { %7964 = vmatmul.f32.vlgmr.msrb.gmra.mxu2 %v14176_v27  ;;  %8069 = vmatpush.msra.mxu0 %v7889_v45  ;;  %v8277_v27 = vand.u32 4294901760, %v8276_v39  ;;  %v8282_v45 = vsub.f32 %v14258_v21, %v8281_v61  ;;  %v14295_v32 = vand.u32 4294901760, %v7789_v46 }
 0xc2f   :  { %8186 = vmatpush.msra.mxu2 %v14166_v4  ;;  %8266 = vmatpush.msra.mxu3 %v8265_v17 }
 0xc30   :  { %7898 = vmatpush.msrb.mxu1 %v7897_v43  ;;  %8073 = vmatpush.msra.mxu0 %v7895_v55  ;;  %v7839_v55 = vand.u32 4294901760, %v7838_v2  ;;  %v8283_v42 = vand.u32 4294901760, %v8282_v45  ;;  %v7846_v14 = vsub.f32 %v7789_v46, %v14295_v32 }
 0xc31   :  { %8188 = vmatpush.msra.mxu2 %v14181_v29  ;;  %8272 = vmatpush.msra.mxu3 %v8271_v52 }
 0xc32   :  { %7904 = vmatpush.msrb.mxu1 %v7903_v22  ;;  %8077 = vmatpush.msra.mxu0 %v7901_v13  ;;  %v10243_v13 = vld [vmem:[%s15628_s7 + $0xb0] sm:$0xff]  ;;  %v7840_v59 = vsub.f32 %v7838_v2, %v7839_v55 }
 0xc33   :  { %8190 = vmatpush.msra.mxu2 %v14191_v44  ;;  %8278 = vmatpush.msra.mxu3 %v8277_v27 }
 0xc34   :  { %7910 = vmatpush.msrb.mxu1 %v7909_v56  ;;  %7834 = vmatmul.f32.gmra.mxu0 %v7833_v16 }
 0xc35   :  { %7912 = vmatmul.f32.vlgmr.msrb.gmra.mxu1 %v14161_v20  ;;  %8023 = vmatmul.f32.gmra.mxu3 %v7831_v9  ;;  %v7841_v9 = vand.u32 4294901760, %v7840_v59 }
 0xc36   :  { %8081 = vmatpush.msra.mxu0 %v7907_v11  ;;  %8119 = vmatpush.msra.mxu1 %v14193_v8  ;;  %v7792_v8 = vsel %vm4257_vm7, %v10243_v13, 0  ;;  %v7847_v11 = vand.u32 4294901760, %v7846_v14  ;;  %v10163_v13 = vld [vmem:[%s15628_s7 + $0x50] sm:$0xff] }
 0xc37   :  { %8192 = vmatpush.msra.mxu2 %v14204_v6  ;;  %8284 = vmatpush.msra.mxu3 %v8283_v42 }
 0xc38   :  { %8323 = vmatpush.msrb.mxu0 %v14185_v58  ;;  %7969 = vmatmul.f32.gmra.mxu2 %v14229_v53  ;;  %v14316_v53 = vand.u32 4294901760, %v7792_v8  ;;  %v7848_v58 = vsub.f32 %v7846_v14, %v7847_v11 }
 0xc39   :  { %8493 = vmatpush.msrb.mxu3 %v14166_v4  ;;  %8121 = vmatpush.msra.mxu1 %v14173_v3  ;;  %v10244_v3 = vld [vmem:[%s15628_s7 + $0xb8] sm:$0x3f] }
 0xc3a   :  { %8194 = vmatpush.msra.mxu2 %v14231_v0  ;;  %8326 = vmatpush.msrb.mxu0 %v14207_v51  ;;  %v7849_v51 = vand.u32 4294901760, %v7848_v58 }
 0xc3b   :  { %8495 = vmatpush.msrb.mxu3 %v14181_v29  ;;  %8123 = vmatpush.msra.mxu1 %v14189_v10  ;;  %v7854_v10 = vsub.f32 %v7792_v8, %v14316_v53  ;;  %v8166_v8 = vsel %vm4257_vm7, %v10163_v13, 0 }
 0xc3c   :  { %8439 = vmatpush.msrb.mxu2 %v8257_v48  ;;  %8329 = vmatpush.msrb.mxu0 %v14219_v57 }
 0xc3d   :  { %8497 = vmatpush.msrb.mxu3 %v14191_v44  ;;  %8125 = vmatpush.msra.mxu1 %v14199_v49  ;;  %v7795_v49 = vsel %vm4257_vm7, %v10244_v3, 0  ;;  %v7855_v48 = vand.u32 4294901760, %v7854_v10  ;;  %v10164_v3 = vld [vmem:[%s15628_s7 + $0x58] sm:$0x3f] }
 0xc3e   :  { %8443 = vmatpush.msrb.mxu2 %v8263_v33  ;;  %8332 = vmatpush.msrb.mxu0 %v14234_v19  ;;  %v14339_v57 = vand.u32 4294901760, %v7795_v49 }
 0xc3f   :  { %8499 = vmatpush.msrb.mxu3 %v14204_v6  ;;  %7842 = vmatmul.f32.gmra.mxu0 %v7841_v9 }
 0xc40   :  { %8447 = vmatpush.msrb.mxu2 %v8269_v7  ;;  %7916 = vmatmul.f32.gmra.mxu1 %v14201_v35 }
 0xc41   :  { %8029 = vmatmul.f32.gmra.mxu3 %v7839_v55  ;;  %8127 = vmatpush.msra.mxu1 %v14216_v12  ;;  %v7862_v12 = vsub.f32 %v7795_v49, %v14339_v57  ;;  %v8169_v49 = vsel %vm4257_vm7, %v10164_v3, 0 }
 0xc42   :  { %8335 = vmatpush.msrb.mxu0 %v14258_v21  ;;  %8451 = vmatpush.msrb.mxu2 %v8275_v15 }
 0xc43   :  { %8379 = vmatpush.msrb.mxu1 %v14166_v4  ;;  %8501 = vmatpush.msrb.mxu3 %v14231_v0  ;;  %v7856_v4 = vsub.f32 %v7854_v10, %v7855_v48  ;;  %v7863_v33 = vand.u32 4294901760, %v7862_v12 }
 0xc44   :  { %7974 = vmatmul.f32.gmra.mxu2 %v7838_v2  ;;  %v10162_v2 = vld [vmem:[%s15628_s7 + $0x48] sm:$0xff] }
 0xc45   :  { %8381 = vmatpush.msrb.mxu1 %v14181_v29  ;;  %8455 = vmatpush.msrb.mxu2 %v8281_v61  ;;  %v10159_v29 = vld [vmem:[%s15628_s7 + $0x30] sm:$0xff]  ;;  %v7857_v19 = vand.u32 4294901760, %v7856_v4  ;;  %v10161_v61 = vld [vmem:[%s15628_s7 + $0x40] sm:$0xff]  ;;  %v8163_v46 = vsel %vm4257_vm7, %v10162_v2, 0 }
 0xc46   :  { %v8160_v60 = vsel %vm4257_vm7, %v10161_v61, 0  ;;  %v14394_v42 = vand.u32 4294901760, %v8163_v46 }
 0xc47   :  { %8383 = vmatpush.msrb.mxu1 %v14191_v44  ;;  %7850 = vmatmul.f32.gmra.mxu0 %v7849_v51  ;;  %v8154_v44 = vsel %vm4257_vm7, %v10159_v29, 0  ;;  %v14378_v16 = vand.u32 4294901760, %v8160_v60 }
 0xc48   :  { %7920 = vmatmul.f32.gmra.mxu1 %v14275_v26  ;;  %v14352_v7 = vand.u32 4294901760, %v8154_v44 }
 0xc49   :  { %8385 = vmatpush.msrb.mxu1 %v14204_v6  ;;  %8035 = vmatmul.f32.gmra.mxu3 %v7847_v11  ;;  %v7864_v6 = vsub.f32 %v7862_v12, %v7863_v33  ;;  %v14389_v45 = vsub.f32 %v8160_v60, %v14378_v16  ;;  %v14410_v11 = vand.u32 4294901760, %v8166_v8 }
 0xc4a   :  { %v14359_v15 = vsub.f32 %v8154_v44, %v14352_v7  ;;  %v10270_v44 = vld [vmem:[%s15625_s8 + $0x1d8] sm:$0xf] }
 0xc4b   :  { %8387 = vmatpush.msrb.mxu1 %v14231_v0  ;;  %v10160_v0 = vld [vmem:[%s15628_s7 + $0x38] sm:$0xff]  ;;  %v7865_v21 = vand.u32 4294901760, %v7864_v6  ;;  %v8213_v55 = vand.u32 4294901760, %v14389_v45  ;;  %v10269_v6 = vld [vmem:[%s15625_s8 + $0x1d0] sm:$0xff] }
 0xc4c   :  { %7979 = vmatmul.f32.gmra.mxu2 %v7846_v14  ;;  %v8157_v63 = vsel %vm4257_vm7, %v10160_v0, 0  ;;  %v8197_v17 = vand.u32 4294901760, %v14359_v15  ;;  %v14405_v14 = vsub.f32 %v8163_v46, %v14394_v42 }
 0xc4d   :  { %v14363_v39 = vand.u32 4294901760, %v8157_v63  ;;  %v8214_v59 = vsub.f32 %v14389_v45, %v8213_v55 }
 0xc4e   :  { %v8198_v43 = vsub.f32 %v14359_v15, %v8197_v17 }
 0xc4f   :  { %7858 = vmatmul.f32.gmra.mxu0 %v7857_v19  ;;  %v14373_v24 = vsub.f32 %v8157_v63, %v14363_v39  ;;  %v8215_v9 = vand.u32 4294901760, %v8214_v59  ;;  %v10268_v63 = vld [vmem:[%s15625_s8 + $0x1c8] sm:$0xff] }
 0xc50   :  { %7924 = vmatmul.f32.gmra.mxu1 %v14295_v32  ;;  %v8199_v52 = vand.u32 4294901760, %v8198_v43  ;;  %v14468_v61 = vand.u32 4294901760, %v10268_v63 }
 0xc51   :  { %8041 = vmatmul.f32.gmra.mxu3 %v7855_v48  ;;  %v8205_v22 = vand.u32 4294901760, %v14373_v24  ;;  %v14426_v48 = vand.u32 4294901760, %v8169_v49 }
 0xc52   :  { %v14483_v2 = vsub.f32 %v10268_v63, %v14468_v61 }
 0xc53   :  { %v8206_v27 = vsub.f32 %v14373_v24, %v8205_v22 }
 0xc54   :  { %7984 = vmatmul.f32.gmra.mxu2 %v7854_v10  ;;  %v14421_v10 = vsub.f32 %v8166_v8, %v14410_v11 }
 0xc55   :  { %v8207_v56 = vand.u32 4294901760, %v8206_v27 }
 0xc57   :  { %7866 = vmatmul.f32.gmra.mxu0 %v7865_v21  ;;  %v14455_v21 = vand.u32 4294901760, %v10269_v6 }
 0xc58   :  { %7928 = vmatmul.f32.gmra.mxu1 %v14316_v53 }
 0xc59   :  { %8047 = vmatmul.f32.gmra.mxu3 %v7863_v33  ;;  %v14471_v43 = vsub.f32 %v10269_v6, %v14455_v21 }
 0xc5b   :  { %v8629_v46 = vand.u32 4294901760, %v14471_v43 }
 0xc5c   :  { %7989 = vmatmul.f32.gmra.mxu2 %v7862_v12  ;;  %v14434_v12 = vsub.f32 %v8169_v49, %v14426_v48 }
 0xc5e   :  { %v15696_v19 = vand.u32 4294901760, %v14434_v12 }
 0xc5f   :  { %8083 = vmatmul.f32.vlgmr.msra.gmra.mxu0 %v14161_v20 }
 0xc60   :  { %7932 = vmatmul.f32.gmra.mxu1 %v14339_v57 }
 0xc61   :  { %8286 = vmatmul.f32.vlgmr.msra.gmra.mxu3 %v14352_v7 }
 0xc64   :  { %8200 = vmatmul.f32.vlgmr.msra.gmra.mxu2 %v8199_v52  ;;  %v10267_v52 = vld [vmem:[%s15625_s8 + $0x1c0] sm:$0xff] }
 0xc67   :  { %8087 = vmatmul.f32.gmra.mxu0 %v14201_v35 }
 0xc68   :  { %8129 = vmatmul.f32.vlgmr.msra.gmra.mxu1 %v14161_v20  ;;  %v8221_v20 = vand.u32 4294901760, %v14405_v14 }
 0xc69   :  { %8290 = vmatmul.f32.gmra.mxu3 %v14363_v39 }
 0xc6a   :  { %v8222_v58 = vsub.f32 %v14405_v14, %v8221_v20 }
 0xc6c   :  { %8208 = vmatmul.f32.gmra.mxu2 %v8207_v56  ;;  %v8223_v51 = vand.u32 4294901760, %v8222_v58  ;;  %v10266_v56 = vld [vmem:[%s15625_s8 + $0x1b8] sm:$0xff]  ;;  %v8635_v58 = vand.u32 4294901760, %v14483_v2 }
 0xc6d   :  { %v14496_v13 = vand.u32 4294901760, %v10266_v56 }
 0xc6f   :  { %8091 = vmatmul.f32.gmra.mxu0 %v14275_v26 }
 0xc70   :  { %8133 = vmatmul.f32.gmra.mxu1 %v14201_v35  ;;  %v15697_v35 = vand.u32 4294901760, %v14421_v10 }
 0xc71   :  { %8294 = vmatmul.f32.gmra.mxu3 %v14378_v16 }
 0xc72   :  { %v8230_v4 = vsub.f32 %v14421_v10, %v15697_v35 }
 0xc74   :  { %8216 = vmatmul.f32.gmra.mxu2 %v8215_v9  ;;  %v8231_v29 = vand.u32 4294901760, %v8230_v4  ;;  %v8630_v9 = vsub.f32 %v14471_v43, %v8629_v46 }
 0xc76   :  { %v8631_v49 = vand.u32 4294901760, %v8630_v9 }
 0xc77   :  { %8095 = vmatmul.f32.gmra.mxu0 %v14295_v32 }
 0xc78   :  { %8137 = vmatmul.f32.gmra.mxu1 %v14275_v26  ;;  %v8238_v26 = vsub.f32 %v14434_v12, %v15696_v19 }
 0xc79   :  { %8298 = vmatmul.f32.gmra.mxu3 %v14394_v42 }
 0xc7a   :  { %v8239_v33 = vand.u32 4294901760, %v8238_v26  ;;  %v8636_v26 = vsub.f32 %v14483_v2, %v8635_v58 }
 0xc7c   :  { %8224 = vmatmul.f32.gmra.mxu2 %v8223_v51  ;;  %v14514_v51 = vsub.f32 %v10266_v56, %v14496_v13  ;;  %v8637_v63 = vand.u32 4294901760, %v8636_v26 }
 0xc7e   :  { %v8647_v6 = vand.u32 4294901760, %v14514_v51 }
 0xc7f   :  { %8099 = vmatmul.f32.gmra.mxu0 %v14316_v53 }
 0xc80   :  { %8141 = vmatmul.f32.gmra.mxu1 %v14295_v32  ;;  %v8546_v32 = vsel %vm1246_vm2, %v10270_v44, 0 }
 0xc81   :  { %8302 = vmatmul.f32.gmra.mxu3 %v14410_v11  ;;  %v14453_v0 = vand.u32 4294901760, %v8546_v32 }
 0xc83   :  { %8555 = vmatpush.msra.mxu0 %v14453_v0  ;;  %8771 = vmatpush.msra.mxu3 %v14453_v0 }
 0xc84   :  { %8232 = vmatmul.f32.gmra.mxu2 %v8231_v29  ;;  %v10264_v29 = vld [vmem:[%s15625_s8 + $0x1a8] sm:$0xff] }
 0xc85   :  { %8557 = vmatpush.msra.mxu0 %v14455_v21  ;;  %8773 = vmatpush.msra.mxu3 %v14455_v21 }
 0xc87   :  { %8103 = vmatmul.f32.gmra.mxu0 %v14339_v57  ;;  %8775 = vmatpush.msra.mxu3 %v14468_v61 }
 0xc88   :  { %8145 = vmatmul.f32.gmra.mxu1 %v14316_v53  ;;  %v14460_v53 = vsub.f32 %v8546_v32, %v14453_v0  ;;  %8559 = vmatpush.msra.mxu0 %v14468_v61 }
 0xc89   :  { %8306 = vmatmul.f32.gmra.mxu3 %v14426_v48 }
 0xc8a   :  { %v8623_v60 = vand.u32 4294901760, %v14460_v53  ;;  %8710 = vmatpush.msra.mxu2 %v14460_v53 }
 0xc8c   :  { %8240 = vmatmul.f32.gmra.mxu2 %v8239_v33  ;;  %v8624_v27 = vsub.f32 %v14460_v53, %v8623_v60  ;;  %v14527_v33 = vand.u32 4294901760, %v10264_v29 }
 0xc8d   :  { %8713 = vmatpush.msra.mxu2 %v14471_v43 }
 0xc8e   :  { %v8625_v59 = vand.u32 4294901760, %v8624_v27  ;;  %v8648_v27 = vsub.f32 %v14514_v51, %v8647_v6 }
 0xc8f   :  { %8338 = vmatmul.f32.vlgmr.msrb.gmra.mxu0 %v14359_v15  ;;  %8716 = vmatpush.msra.mxu2 %v14483_v2  ;;  %v10263_v15 = vld [vmem:[%s15625_s8 + $0x1a0] sm:$0xff] }
 0xc90   :  { %8149 = vmatmul.f32.gmra.mxu1 %v14339_v57  ;;  %v14480_v57 = vand.u32 4294901760, %v10267_v52 }
 0xc91   :  { %8503 = vmatmul.f32.vlgmr.msrb.gmra.mxu3 %v14352_v7  ;;  %8626 = vmatpush.msra.mxu1 %v8625_v59  ;;  %v10262_v59 = vld [vmem:[%s15625_s8 + $0x198] sm:$0xff] }
 0xc92   :  { %v14499_v8 = vsub.f32 %v10267_v52, %v14480_v57  ;;  %8561 = vmatpush.msra.mxu0 %v14480_v57  ;;  %8777 = vmatpush.msra.mxu3 %v14480_v57  ;;  %v14545_v52 = vsub.f32 %v10264_v29, %v14527_v33  ;;  %v14558_v9 = vand.u32 4294901760, %v10262_v59  ;;  %v10261_v29 = vld [vmem:[%s15625_s8 + $0x190] sm:$0xff] }
 0xc93   :  { %8632 = vmatpush.msra.mxu1 %v8631_v49 }
 0xc94   :  { %8457 = vmatmul.f32.vlgmr.msrb.gmra.mxu2 %v14352_v7  ;;  %v10265_v7 = vld [vmem:[%s15625_s8 + $0x1b0] sm:$0xff]  ;;  %v8641_v4 = vand.u32 4294901760, %v14499_v8  ;;  %8563 = vmatpush.msra.mxu0 %v14496_v13  ;;  %v14576_v19 = vsub.f32 %v10262_v59, %v14558_v9 }
 0xc95   :  { %v14508_v3 = vand.u32 4294901760, %v10265_v7  ;;  %8719 = vmatpush.msra.mxu2 %v14499_v8  ;;  %8779 = vmatpush.msra.mxu3 %v14496_v13 }
 0xc96   :  { %v8642_v32 = vsub.f32 %v14499_v8, %v8641_v4  ;;  %8638 = vmatpush.msra.mxu1 %v8637_v63  ;;  %v8671_v59 = vand.u32 4294901760, %v14576_v19 }
 0xc97   :  { %8343 = vmatmul.f32.gmra.mxu0 %v14373_v24  ;;  %v14530_v44 = vsub.f32 %v10265_v7, %v14508_v3  ;;  %8722 = vmatpush.msra.mxu2 %v14514_v51 }
 0xc98   :  { %8391 = vmatmul.f32.vlgmr.msrb.gmra.mxu1 %v8197_v17  ;;  %v14542_v17 = vand.u32 4294901760, %v10263_v15  ;;  %8565 = vmatpush.msra.mxu0 %v14508_v3  ;;  %v8643_v56 = vand.u32 4294901760, %v8642_v32  ;;  %v8649_v32 = vand.u32 4294901760, %v8648_v27 }
 0xc99   :  { %8507 = vmatmul.f32.gmra.mxu3 %v14363_v39  ;;  %v15698_v7 = vand.u32 4294901760, %v14530_v44  ;;  %8725 = vmatpush.msra.mxu2 %v14530_v44 }
 0xc9a   :  { %8781 = vmatpush.msra.mxu3 %v14508_v3  ;;  %v14561_v49 = vsub.f32 %v10263_v15, %v14542_v17  ;;  %8567 = vmatpush.msra.mxu0 %v14527_v33  ;;  %v14573_v15 = vand.u32 4294901760, %v10261_v29 }
 0xc9b   :  { %v8654_v26 = vsub.f32 %v14530_v44, %v15698_v7  ;;  %8644 = vmatpush.msra.mxu1 %v8643_v56  ;;  %8728 = vmatpush.msra.mxu2 %v14545_v52 }
 0xc9c   :  { %8461 = vmatmul.f32.gmra.mxu2 %v14363_v39  ;;  %v8659_v39 = vand.u32 4294901760, %v14545_v52  ;;  %8783 = vmatpush.msra.mxu3 %v14527_v33  ;;  %v15699_v63 = vand.u32 4294901760, %v14561_v49  ;;  %v14587_v27 = vsub.f32 %v10261_v29, %v14573_v15  ;;  %v8672_v29 = vsub.f32 %v14576_v19, %v8671_v59 }
 0xc9d   :  { %8569 = vmatpush.msra.mxu0 %v14542_v17  ;;  %v8655_v7 = vand.u32 4294901760, %v8654_v26  ;;  %8650 = vmatpush.msra.mxu1 %v8649_v32  ;;  %v16153_v32 = vld [vmem:[#allocation29_spill] sm:$0xff] }
 0xc9e   :  { %v8660_v35 = vsub.f32 %v14545_v52, %v8659_v39  ;;  %v8666_v56 = vsub.f32 %v14561_v49, %v15699_v63  ;;  %8785 = vmatpush.msra.mxu3 %v14542_v17  ;;  %v8677_v24 = vand.u32 4294901760, %v14587_v27  ;;  %8731 = vmatpush.msra.mxu2 %v14561_v49 }
 0xc9f   :  { %8348 = vmatmul.f32.gmra.mxu0 %v14389_v45  ;;  %8656 = vmatpush.msra.mxu1 %v8655_v7 }
 0xca0   :  { %8397 = vmatmul.f32.gmra.mxu1 %v8205_v22  ;;  %8571 = vmatpush.msra.mxu0 %v14558_v9  ;;  %v8661_v22 = vand.u32 4294901760, %v8660_v35  ;;  %v8667_v26 = vand.u32 4294901760, %v8666_v56  ;;  %v8678_v63 = vsub.f32 %v14587_v27, %v8677_v24 }
 0xca1   :  { %8511 = vmatmul.f32.gmra.mxu3 %v14378_v16  ;;  %8734 = vmatpush.msra.mxu2 %v14576_v19 }
 0xca2   :  { %8787 = vmatpush.msra.mxu3 %v14558_v9  ;;  %8573 = vmatpush.msra.mxu0 %v14573_v15  ;;  %v8679_v7 = vand.u32 4294901760, %v8678_v63 }
 0xca3   :  { %8662 = vmatpush.msra.mxu1 %v8661_v22  ;;  %8737 = vmatpush.msra.mxu2 %v14587_v27 }
 0xca4   :  { %8465 = vmatmul.f32.gmra.mxu2 %v14378_v16  ;;  %8789 = vmatpush.msra.mxu3 %v14573_v15  ;;  %v8673_v16 = vand.u32 4294901760, %v8672_v29 }
 0xca5   :  { %8668 = vmatpush.msra.mxu1 %v8667_v26  ;;  %8830 = vmatpush.msrb.mxu0 %v8623_v60 }
 0xca7   :  { %8353 = vmatmul.f32.gmra.mxu0 %v14405_v14  ;;  %8674 = vmatpush.msra.mxu1 %v8673_v16  ;;  %v16124_v14 = vand.u32 4294901760, %v14530_v44 }
 0xca8   :  { %8403 = vmatmul.f32.gmra.mxu1 %v8213_v55  ;;  %v14610_v35 = vpop.f32.mrf.mxu0  ;;  %8834 = vmatpush.msrb.mxu0 %v8629_v46 }
 0xca9   :  { %8515 = vmatmul.f32.gmra.mxu3 %v14394_v42  ;;  %16119 = vst [vmem:[#allocation33_spill] sm:$0xff] %v14610_v35  ;;  %8680 = vmatpush.msra.mxu1 %v8679_v7 }
 0xcaa   :  { %8838 = vmatpush.msrb.mxu0 %v8635_v58 }
 0xcab   :  { %8895 = vmatpush.msrb.mxu1 %v14453_v0 }
 0xcac   :  { %8469 = vmatmul.f32.gmra.mxu2 %v14394_v42  ;;  %8842 = vmatpush.msrb.mxu0 %v8641_v4 }
 0xcad   :  { %8897 = vmatpush.msrb.mxu1 %v14455_v21  ;;  %v16128_v21 = vand.u32 4294901760, %v14561_v49 }
 0xcae   :  { %v14622_v45 = vpop.f32.mrf.mxu3  ;;  %8846 = vmatpush.msrb.mxu0 %v8647_v6 }
 0xcaf   :  { %8358 = vmatmul.f32.gmra.mxu0 %v14421_v10  ;;  %16120 = vst [vmem:[#allocation38_spill] sm:$0xff] %v14622_v45  ;;  %8899 = vmatpush.msrb.mxu1 %v14468_v61  ;;  %v16131_v61 = vand.u32 4294901760, %v14434_v12 }
 0xcb0   :  { %8409 = vmatmul.f32.gmra.mxu1 %v8221_v20  ;;  %8850 = vmatpush.msrb.mxu0 %v16124_v14  ;;  %v16125_v20 = vand.u32 4294901760, %v14421_v10 }
 0xcb1   :  { %8519 = vmatmul.f32.gmra.mxu3 %v14410_v11  ;;  %v14627_v55 = vpop.f32.mrf.mxu2  ;;  %v14632_v42 = vpop.f32.mrf.mxu0  ;;  %8901 = vmatpush.msrb.mxu1 %v14480_v57 }
 0xcb2   :  { %16121 = vst [vmem:[#allocation47_spill] sm:$0xff] %v14627_v55  ;;  %v14634_v19 = vpop.f32.mrf.mxu1  ;;  %8854 = vmatpush.msrb.mxu0 %v8659_v39 }
 0xcb3   :  { %16122 = vst [vmem:[#allocation11_spill] sm:$0xff] %v14632_v42  ;;  %8903 = vmatpush.msrb.mxu1 %v14496_v13 }
 0xcb4   :  { %16123 = vst [vmem:[#allocation20_spill] sm:$0xff] %v14634_v19  ;;  %8473 = vmatmul.f32.gmra.mxu2 %v14410_v11  ;;  %8858 = vmatpush.msrb.mxu0 %v16128_v21 }
 0xcb5   :  { %8905 = vmatpush.msrb.mxu1 %v14508_v3 }
 0xcb6   :  { %8862 = vmatpush.msrb.mxu0 %v8671_v59 }
 0xcb7   :  { %8363 = vmatmul.f32.gmra.mxu0 %v14434_v12  ;;  %8907 = vmatpush.msrb.mxu1 %v14527_v33 }
 0xcb8   :  { %8415 = vmatmul.f32.gmra.mxu1 %v16125_v20  ;;  %v14647_v0 = vpop.f32.mrf.mxu3  ;;  %8866 = vmatpush.msrb.mxu0 %v8677_v24 }
 0xcb9   :  { %8523 = vmatmul.f32.gmra.mxu3 %v14426_v48  ;;  %16126 = vst [vmem:[#allocation44_spill] sm:$0xff] %v14647_v0  ;;  %8909 = vmatpush.msrb.mxu1 %v14542_v17  ;;  %v16148_v17 = vld [vmem:[#allocation30_spill] sm:$0xff] }
 0xcbb   :  { %v14653_v11 = vpop.f32.mrf.mxu2  ;;  %8911 = vmatpush.msrb.mxu1 %v14558_v9 }
 0xcbc   :  { %8477 = vmatmul.f32.gmra.mxu2 %v14426_v48  ;;  %16127 = vst [vmem:[#allocation31_spill] sm:$0xff] %v14653_v11  ;;  %v14657_v53 = vpop.f32.mrf.mxu0 }
 0xcbd   :  { %16129 = vst [vmem:[#allocation27_spill] sm:$0xff] %v14657_v53  ;;  %v14659_v10 = vpop.f32.mrf.mxu1  ;;  %8913 = vmatpush.msrb.mxu1 %v14573_v15  ;;  %v10255_v53 = vld [vmem:[%s15628_s7 + $0xf0] sm:$0xff] }
 0xcbe   :  { %16130 = vst [vmem:[#allocation43_spill] sm:$0xff] %v14659_v10 }
 0xcbf   :  { %8579 = vmatmul.f32.vlgmr.msra.gmra.mxu0 %v11615_v37 }
 0xcc0   :  { %8421 = vmatmul.f32.gmra.mxu1 %v16131_v61 }
 0xcc1   :  { %8793 = vmatmul.f32.vlgmr.msra.gmra.mxu3 %v15836_v41 }
 0xcc4   :  { %8740 = vmatmul.f32.vlgmr.msra.gmra.mxu2 %v15838_v50  ;;  %v14669_v48 = vpop.f32.mrf.mxu3  ;;  %v14672_v43 = vpop.f32.mrf.mxu0 }
 0xcc5   :  { %16132 = vst [vmem:[#allocation10_spill] sm:$0xff] %v14669_v48  ;;  %v14674_v60 = vpop.f32.mrf.mxu1 }
 0xcc6   :  { %16133 = vst [vmem:[#allocation21_spill] sm:$0xff] %v14672_v43 }
 0xcc7   :  { %16134 = vst [vmem:[#allocation40_spill] sm:$0xff] %v14674_v60  ;;  %v14677_v57 = vpop.f32.mrf.mxu2  ;;  %8587 = vmatmul.f32.gmra.mxu0 %v15841_v1 }
 0xcc8   :  { %16135 = vst [vmem:[#allocation52_spill] sm:$0xff] %v14677_v57  ;;  %8682 = vmatmul.f32.vlgmr.msra.gmra.mxu1 %v15842_v36 }
 0xcc9   :  { %8799 = vmatmul.f32.gmra.mxu3 %v15843_v62 }
 0xccc   :  { %8745 = vmatmul.f32.gmra.mxu2 %v15844_v34  ;;  %v14683_v12 = vpop.f32.mrf.mxu3  ;;  %v14685_v2 = vpop.f32.mrf.mxu0 }
 0xccd   :  { %16136 = vst [vmem:[#allocation35_spill] sm:$0xff] %v14683_v12  ;;  %v14687_v46 = vpop.f32.mrf.mxu1 }
 0xcce   :  { %16137 = vst [vmem:[#allocation41_spill] sm:$0xff] %v14685_v2 }
 0xccf   :  { %16138 = vst [vmem:[#allocation24_spill] sm:$0xff] %v14687_v46  ;;  %v14689_v13 = vpop.f32.mrf.mxu2  ;;  %8595 = vmatmul.f32.gmra.mxu0 %v15847_v47 }
 0xcd0   :  { %16139 = vst [vmem:[#allocation26_spill] sm:$0xff] %v14689_v13  ;;  %8686 = vmatmul.f32.gmra.mxu1 %v15849_v28 }
 0xcd1   :  { %8805 = vmatmul.f32.gmra.mxu3 %v16049_v25 }
 0xcd4   :  { %8750 = vmatmul.f32.gmra.mxu2 %v15852_v23  ;;  %v14695_v8 = vpop.f32.mrf.mxu3  ;;  %v14697_v3 = vpop.f32.mrf.mxu0 }
 0xcd5   :  { %16140 = vst [vmem:[#allocation37_spill] sm:$0xff] %v14695_v8  ;;  %v14699_v58 = vpop.f32.mrf.mxu1 }
 0xcd6   :  { %16141 = vst [vmem:[#allocation53_spill] sm:$0xff] %v14697_v3 }
 0xcd7   :  { %16142 = vst [vmem:[#allocation25_spill] sm:$0xff] %v14699_v58  ;;  %v14701_v51 = vpop.f32.mrf.mxu2  ;;  %8603 = vmatmul.f32.gmra.mxu0 %v15855_v5 }
 0xcd8   :  { %16143 = vst [vmem:[#allocation22_spill] sm:$0xff] %v14701_v51  ;;  %8690 = vmatmul.f32.gmra.mxu1 %v15856_v30 }
 0xcd9   :  { %8811 = vmatmul.f32.gmra.mxu3 %v16052_v38 }
 0xcdc   :  { %8755 = vmatmul.f32.gmra.mxu2 %v15860_v18  ;;  %v14707_v4 = vpop.f32.mrf.mxu0  ;;  %v14711_v44 = vpop.f32.mrf.mxu3 }
 0xcdd   :  { %16144 = vst [vmem:[#allocation50_spill] sm:$0xff] %v14707_v4  ;;  %v14709_v33 = vpop.f32.mrf.mxu1 }
 0xcde   :  { %16145 = vst [vmem:[#allocation48_spill] sm:$0xff] %v14709_v33 }
 0xcdf   :  { %16146 = vst [vmem:[#allocation34_spill] sm:$0xff] %v14711_v44  ;;  %v14713_v6 = vpop.f32.mrf.mxu2  ;;  %8611 = vmatmul.f32.gmra.mxu0 %v15862_v54 }
 0xce0   :  { %16147 = vst [vmem:[#allocation45_spill] sm:$0xff] %v14713_v6  ;;  %8694 = vmatmul.f32.gmra.mxu1 %v15863_v31 }
 0xce1   :  { %8817 = vmatmul.f32.gmra.mxu3 %v16057_v40 }
 0xce4   :  { %8760 = vmatmul.f32.gmra.mxu2 %v16148_v17  ;;  %v14719_v52 = vpop.f32.mrf.mxu0  ;;  %v14726_v39 = vpop.f32.mrf.mxu3 }
 0xce5   :  { %16149 = vst [vmem:[#allocation51_spill] sm:$0xff] %v14719_v52  ;;  %v14721_v9 = vpop.f32.mrf.mxu1 }
 0xce6   :  { %16150 = vst [vmem:[#allocation49_spill] sm:$0xff] %v14721_v9 }
 0xce7   :  { %v14723_v49 = vpop.f32.mrf.mxu2  ;;  %8868 = vmatmul.f32.vlgmr.msrb.gmra.mxu0 %v15842_v36  ;;  %16152 = vst [vmem:[#allocation46_spill] sm:$0xff] %v14726_v39 }
 0xce8   :  { %16151 = vst [vmem:[#allocation39_spill] sm:$0xff] %v14723_v49  ;;  %8698 = vmatmul.f32.gmra.mxu1 %v16153_v32 }
 0xcec   :  { %v14729_v15 = vpop.f32.mrf.mxu0  ;;  %v14737_v59 = vpop.f32.mrf.mxu3 }
 0xced   :  { %16154 = vst [vmem:[#allocation42_spill] sm:$0xff] %v14729_v15  ;;  %v14731_v63 = vpop.f32.mrf.mxu1 }
 0xcee   :  { %16155 = vst [vmem:[#allocation29_spill] sm:$0xff] %v14731_v63 }
 0xcef   :  { %v14733_v27 = vpop.f32.mrf.mxu2  ;;  %8872 = vmatmul.f32.gmra.mxu0 %v15849_v28  ;;  %16157 = vst [vmem:[#allocation217_spill] sm:$0xff] %v14737_v59 }
 0xcf0   :  { %16156 = vst [vmem:[#allocation216_spill] sm:$0xff] %v14733_v27  ;;  %8915 = vmatmul.f32.vlgmr.msrb.gmra.mxu1 %v15842_v36 }
 0xcf4   :  { %v14739_v56 = vpop.f32.mrf.mxu0  ;;  %v14747_v29 = vpop.f32.mrf.mxu3 }
 0xcf5   :  { %16158 = vst [vmem:[#allocation218_spill] sm:$0xff] %v14739_v56  ;;  %v14741_v24 = vpop.f32.mrf.mxu1 }
 0xcf6   :  { %16159 = vst [vmem:[#allocation219_spill] sm:$0xff] %v14741_v24 }
 0xcf7   :  { %8876 = vmatmul.f32.gmra.mxu0 %v15856_v30  ;;  %v14745_v22 = vpop.f32.mrf.mxu2  ;;  %16161 = vst [vmem:[#allocation221_spill] sm:$0xff] %v14747_v29 }
 0xcf8   :  { %8919 = vmatmul.f32.gmra.mxu1 %v15849_v28  ;;  %16160 = vst [vmem:[#allocation220_spill] sm:$0xff] %v14745_v22 }
 0xcfc   :  { %v14749_v26 = vpop.f32.mrf.mxu0  ;;  %v14761_v21 = vpop.f32.mrf.mxu3 }
 0xcfd   :  { %16162 = vst [vmem:[#allocation222_spill] sm:$0xff] %v14749_v26  ;;  %v14751_v16 = vpop.f32.mrf.mxu1 }
 0xcfe   :  { %16163 = vst [vmem:[#allocation223_spill] sm:$0xff] %v14751_v16 }
 0xcff   :  { %8880 = vmatmul.f32.gmra.mxu0 %v15863_v31  ;;  %v14755_v7 = vpop.f32.mrf.mxu2  ;;  %16167 = vst [vmem:[#allocation227_spill] sm:$0xff] %v14761_v21 }
 0xd00   :  { %8923 = vmatmul.f32.gmra.mxu1 %v15856_v30  ;;  %16164 = vst [vmem:[#allocation224_spill] sm:$0xff] %v14755_v7 }
 0xd04   :  { %v14757_v14 = vpop.f32.mrf.mxu0  ;;  %v14771_v26 = vpop.f32.mrf.mxu3 }
 0xd05   :  { %16165 = vst [vmem:[#allocation225_spill] sm:$0xff] %v14757_v14  ;;  %v14759_v20 = vpop.f32.mrf.mxu1 }
 0xd06   :  { %16166 = vst [vmem:[#allocation226_spill] sm:$0xff] %v14759_v20 }
 0xd07   :  { %8884 = vmatmul.f32.gmra.mxu0 %v16153_v32  ;;  %v14767_v44 = vpop.f32.mrf.mxu2  ;;  %16171 = vst [vmem:[#allocation231_spill] sm:$0xff] %v14771_v26 }
 0xd08   :  { %8927 = vmatmul.f32.gmra.mxu1 %v15863_v31  ;;  %16169 = vst [vmem:[#allocation229_spill] sm:$0xff] %v14767_v44 }
 0xd0c   :  { %v14765_v61 = vpop.f32.mrf.mxu0  ;;  %v14780_v33 = vpop.f32.mrf.mxu3 }
 0xd0d   :  { %16168 = vst [vmem:[#allocation228_spill] sm:$0xff] %v14765_v61  ;;  %v14769_v6 = vpop.f32.mrf.mxu1 }
 0xd0e   :  { %16170 = vst [vmem:[#allocation230_spill] sm:$0xff] %v14769_v6 }
 0xd0f   :  { %v14778_v20 = vpop.f32.mrf.mxu2  ;;  %16175 = vst [vmem:[#allocation235_spill] sm:$0xff] %v14780_v33 }
 0xd10   :  { %8931 = vmatmul.f32.gmra.mxu1 %v16153_v32  ;;  %16174 = vst [vmem:[#allocation234_spill] sm:$0xff] %v14778_v20 }
 0xd14   :  { %v14774_v8 = vpop.f32.mrf.mxu0  ;;  %v14788_v44 = vpop.f32.mrf.mxu3 }
 0xd15   :  { %16172 = vst [vmem:[#allocation232_spill] sm:$0xff] %v14774_v8  ;;  %v14776_v14 = vpop.f32.mrf.mxu1 }
 0xd16   :  { %16173 = vst [vmem:[#allocation233_spill] sm:$0xff] %v14776_v14 }
 0xd17   :  { %v14786_v58 = vpop.f32.mrf.mxu2  ;;  %16179 = vst [vmem:[#allocation239_spill] sm:$0xff] %v14788_v44 }
 0xd18   :  { %16178 = vst [vmem:[#allocation238_spill] sm:$0xff] %v14786_v58 }
 0xd1c   :  { %v14782_v3 = vpop.f32.mrf.mxu0  ;;  %v14800_v20 = vpop.f32.mrf.mxu3 }
 0xd1d   :  { %16176 = vst [vmem:[#allocation236_spill] sm:$0xff] %v14782_v3  ;;  %v14784_v51 = vpop.f32.mrf.mxu1 }
 0xd1e   :  { %16177 = vst [vmem:[#allocation237_spill] sm:$0xff] %v14784_v51 }
 0xd1f   :  { %v14794_v2 = vpop.f32.mrf.mxu2  ;;  %16185 = vst [vmem:[#allocation245_spill] sm:$0xff] %v14800_v20 }
 0xd20   :  { %16182 = vst [vmem:[#allocation242_spill] sm:$0xff] %v14794_v2 }
 0xd24   :  { %v14790_v6 = vpop.f32.mrf.mxu0  ;;  %v14808_v16 = vpop.f32.mrf.mxu3 }
 0xd25   :  { %16180 = vst [vmem:[#allocation240_spill] sm:$0xff] %v14790_v6  ;;  %v14792_v26 = vpop.f32.mrf.mxu1 }
 0xd26   :  { %16181 = vst [vmem:[#allocation241_spill] sm:$0xff] %v14792_v26 }
 0xd27   :  { %v14804_v3 = vpop.f32.mrf.mxu2  ;;  %16189 = vst [vmem:[#allocation249_spill] sm:$0xff] %v14808_v16 }
 0xd28   :  { %16187 = vst [vmem:[#allocation247_spill] sm:$0xff] %v14804_v3 }
 0xd2c   :  { %v14796_v21 = vpop.f32.mrf.mxu0  ;;  %v14814_v2 = vpop.f32.mrf.mxu3 }
 0xd2d   :  { %16183 = vst [vmem:[#allocation243_spill] sm:$0xff] %v14796_v21  ;;  %v14798_v7 = vpop.f32.mrf.mxu1 }
 0xd2e   :  { %16184 = vst [vmem:[#allocation244_spill] sm:$0xff] %v14798_v7 }
 0xd2f   :  { %v14812_v26 = vpop.f32.mrf.mxu2  ;;  %16192 = vst [vmem:[#allocation252_spill] sm:$0xff] %v14814_v2 }
 0xd30   :  { %16191 = vst [vmem:[#allocation251_spill] sm:$0xff] %v14812_v26 }
 0xd34   :  { %v14802_v33 = vpop.f32.mrf.mxu0  ;;  %v14818_v20 = vpop.f32.mrf.mxu3 }
 0xd35   :  { %16186 = vst [vmem:[#allocation246_spill] sm:$0xff] %v14802_v33  ;;  %v14806_v29 = vpop.f32.mrf.mxu1 }
 0xd36   :  { %16188 = vst [vmem:[#allocation248_spill] sm:$0xff] %v14806_v29 }
 0xd37   :  { %v14816_v7 = vpop.f32.mrf.mxu2  ;;  %16194 = vst [vmem:[#allocation254_spill] sm:$0xff] %v14818_v20 }
 0xd38   :  { %16193 = vst [vmem:[#allocation253_spill] sm:$0xff] %v14816_v7 }
 0xd3c   :  { %v8580_v56 = vpop.f32.mrf.mxu0  ;;  %v14822_v16 = vpop.f32.mrf.mxu3 }
 0xd3d   :  { %v14810_v6 = vpop.f32.mrf.mxu1  ;;  %16196 = vst [vmem:[#allocation256_spill] sm:$0xff] %v14822_v16 }
 0xd3e   :  { %16190 = vst [vmem:[#allocation250_spill] sm:$0xff] %v14810_v6 }
 0xd3f   :  { %v14820_v3 = vpop.f32.mrf.mxu2 }
 0xd40   :  { %16195 = vst [vmem:[#allocation255_spill] sm:$0xff] %v14820_v3 }
 0xd44   :  { %v8588_v21 = vpop.f32.mrf.mxu0  ;;  %v8794_v26 = vpop.f32.mrf.mxu3 }
 0xd45   :  { %v8683_v51 = vpop.f32.mrf.mxu1 }
 0xd46   :  { %v8684_v57 = vadd.f32 %v8683_v51, %v8580_v56 }
 0xd47   :  { %v8741_v6 = vpop.f32.mrf.mxu2 }
 0xd48   :  { %v8742_v9 = vadd.f32 %v8741_v6, %v8684_v57 }
 0xd4c   :  { %v8596_v33 = vpop.f32.mrf.mxu0  ;;  %v8800_v24 = vpop.f32.mrf.mxu3 }
 0xd4d   :  { %v8687_v44 = vpop.f32.mrf.mxu1 }
 0xd4e   :  { %v8688_v43 = vadd.f32 %v8687_v44, %v8588_v21  ;;  %v8936_v44 = vsel %vm4257_vm7, %v10255_v53, 0 }
 0xd4f   :  { %v8746_v59 = vpop.f32.mrf.mxu2 }
 0xd50   :  { %v8747_v49 = vadd.f32 %v8746_v59, %v8688_v43 }
 0xd54   :  { %v8604_v29 = vpop.f32.mrf.mxu0  ;;  %v8806_v20 = vpop.f32.mrf.mxu3 }
 0xd55   :  { %v8691_v22 = vpop.f32.mrf.mxu1 }
 0xd56   :  { %v8692_v61 = vadd.f32 %v8691_v22, %v8596_v33  ;;  %v8801_v33 = vadd.f32 %v8800_v24, %v8747_v49 }
 0xd57   :  { %v8751_v15 = vpop.f32.mrf.mxu2 }
 0xd58   :  { %v8752_v0 = vadd.f32 %v8751_v15, %v8692_v61 }
 0xd5a   :  { %v8807_v22 = vadd.f32 %v8806_v20, %v8752_v0 }
 0xd5c   :  { %v8612_v12 = vpop.f32.mrf.mxu0  ;;  %v8812_v16 = vpop.f32.mrf.mxu3 }
 0xd5d   :  { %v8695_v8 = vpop.f32.mrf.mxu1 }
 0xd5e   :  { %v8696_v48 = vadd.f32 %v8695_v8, %v8604_v29 }
 0xd5f   :  { %v8756_v3 = vpop.f32.mrf.mxu2 }
 0xd60   :  { %v8757_v39 = vadd.f32 %v8756_v3, %v8696_v48  ;;  %v8795_v3 = vadd.f32 %v8794_v26, %v8742_v9 }
 0xd62   :  { %v8813_v60 = vadd.f32 %v8812_v16, %v8757_v39  ;;  %v14828_v39 = vand.u32 4294901760, %v8936_v44 }
 0xd64   :  { %v8869_v58 = vpop.f32.mrf.mxu0  ;;  %v8818_v51 = vpop.f32.mrf.mxu3 }
 0xd65   :  { %v8699_v2 = vpop.f32.mrf.mxu1  ;;  %v8870_v15 = vadd.f32 %v8869_v58, %v8795_v3 }
 0xd66   :  { %v8700_v52 = vadd.f32 %v8699_v2, %v8612_v12 }
 0xd67   :  { %v8761_v11 = vpop.f32.mrf.mxu2 }
 0xd68   :  { %v8762_v29 = vadd.f32 %v8761_v11, %v8700_v52  ;;  %v10256_v11 = vld [vmem:[%s15628_s7 + $0xf8] sm:$0xff] }
 0xd69   :  { %v8939_v52 = vsel %vm4257_vm7, %v10256_v11, 0 }
 0xd6a   :  { %v8819_v59 = vadd.f32 %v8818_v51, %v8762_v29  ;;  %v14855_v16 = vand.u32 4294901760, %v8939_v52  ;;  %v10257_v29 = vld [vmem:[%s15628_s7 + $0x100] sm:$0xff] }
 0xd6c   :  { %v8873_v13 = vpop.f32.mrf.mxu0 }
 0xd6d   :  { %v8916_v7 = vpop.f32.mrf.mxu1  ;;  %v8874_v12 = vadd.f32 %v8873_v13, %v8801_v33 }
 0xd6e   :  { %v8917_v53 = vadd.f32 %v8916_v7, %v8870_v15 }
 0xd70   :  { %v14846_v49 = vand.u32 4294901760, %v8917_v53 }
 0xd74   :  { %v8877_v14 = vpop.f32.mrf.mxu0 }
 0xd75   :  { %v8920_v27 = vpop.f32.mrf.mxu1  ;;  %v8878_v43 = vadd.f32 %v8877_v14, %v8807_v22 }
 0xd76   :  { %v8921_v56 = vadd.f32 %v8920_v27, %v8874_v12  ;;  %v10286_v27 = vld [vmem:[%s15625_s8 + $0x278] sm:$0xf]  ;;  %v14893_v12 = vsub.f32 %v8939_v52, %v14855_v16 }
 0xd77   :  { %v9334_v7 = vsel %vm1246_vm2, %v10286_v27, 0 }
 0xd78   :  { %v14839_v9 = vand.u32 4294901760, %v8921_v56  ;;  %v14858_v14 = vand.u32 4294901760, %v9334_v7  ;;  %v16199_v42 = vand.u32 4294901760, %v14893_v12 }
 0xd7a   :  { %v14861_v20 = vsub.f32 %v8921_v56, %v14839_v9  ;;  %v14879_v33 = vsub.f32 %v9334_v7, %v14858_v14  ;;  %v8988_v55 = vsub.f32 %v14893_v12, %v16199_v42 }
 0xd7c   :  { %v8881_v63 = vpop.f32.mrf.mxu0  ;;  %v15700_v15 = vand.u32 4294901760, %v14879_v33 }
 0xd7d   :  { %v8924_v46 = vpop.f32.mrf.mxu1  ;;  %v8882_v4 = vadd.f32 %v8881_v63, %v8813_v60 }
 0xd7e   :  { %v8925_v57 = vadd.f32 %v8924_v46, %v8878_v43  ;;  %v10284_v43 = vld [vmem:[%s15625_s8 + $0x268] sm:$0xff] }
 0xd7f   :  { %v14904_v56 = vand.u32 4294901760, %v10284_v43 }
 0xd80   :  { %v14841_v58 = vand.u32 4294901760, %v8925_v57 }
 0xd82   :  { %v14864_v21 = vsub.f32 %v8925_v57, %v14841_v58 }
 0xd84   :  { %v8885_v2 = vpop.f32.mrf.mxu0 }
 0xd85   :  { %v8928_v8 = vpop.f32.mrf.mxu1  ;;  %v8886_v0 = vadd.f32 %v8885_v2, %v8819_v59  ;;  %v8942_v2 = vsel %vm4257_vm7, %v10257_v29, 0 }
 0xd86   :  { %v8929_v48 = vadd.f32 %v8928_v8, %v8882_v4  ;;  %v14836_v4 = vsub.f32 %v8936_v44, %v14828_v39  ;;  %v10285_v44 = vld [vmem:[%s15625_s8 + $0x270] sm:$0xff] }
 0xd87   :  { %v14881_v22 = vand.u32 4294901760, %v10285_v44 }
 0xd88   :  { %v14830_v6 = vand.u32 4294901760, %v8929_v48  ;;  %v15702_v26 = vand.u32 4294901760, %v14836_v4 }
 0xd89   :  { %v14902_v59 = vsub.f32 %v10285_v44, %v14881_v22  ;;  %v14930_v44 = vand.u32 4294901760, %v8942_v2 }
 0xd8a   :  { %v14844_v46 = vsub.f32 %v8929_v48, %v14830_v6  ;;  %v14884_v48 = vsub.f32 %v8917_v53, %v14846_v49  ;;  %v8980_v51 = vsub.f32 %v14836_v4, %v15702_v26  ;;  %v15704_v53 = vand.u32 4294901760, %v14864_v21 }
 0xd8b   :  { %v15703_v52 = vand.u32 4294901760, %v14902_v59  ;;  %v14973_v19 = vsub.f32 %v8942_v2, %v14930_v44 }
 0xd8c   :  { %v15701_v8 = vand.u32 4294901760, %v14844_v46 }
 0xd8d   :  { %v8932_v60 = vpop.f32.mrf.mxu1 }
 0xd8e   :  { %v8933_v13 = vadd.f32 %v8932_v60, %v8886_v0  ;;  %v9046_v11 = vsub.f32 %v14844_v46, %v15701_v8  ;;  %v15705_v0 = vand.u32 4294901760, %v14861_v20  ;;  %v10283_v60 = vld [vmem:[%s15625_s8 + $0x260] sm:$0xff]  ;;  %v9418_v8 = vsub.f32 %v14902_v59, %v15703_v52  ;;  %v10258_v52 = vld [vmem:[%s15628_s7 + $0x108] sm:$0xff] }
 0xd8f   :  { %v14925_v27 = vand.u32 4294901760, %v10283_v60  ;;  %v8945_v45 = vsel %vm4257_vm7, %v10258_v52, 0 }
 0xd90   :  { %v8954_v63 = vsel %vm4276_vm8, %v8933_v13, 0  ;;  %v9412_v13 = vsub.f32 %v14879_v33, %v15700_v15  ;;  %v10282_v15 = vld [vmem:[%s15625_s8 + $0x258] sm:$0xff]  ;;  %v9419_v35 = vand.u32 4294901760, %v9418_v8  ;;  %v16201_v8 = vand.u32 4294901760, %v14844_v46 }
 0xd91   :  { %v14852_v24 = vand.u32 4294901760, %v8954_v63  ;;  %v14954_v26 = vand.u32 4294901760, %v10282_v15  ;;  %v15005_v40 = vand.u32 4294901760, %v8945_v45 }
 0xd92   :  { %v9413_v29 = vand.u32 4294901760, %v9412_v13  ;;  %v16198_v13 = vand.u32 4294901760, %v14836_v4 }
 0xd93   :  { %v14867_v61 = vsub.f32 %v8954_v63, %v14852_v24  ;;  %8968 = vmatpush.msrb.mxu2 %v14852_v24  ;;  %9161 = vmatpush.msra.mxu1 %v14852_v24  ;;  %v14923_v63 = vsub.f32 %v10284_v43, %v14904_v56  ;;  %v9058_v43 = vsub.f32 %v14861_v20, %v15705_v0 }
 0xd94   :  { %v15042_v25 = vsub.f32 %v8945_v45, %v15005_v40 }
 0xd95   :  { %v9039_v3 = vand.u32 4294901760, %v14867_v61  ;;  %8970 = vmatpush.msrb.mxu2 %v14830_v6  ;;  %9105 = vmatpush.msra.mxu0 %v14867_v61 }
 0xd96   :  { %9163 = vmatpush.msra.mxu1 %v14830_v6 }
 0xd97   :  { %8972 = vmatpush.msrb.mxu2 %v14841_v58  ;;  %9108 = vmatpush.msra.mxu0 %v14844_v46  ;;  %v9040_v57 = vsub.f32 %v14867_v61, %v9039_v3  ;;  %v8981_v61 = vand.u32 4294901760, %v8980_v51  ;;  %v14942_v51 = vsub.f32 %v10283_v60, %v14925_v27  ;;  %v10281_v60 = vld [vmem:[%s15625_s8 + $0x250] sm:$0xff]  ;;  %v10278_v46 = vld [vmem:[%s15625_s8 + $0x238] sm:$0xff] }
 0xd98   :  { %9165 = vmatpush.msra.mxu1 %v14841_v58  ;;  %v14965_v10 = vand.u32 4294901760, %v10281_v60 }
 0xd99   :  { %8974 = vmatpush.msrb.mxu2 %v14839_v9  ;;  %9111 = vmatpush.msra.mxu0 %v14864_v21  ;;  %v9041_v7 = vand.u32 4294901760, %v9040_v57  ;;  %v9052_v57 = vsub.f32 %v14864_v21, %v15704_v53  ;;  %v16197_v53 = vand.u32 4294901760, %v14923_v63 }
 0xd9a   :  { %9167 = vmatpush.msra.mxu1 %v14839_v9  ;;  %v14986_v42 = vsub.f32 %v10281_v60, %v14965_v10  ;;  %v16202_v60 = vand.u32 4294901760, %v14942_v51 }
 0xd9b   :  { %8976 = vmatpush.msrb.mxu2 %v14846_v49  ;;  %9042 = vmatpush.msrb.mxu3 %v9041_v7  ;;  %v9047_v7 = vand.u32 4294901760, %v9046_v11  ;;  %v9424_v0 = vsub.f32 %v14923_v63, %v16197_v53  ;;  %v14976_v11 = vsub.f32 %v10282_v15, %v14954_v26  ;;  %v10280_v53 = vld [vmem:[%s15625_s8 + $0x248] sm:$0xff]  ;;  %v9053_v2 = vand.u32 4294901760, %v9052_v57 }
 0xd9c   :  { %9114 = vmatpush.msra.mxu0 %v14861_v20  ;;  %9169 = vmatpush.msra.mxu1 %v14846_v49  ;;  %v9059_v15 = vand.u32 4294901760, %v9058_v43  ;;  %v14990_v38 = vand.u32 4294901760, %v10280_v53  ;;  %v9430_v57 = vsub.f32 %v14942_v51, %v16202_v60  ;;  %v15022_v60 = vand.u32 4294901760, %v10278_v46 }
 0xd9d   :  { %8982 = vmatmul.f32.vlgmr.msrb.gmra.mxu2 %v8981_v61  ;;  %9173 = vmatmul.f32.vlgmr.msra.gmra.mxu1 %v16198_v13  ;;  %v16200_v61 = vand.u32 4294901760, %v14884_v48  ;;  %v9425_v52 = vand.u32 4294901760, %v9424_v0  ;;  %v16203_v0 = vand.u32 4294901760, %v14864_v21  ;;  %v16205_v21 = vand.u32 4294901760, %v14861_v20 }
 0xd9e   :  { %9221 = vmatpush.msra.mxu2 %v9039_v3  ;;  %9048 = vmatpush.msrb.mxu3 %v9047_v7  ;;  %v10279_v3 = vld [vmem:[%s15625_s8 + $0x240] sm:$0xff]  ;;  %v8989_v7 = vand.u32 4294901760, %v8988_v55 }
 0xd9f   :  { %v9064_v13 = vsub.f32 %v14884_v48, %v16200_v61  ;;  %9117 = vmatpush.msra.mxu0 %v14884_v48  ;;  %9414 = vmatpush.msrb.mxu1 %v9413_v29  ;;  %v15002_v43 = vand.u32 4294901760, %v10279_v3  ;;  %v8995_v61 = vand.u32 4294901760, %v14973_v19  ;;  %v10259_v29 = vld [vmem:[%s15628_s7 + $0x110] sm:$0xff] }
 0xda0   :  { %9120 = vmatmul.f32.vlgmr.msra.gmra.mxu0 %v14836_v4  ;;  %9225 = vmatpush.msra.mxu2 %v16201_v8  ;;  %v15009_v4 = vsub.f32 %v10280_v53, %v14990_v38 }
 0xda1   :  { %9054 = vmatpush.msrb.mxu3 %v9053_v2  ;;  %9343 = vmatpush.msrb.mxu0 %v14858_v14  ;;  %v16204_v2 = vand.u32 4294901760, %v14976_v11  ;;  %v15020_v8 = vsub.f32 %v10279_v3, %v15002_v43  ;;  %v9065_v53 = vand.u32 4294901760, %v9064_v13  ;;  %v9431_v3 = vand.u32 4294901760, %v9430_v57 }
 0xda2   :  { %9229 = vmatpush.msra.mxu2 %v16203_v0  ;;  %9420 = vmatpush.msrb.mxu1 %v9419_v35  ;;  %v10277_v35 = vld [vmem:[%s15625_s8 + $0x230] sm:$0xff]  ;;  %v16206_v0 = vand.u32 4294901760, %v14986_v42  ;;  %v9447_v13 = vand.u32 4294901760, %v15009_v4  ;;  %v8996_v17 = vsub.f32 %v14973_v19, %v8995_v61  ;;  %v8948_v57 = vsel %vm4257_vm7, %v10259_v29, 0 }
 0xda3   :  { %v9436_v55 = vsub.f32 %v14976_v11, %v16204_v2  ;;  %9060 = vmatpush.msrb.mxu3 %v9059_v15  ;;  %9345 = vmatpush.msrb.mxu0 %v14881_v22  ;;  %v15038_v2 = vsub.f32 %v10278_v46, %v15022_v60  ;;  %v15044_v20 = vand.u32 4294901760, %v10277_v35  ;;  %v9453_v46 = vand.u32 4294901760, %v15020_v8 }
 0xda4   :  { %9233 = vmatpush.msra.mxu2 %v16205_v21  ;;  %9426 = vmatpush.msrb.mxu1 %v9425_v52  ;;  %v9442_v15 = vsub.f32 %v14986_v42, %v16206_v0  ;;  %v16207_v52 = vand.u32 4294901760, %v14893_v12  ;;  %v9448_v0 = vsub.f32 %v15009_v4, %v9447_v13 }
 0xda5   :  { %9066 = vmatpush.msrb.mxu3 %v9065_v53  ;;  %8990 = vmatmul.f32.gmra.mxu2 %v8989_v7  ;;  %v9437_v21 = vand.u32 4294901760, %v9436_v55  ;;  %v16208_v53 = vand.u32 4294901760, %v14884_v48  ;;  %v15055_v45 = vsub.f32 %v10277_v35, %v15044_v20  ;;  %v9459_v29 = vand.u32 4294901760, %v15038_v2 }
 0xda6   :  { %9068 = vmatmul.f32.vlgmr.msrb.gmra.mxu3 %v14828_v39  ;;  %9179 = vmatmul.f32.gmra.mxu1 %v16207_v52  ;;  %v9443_v7 = vand.u32 4294901760, %v9442_v15  ;;  %v8997_v55 = vand.u32 4294901760, %v8996_v17  ;;  %v9003_v48 = vand.u32 4294901760, %v15042_v25  ;;  %v15064_v52 = vand.u32 4294901760, %v8948_v57  ;;  %v10260_v17 = vld [vmem:[%s15628_s7 + $0x118] sm:$0x3f] }
 0xda7   :  { %9237 = vmatpush.msra.mxu2 %v16208_v53  ;;  %9275 = vmatpush.msra.mxu3 %v14852_v24  ;;  %v9454_v24 = vsub.f32 %v15020_v8, %v9453_v46  ;;  %v9460_v35 = vsub.f32 %v15038_v2, %v9459_v29  ;;  %v8951_v15 = vsel %vm4257_vm7, %v10260_v17, 0  ;;  %v16209_v17 = vand.u32 4294901760, %v14879_v33 }
 0xda8   :  { %9125 = vmatmul.f32.gmra.mxu0 %v14893_v12  ;;  %9432 = vmatpush.msrb.mxu1 %v9431_v3  ;;  %v9449_v12 = vand.u32 4294901760, %v9448_v0  ;;  %v9010_v3 = vsub.f32 %v8948_v57, %v15064_v52  ;;  %v15092_v0 = vand.u32 4294901760, %v8951_v15 }
 0xda9   :  { %9277 = vmatpush.msra.mxu3 %v14830_v6  ;;  %9347 = vmatpush.msrb.mxu0 %v14904_v56  ;;  %v9465_v6 = vand.u32 4294901760, %v15055_v45 }
 0xdaa   :  { %9438 = vmatpush.msrb.mxu1 %v9437_v21  ;;  %9498 = vmatpush.msrb.mxu2 %v14879_v33  ;;  %v9455_v21 = vand.u32 4294901760, %v9454_v24  ;;  %v9011_v57 = vand.u32 4294901760, %v9010_v3 }
 0xdab   :  { %9279 = vmatpush.msra.mxu3 %v14841_v58  ;;  %9349 = vmatpush.msrb.mxu0 %v14925_v27  ;;  %v9004_v58 = vsub.f32 %v15042_v25, %v9003_v48  ;;  %v9466_v53 = vsub.f32 %v15055_v45, %v9465_v6 }
 0xdac   :  { %9444 = vmatpush.msrb.mxu1 %v9443_v7  ;;  %9501 = vmatpush.msrb.mxu2 %v14902_v59 }
 0xdad   :  { %9281 = vmatpush.msra.mxu3 %v14839_v9  ;;  %8998 = vmatmul.f32.gmra.mxu2 %v8997_v55  ;;  %v9461_v9 = vand.u32 4294901760, %v9460_v35  ;;  %v9005_v7 = vand.u32 4294901760, %v9004_v58 }
 0xdae   :  { %9072 = vmatmul.f32.gmra.mxu3 %v14855_v16  ;;  %9185 = vmatmul.f32.gmra.mxu1 %v8995_v61  ;;  %v9018_v61 = vsub.f32 %v8951_v15, %v15092_v0  ;;  %v16225_v15 = vld [vmem:[#allocation50_spill] sm:$0xff] }
 0xdaf   :  { %9283 = vmatpush.msra.mxu3 %v14846_v49  ;;  %9351 = vmatpush.msrb.mxu0 %v14954_v26  ;;  %v9467_v49 = vand.u32 4294901760, %v9466_v53 }
 0xdb0   :  { %9130 = vmatmul.f32.gmra.mxu0 %v14973_v19  ;;  %9450 = vmatpush.msrb.mxu1 %v9449_v12  ;;  %v9012_v19 = vsub.f32 %v9010_v3, %v9011_v57  ;;  %v9019_v24 = vand.u32 4294901760, %v9018_v61  ;;  %v16224_v12 = vld [vmem:[#allocation38_spill] sm:$0xff] }
 0xdb1   :  { %9353 = vmatpush.msrb.mxu0 %v14965_v10  ;;  %9504 = vmatpush.msrb.mxu2 %v14923_v63 }
 0xdb2   :  { %9456 = vmatpush.msrb.mxu1 %v9455_v21  ;;  %9559 = vmatpush.msrb.mxu3 %v14858_v14  ;;  %v9013_v55 = vand.u32 4294901760, %v9012_v19 }
 0xdb3   :  { %9355 = vmatpush.msrb.mxu0 %v14990_v38  ;;  %9507 = vmatpush.msrb.mxu2 %v14942_v51 }
 0xdb4   :  { %9462 = vmatpush.msrb.mxu1 %v9461_v9  ;;  %9561 = vmatpush.msrb.mxu3 %v14881_v22 }
 0xdb5   :  { %9006 = vmatmul.f32.gmra.mxu2 %v9005_v7  ;;  %9357 = vmatpush.msrb.mxu0 %v15002_v43  ;;  %v16226_v7 = vld [vmem:[#allocation31_spill] sm:$0xff] }
 0xdb6   :  { %9076 = vmatmul.f32.gmra.mxu3 %v14930_v44  ;;  %9191 = vmatmul.f32.gmra.mxu1 %v9003_v48  ;;  %v16210_v48 = vand.u32 4294901760, %v14902_v59  ;;  %v16213_v59 = vand.u32 4294901760, %v14976_v11 }
 0xdb7   :  { %9359 = vmatpush.msrb.mxu0 %v15022_v60  ;;  %9468 = vmatpush.msrb.mxu1 %v9467_v49 }
 0xdb8   :  { %9135 = vmatmul.f32.gmra.mxu0 %v15042_v25  ;;  %9510 = vmatpush.msrb.mxu2 %v14976_v11  ;;  %v9020_v25 = vsub.f32 %v9018_v61, %v9019_v24  ;;  %v16220_v11 = vld [vmem:[#allocation20_spill] sm:$0xff] }
 0xdb9   :  { %9683 = vmatpush.msra.mxu1 %v14858_v14  ;;  %9361 = vmatpush.msrb.mxu0 %v15044_v20  ;;  %v16211_v14 = vand.u32 4294901760, %v14923_v63 }
 0xdba   :  { %9513 = vmatpush.msrb.mxu2 %v14986_v42  ;;  %9563 = vmatpush.msrb.mxu3 %v14904_v56  ;;  %v9021_v33 = vand.u32 4294901760, %v9020_v25  ;;  %v16230_v25 = vld [vmem:[#allocation44_spill] sm:$0xff] }
 0xdbb   :  { %9618 = vmatpush.msra.mxu0 %v16209_v17  ;;  %9685 = vmatpush.msra.mxu1 %v14881_v22  ;;  %v16212_v22 = vand.u32 4294901760, %v14942_v51  ;;  %v16219_v51 = vld [vmem:[#allocation33_spill] sm:$0xff] }
 0xdbc   :  { %9565 = vmatpush.msrb.mxu3 %v14925_v27  ;;  %9516 = vmatpush.msrb.mxu2 %v15009_v4 }
 0xdbd   :  { %9622 = vmatpush.msra.mxu0 %v16210_v48  ;;  %9687 = vmatpush.msra.mxu1 %v14904_v56  ;;  %v16214_v56 = vand.u32 4294901760, %v14986_v42  ;;  %v7914_v42 = vadd.f32 %v16220_v11, %v16219_v51  ;;  %v16241_v11 = vld [vmem:[#allocation233_spill] sm:$0xff] }
 0xdbe   :  { %9014 = vmatmul.f32.gmra.mxu2 %v9013_v55  ;;  %9080 = vmatmul.f32.gmra.mxu3 %v15005_v40  ;;  %v16228_v55 = vld [vmem:[#allocation27_spill] sm:$0xff] }
 0xdbf   :  { %9197 = vmatmul.f32.gmra.mxu1 %v9011_v57  ;;  %9626 = vmatpush.msra.mxu0 %v16211_v14 }
 0xdc0   :  { %9689 = vmatpush.msra.mxu1 %v14925_v27  ;;  %9140 = vmatmul.f32.gmra.mxu0 %v9010_v3 }
 0xdc1   :  { %9630 = vmatpush.msra.mxu0 %v16212_v22  ;;  %9519 = vmatpush.msrb.mxu2 %v15020_v8 }
 0xdc2   :  { %9691 = vmatpush.msra.mxu1 %v14954_v26  ;;  %9567 = vmatpush.msrb.mxu3 %v14954_v26 }
 0xdc3   :  { %9634 = vmatpush.msra.mxu0 %v16213_v59  ;;  %9522 = vmatpush.msrb.mxu2 %v15038_v2 }
 0xdc4   :  { %9693 = vmatpush.msra.mxu1 %v14965_v10  ;;  %9569 = vmatpush.msrb.mxu3 %v14965_v10 }
 0xdc5   :  { %9638 = vmatpush.msra.mxu0 %v16214_v56  ;;  %9525 = vmatpush.msrb.mxu2 %v15055_v45  ;;  %v16232_v56 = vld [vmem:[#allocation51_spill] sm:$0xff] }
 0xdc6   :  { %9022 = vmatmul.f32.gmra.mxu2 %v9021_v33  ;;  %9084 = vmatmul.f32.gmra.mxu3 %v15064_v52  ;;  %v16231_v33 = vld [vmem:[#allocation39_spill] sm:$0xff] }
 0xdc7   :  { %9203 = vmatmul.f32.gmra.mxu1 %v9019_v24  ;;  %9642 = vmatpush.msra.mxu0 %v9447_v13  ;;  %v16221_v13 = vld [vmem:[#allocation47_spill] sm:$0xff]  ;;  %v16229_v24 = vld [vmem:[#allocation40_spill] sm:$0xff] }
 0xdc8   :  { %9695 = vmatpush.msra.mxu1 %v14990_v38  ;;  %9145 = vmatmul.f32.gmra.mxu0 %v9018_v61  ;;  %v7966_v2 = vadd.f32 %v16221_v13, %v7914_v42  ;;  %v7922_v17 = vadd.f32 %v16229_v24, %v16228_v55  ;;  %v16251_v55 = vld [vmem:[#allocation237_spill] sm:$0xff] }
 0xdc9   :  { %9646 = vmatpush.msra.mxu0 %v9453_v46  ;;  %9571 = vmatpush.msrb.mxu3 %v14990_v38 }
 0xdca   :  { %9697 = vmatpush.msra.mxu1 %v15002_v43  ;;  %v8019_v35 = vadd.f32 %v16224_v12, %v7966_v2  ;;  %v16243_v2 = vld [vmem:[#allocation26_spill] sm:$0xff] }
 0xdcb   :  { %9650 = vmatpush.msra.mxu0 %v9459_v29  ;;  %9573 = vmatpush.msrb.mxu3 %v15002_v43  ;;  %v16222_v29 = vld [vmem:[#allocation11_spill] sm:$0xff] }
 0xdcc   :  { %9699 = vmatpush.msra.mxu1 %v15022_v60  ;;  %v8085_v21 = vadd.f32 %v16225_v15, %v8019_v35 }
 0xdcd   :  { %9654 = vmatpush.msra.mxu0 %v9465_v6  ;;  %9575 = vmatpush.msrb.mxu3 %v15022_v60 }
 0xdce   :  { %9239 = vmatmul.f32.vlgmr.msra.gmra.mxu2 %v14828_v39  ;;  %9701 = vmatpush.msra.mxu1 %v15044_v20 }
 0xdcf   :  { %9088 = vmatmul.f32.gmra.mxu3 %v15092_v0  ;;  %9470 = vmatmul.f32.vlgmr.msrb.gmra.mxu1 %v15842_v36 }
 0xdd0   :  { %9367 = vmatmul.f32.vlgmr.msrb.gmra.mxu0 %v11615_v37  ;;  %9577 = vmatpush.msrb.mxu3 %v15044_v20  ;;  %v16215_v37 = vld [vmem:[#allocation8_spill] sm:$0xff] }
 0xdd6   :  { %9243 = vmatmul.f32.gmra.mxu2 %v14855_v16 }
 0xdd7   :  { %9285 = vmatmul.f32.vlgmr.msra.gmra.mxu3 %v14828_v39  ;;  %9474 = vmatmul.f32.gmra.mxu1 %v15849_v28 }
 0xdd8   :  { %9375 = vmatmul.f32.gmra.mxu0 %v15841_v1  ;;  %v16216_v1 = vld [vmem:[#allocation30_spill] sm:$0xff] }
 0xdde   :  { %9247 = vmatmul.f32.gmra.mxu2 %v14930_v44 }
 0xddf   :  { %9289 = vmatmul.f32.gmra.mxu3 %v14855_v16  ;;  %9478 = vmatmul.f32.gmra.mxu1 %v15856_v30 }
 0xde0   :  { %9383 = vmatmul.f32.gmra.mxu0 %v15847_v47 }
 0xde6   :  { %9251 = vmatmul.f32.gmra.mxu2 %v15005_v40 }
 0xde7   :  { %9293 = vmatmul.f32.gmra.mxu3 %v14930_v44  ;;  %9482 = vmatmul.f32.gmra.mxu1 %v15863_v31 }
 0xde8   :  { %9391 = vmatmul.f32.gmra.mxu0 %v15855_v5 }
 0xdee   :  { %9255 = vmatmul.f32.gmra.mxu2 %v15064_v52 }
 0xdef   :  { %9297 = vmatmul.f32.gmra.mxu3 %v15005_v40  ;;  %9486 = vmatmul.f32.gmra.mxu1 %v16153_v32 }
 0xdf0   :  { %9399 = vmatmul.f32.gmra.mxu0 %v15862_v54 }
 0xdf6   :  { %9259 = vmatmul.f32.gmra.mxu2 %v15092_v0 }
 0xdf7   :  { %9301 = vmatmul.f32.gmra.mxu3 %v15064_v52  ;;  %9703 = vmatmul.f32.vlgmr.msra.gmra.mxu1 %v15842_v36  ;;  %v16223_v52 = vld [vmem:[#allocation43_spill] sm:$0xff] }
 0xdf8   :  { %9656 = vmatmul.f32.vlgmr.msra.gmra.mxu0 %v15842_v36  ;;  %v16217_v36 = vld [vmem:[#allocation28_spill] sm:$0xff]  ;;  %v7918_v6 = vadd.f32 %v16223_v52, %v16222_v29  ;;  %v16245_v29 = vld [vmem:[#allocation217_spill] sm:$0xff] }
 0xdfa   :  { %v7971_v57 = vadd.f32 %v16226_v7, %v7918_v6  ;;  %v16246_v6 = vld [vmem:[#allocation238_spill] sm:$0xff] }
 0xdfc   :  { %v8025_v14 = vadd.f32 %v16230_v25, %v7971_v57  ;;  %v16252_v25 = vld [vmem:[#allocation218_spill] sm:$0xff] }
 0xdfe   :  { %9528 = vmatmul.f32.vlgmr.msrb.gmra.mxu2 %v15838_v50 }
 0xdff   :  { %9305 = vmatmul.f32.gmra.mxu3 %v15092_v0  ;;  %9707 = vmatmul.f32.gmra.mxu1 %v15849_v28  ;;  %v16227_v0 = vld [vmem:[#allocation49_spill] sm:$0xff] }
 0xe00   :  { %9660 = vmatmul.f32.gmra.mxu0 %v15849_v28  ;;  %v16218_v28 = vld [vmem:[#allocation32_spill] sm:$0xff]  ;;  %v8131_v49 = vadd.f32 %v16227_v0, %v8085_v21  ;;  %v16248_v21 = vld [vmem:[#allocation35_spill] sm:$0xff] }
 0xe01   :  { %v16249_v0 = vld [vmem:[#allocation220_spill] sm:$0xff] }
 0xe02   :  { %v8202_v22 = vadd.f32 %v16231_v33, %v8131_v49 }
 0xe06   :  { %9533 = vmatmul.f32.gmra.mxu2 %v15844_v34 }
 0xe07   :  { %9581 = vmatmul.f32.vlgmr.msrb.gmra.mxu3 %v15836_v41  ;;  %9711 = vmatmul.f32.gmra.mxu1 %v15856_v30 }
 0xe08   :  { %9664 = vmatmul.f32.gmra.mxu0 %v15856_v30 }
 0xe0e   :  { %9538 = vmatmul.f32.gmra.mxu2 %v15852_v23 }
 0xe0f   :  { %9587 = vmatmul.f32.gmra.mxu3 %v15843_v62  ;;  %9715 = vmatmul.f32.gmra.mxu1 %v15863_v31 }
 0xe10   :  { %9668 = vmatmul.f32.gmra.mxu0 %v15863_v31 }
 0xe16   :  { %9543 = vmatmul.f32.gmra.mxu2 %v15860_v18 }
 0xe17   :  { %9593 = vmatmul.f32.gmra.mxu3 %v16215_v37  ;;  %9719 = vmatmul.f32.gmra.mxu1 %v16153_v32  ;;  %v8089_v37 = vadd.f32 %v16232_v56, %v8025_v14  ;;  %v16254_v56 = vld [vmem:[#allocation221_spill] sm:$0xff] }
 0xe18   :  { %9672 = vmatmul.f32.gmra.mxu0 %v16153_v32 }
 0xe1a   :  { %v9174_v41 = vpop.f32.mrf.mxu1 }
 0xe1d   :  { %v9121_v50 = vpop.f32.mrf.mxu0 }
 0xe1e   :  { %9548 = vmatmul.f32.gmra.mxu2 %v16216_v1 }
 0xe1f   :  { %9599 = vmatmul.f32.gmra.mxu3 %v16217_v36 }
 0xe20   :  { %v8983_v34 = vpop.f32.mrf.mxu2 }
 0xe23   :  { %v9180_v62 = vpop.f32.mrf.mxu1 }
 0xe25   :  { %v9126_v47 = vpop.f32.mrf.mxu0 }
 0xe27   :  { %9605 = vmatmul.f32.gmra.mxu3 %v16218_v28  ;;  %v16235_v28 = vld [vmem:[#allocation46_spill] sm:$0xff] }
 0xe28   :  { %v8991_v23 = vpop.f32.mrf.mxu2 }
 0xe29   :  { %v9069_v5 = vpop.f32.mrf.mxu3 }
 0xe2a   :  { %v9070_v30 = vadd.f32 %v9069_v5, %v8983_v34 }
 0xe2b   :  { %v9186_v18 = vpop.f32.mrf.mxu1 }
 0xe2c   :  { %v9122_v54 = vadd.f32 %v9121_v50, %v9070_v30  ;;  %v16233_v50 = vld [vmem:[#allocation52_spill] sm:$0xff] }
 0xe2d   :  { %v9131_v31 = vpop.f32.mrf.mxu0  ;;  %v7976_v1 = vadd.f32 %v16233_v50, %v7922_v17  ;;  %v16256_v50 = vld [vmem:[#allocation236_spill] sm:$0xff] }
 0xe2e   :  { %v9175_v38 = vadd.f32 %v9174_v41, %v9122_v54 }
 0xe30   :  { %v8999_v40 = vpop.f32.mrf.mxu2 }
 0xe31   :  { %v9073_v10 = vpop.f32.mrf.mxu3 }
 0xe32   :  { %v9074_v32 = vadd.f32 %v9073_v10, %v8991_v23  ;;  %v8288_v23 = vadd.f32 %v16235_v28, %v8202_v22  ;;  %v16238_v10 = vld [vmem:[#allocation24_spill] sm:$0xff]  ;;  %v16253_v22 = vld [vmem:[#allocation223_spill] sm:$0xff] }
 0xe33   :  { %v9192_v39 = vpop.f32.mrf.mxu1 }
 0xe34   :  { %v9127_v26 = vadd.f32 %v9126_v47, %v9074_v32 }
 0xe35   :  { %v9136_v16 = vpop.f32.mrf.mxu0 }
 0xe36   :  { %v9181_v63 = vadd.f32 %v9180_v62, %v9127_v26  ;;  %v16234_v62 = vld [vmem:[#allocation29_spill] sm:$0xff] }
 0xe37   :  { %v8135_v47 = vadd.f32 %v16234_v62, %v8089_v37 }
 0xe38   :  { %v9007_v27 = vpop.f32.mrf.mxu2 }
 0xe39   :  { %v9077_v44 = vpop.f32.mrf.mxu3 }
 0xe3a   :  { %v9078_v43 = vadd.f32 %v9077_v44, %v8999_v40  ;;  %v16237_v40 = vld [vmem:[#allocation21_spill] sm:$0xff]  ;;  %v16240_v44 = vld [vmem:[#allocation216_spill] sm:$0xff] }
 0xe3b   :  { %v7926_v32 = vadd.f32 %v16238_v10, %v16237_v40  ;;  %v8210_v51 = vadd.f32 %v16240_v44, %v8135_v47  ;;  %v16257_v47 = vld [vmem:[#allocation224_spill] sm:$0xff] }
 0xe3c   :  { %v9198_v4 = vpop.f32.mrf.mxu1  ;;  %v9132_v8 = vadd.f32 %v9131_v31, %v9078_v43 }
 0xe3d   :  { %v9141_v60 = vpop.f32.mrf.mxu0  ;;  %v8292_v52 = vadd.f32 %v16245_v29, %v8210_v51  ;;  %v16262_v51 = vld [vmem:[#allocation240_spill] sm:$0xff] }
 0xe3e   :  { %v9187_v20 = vadd.f32 %v9186_v18, %v9132_v8  ;;  %v16236_v18 = vld [vmem:[#allocation228_spill] sm:$0xff]  ;;  %v16242_v8 = vld [vmem:[#allocation42_spill] sm:$0xff] }
 0xe3f   :  { %v8340_v54 = vadd.f32 %v16236_v18, %v8288_v23  ;;  %v16258_v23 = vld [vmem:[#allocation245_spill] sm:$0xff] }
 0xe41   :  { %v9015_v46 = vpop.f32.mrf.mxu2  ;;  %v9081_v45 = vpop.f32.mrf.mxu3  ;;  %v8393_v42 = vadd.f32 %v16241_v11, %v8340_v54  ;;  %v16259_v54 = vld [vmem:[#allocation241_spill] sm:$0xff] }
 0xe42   :  { %v9082_v58 = vadd.f32 %v9081_v45, %v9007_v27 }
 0xe43   :  { %v8459_v12 = vadd.f32 %v16246_v6, %v8393_v42 }
 0xe44   :  { %v9204_v3 = vpop.f32.mrf.mxu1  ;;  %v9137_v53 = vadd.f32 %v9136_v16, %v9082_v58  ;;  %v16239_v16 = vld [vmem:[#allocation10_spill] sm:$0xff] }
 0xe45   :  { %v9146_v9 = vpop.f32.mrf.mxu0  ;;  %v8031_v27 = vadd.f32 %v16239_v16, %v7976_v1  ;;  %v16261_v16 = vld [vmem:[#allocation247_spill] sm:$0xff] }
 0xe46   :  { %v15204_v19 = vadd.f32 %v9192_v39, %v9137_v53 }
 0xe49   :  { %v9023_v61 = vpop.f32.mrf.mxu2  ;;  %v9085_v48 = vpop.f32.mrf.mxu3 }
 0xe4a   :  { %v9086_v59 = vadd.f32 %v9085_v48, %v9015_v46  ;;  %v16244_v46 = vld [vmem:[#allocation219_spill] sm:$0xff] }
 0xe4c   :  { %v9142_v41 = vadd.f32 %v9141_v60, %v9086_v59  ;;  %v9471_v36 = vpop.f32.mrf.mxu1  ;;  %v8093_v60 = vadd.f32 %v16242_v8, %v8031_v27  ;;  %v16263_v8 = vld [vmem:[#allocation249_spill] sm:$0xff] }
 0xe4d   :  { %v9368_v34 = vpop.f32.mrf.mxu0 }
 0xe4e   :  { %v15214_v5 = vadd.f32 %v9471_v36, %v9368_v34  ;;  %v9199_v30 = vadd.f32 %v9198_v4, %v9142_v41  ;;  %v7981_v4 = vadd.f32 %v16243_v2, %v7926_v32  ;;  %v8139_v45 = vadd.f32 %v16244_v46, %v8093_v60  ;;  %v16255_v41 = vld [vmem:[#allocation242_spill] sm:$0xff] }
 0xe50   :  { %v8037_v53 = vadd.f32 %v16248_v21, %v7981_v4  ;;  %v8218_v49 = vadd.f32 %v16249_v0, %v8139_v45  ;;  %v16265_v45 = vld [vmem:[#allocation251_spill] sm:$0xff] }
 0xe51   :  { %v9240_v31 = vpop.f32.mrf.mxu2 }
 0xe52   :  { %v9089_v39 = vpop.f32.mrf.mxu3  ;;  %v9241_v26 = vadd.f32 %v9240_v31, %v9175_v38  ;;  %v16247_v38 = vld [vmem:[#allocation232_spill] sm:$0xff]  ;;  %v8097_v14 = vadd.f32 %v16252_v25, %v8037_v53  ;;  %v8296_v37 = vadd.f32 %v16254_v56, %v8218_v49 }
 0xe53   :  { %v9090_v43 = vadd.f32 %v9089_v39, %v9023_v61  ;;  %v8345_v58 = vadd.f32 %v16247_v38, %v8292_v52  ;;  %v16250_v61 = vld [vmem:[#allocation239_spill] sm:$0xff] }
 0xe54   :  { %v8143_v59 = vadd.f32 %v16253_v22, %v8097_v14  ;;  %v8350_v1 = vadd.f32 %v16256_v50, %v8296_v37  ;;  %v16260_v39 = vld [vmem:[#allocation227_spill] sm:$0xff] }
 0xe55   :  { %v9147_v13 = vadd.f32 %v9146_v9, %v9090_v43  ;;  %v8505_v9 = vadd.f32 %v16250_v61, %v8459_v12  ;;  %v8399_v24 = vadd.f32 %v16251_v55, %v8345_v58  ;;  %v9376_v48 = vpop.f32.mrf.mxu0 }
 0xe56   :  { %v8226_v28 = vadd.f32 %v16257_v47, %v8143_v59  ;;  %v8405_v31 = vadd.f32 %v16259_v54, %v8350_v1 }
 0xe57   :  { %v9205_v35 = vadd.f32 %v9204_v3, %v9147_v13  ;;  %v9475_v3 = vpop.f32.mrf.mxu1  ;;  %v16264_v13 = vld [vmem:[#allocation244_spill] sm:$0xff] }
 0xe58   :  { %v8467_v27 = vadd.f32 %v16261_v16, %v8405_v31 }
 0xe59   :  { %v9244_v15 = vpop.f32.mrf.mxu2 }
 0xe5a   :  { %v9245_v7 = vadd.f32 %v9244_v15, %v9181_v63  ;;  %v9286_v57 = vpop.f32.mrf.mxu3  ;;  %v8463_v63 = vadd.f32 %v16255_v41, %v8399_v24  ;;  %v8513_v60 = vadd.f32 %v16263_v8, %v8467_v27  ;;  %v16266_v15 = vld [vmem:[#allocation252_spill] sm:$0xff] }
 0xe5b   :  { %v9287_v17 = vadd.f32 %v9286_v57, %v9241_v26  ;;  %v8300_v26 = vadd.f32 %v16260_v39, %v8226_v28 }
 0xe5c   :  { %v8509_v18 = vadd.f32 %v16258_v23, %v8463_v63 }
 0xe5d   :  { %v15233_v33 = vadd.f32 %v9287_v17, %v8505_v9  ;;  %v9384_v32 = vpop.f32.mrf.mxu0  ;;  %v8355_v11 = vadd.f32 %v16262_v51, %v8300_v26  ;;  %v10271_v26 = vld [vmem:[%s15628_s7 + $0x150] sm:$0xff] }
 0xe5f   :  { %v9479_v44 = vpop.f32.mrf.mxu1  ;;  %v8411_v2 = vadd.f32 %v16264_v13, %v8355_v11 }
 0xe61   :  { %v9248_v36 = vpop.f32.mrf.mxu2  ;;  %v8471_v29 = vadd.f32 %v16265_v45, %v8411_v2 }
 0xe62   :  { %v9249_v34 = vadd.f32 %v9248_v36, %v9187_v20  ;;  %v9290_v62 = vpop.f32.mrf.mxu3  ;;  %v9480_v36 = vadd.f32 %v9479_v44, %v9384_v32 }
 0xe63   :  { %v9291_v40 = vadd.f32 %v9290_v62, %v9245_v7  ;;  %v8517_v21 = vadd.f32 %v16266_v15, %v8471_v29  ;;  %v9476_v62 = vadd.f32 %v9475_v3, %v9376_v48  ;;  %v9724_v48 = vsel %vm4257_vm7, %v10271_v26, 0 }
 0xe65   :  { %v15242_v10 = vadd.f32 %v9291_v40, %v8509_v18  ;;  %v9392_v52 = vpop.f32.mrf.mxu0 }
 0xe67   :  { %v9483_v12 = vpop.f32.mrf.mxu1 }
 0xe69   :  { %v9252_v42 = vpop.f32.mrf.mxu2 }
 0xe6a   :  { %v9253_v20 = vadd.f32 %v9252_v42, %v15204_v19  ;;  %v9294_v43 = vpop.f32.mrf.mxu3 }
 0xe6b   :  { %v9295_v4 = vadd.f32 %v9294_v43, %v9249_v34  ;;  %v9484_v34 = vadd.f32 %v9483_v12, %v9392_v52  ;;  %v10272_v52 = vld [vmem:[%s15628_s7 + $0x158] sm:$0xff] }
 0xe6d   :  { %v15250_v46 = vadd.f32 %v9295_v4, %v8513_v60  ;;  %v9400_v57 = vpop.f32.mrf.mxu0  ;;  %v15265_v60 = vand.u32 4294901760, %v9724_v48 }
 0xe6f   :  { %v9487_v9 = vpop.f32.mrf.mxu1 }
 0xe70   :  { %v9488_v3 = vadd.f32 %v9487_v9, %v9400_v57 }
 0xe71   :  { %v9256_v6 = vpop.f32.mrf.mxu2 }
 0xe72   :  { %v9257_v38 = vadd.f32 %v9256_v6, %v9199_v30  ;;  %v9298_v58 = vpop.f32.mrf.mxu3 }
 0xe73   :  { %v9299_v53 = vadd.f32 %v9298_v58, %v9253_v20 }
 0xe75   :  { %v15254_v7 = vadd.f32 %v9299_v53, %v8517_v21  ;;  %v9657_v25 = vpop.f32.mrf.mxu0  ;;  %v9727_v53 = vsel %vm4257_vm7, %v10272_v52, 0 }
 0xe77   :  { %v9704_v14 = vpop.f32.mrf.mxu1 }
 0xe79   :  { %v9260_v19 = vpop.f32.mrf.mxu2 }
 0xe7a   :  { %v9261_v0 = vadd.f32 %v9260_v19, %v9205_v35  ;;  %v9302_v49 = vpop.f32.mrf.mxu3 }
 0xe7b   :  { %v15256_v61 = vadd.f32 %v9302_v49, %v9257_v38  ;;  %v15273_v38 = vsub.f32 %v9724_v48, %v15265_v60 }
 0xe7d   :  { %v9661_v59 = vpop.f32.mrf.mxu0  ;;  %v9767_v9 = vand.u32 4294901760, %v15273_v38 }
 0xe7f   :  { %v9708_v56 = vpop.f32.mrf.mxu1 }
 0xe81   :  { %v9529_v55 = vpop.f32.mrf.mxu2 }
 0xe82   :  { %v9306_v24 = vpop.f32.mrf.mxu3  ;;  %v9530_v40 = vadd.f32 %v9529_v55, %v15214_v5 }
 0xe83   :  { %v15258_v17 = vadd.f32 %v9306_v24, %v9261_v0 }
 0xe85   :  { %v9665_v63 = vpop.f32.mrf.mxu0 }
 0xe87   :  { %v9712_v50 = vpop.f32.mrf.mxu1 }
 0xe89   :  { %v9534_v30 = vpop.f32.mrf.mxu2 }
 0xe8a   :  { %v9582_v22 = vpop.f32.mrf.mxu3  ;;  %v9535_v23 = vadd.f32 %v9534_v30, %v9476_v62 }
 0xe8b   :  { %v9583_v51 = vadd.f32 %v9582_v22, %v9530_v40 }
 0xe8d   :  { %v9669_v18 = vpop.f32.mrf.mxu0  ;;  %v9658_v43 = vadd.f32 %v9657_v25, %v9583_v51  ;;  %v15288_v25 = vand.u32 4294901760, %v9727_v53 }
 0xe8f   :  { %v9716_v16 = vpop.f32.mrf.mxu1  ;;  %v9705_v6 = vadd.f32 %v9704_v14, %v9658_v43 }
 0xe91   :  { %v9539_v37 = vpop.f32.mrf.mxu2  ;;  %v15281_v0 = vand.u32 4294901760, %v9705_v6 }
 0xe92   :  { %v9588_v41 = vpop.f32.mrf.mxu3  ;;  %v9540_v47 = vadd.f32 %v9539_v37, %v9480_v36 }
 0xe93   :  { %v9589_v27 = vadd.f32 %v9588_v41, %v9535_v23  ;;  %v9850_v37 = vsub.f32 %v9705_v6, %v15281_v0 }
 0xe95   :  { %v9662_v42 = vadd.f32 %v9661_v59, %v9589_v27  ;;  %v9673_v45 = vpop.f32.mrf.mxu0  ;;  %v10273_v59 = vld [vmem:[%s15628_s7 + $0x160] sm:$0xff] }
 0xe97   :  { %v9709_v4 = vadd.f32 %v9708_v56, %v9662_v42  ;;  %v9720_v58 = vpop.f32.mrf.mxu1  ;;  %v9768_v56 = vsub.f32 %v15273_v38, %v9767_v9 }
 0xe99   :  { %v9544_v35 = vpop.f32.mrf.mxu2  ;;  %v15278_v19 = vand.u32 4294901760, %v9709_v4  ;;  %v9769_v62 = vand.u32 4294901760, %v9768_v56 }
 0xe9a   :  { %v9594_v1 = vpop.f32.mrf.mxu3  ;;  %v9545_v28 = vadd.f32 %v9544_v35, %v9484_v34 }
 0xe9b   :  { %v9595_v54 = vadd.f32 %v9594_v1, %v9540_v47  ;;  %v9844_v30 = vsub.f32 %v9709_v4, %v15278_v19  ;;  %v9730_v1 = vsel %vm4257_vm7, %v10273_v59, 0  ;;  %v9851_v47 = vand.u32 4294901760, %v9850_v37  ;;  %v16270_v59 = vld [vmem:[#allocation57_spill] sm:$0xff] }
 0xe9d   :  { %v9666_v32 = vadd.f32 %v9665_v63, %v9595_v54  ;;  %v9845_v34 = vand.u32 4294901760, %v9844_v30  ;;  %v15306_v54 = vand.u32 4294901760, %v9730_v1 }
 0xe9f   :  { %v9713_v5 = vadd.f32 %v9712_v50, %v9666_v32  ;;  %v9774_v50 = vsub.f32 %v9727_v53, %v15288_v25  ;;  %v9846_v40 = vsub.f32 %v9844_v30, %v9845_v34  ;;  %v9782_v51 = vsub.f32 %v9730_v1, %v15306_v54 }
 0xea1   :  { %v9549_v44 = vpop.f32.mrf.mxu2  ;;  %v15275_v15 = vand.u32 4294901760, %v9713_v5  ;;  %v9847_v32 = vand.u32 4294901760, %v9846_v40  ;;  %v16279_v40 = vld [vmem:[#allocation59_spill] sm:$0xff] }
 0xea2   :  { %v9600_v31 = vpop.f32.mrf.mxu3  ;;  %v9550_v8 = vadd.f32 %v9549_v44, %v9488_v3  ;;  %v9783_v3 = vand.u32 4294901760, %v9782_v51 }
 0xea3   :  { %v9601_v39 = vadd.f32 %v9600_v31, %v9545_v28  ;;  %v9838_v24 = vsub.f32 %v9713_v5, %v15275_v15 }
 0xea4   :  { %v9784_v43 = vsub.f32 %v9782_v51, %v9783_v3 }
 0xea5   :  { %v9670_v11 = vadd.f32 %v9669_v18, %v9601_v39  ;;  %v9839_v63 = vand.u32 4294901760, %v9838_v24  ;;  %v9775_v18 = vand.u32 4294901760, %v9774_v50  ;;  %v10274_v39 = vld [vmem:[%s15628_s7 + $0x168] sm:$0xff] }
 0xea7   :  { %v9717_v20 = vadd.f32 %v9716_v16, %v9670_v11  ;;  %v9840_v23 = vsub.f32 %v9838_v24, %v9839_v63  ;;  %v9852_v16 = vsub.f32 %v9850_v37, %v9851_v47  ;;  %v9776_v27 = vsub.f32 %v9774_v50, %v9775_v18 }
 0xea8   :  { %v9733_v11 = vsel %vm4257_vm7, %v10274_v39, 0 }
 0xea9   :  { %v15267_v29 = vand.u32 4294901760, %v9717_v20  ;;  %v9841_v26 = vand.u32 4294901760, %v9840_v23  ;;  %v9853_v44 = vand.u32 4294901760, %v9852_v16  ;;  %v9777_v48 = vand.u32 4294901760, %v9776_v27  ;;  %v16277_v23 = vld [vmem:[#allocation17_spill] sm:$0xff]  ;;  %v16281_v16 = vld [vmem:[#allocation16_spill] sm:$0xff] }
 0xeaa   :  { %v9606_v13 = vpop.f32.mrf.mxu3  ;;  %v9789_v42 = vand.u32 4294901760, %v9733_v11 }
 0xeab   :  { %v9607_v2 = vadd.f32 %v9606_v13, %v9550_v8  ;;  %v9832_v57 = vsub.f32 %v9717_v20, %v15267_v29  ;;  %v10275_v20 = vld [vmem:[%s15628_s7 + $0x170] sm:$0xff]  ;;  %v9785_v13 = vand.u32 4294901760, %v9784_v43 }
 0xeac   :  { %v9790_v8 = vsub.f32 %v9733_v11, %v9789_v42  ;;  %v9736_v5 = vsel %vm4257_vm7, %v10275_v20, 0  ;;  %v16286_v43 = vld [vmem:[#allocation63_spill] sm:$0xff] }
 0xead   :  { %v9674_v12 = vadd.f32 %v9673_v45, %v9607_v2  ;;  %v9833_v22 = vand.u32 4294901760, %v9832_v57  ;;  %v9797_v4 = vand.u32 4294901760, %v9736_v5  ;;  %v10276_v45 = vld [vmem:[%s15628_s7 + $0x178] sm:$0x3f] }
 0xeae   :  { %v9791_v2 = vand.u32 4294901760, %v9790_v8  ;;  %v9739_v6 = vsel %vm4257_vm7, %v10276_v45, 0  ;;  %v16289_v45 = vld [vmem:[#allocation69_spill] sm:$0xff] }
 0xeaf   :  { %v9721_v21 = vadd.f32 %v9720_v58, %v9674_v12  ;;  %v9834_v36 = vsub.f32 %v9832_v57, %v9833_v22  ;;  %v9805_v58 = vand.u32 4294901760, %v9739_v6 }
 0xeb0   :  { %v9792_v52 = vsub.f32 %v9790_v8, %v9791_v2 }
 0xeb1   :  { %v9742_v49 = vsel %vm4276_vm8, %v9721_v21, 0  ;;  %v9835_v31 = vand.u32 4294901760, %v9834_v36  ;;  %v9806_v21 = vsub.f32 %v9739_v6, %v9805_v58  ;;  %v16274_v36 = vld [vmem:[#allocation5_spill] sm:$0xff] }
 0xeb2   :  { %v15285_v55 = vand.u32 4294901760, %v9742_v49  ;;  %v9793_v12 = vand.u32 4294901760, %v9792_v52 }
 0xeb4   :  { %9756 = vmatpush.msra.mxu2 %v15285_v55  ;;  %9949 = vmatpush.msrb.mxu1 %v15285_v55  ;;  %v9826_v14 = vsub.f32 %v9742_v49, %v15285_v55 }
 0xeb6   :  { %9758 = vmatpush.msra.mxu2 %v15267_v29  ;;  %9893 = vmatpush.msrb.mxu0 %v9826_v14  ;;  %v9827_v41 = vand.u32 4294901760, %v9826_v14 }
 0xeb7   :  { %9951 = vmatpush.msrb.mxu1 %v15267_v29 }
 0xeb8   :  { %9760 = vmatpush.msra.mxu2 %v15275_v15  ;;  %9896 = vmatpush.msrb.mxu0 %v9832_v57  ;;  %v9828_v35 = vsub.f32 %v9826_v14, %v9827_v41  ;;  %v16267_v14 = vld [vmem:[#allocation56_spill] sm:$0xff] }
 0xeb9   :  { %9953 = vmatpush.msrb.mxu1 %v15275_v15 }
 0xeba   :  { %9762 = vmatpush.msra.mxu2 %v15278_v19  ;;  %9899 = vmatpush.msrb.mxu0 %v9838_v24  ;;  %v9829_v28 = vand.u32 4294901760, %v9828_v35  ;;  %v16273_v35 = vld [vmem:[#allocation18_spill] sm:$0xff] }
 0xebb   :  { %9955 = vmatpush.msrb.mxu1 %v15278_v19 }
 0xebc   :  { %9764 = vmatpush.msra.mxu2 %v15281_v0  ;;  %9830 = vmatpush.msra.mxu3 %v9829_v28  ;;  %v16276_v28 = vld [vmem:[#allocation15_spill] sm:$0xff] }
 0xebd   :  { %9902 = vmatpush.msrb.mxu0 %v9844_v30  ;;  %9957 = vmatpush.msrb.mxu1 %v15281_v0 }
 0xebe   :  { %9770 = vmatmul.f32.vlgmr.msra.gmra.mxu2 %v9769_v62  ;;  %9836 = vmatpush.msra.mxu3 %v9835_v31  ;;  %v16275_v62 = vld [vmem:[#allocation55_spill] sm:$0xff] }
 0xebf   :  { %10009 = vmatpush.msrb.mxu2 %v9827_v41  ;;  %9905 = vmatpush.msrb.mxu0 %v9850_v37  ;;  %v16271_v37 = vld [vmem:[#allocation9_spill] sm:$0xff]  ;;  %v16272_v41 = vld [vmem:[#allocation12_spill] sm:$0xff] }
 0xec0   :  { %9842 = vmatpush.msra.mxu3 %v9841_v26  ;;  %9908 = vmatmul.f32.vlgmr.msrb.gmra.mxu0 %v15273_v38  ;;  %v16280_v26 = vld [vmem:[#allocation36_spill] sm:$0xff] }
 0xec1   :  { %10013 = vmatpush.msrb.mxu2 %v9833_v22  ;;  %9961 = vmatmul.f32.vlgmr.msrb.gmra.mxu1 %v9767_v9  ;;  %v16269_v22 = vld [vmem:[#allocation7_spill] sm:$0xff]  ;;  %v4414_v27 = vadd.f32 %v16281_v16, %v16280_v26  ;;  %v16305_v26 = vld [vmem:[#allocation68_spill] sm:$0xff] }
 0xec2   :  { %9848 = vmatpush.msra.mxu3 %v9847_v32  ;;  %v4451_v56 = vadd.f32 %v16270_v59, %v16269_v22  ;;  %v16283_v32 = vld [vmem:[#allocation61_spill] sm:$0xff] }
 0xec3   :  { %10017 = vmatpush.msrb.mxu2 %v9839_v63  ;;  %v4456_v63 = vadd.f32 %v16272_v41, %v16271_v37  ;;  %v16296_v22 = vld [vmem:[#allocation13_spill] sm:$0xff]  ;;  %v16297_v37 = vld [vmem:[#allocation60_spill] sm:$0xff] }
 0xec4   :  { %9854 = vmatpush.msra.mxu3 %v9853_v44 }
 0xec5   :  { %10021 = vmatpush.msrb.mxu2 %v9845_v34  ;;  %9856 = vmatmul.f32.vlgmr.msra.gmra.mxu3 %v15265_v60  ;;  %v4461_v34 = vadd.f32 %v16274_v36, %v16273_v35  ;;  %v4511_v39 = vadd.f32 %v16279_v40, %v4456_v63  ;;  %v16298_v63 = vld [vmem:[#allocation73_spill] sm:$0xff]  ;;  %v16299_v36 = vld [vmem:[#allocation75_spill] sm:$0xff] }
 0xec6   :  { %9778 = vmatmul.f32.gmra.mxu2 %v9777_v48  ;;  %10063 = vmatpush.msrb.mxu3 %v15285_v55  ;;  %v16284_v48 = vld [vmem:[#allocation65_spill] sm:$0xff] }
 0xec7   :  { %10025 = vmatpush.msrb.mxu2 %v9851_v47  ;;  %v16304_v40 = vld [vmem:[#allocation77_spill] sm:$0xff] }
 0xec8   :  { %10065 = vmatpush.msrb.mxu3 %v15267_v29  ;;  %9913 = vmatmul.f32.gmra.mxu0 %v9774_v50  ;;  %v9798_v29 = vsub.f32 %v9736_v5, %v9797_v4  ;;  %v16287_v5 = vld [vmem:[#allocation14_spill] sm:$0xff] }
 0xec9   :  { %9967 = vmatmul.f32.gmra.mxu1 %v9775_v18  ;;  %v4410_v18 = vadd.f32 %v16277_v23, %v16276_v28  ;;  %v16301_v28 = vld [vmem:[#allocation64_spill] sm:$0xff] }
 0xeca   :  { %10067 = vmatpush.msrb.mxu3 %v15275_v15  ;;  %v9799_v38 = vand.u32 4294901760, %v9798_v29 }
 0xecc   :  { %10069 = vmatpush.msrb.mxu3 %v15278_v19  ;;  %v9800_v15 = vsub.f32 %v9798_v29, %v9799_v38  ;;  %v9807_v19 = vand.u32 4294901760, %v9806_v21 }
 0xecd   :  { %9860 = vmatmul.f32.gmra.mxu3 %v15288_v25 }
 0xece   :  { %9786 = vmatmul.f32.gmra.mxu2 %v9785_v13  ;;  %10071 = vmatpush.msrb.mxu3 %v15281_v0  ;;  %v9801_v53 = vand.u32 4294901760, %v9800_v15  ;;  %v9808_v57 = vsub.f32 %v9806_v21, %v9807_v19  ;;  %v4466_v13 = vadd.f32 %v16287_v5, %v4410_v18  ;;  %v16302_v18 = vld [vmem:[#allocation108_spill] sm:$0xff] }
 0xed0   :  { %9918 = vmatmul.f32.gmra.mxu0 %v9782_v51  ;;  %v9809_v0 = vand.u32 4294901760, %v9808_v57  ;;  %v16282_v51 = vld [vmem:[#allocation23_spill] sm:$0xff]  ;;  %v4523_v59 = vadd.f32 %v16296_v22, %v4466_v13 }
 0xed1   :  { %9973 = vmatmul.f32.gmra.mxu1 %v9783_v3  ;;  %v4573_v3 = vadd.f32 %v16284_v48, %v4511_v39  ;;  %v16311_v13 = vld [vmem:[#allocation83_spill] sm:$0xff] }
 0xed2   :  { %v4581_v35 = vadd.f32 %v16298_v63, %v4523_v59  ;;  %v16320_v22 = vld [vmem:[#allocation91_spill] sm:$0xff]  ;;  %v16322_v63 = vld [vmem:[#allocation85_spill] sm:$0xff] }
 0xed4   :  { %v4627_v39 = vadd.f32 %v16304_v40, %v4581_v35  ;;  %v16327_v40 = vld [vmem:[#allocation89_spill] sm:$0xff] }
 0xed5   :  { %9864 = vmatmul.f32.gmra.mxu3 %v15306_v54 }
 0xed6   :  { %9794 = vmatmul.f32.gmra.mxu2 %v9793_v12 }
 0xed8   :  { %9923 = vmatmul.f32.gmra.mxu0 %v9790_v8 }
 0xed9   :  { %9979 = vmatmul.f32.gmra.mxu1 %v9791_v2  ;;  %v16288_v2 = vld [vmem:[#allocation66_spill] sm:$0xff] }
 0xedd   :  { %9868 = vmatmul.f32.gmra.mxu3 %v9789_v42 }
 0xede   :  { %9802 = vmatmul.f32.gmra.mxu2 %v9801_v53 }
 0xee0   :  { %9928 = vmatmul.f32.gmra.mxu0 %v9798_v29  ;;  %v16290_v29 = vld [vmem:[#allocation70_spill] sm:$0xff] }
 0xee1   :  { %9985 = vmatmul.f32.gmra.mxu1 %v9799_v38  ;;  %v4619_v6 = vadd.f32 %v16290_v29, %v4573_v3  ;;  %v16291_v38 = vld [vmem:[#allocation19_spill] sm:$0xff] }
 0xee2   :  { %v16308_v3 = vld [vmem:[#allocation79_spill] sm:$0xff] }
 0xee5   :  { %9872 = vmatmul.f32.gmra.mxu3 %v9797_v4 }
 0xee6   :  { %9810 = vmatmul.f32.gmra.mxu2 %v9809_v0  ;;  %v16294_v0 = vld [vmem:[#allocation67_spill] sm:$0xff] }
 0xee8   :  { %9933 = vmatmul.f32.gmra.mxu0 %v9806_v21  ;;  %v16292_v21 = vld [vmem:[#allocation74_spill] sm:$0xff] }
 0xee9   :  { %9991 = vmatmul.f32.gmra.mxu1 %v9807_v19  ;;  %v16293_v19 = vld [vmem:[#allocation62_spill] sm:$0xff] }
 0xeed   :  { %9876 = vmatmul.f32.gmra.mxu3 %v9805_v58 }
 0xeee   :  { %10027 = vmatmul.f32.vlgmr.msrb.gmra.mxu2 %v15265_v60 }
 0xef5   :  { %10073 = vmatmul.f32.vlgmr.msrb.gmra.mxu3 %v15265_v60 }
 0xef6   :  { %10031 = vmatmul.f32.gmra.mxu2 %v15288_v25 }
 0xefd   :  { %10077 = vmatmul.f32.gmra.mxu3 %v15288_v25  ;;  %v16268_v25 = vld [vmem:[#allocation54_spill] sm:$0xff] }
 0xefe   :  { %10035 = vmatmul.f32.gmra.mxu2 %v15306_v54  ;;  %v4446_v30 = vadd.f32 %v16268_v25, %v16267_v14  ;;  %v16295_v25 = vld [vmem:[#allocation71_spill] sm:$0xff] }
 0xf00   :  { %v4499_v47 = vadd.f32 %v16275_v62, %v4446_v30  ;;  %v4698_v30 = vadd.f32 %v16295_v25, %v4619_v6  ;;  %v16300_v62 = vld [vmem:[#allocation76_spill] sm:$0xff] }
 0xf01   :  { %v16314_v6 = vld [vmem:[#allocation84_spill] sm:$0xff] }
 0xf02   :  { %v4565_v11 = vadd.f32 %v16282_v51, %v4499_v47  ;;  %v16319_v25 = vld [vmem:[#allocation88_spill] sm:$0xff] }
 0xf04   :  { %v4611_v8 = vadd.f32 %v16286_v43, %v4565_v11  ;;  %v16310_v43 = vld [vmem:[#allocation147_spill] sm:$0xff] }
 0xf05   :  { %10081 = vmatmul.f32.gmra.mxu3 %v15306_v54  ;;  %v16278_v54 = vld [vmem:[#allocation58_spill] sm:$0xff] }
 0xf06   :  { %10039 = vmatmul.f32.gmra.mxu2 %v9789_v42  ;;  %v4505_v31 = vadd.f32 %v16278_v54, %v4451_v56  ;;  %v4682_v57 = vadd.f32 %v16293_v19, %v4611_v8  ;;  %v16303_v54 = vld [vmem:[#allocation111_spill] sm:$0xff] }
 0xf07   :  { %v16317_v19 = vld [vmem:[#allocation183_spill] sm:$0xff] }
 0xf08   :  { %v4569_v44 = vadd.f32 %v16283_v32, %v4505_v31  ;;  %v4768_v23 = vadd.f32 %v16301_v28, %v4682_v57  ;;  %v5550_v31 = vadd.f32 %v16303_v54, %v16302_v18  ;;  %v16326_v18 = vld [vmem:[#allocation115_spill] sm:$0xff] }
 0xf0d   :  { %10085 = vmatmul.f32.gmra.mxu3 %v9789_v42  ;;  %v16285_v42 = vld [vmem:[#allocation6_spill] sm:$0xff] }
 0xf0e   :  { %10043 = vmatmul.f32.gmra.mxu2 %v9797_v4  ;;  %v4517_v20 = vadd.f32 %v16285_v42, %v4461_v34  ;;  %v4820_v42 = vadd.f32 %v16308_v3, %v4768_v23  ;;  %v16325_v23 = vld [vmem:[#allocation110_spill] sm:$0xff] }
 0xf0f   :  { %v5554_v54 = vadd.f32 %v16326_v18, %v16325_v23 }
 0xf10   :  { %v4577_v52 = vadd.f32 %v16289_v45, %v4517_v20  ;;  %v16309_v20 = vld [vmem:[#allocation144_spill] sm:$0xff] }
 0xf11   :  { %v6338_v8 = vadd.f32 %v16310_v43, %v16309_v20 }
 0xf12   :  { %v4623_v53 = vadd.f32 %v16292_v21, %v4577_v52  ;;  %v16313_v52 = vld [vmem:[#allocation78_spill] sm:$0xff] }
 0xf14   :  { %v4706_v34 = vadd.f32 %v16299_v36, %v4623_v53  ;;  %v16316_v53 = vld [vmem:[#allocation180_spill] sm:$0xff] }
 0xf15   :  { %10089 = vmatmul.f32.gmra.mxu3 %v9797_v4  ;;  %v4615_v4 = vadd.f32 %v16288_v2, %v4569_v44  ;;  %v16307_v44 = vld [vmem:[#allocation81_spill] sm:$0xff]  ;;  %v7126_v57 = vadd.f32 %v16317_v19, %v16316_v53  ;;  %v16323_v36 = vld [vmem:[#allocation148_spill] sm:$0xff] }
 0xf16   :  { %10047 = vmatmul.f32.gmra.mxu2 %v9805_v58  ;;  %v4780_v29 = vadd.f32 %v16313_v52, %v4706_v34  ;;  %v16339_v19 = vld [vmem:[#allocation116_spill] sm:$0xff] }
 0xf17   :  { %v4690_v14 = vadd.f32 %v16294_v0, %v4615_v4  ;;  %v16312_v4 = vld [vmem:[#allocation87_spill] sm:$0xff]  ;;  %v16318_v0 = vld [vmem:[#allocation80_spill] sm:$0xff] }
 0xf18   :  { %v4835_v59 = vadd.f32 %v16320_v22, %v4780_v29  ;;  %v16337_v29 = vld [vmem:[#allocation145_spill] sm:$0xff]  ;;  %v16343_v22 = vld [vmem:[#allocation187_spill] sm:$0xff] }
 0xf19   :  { %v4772_v16 = vadd.f32 %v16305_v26, %v4690_v14  ;;  %v4714_v14 = vadd.f32 %v16318_v0, %v4627_v39  ;;  %v16328_v39 = vld [vmem:[#allocation109_spill] sm:$0xff]  ;;  %v16340_v0 = vld [vmem:[#allocation114_spill] sm:$0xff] }
 0xf1b   :  { %v4825_v2 = vadd.f32 %v16311_v13, %v4772_v16 }
 0xf1d   :  { %10093 = vmatmul.f32.gmra.mxu3 %v9805_v58  ;;  %v4471_v58 = vadd.f32 %v16291_v38, %v4414_v27  ;;  %v16306_v27 = vld [vmem:[#allocation72_spill] sm:$0xff]  ;;  %v4873_v38 = vadd.f32 %v16314_v6, %v4820_v42  ;;  %v16331_v42 = vld [vmem:[#allocation98_spill] sm:$0xff] }
 0xf1e   :  { %v4776_v51 = vadd.f32 %v16306_v27, %v4698_v30  ;;  %v4879_v30 = vadd.f32 %v16319_v25, %v4825_v2  ;;  %v16329_v27 = vld [vmem:[#allocation184_spill] sm:$0xff]  ;;  %v16335_v2 = vld [vmem:[#allocation86_spill] sm:$0xff]  ;;  %v16341_v25 = vld [vmem:[#allocation119_spill] sm:$0xff] }
 0xf1f   :  { %v4529_v41 = vadd.f32 %v16297_v37, %v4471_v58  ;;  %v16315_v58 = vld [vmem:[#allocation112_spill] sm:$0xff]  ;;  %v4939_v26 = vadd.f32 %v16327_v40, %v4873_v38 }
 0xf20   :  { %v4830_v45 = vadd.f32 %v16312_v4, %v4776_v51  ;;  %v5602_v21 = vadd.f32 %v16315_v58, %v5550_v31  ;;  %v16321_v37 = vld [vmem:[#allocation92_spill] sm:$0xff]  ;;  %v7178_v51 = vadd.f32 %v16329_v27, %v7126_v57  ;;  %v5607_v57 = vadd.f32 %v16339_v19, %v5554_v54  ;;  %v16359_v19 = vld [vmem:[#allocation41_spill] sm:$0xff] }
 0xf21   :  { %v4585_v47 = vadd.f32 %v16300_v62, %v4529_v41  ;;  %v6390_v62 = vadd.f32 %v16323_v36, %v6338_v8  ;;  %v16333_v8 = vld [vmem:[#allocation146_spill] sm:$0xff]  ;;  %v16350_v54 = vld [vmem:[#allocation100_spill] sm:$0xff] }
 0xf22   :  { %v4885_v41 = vadd.f32 %v16321_v37, %v4830_v45  ;;  %v5655_v16 = vadd.f32 %v16328_v39, %v5602_v21  ;;  %v16336_v45 = vld [vmem:[#allocation130_spill] sm:$0xff] }
 0xf23   :  { %v4631_v48 = vadd.f32 %v16307_v44, %v4585_v47  ;;  %v16324_v47 = vld [vmem:[#allocation95_spill] sm:$0xff]  ;;  %v16330_v44 = vld [vmem:[#allocation93_spill] sm:$0xff]  ;;  %v6443_v6 = vadd.f32 %v16337_v29, %v6390_v62  ;;  %v16338_v21 = vld [vmem:[#allocation102_spill] sm:$0xff] }
 0xf24   :  { %v4891_v28 = vadd.f32 %v16324_v47, %v4835_v59  ;;  %v4943_v3 = vadd.f32 %v16330_v44, %v4879_v30  ;;  %v4947_v20 = vadd.f32 %v16331_v42, %v4885_v41  ;;  %v5721_v52 = vadd.f32 %v16336_v45, %v5655_v16  ;;  %v16342_v30 = vld [vmem:[#allocation182_spill] sm:$0xff]  ;;  %v16347_v62 = vld [vmem:[#allocation181_spill] sm:$0xff]  ;;  %v16351_v16 = vld [vmem:[#allocation152_spill] sm:$0xff] }
 0xf25   :  { %v4722_v35 = vadd.f32 %v16322_v63, %v4631_v48  ;;  %v16332_v48 = vld [vmem:[#allocation82_spill] sm:$0xff]  ;;  %v7130_v59 = vadd.f32 %v16343_v22, %v16342_v30  ;;  %v16361_v22 = vld [vmem:[#allocation97_spill] sm:$0xff] }
 0xf26   :  { %v4784_v43 = vadd.f32 %v16332_v48, %v4714_v14  ;;  %v4951_v53 = vadd.f32 %v16338_v21, %v4891_v28  ;;  %v5558_v14 = vadd.f32 %v16341_v25, %v16340_v0  ;;  %v16344_v41 = vld [vmem:[#allocation90_spill] sm:$0xff]  ;;  %v16349_v28 = vld [vmem:[#allocation96_spill] sm:$0xff]  ;;  %v15443_v39 = vadd.f32 %v16350_v54, %v4947_v20  ;;  %v16360_v0 = vld [vmem:[#allocation25_spill] sm:$0xff] }
 0xf27   :  { %v4788_v4 = vadd.f32 %v16335_v2, %v4722_v35  ;;  %v4985_v63 = vadd.f32 %v16344_v41, %v4939_v26  ;;  %v16345_v35 = vld [vmem:[#allocation134_spill] sm:$0xff]  ;;  %v4989_v40 = vadd.f32 %v16349_v28, %v4943_v3  ;;  %v16354_v2 = vld [vmem:[#allocation120_spill] sm:$0xff]  ;;  %v7930_v25 = vadd.f32 %v16360_v0, %v16359_v19 }
 0xf28   :  { %v5767_v36 = vadd.f32 %v16345_v35, %v5721_v52  ;;  %v16346_v47 = vld [vmem:[#allocation166_spill] sm:$0xff]  ;;  %v5612_v45 = vadd.f32 %v16354_v2, %v5558_v14  ;;  %v16357_v3 = vld [vmem:[#allocation188_spill] sm:$0xff]  ;;  %v16365_v14 = vld [vmem:[#allocation155_spill] sm:$0xff] }
 0xf29   :  { %v6509_v23 = vadd.f32 %v16346_v47, %v6443_v6  ;;  %v16352_v44 = vld [vmem:[#allocation170_spill] sm:$0xff]  ;;  %v7183_v20 = vadd.f32 %v16357_v3, %v7130_v59  ;;  %v15460_v41 = vadd.f32 %v16361_v22, %v4788_v4  ;;  %v16366_v59 = vld [vmem:[#allocation149_spill] sm:$0xff]  ;;  %v16368_v28 = vld [vmem:[#allocation136_spill] sm:$0xff] }
 0xf2a   :  { %v16353_v48 = vld [vmem:[#allocation202_spill] sm:$0xff]  ;;  %v5789_v6 = vadd.f32 %v5767_v36, %v4985_v63  ;;  %v16378_v19 = vld [vmem:[#allocation172_spill] sm:$0xff] }
 0xf2b   :  { %v6555_v42 = vadd.f32 %v16352_v44, %v6509_v23  ;;  %v16358_v21 = vld [vmem:[#allocation206_spill] sm:$0xff]  ;;  %v16371_v44 = vld [vmem:[#allocation185_spill] sm:$0xff]  ;;  %v16379_v22 = vld [vmem:[#allocation192_spill] sm:$0xff] }
 0xf2c   :  { %v16369_v54 = vld [vmem:[#allocation186_spill] sm:$0xff] }
 0xf2d   :  { %v6577_v36 = vadd.f32 %v6555_v42, %v5789_v6  ;;  %v16374_v42 = vld [vmem:[#allocation118_spill] sm:$0xff] }
 0xf3d   :  { %v9909_v56 = vpop.f32.mrf.mxu0 }
 0xf3e   :  { %v9962_v32 = vpop.f32.mrf.mxu1 }
 0xf41   :  { %v9771_v49 = vpop.f32.mrf.mxu2 }
 0xf45   :  { %v9914_v31 = vpop.f32.mrf.mxu0 }
 0xf46   :  { %v9968_v37 = vpop.f32.mrf.mxu1 }
 0xf48   :  { %v9857_v9 = vpop.f32.mrf.mxu3 }
 0xf49   :  { %v15339_v55 = vpop.f32.mrf.mxu2  ;;  %v9858_v34 = vadd.f32 %v9857_v9, %v9771_v49  ;;  %v16334_v49 = vld [vmem:[#allocation151_spill] sm:$0xff] }
 0xf4a   :  { %v6342_v9 = vadd.f32 %v16334_v49, %v16333_v8 }
 0xf4b   :  { %v9910_v38 = vadd.f32 %v9909_v56, %v9858_v34  ;;  %v7231_v56 = vadd.f32 %v16347_v62, %v7178_v51  ;;  %v16348_v34 = vld [vmem:[#allocation94_spill] sm:$0xff]  ;;  %v16355_v51 = vld [vmem:[#allocation113_spill] sm:$0xff] }
 0xf4c   :  { %v4840_v18 = vadd.f32 %v16348_v34, %v4784_v43  ;;  %v6395_v27 = vadd.f32 %v16351_v16, %v6342_v9  ;;  %v5661_v52 = vadd.f32 %v16355_v51, %v5607_v57  ;;  %v16356_v43 = vld [vmem:[#allocation103_spill] sm:$0xff]  ;;  %v16364_v57 = vld [vmem:[#allocation150_spill] sm:$0xff]  ;;  %v16367_v34 = vld [vmem:[#allocation117_spill] sm:$0xff] }
 0xf4d   :  { %v7297_v8 = vadd.f32 %v16353_v48, %v7231_v56  ;;  %v9963_v49 = vadd.f32 %v9962_v32, %v9910_v38  ;;  %v15453_v29 = vadd.f32 %v16356_v43, %v4951_v53  ;;  %v16363_v32 = vld [vmem:[#allocation133_spill] sm:$0xff]  ;;  %v6346_v53 = vadd.f32 %v16365_v14, %v16364_v57  ;;  %v9919_v35 = vpop.f32.mrf.mxu0  ;;  %v16370_v16 = vld [vmem:[#allocation191_spill] sm:$0xff]  ;;  %v16373_v51 = vld [vmem:[#allocation22_spill] sm:$0xff] }
 0xf4e   :  { %v5725_v38 = vadd.f32 %v16363_v32, %v5661_v52  ;;  %v6449_v63 = vadd.f32 %v16366_v59, %v6395_v27  ;;  %v7237_v48 = vadd.f32 %v16371_v44, %v7183_v20  ;;  %v7986_v52 = vadd.f32 %v16373_v51, %v7930_v25  ;;  %v16376_v43 = vld [vmem:[#allocation156_spill] sm:$0xff]  ;;  %v9974_v20 = vpop.f32.mrf.mxu1  ;;  %v16381_v57 = vld [vmem:[#allocation53_spill] sm:$0xff] }
 0xf4f   :  { %v7343_v9 = vadd.f32 %v16358_v21, %v7297_v8  ;;  %v16372_v8 = vld [vmem:[#allocation169_spill] sm:$0xff]  ;;  %v6400_v3 = vadd.f32 %v16376_v43, %v6346_v53  ;;  %v15482_v21 = vstv %s15629_s11  ;;  %v16380_v32 = vld [vmem:[#allocation208_spill] sm:$0xff] }
 0xf50   :  { %v15341_v24 = vpop.f32.mrf.mxu3  ;;  %v5771_v4 = vadd.f32 %v16368_v28, %v5725_v38  ;;  %v16382_v14 = vld [vmem:[#allocation48_spill] sm:$0xff]  ;;  %v16385_v28 = vld [vmem:[#allocation135_spill] sm:$0xff] }
 0xf51   :  { %v15343_v60 = vpop.f32.mrf.mxu2  ;;  %v9862_v26 = vadd.f32 %v15341_v24, %v15339_v55  ;;  %v16362_v55 = vld [vmem:[#allocation99_spill] sm:$0xff]  ;;  %v7365_v2 = vadd.f32 %v7343_v9, %v6577_v36  ;;  %v7934_v53 = vadd.f32 %v16382_v14, %v16381_v57 }
 0xf52   :  { %v4897_v24 = vadd.f32 %v16362_v55, %v4840_v18  ;;  %v7134_v18 = vadd.f32 %v16370_v16, %v16369_v54  ;;  %v16401_v14 = vld [vmem:[#allocation207_spill] sm:$0xff] }
 0xf53   :  { %v9915_v23 = vadd.f32 %v9914_v31, %v9862_v26  ;;  %v16375_v31 = vld [vmem:[#allocation123_spill] sm:$0xff] }
 0xf54   :  { %v5562_v26 = vadd.f32 %v16375_v31, %v16374_v42  ;;  %v7188_v55 = vadd.f32 %v16379_v22, %v7134_v18  ;;  %v16389_v18 = vld [vmem:[#allocation222_spill] sm:$0xff]  ;;  %v16394_v31 = vld [vmem:[#allocation189_spill] sm:$0xff] }
 0xf55   :  { %v9969_v25 = vadd.f32 %v9968_v37, %v9915_v23  ;;  %v16387_v37 = vld [vmem:[#allocation159_spill] sm:$0xff]  ;;  %v16388_v23 = vld [vmem:[#allocation153_spill] sm:$0xff]  ;;  %v9924_v43 = vpop.f32.mrf.mxu0 }
 0xf58   :  { %v15351_v50 = vpop.f32.mrf.mxu3 }
 0xf59   :  { %v15353_v1 = vpop.f32.mrf.mxu2  ;;  %v9866_v9 = vadd.f32 %v15351_v50, %v15343_v60  ;;  %v16386_v50 = vld [vmem:[#allocation154_spill] sm:$0xff] }
 0xf60   :  { %v15373_v12 = vpop.f32.mrf.mxu3 }
 0xf61   :  { %v15376_v15 = vpop.f32.mrf.mxu2 }
 0xf68   :  { %v15393_v11 = vpop.f32.mrf.mxu3 }
 0xf69   :  { %v15399_v5 = vpop.f32.mrf.mxu2 }
 0xf70   :  { %v15425_v13 = vpop.f32.mrf.mxu3 }
 0xf71   :  { %v10028_v58 = vpop.f32.mrf.mxu2 }
 0xf72   :  { %v10029_v30 = vadd.f32 %v10028_v58, %v9963_v49  ;;  %v5667_v58 = vadd.f32 %v16367_v34, %v5612_v45  ;;  %v6513_v49 = vadd.f32 %v16372_v8, %v6449_v63  ;;  %v16377_v45 = vld [vmem:[#allocation205_spill] sm:$0xff] }
 0xf73   :  { %v7301_v6 = vadd.f32 %v16377_v45, %v7237_v48  ;;  %v9920_v48 = vadd.f32 %v9919_v35, %v9866_v9  ;;  %v16395_v45 = vld [vmem:[#allocation45_spill] sm:$0xff]  ;;  %v16397_v9 = vld [vmem:[#allocation104_spill] sm:$0xff] }
 0xf74   :  { %v6559_v0 = vadd.f32 %v16378_v19, %v6513_v49  ;;  %v5729_v60 = vadd.f32 %v16385_v28, %v5667_v58  ;;  %v16390_v49 = vld [vmem:[#allocation138_spill] sm:$0xff]  ;;  %v16391_v58 = vld [vmem:[#allocation171_spill] sm:$0xff]  ;;  %v7991_v35 = vadd.f32 %v16395_v45, %v7934_v53  ;;  %v16404_v28 = vld [vmem:[#allocation196_spill] sm:$0xff] }
 0xf75   :  { %v7347_v38 = vadd.f32 %v16380_v32, %v7301_v6  ;;  %v16396_v6 = vld [vmem:[#allocation226_spill] sm:$0xff]  ;;  %v16400_v32 = vld [vmem:[#allocation160_spill] sm:$0xff] }
 0xf78   :  { %v10074_v47 = vpop.f32.mrf.mxu3 }
 0xf79   :  { %v10032_v62 = vpop.f32.mrf.mxu2  ;;  %v10075_v56 = vadd.f32 %v10074_v47, %v10029_v30  ;;  %v5790_v30 = vadd.f32 %v5771_v4, %v4989_v40  ;;  %v16383_v47 = vld [vmem:[#allocation37_spill] sm:$0xff]  ;;  %v6350_v40 = vadd.f32 %v16387_v37, %v16386_v50  ;;  %v6455_v4 = vadd.f32 %v16388_v23, %v6400_v3  ;;  %v9980_v37 = vpop.f32.mrf.mxu1  ;;  %v16406_v23 = vld [vmem:[#allocation34_spill] sm:$0xff] }
 0xf7a   :  { %v8043_v59 = vadd.f32 %v16383_v47, %v7986_v52  ;;  %v10033_v63 = vadd.f32 %v10032_v62, %v9969_v25  ;;  %v16392_v52 = vld [vmem:[#allocation190_spill] sm:$0xff]  ;;  %v4955_v25 = vadd.f32 %v16397_v9, %v4897_v24 }
 0xf7b   :  { %v10097_v27 = vadd.f32 %v10075_v56, %v15233_v33  ;;  %v16384_v56 = vld [vmem:[#allocation124_spill] sm:$0xff]  ;;  %v6578_v16 = vadd.f32 %v6559_v0, %v5790_v30  ;;  %v6517_v51 = vadd.f32 %v16391_v58, %v6455_v4  ;;  %v16399_v30 = vld [vmem:[#allocation127_spill] sm:$0xff]  ;;  %v6405_v57 = vadd.f32 %v16400_v32, %v6350_v40  ;;  %v16407_v4 = vld [vmem:[#allocation229_spill] sm:$0xff] }
 0xf7c   :  { %v5617_v34 = vadd.f32 %v16384_v56, %v5562_v26  ;;  %v8101_v44 = vadd.f32 %v16389_v18, %v8043_v59  ;;  %v7243_v26 = vadd.f32 %v16394_v31, %v7188_v55  ;;  %v16402_v59 = vld [vmem:[#allocation174_spill] sm:$0xff]  ;;  %v9870_v55 = vadd.f32 %v15373_v12, %v15353_v1  ;;  %v16409_v12 = vld [vmem:[#allocation137_spill] sm:$0xff]  ;;  %v16414_v31 = vld [vmem:[#allocation140_spill] sm:$0xff] }
 0xf7d   :  { %v10103_v33 = vadd.f32 %v10097_v27, %v7365_v2  ;;  %v5775_v2 = vadd.f32 %v16390_v49, %v5729_v60  ;;  %v16393_v27 = vld [vmem:[#allocation195_spill] sm:$0xff]  ;;  %v7366_v3 = vadd.f32 %v7347_v38, %v6578_v16  ;;  %v9975_v38 = vadd.f32 %v9974_v20, %v9920_v48  ;;  %v16405_v60 = vld [vmem:[#allocation210_spill] sm:$0xff] }
 0xf7e   :  { %v7138_v42 = vadd.f32 %v16393_v27, %v16392_v52  ;;  %v8147_v19 = vadd.f32 %v16396_v6, %v8101_v44  ;;  %v7305_v47 = vadd.f32 %v16401_v14, %v7243_v26  ;;  %v8049_v40 = vadd.f32 %v16406_v23, %v7991_v35  ;;  %v16408_v44 = vld [vmem:[#allocation128_spill] sm:$0xff]  ;;  %v16410_v48 = vld [vmem:[#allocation158_spill] sm:$0xff]  ;;  %v16417_v6 = vld [vmem:[#allocation199_spill] sm:$0xff] }
 0xf7f   :  { %v10111_v36 = vadd.f32 %v15482_v21, %v10103_v33  ;;  %v16398_v33 = vld [vmem:[#allocation122_spill] sm:$0xff]  ;;  %v9925_v27 = vadd.f32 %v9924_v43, %v9870_v55  ;;  %v16420_v43 = vld [vmem:[#allocation231_spill] sm:$0xff] }
 0xf80   :  { %v10078_v54 = vpop.f32.mrf.mxu3  ;;  %v5566_v22 = vadd.f32 %v16399_v30, %v16398_v33  ;;  %v7193_v24 = vadd.f32 %v16404_v28, %v7138_v42  ;;  %v7351_v50 = vadd.f32 %v16405_v60, %v7305_v47  ;;  %v16416_v35 = vld [vmem:[#allocation194_spill] sm:$0xff]  ;;  %v16422_v47 = vld [vmem:[#allocation131_spill] sm:$0xff] }
 0xf81   :  { %10118 = vst.msk [vmem:[%s15630_s12] sm:$0xff] %vm10117_vm9, %v10111_v36  ;;  %v10036_v62 = vpop.f32.mrf.mxu2  ;;  %v10079_v8 = vadd.f32 %v10078_v54, %v10033_v63  ;;  %v6563_v63 = vadd.f32 %v16402_v59, %v6517_v51  ;;  %v16403_v36 = vld [vmem:[#allocation121_spill] sm:$0xff]  ;;  %v8234_v54 = vadd.f32 %v16407_v4, %v8147_v19  ;;  %v7142_v19 = vadd.f32 %v16417_v6, %v16416_v35  ;;  %v16419_v30 = vld [vmem:[#allocation230_spill] sm:$0xff]  ;;  %v16426_v28 = vld [vmem:[#allocation243_spill] sm:$0xff] }
 0xf82   :  { %v5673_v56 = vadd.f32 %v16403_v36, %v5617_v34  ;;  %v10037_v16 = vadd.f32 %v10036_v62, %v9975_v38  ;;  %v5622_v1 = vadd.f32 %v16408_v44, %v5566_v22  ;;  %v16411_v34 = vld [vmem:[#allocation163_spill] sm:$0xff]  ;;  %v16413_v51 = vld [vmem:[#allocation225_spill] sm:$0xff]  ;;  %v16421_v14 = vld [vmem:[#allocation126_spill] sm:$0xff] }
 0xf83   :  { %v10098_v0 = vadd.f32 %v10079_v8, %v15242_v10  ;;  %v5791_v10 = vadd.f32 %v5775_v2, %v15443_v39  ;;  %v6354_v8 = vadd.f32 %v16411_v34, %v16410_v48  ;;  %v16412_v39 = vld [vmem:[#allocation157_spill] sm:$0xff]  ;;  %v8105_v52 = vadd.f32 %v16413_v51, %v8049_v40  ;;  %v16424_v38 = vld [vmem:[#allocation176_spill] sm:$0xff] }
 0xf84   :  { %v5733_v20 = vadd.f32 %v16409_v12, %v5673_v56  ;;  %v6461_v49 = vadd.f32 %v16412_v39, %v6405_v57  ;;  %v8304_v32 = vadd.f32 %v16420_v43, %v8234_v54  ;;  %v5570_v59 = vadd.f32 %v16422_v47, %v16421_v14  ;;  %v16425_v36 = vld [vmem:[#allocation209_spill] sm:$0xff]  ;;  %v16428_v54 = vld [vmem:[#allocation200_spill] sm:$0xff]  ;;  %v16430_v12 = vld [vmem:[#allocation234_spill] sm:$0xff] }
 0xf85   :  { %v10104_v53 = vadd.f32 %v10098_v0, %v7366_v3  ;;  %v6579_v58 = vadd.f32 %v6563_v63, %v5791_v10  ;;  %v16415_v3 = vld [vmem:[#allocation173_spill] sm:$0xff]  ;;  %v8151_v22 = vadd.f32 %v16419_v30, %v8105_v52  ;;  %v16423_v63 = vld [vmem:[#allocation164_spill] sm:$0xff]  ;;  %v9929_v10 = vpop.f32.mrf.mxu0  ;;  %v9986_v52 = vpop.f32.mrf.mxu1 }
 0xf86   :  { %v5779_v26 = vadd.f32 %v16414_v31, %v5733_v20  ;;  %v6521_v45 = vadd.f32 %v16415_v3, %v6461_v49  ;;  %v16418_v0 = vld [vmem:[#allocation193_spill] sm:$0xff]  ;;  %v6410_v55 = vadd.f32 %v16423_v63, %v6354_v8  ;;  %v8360_v60 = vadd.f32 %v16426_v28, %v8304_v32  ;;  %v16431_v48 = vld [vmem:[#allocation248_spill] sm:$0xff]  ;;  %v16432_v49 = vld [vmem:[#allocation139_spill] sm:$0xff] }
 0xf87   :  { %v10112_v18 = vadd.f32 %v15482_v21, %v10104_v53  ;;  %v7249_v9 = vadd.f32 %v16418_v0, %v7193_v24  ;;  %v7367_v33 = vadd.f32 %v7351_v50, %v6579_v58  ;;  %v9874_v24 = vadd.f32 %v15393_v11, %v15376_v15  ;;  %v16427_v40 = vld [vmem:[#allocation125_spill] sm:$0xff]  ;;  %v16435_v58 = vld [vmem:[#allocation167_spill] sm:$0xff] }
 0xf88   :  { %v10082_v2 = vpop.f32.mrf.mxu3  ;;  %v6567_v53 = vadd.f32 %v16424_v38, %v6521_v45  ;;  %v9981_v50 = vadd.f32 %v9980_v37, %v9925_v27  ;;  %v5679_v4 = vadd.f32 %v16427_v40, %v5622_v1  ;;  %v8242_v20 = vadd.f32 %v16430_v12, %v8151_v22  ;;  %v16433_v15 = vld [vmem:[#allocation105_spill] sm:$0xff]  ;;  %v16434_v37 = vld [vmem:[#allocation162_spill] sm:$0xff]  ;;  %v16441_v0 = vld [vmem:[#allocation203_spill] sm:$0xff] }
 0xf89   :  { %10119 = vst.msk [vmem:[%s15630_s12 + $0x8] sm:$0xff] %vm10117_vm9, %v10112_v18  ;;  %v10040_v62 = vpop.f32.mrf.mxu2  ;;  %v10083_v42 = vadd.f32 %v10082_v2, %v10037_v16  ;;  %v7309_v56 = vadd.f32 %v16425_v36, %v7249_v9  ;;  %v7198_v16 = vadd.f32 %v16428_v54, %v7142_v19  ;;  %v16429_v18 = vld [vmem:[#allocation212_spill] sm:$0xff]  ;;  %v8417_v34 = vadd.f32 %v16431_v48, %v8360_v60  ;;  %v16436_v51 = vld [vmem:[#allocation161_spill] sm:$0xff]  ;;  %v16438_v45 = vld [vmem:[#allocation142_spill] sm:$0xff] }
 0xf8a   :  { %v10041_v8 = vadd.f32 %v10040_v62, %v9981_v50  ;;  %v5737_v2 = vadd.f32 %v16432_v49, %v5679_v4  ;;  %v5001_v11 = vadd.f32 %v16433_v15, %v4955_v25  ;;  %v6358_v1 = vadd.f32 %v16435_v58, %v16434_v37  ;;  %v16439_v25 = vld [vmem:[#allocation175_spill] sm:$0xff]  ;;  %v16440_v19 = vld [vmem:[#allocation198_spill] sm:$0xff]  ;;  %v16444_v14 = vld [vmem:[#allocation253_spill] sm:$0xff] }
 0xf8b   :  { %v10099_v57 = vadd.f32 %v10083_v42, %v15250_v46  ;;  %v5792_v46 = vadd.f32 %v5779_v26, %v15453_v29  ;;  %v7355_v44 = vadd.f32 %v16429_v18, %v7309_v56  ;;  %v6467_v29 = vadd.f32 %v16436_v51, %v6410_v55  ;;  %v16437_v42 = vld [vmem:[#allocation132_spill] sm:$0xff]  ;;  %v16443_v32 = vld [vmem:[#allocation235_spill] sm:$0xff]  ;;  %v16445_v63 = vld [vmem:[#allocation101_spill] sm:$0xff] }
 0xf8c   :  { %v5627_v31 = vadd.f32 %v16437_v42, %v5570_v59  ;;  %v9930_v3 = vadd.f32 %v9929_v10, %v9874_v24  ;;  %v5783_v35 = vadd.f32 %v16438_v45, %v5737_v2  ;;  %v7146_v9 = vadd.f32 %v16441_v0, %v16440_v19  ;;  %v16446_v38 = vld [vmem:[#allocation168_spill] sm:$0xff]  ;;  %v16447_v36 = vld [vmem:[#allocation178_spill] sm:$0xff]  ;;  %v16448_v10 = vld [vmem:[#allocation211_spill] sm:$0xff] }
 0xf8d   :  { %v10105_v23 = vadd.f32 %v10099_v57, %v7367_v33  ;;  %v6580_v26 = vadd.f32 %v6567_v53, %v5792_v46  ;;  %v6525_v6 = vadd.f32 %v16439_v25, %v6467_v29  ;;  %v16442_v33 = vld [vmem:[#allocation197_spill] sm:$0xff]  ;;  %v8308_v57 = vadd.f32 %v16443_v32, %v8242_v20  ;;  %v16449_v60 = vld [vmem:[#allocation246_spill] sm:$0xff]  ;;  %v16462_v19 = vld [vmem:[#allocation107_spill] sm:$0xff] }
 0xf8e   :  { %v7255_v30 = vadd.f32 %v16442_v33, %v7198_v16  ;;  %v8475_v47 = vadd.f32 %v16444_v14, %v8417_v34  ;;  %v4903_v55 = vadd.f32 %v16445_v63, %v15460_v41  ;;  %v6415_v53 = vadd.f32 %v16446_v38, %v6358_v1  ;;  %v16450_v4 = vld [vmem:[#allocation129_spill] sm:$0xff]  ;;  %v16452_v18 = vld [vmem:[#allocation214_spill] sm:$0xff]  ;;  %v16465_v14 = vld [vmem:[#allocation215_spill] sm:$0xff] }
 0xf8f   :  { %v10113_v39 = vadd.f32 %v15482_v21, %v10105_v23  ;;  %v7368_v43 = vadd.f32 %v7355_v44, %v6580_v26  ;;  %v6571_v56 = vadd.f32 %v16447_v36, %v6525_v6  ;;  %v8365_v24 = vadd.f32 %v16449_v60, %v8308_v57  ;;  %v9934_v44 = vpop.f32.mrf.mxu0  ;;  %v16453_v12 = vld [vmem:[#allocation254_spill] sm:$0xff]  ;;  %v16457_v15 = vld [vmem:[#allocation165_spill] sm:$0xff]  ;;  %v9992_v26 = vpop.f32.mrf.mxu1 }
 0xf90   :  { %v10086_v27 = vpop.f32.mrf.mxu3  ;;  %v7313_v28 = vadd.f32 %v16448_v10, %v7255_v30  ;;  %v9878_v50 = vadd.f32 %v15425_v13, %v15399_v5  ;;  %v9987_v23 = vadd.f32 %v9986_v52, %v9930_v3  ;;  %v5685_v46 = vadd.f32 %v16450_v4, %v5627_v31  ;;  %v16454_v48 = vld [vmem:[#allocation250_spill] sm:$0xff]  ;;  %v16456_v5 = vld [vmem:[#allocation141_spill] sm:$0xff]  ;;  %v16458_v52 = vld [vmem:[#allocation143_spill] sm:$0xff] }
 0xf91   :  { %10120 = vst.msk [vmem:[%s15630_s12 + $0x10] sm:$0xff] %vm10117_vm9, %v10113_v39  ;;  %v10087_v62 = vadd.f32 %v10086_v27, %v10041_v8  ;;  %v10044_v22 = vpop.f32.mrf.mxu2  ;;  %v5793_v54 = vadd.f32 %v5783_v35, %v5001_v11  ;;  %v8521_v20 = vadd.f32 %v16453_v12, %v8475_v47  ;;  %v8423_v34 = vadd.f32 %v16454_v48, %v8365_v24  ;;  %v16455_v49 = vld [vmem:[#allocation106_spill] sm:$0xff]  ;;  %v16459_v42 = vld [vmem:[#allocation177_spill] sm:$0xff]  ;;  %v16461_v35 = vld [vmem:[#allocation255_spill] sm:$0xff] }
 0xf92   :  { %v7359_v41 = vadd.f32 %v16452_v18, %v7313_v28  ;;  %v10045_v8 = vadd.f32 %v10044_v22, %v9987_v23  ;;  %v4959_v2 = vadd.f32 %v16455_v49, %v4903_v55  ;;  %v5741_v13 = vadd.f32 %v16456_v5, %v5685_v46  ;;  %v16460_v3 = vld [vmem:[#allocation201_spill] sm:$0xff] }
 0xf93   :  { %v10100_v59 = vadd.f32 %v10087_v62, %v15254_v7  ;;  %v16451_v7 = vld [vmem:[#allocation204_spill] sm:$0xff]  ;;  %v6473_v37 = vadd.f32 %v16457_v15, %v6415_v53  ;;  %v6581_v11 = vadd.f32 %v6571_v56, %v5793_v54  ;;  %v9313_v1 = vadd.f32 %v15256_v61, %v8521_v20  ;;  %v16464_v30 = vld [vmem:[#allocation213_spill] sm:$0xff] }
 0xf94   :  { %v7203_v16 = vadd.f32 %v16451_v7, %v7146_v9  ;;  %v9935_v51 = vadd.f32 %v9934_v44, %v9878_v50  ;;  %v5787_v27 = vadd.f32 %v16458_v52, %v5741_v13  ;;  %v8479_v25 = vadd.f32 %v16461_v35, %v8423_v34  ;;  %v16463_v9 = vld [vmem:[#allocation179_spill] sm:$0xff] }
 0xf95   :  { %v10106_v40 = vadd.f32 %v10100_v59, %v7368_v43  ;;  %v6529_v31 = vadd.f32 %v16459_v42, %v6473_v37  ;;  %v7369_v45 = vadd.f32 %v7359_v41, %v6581_v11  ;;  %v5005_v61 = vadd.f32 %v16462_v19, %v4959_v2  ;;  %v16466_v59 = vld [vmem:[#allocation256_spill] sm:$0xff] }
 0xf96   :  { %v7261_v62 = vadd.f32 %v16460_v3, %v7203_v16  ;;  %v9993_v43 = vadd.f32 %v9992_v26, %v9935_v51  ;;  %v8525_v63 = vadd.f32 %v16466_v59, %v8479_v25 }
 0xf97   :  { %v10114_v39 = vadd.f32 %v15482_v21, %v10106_v40  ;;  %v6575_v33 = vadd.f32 %v16463_v9, %v6529_v31  ;;  %v5794_v57 = vadd.f32 %v5787_v27, %v5005_v61 }
 0xf98   :  { %v10090_v58 = vpop.f32.mrf.mxu3  ;;  %v7317_v22 = vadd.f32 %v16464_v30, %v7261_v62  ;;  %v9314_v56 = vadd.f32 %v15258_v17, %v8525_v63 }
 0xf99   :  { %10121 = vst.msk [vmem:[%s15630_s12 + $0x18] sm:$0xff] %vm10117_vm9, %v10114_v39  ;;  %v10091_v29 = vadd.f32 %v10090_v58, %v10045_v8  ;;  %v10048_v0 = vpop.f32.mrf.mxu2  ;;  %v6582_v36 = vadd.f32 %v6575_v33, %v5794_v57 }
 0xf9a   :  { %v7363_v47 = vadd.f32 %v16465_v14, %v7317_v22  ;;  %v10049_v55 = vadd.f32 %v10048_v0, %v9993_v43 }
 0xf9b   :  { %v10101_v6 = vadd.f32 %v10091_v29, %v9313_v1 }
 0xf9c   :  { %v7370_v28 = vadd.f32 %v7363_v47, %v6582_v36 }
 0xf9d   :  { %v10107_v32 = vadd.f32 %v10101_v6, %v7369_v45 }
 0xf9f   :  { %v10115_v38 = vadd.f32 %v15482_v21, %v10107_v32 }
 0xfa0   :  { %v10094_v53 = vpop.f32.mrf.mxu3 }
 0xfa1   :  { %10122 = vst.msk [vmem:[%s15630_s12 + $0x20] sm:$0xff] %vm10117_vm9, %v10115_v38  ;;  %v10095_v10 = vadd.f32 %v10094_v53, %v10049_v55 }
 0xfa3   :  { %v10102_v60 = vadd.f32 %v10095_v10, %v9314_v56 }
 0xfa5   :  { %v10108_v24 = vadd.f32 %v10102_v60, %v7370_v28 }
 0xfa7   :  { %v10116_v50 = vadd.f32 %v15482_v21, %v10108_v24 }
 0xfa9   :  { %10124 = vst.msk [vmem:[%s15630_s12 + $0x28] sm:$0x3f] %vm10123_vm10, %v10116_v50 }

</bundles_post_ra>
